<compile_context>
chip_gen: v6e
topology: v6e:2x2x1
jax: 0.10.0
libtpu: 0.0.40
codegen_flags: <defaults>
</compile_context>

<pallas_src>
import math

import jax
import jax.numpy as jnp
from jax.experimental import pallas as pl
from jax.experimental.pallas import tpu as pltpu


# ----------------------------------------------------------------------------
# Fused residual-block kernel
# ----------------------------------------------------------------------------
def _make_block_kernel(N, Cin, Cout, K, H4, W4, eps=1e-5):
    HW4 = H4 * W4                      # positions per image on the upsampled grid
    L = N * HW4                        # lane extent: whole batch flattened (mult of 128)
    KK = K * K
    pad = (K - 1) // 2
    CinP = -(-Cin // 8) * 8            # per-activation channel slab, 8-sublane padded
    CoutP = -(-Cout // 8) * 8
    SLAB_A = 2 * CinP                  # fused (shortcut + conv1) per-tap patch slab
    SLAB_2 = CoutP                     # conv2 per-tap patch slab
    FLAT_R = max(SLAB_A, SLAB_2)
    ROWS = KK * max(SLAB_A, SLAB_2)
    # A KxK tap at spatial offset (dh-pad, dw-pad) is the same flat row shifted by
    # (dh-pad)*W4 + (dw-pad) lanes.  BASE >= max |offset| (rounded to a lane multiple)
    # gives headroom so every shifted read stays inside the scratch; headroom lanes are
    # zeroed once at kernel start so the mask-multiply is NaN-safe.
    max_off = pad * (W4 + 1)
    BASE = -(-max_off // 128) * 128
    PADL = L + 2 * BASE
    taps = [(dh, dw) for dh in range(K) for dw in range(K)]

    def kernel(stk_ref, mask_ref, wA_ref, bA_ref, w2_ref, b2_ref,
               g2_ref, be2_ref, out_ref, flat_ref, patch_ref):
        # zero halo headroom once (BASE-wide on both sides; aligned full-lane stores)
        flat_ref[:, pl.ds(0, BASE)] = jnp.zeros((FLAT_R, BASE), jnp.float32)
        flat_ref[:, pl.ds(BASE + L, BASE)] = jnp.zeros((FLAT_R, BASE), jnp.float32)

        def build_patch(slab):
            """9 shifted reads of the staged activation -> im2col patch rows.
            slab is a multiple of 8 -> every store is a full aligned (8,128)-tile vst."""
            for t, (dh, dw) in enumerate(taps):
                off = (dh - pad) * W4 + (dw - pad)
                tap = flat_ref[pl.ds(0, slab), pl.ds(BASE + off, L)]
                patch_ref[pl.ds(t * slab, slab), :] = tap * mask_ref[pl.ds(t, 1), :]

        # ---- fused shortcut-conv + conv1: one staging store, one im2col, one matmul ----
        flat_ref[pl.ds(0, SLAB_A), pl.ds(BASE, L)] = stk_ref[...]
        build_patch(SLAB_A)
        res = jnp.dot(wA_ref[...], patch_ref[pl.ds(0, KK * SLAB_A), :],
                      preferred_element_type=jnp.float32) + bA_ref[...]
        out_ref[...] = res[0:Cout, :]           # park shortcut in VMEM (frees vregs)
        h = res[CoutP:CoutP + Cout, :]          # conv1 output (Cout, L)

        # ---- BN2: one-pass train-mode batch stats, entirely in VMEM/vregs ----
        inv_n = 1.0 / float(L)
        mu = jnp.sum(h, axis=1, keepdims=True) * inv_n
        ex2 = jnp.sum(h * h, axis=1, keepdims=True) * inv_n
        var = ex2 - mu * mu                     # biased, as PyTorch train mode (f32)
        sc2 = g2_ref[...] * jax.lax.rsqrt(var + eps)
        sh2 = be2_ref[...] - mu * sc2
        act2 = jnp.maximum(h * sc2 + sh2, 0.0)

        # ---- conv2 + residual add (lane-dense full-tile output store) ----
        flat_ref[pl.ds(0, Cout), pl.ds(BASE, L)] = act2
        if Cout < SLAB_2:                       # zero alignment rows of the slab
            flat_ref[pl.ds(Cout, SLAB_2 - Cout), pl.ds(BASE, L)] = jnp.zeros(
                (SLAB_2 - Cout, L), jnp.float32)
        build_patch(SLAB_2)
        conv2 = jnp.dot(w2_ref[...], patch_ref[pl.ds(0, KK * SLAB_2), :],
                        preferred_element_type=jnp.float32) + b2_ref[...]
        out_ref[...] = out_ref[...] + conv2

    scratch = [pltpu.VMEM((FLAT_R, PADL), jnp.float32),   # halo staging buffer
               pltpu.VMEM((ROWS, L), jnp.float32)]        # im2col patch matrix
    return kernel, scratch


# ----------------------------------------------------------------------------
# Wrapper: layout plumbing + tiny BN1 / upsample glue, then one pallas_call
# ----------------------------------------------------------------------------
def residual_block_up(x_nchw, params, eps=1e-5):
    """ResidualBlock(resample='up', bn=True) forward.  x: (N, Cin, H, W) NCHW."""
    N, Cin, H, W = x_nchw.shape
    w1 = params["w1"]
    Cout, K = w1.shape[0], w1.shape[2]
    KK = K * K
    H4, W4 = 2 * H, 2 * W
    HW4 = H4 * W4
    L = N * HW4
    CinP = -(-Cin // 8) * 8
    CoutP = -(-Cout // 8) * 8
    assert L % 128 == 0, "flattened batch*spatial lane extent must be a multiple of 128"

    # ---- BN1 (train-mode batch stats) + ReLU on the SMALL pre-upsample x ----
    mean1 = jnp.mean(x_nchw, axis=(0, 2, 3))
    var1 = jnp.mean(jnp.square(x_nchw - mean1[None, :, None, None]), axis=(0, 2, 3))
    s1 = params["gamma1"] * jax.lax.rsqrt(var1 + eps)
    t1 = params["beta1"] - mean1 * s1
    act1 = jnp.maximum(x_nchw * s1[None, :, None, None] + t1[None, :, None, None], 0.0)

    # repeat((1,4,1,1)) + PixelShuffle(2) == one channel gather:
    #   up[n, c, 2h+i, 2w+j] = v[n, (4c + 2i + j) % Cin, h, w]
    src = (4 * jnp.arange(Cin)[:, None, None]
           + 2 * jnp.arange(2)[None, :, None]
           + jnp.arange(2)[None, None, :]) % Cin                 # (Cin, 2, 2)

    def upsample_flat(v):
        u = v[:, src, :, :]                                      # (N, Cin, 2, 2, H, W)
        u = jnp.transpose(u, (0, 1, 4, 2, 5, 3)).reshape(N, Cin, H4, W4)
        # kernel layout: channels on sublanes, (batch * spatial) lane-dense on lanes
        return jnp.transpose(u.reshape(N, Cin, HW4), (1, 0, 2)).reshape(Cin, L)

    up_x = upsample_flat(x_nchw)              # shortcut-branch activation
    up_a = upsample_flat(act1)                # main-branch (BN1+ReLU already applied)

    # stacked kernel input: [up_x ; 0-pad ; up_act1 ; 0-pad]  -> (2*CinP, L)
    stk = jnp.zeros((2 * CinP, L), jnp.float32)
    stk = stk.at[0:Cin].set(up_x).at[CinP:CinP + Cin].set(up_a)

    # ---- per-tap image-boundary masks (K*K, L) f32; constant-folded by XLA ----
    pad = (K - 1) // 2
    p = jnp.arange(L) % HW4
    yy, xx = p // W4, p % W4
    mrows = []
    for dh in range(K):
        for dw in range(K):
            ys, xs = yy + dh - pad, xx + dw - pad
            mrows.append(((ys >= 0) & (ys < H4) & (xs >= 0) & (xs < W4))
                         .astype(jnp.float32))
    mask = jnp.stack(mrows, 0)

    # ---- MXU-ready weight matrices (per-tap columns padded to the 8-sublane slabs) ----
    def oihw_to_tap(w):                        # (Co, C, K, K) -> (Co, K*K, C)
        co, c = w.shape[0], w.shape[1]
        return jnp.transpose(w, (0, 2, 3, 1)).reshape(co, KK, c)

    # block-diagonal fused weight: rows [0,Cout) = shortcut conv, [CoutP, CoutP+Cout) = conv1
    wA = jnp.zeros((2 * CoutP, KK, 2 * CinP), jnp.float32)
    wA = wA.at[0:Cout, :, 0:Cin].set(oihw_to_tap(params["w_sc"]))
    wA = wA.at[CoutP:CoutP + Cout, :, CinP:CinP + Cin].set(oihw_to_tap(w1))
    wA = wA.reshape(2 * CoutP, KK * 2 * CinP)
    bA = jnp.zeros((2 * CoutP, 1), jnp.float32)
    bA = bA.at[0:Cout, 0].set(params["b_sc"]).at[CoutP:CoutP + Cout, 0].set(params["b1"])

    w2m = jnp.zeros((Cout, KK, CoutP), jnp.float32)
    w2m = w2m.at[:, :, 0:Cout].set(oihw_to_tap(params["w2"]))
    w2m = w2m.reshape(Cout, KK * CoutP)

    col = lambda v: v.reshape(-1, 1)

    kernel, scratch = _make_block_kernel(N, Cin, Cout, K, H4, W4, eps)
    vspec = pl.BlockSpec(memory_space=pltpu.MemorySpace.VMEM)

    # TODO(synk): add a grid over the lane axis (multiples of HW4) + BN2 cross-tile
    # reduction before scaling C/H/W (v7x: 64 MiB VMEM, 2 TensorCores).
    out_flat = pl.pallas_call(
        kernel,
        out_shape=jax.ShapeDtypeStruct((Cout, L), jnp.float32),
        in_specs=[vspec] * 8,
        out_specs=vspec,
        scratch_shapes=scratch,
    )(stk, mask, wA, bA, w2m, col(params["b2"]),
      col(params["gamma2"]), col(params["beta2"]))

    # back to the module's NCHW layout
    return jnp.transpose(out_flat.reshape(Cout, N, H4, W4), (1, 0, 2, 3))


# ----------------------------------------------------------------------------
# Deterministic parameter init (matches the module's init scheme / shapes)
# ----------------------------------------------------------------------------
def _kaiming_uniform_oihw(key, cout, cin, k):
    # nn.init.kaiming_uniform_(mode='fan_in', nonlinearity='relu'): bound = sqrt(6/fan_in)
    fan_in = cin * k * k
    bound = math.sqrt(6.0 / fan_in)
    return jax.random.uniform(key, (cout, cin, k, k), jnp.float32, -bound, bound)


def _bias_uniform(key, cin, k, cout):
    # PyTorch Conv2d default bias init: U(-1/sqrt(fan_in), 1/sqrt(fan_in))
    fan_in = cin * k * k
    bound = 1.0 / math.sqrt(fan_in)
    return jax.random.uniform(key, (cout,), jnp.float32, -bound, bound)


def init_params(key, n_input, n_output, k_size):
    ks = jax.random.split(key, 6)
    return {
        "w1": _kaiming_uniform_oihw(ks[0], n_output, n_input, k_size),
        "b1": _bias_uniform(ks[1], n_input, k_size, n_output),
        "w2": _kaiming_uniform_oihw(ks[2], n_output, n_output, k_size),
        "b2": _bias_uniform(ks[3], n_output, k_size, n_output),
        "w_sc": _kaiming_uniform_oihw(ks[4], n_output, n_input, k_size),
        "b_sc": _bias_uniform(ks[5], n_input, k_size, n_output),
        "gamma1": jnp.ones((n_input,), jnp.float32),
        "beta1": jnp.zeros((n_input,), jnp.float32),
        "gamma2": jnp.ones((n_output,), jnp.float32),
        "beta2": jnp.zeros((n_output,), jnp.float32),
    }


# ----------------------------------------------------------------------------
# Pure-JAX reference of the PyTorch forward (train-mode BatchNorm)
# ----------------------------------------------------------------------------
def reference_block(x, params, eps=1e-5):
    K = params["w1"].shape[2]
    p = (K - 1) // 2
    hp = jax.lax.Precision.HIGHEST

    def upsample(v):                    # x.repeat((1,4,1,1)) + nn.PixelShuffle(2)
        n, c, h, w = v.shape
        rep = jnp.tile(v, (1, 4, 1, 1))
        return (rep.reshape(n, c, 2, 2, h, w)
                   .transpose(0, 1, 4, 2, 5, 3)
                   .reshape(n, c, 2 * h, 2 * w))

    def conv(v, w, b):
        o = jax.lax.conv_general_dilated(
            v, w, (1, 1), [(p, p), (p, p)],
            dimension_numbers=("NCHW", "OIHW", "NCHW"), precision=hp)
        return o + b[None, :, None, None]

    def bn_relu(v, g, bt):
        m = jnp.mean(v, axis=(0, 2, 3), keepdims=True)
        va = jnp.mean(jnp.square(v - m), axis=(0, 2, 3), keepdims=True)
        return jnp.maximum((v - m) * jax.lax.rsqrt(va + eps) * g[None, :, None, None]
                           + bt[None, :, None, None], 0.0)

    shortcut = conv(upsample(x), params["w_sc"], params["b_sc"])
    h = bn_relu(x, params["gamma1"], params["beta1"])
    h = conv(upsample(h), params["w1"], params["b1"])
    h = bn_relu(h, params["gamma2"], params["beta2"])
    h = conv(h, params["w2"], params["b2"])
    return shortcut + h


if __name__ == "__main__":
    N, Cin, H, W = 2, 4, 16, 16
    Cout, K = 8, 3

    key = jax.random.PRNGKey(0)
    k_x, k_p = jax.random.split(key)
    x = jax.random.normal(k_x, (N, Cin, H, W), jnp.float32)   # NCHW, as the PyTorch module
    params = init_params(k_p, Cin, Cout, K)

    out = jax.jit(residual_block_up)(x, params)
    jax.block_until_ready(out)

    assert out.shape == (N, Cout, 2 * H, 2 * W), out.shape
    assert bool(jnp.all(jnp.isfinite(out)))

    # pure-JAX reference check (tolerance covers MXU vs XLA-conv accumulation order;
    # any tap-offset / mask / layout bug produces O(1) relative errors and still trips it)
    ref = jax.jit(reference_block)(x, params)
    err = float(jnp.max(jnp.abs(out - ref)) / (jnp.max(jnp.abs(ref)) + 1e-8))
    assert err < 5e-2, f"mismatch vs reference: rel-max-err={err:.3e}"

    print("KERNEL_OK")
</pallas_src>

<mosaic_0001>
module attributes {stable_mosaic.version = 11 : i64} {
  func.func @kernel(%arg0: memref<16x2048xf32, #tpu.memory_space<vmem>>, %arg1: memref<9x2048xf32, #tpu.memory_space<vmem>>, %arg2: memref<16x144xf32, #tpu.memory_space<vmem>>, %arg3: memref<16x1xf32, #tpu.memory_space<vmem>>, %arg4: memref<8x72xf32, #tpu.memory_space<vmem>>, %arg5: memref<8x1xf32, #tpu.memory_space<vmem>>, %arg6: memref<8x1xf32, #tpu.memory_space<vmem>>, %arg7: memref<8x1xf32, #tpu.memory_space<vmem>>, %arg8: memref<8x2048xf32, #tpu.memory_space<vmem>>, %arg9: memref<16x2304xf32, #tpu.memory_space<vmem>>, %arg10: memref<144x2048xf32, #tpu.memory_space<vmem>>) attributes {dimension_semantics = [], scalar_prefetch = 0 : i64, scratch_operands = 2 : i64, tpu.core_type = #tpu.core_type<tc>} {
    %cst = arith.constant 0.000000e+00 : f32
    %0 = vector.broadcast %cst : f32 to vector<16x128xf32>
    %c0 = arith.constant 0 : index
    %c0_0 = arith.constant 0 : index
    %1 = vector.load %arg9[%c0, %c0_0] : memref<16x2304xf32, #tpu.memory_space<vmem>>, vector<16x128xf32>
    tpu.vector_store %arg9[%c0, %c0_0], %0 {strides = array<i32>} : memref<16x2304xf32, #tpu.memory_space<vmem>>, vector<16x128xf32>,
    %cst_1 = arith.constant 0.000000e+00 : f32
    %2 = vector.broadcast %cst_1 : f32 to vector<16x128xf32>
    %c0_2 = arith.constant 0 : index
    %c2176 = arith.constant 2176 : index
    %3 = vector.load %arg9[%c0_2, %c2176] : memref<16x2304xf32, #tpu.memory_space<vmem>>, vector<16x128xf32>
    tpu.vector_store %arg9[%c0_2, %c2176], %2 {strides = array<i32>} : memref<16x2304xf32, #tpu.memory_space<vmem>>, vector<16x128xf32>,
    %c0_3 = arith.constant 0 : index
    %c0_4 = arith.constant 0 : index
    %4 = vector.load %arg0[%c0_3, %c0_4] : memref<16x2048xf32, #tpu.memory_space<vmem>>, vector<16x2048xf32>
    %c0_5 = arith.constant 0 : index
    %c128 = arith.constant 128 : index
    %5 = vector.load %arg9[%c0_5, %c128] : memref<16x2304xf32, #tpu.memory_space<vmem>>, vector<16x2048xf32>
    tpu.vector_store %arg9[%c0_5, %c128], %4 {strides = array<i32>} : memref<16x2304xf32, #tpu.memory_space<vmem>>, vector<16x2048xf32>,
    %c0_6 = arith.constant 0 : index
    %c95 = arith.constant 95 : index
    %6 = vector.load %arg9[%c0_6, %c95] : memref<16x2304xf32, #tpu.memory_space<vmem>>, vector<16x2048xf32>
    %c0_7 = arith.constant 0 : index
    %c0_8 = arith.constant 0 : index
    %7 = vector.load %arg1[%c0_7, %c0_8] : memref<9x2048xf32, #tpu.memory_space<vmem>>, vector<1x2048xf32>
    %8 = vector.broadcast %7 : vector<1x2048xf32> to vector<16x2048xf32>
    %9 = arith.mulf %6, %8 : vector<16x2048xf32>
    %c0_9 = arith.constant 0 : index
    %c0_10 = arith.constant 0 : index
    %10 = vector.load %arg10[%c0_9, %c0_10] : memref<144x2048xf32, #tpu.memory_space<vmem>>, vector<16x2048xf32>
    tpu.vector_store %arg10[%c0_9, %c0_10], %9 {strides = array<i32>} : memref<144x2048xf32, #tpu.memory_space<vmem>>, vector<16x2048xf32>,
    %c0_11 = arith.constant 0 : index
    %c96 = arith.constant 96 : index
    %11 = vector.load %arg9[%c0_11, %c96] : memref<16x2304xf32, #tpu.memory_space<vmem>>, vector<16x2048xf32>
    %c1 = arith.constant 1 : index
    %c0_12 = arith.constant 0 : index
    %12 = vector.load %arg1[%c1, %c0_12] : memref<9x2048xf32, #tpu.memory_space<vmem>>, vector<1x2048xf32>
    %13 = vector.broadcast %12 : vector<1x2048xf32> to vector<16x2048xf32>
    %14 = arith.mulf %11, %13 : vector<16x2048xf32>
    %c16 = arith.constant 16 : index
    %c0_13 = arith.constant 0 : index
    %15 = vector.load %arg10[%c16, %c0_13] : memref<144x2048xf32, #tpu.memory_space<vmem>>, vector<16x2048xf32>
    tpu.vector_store %arg10[%c16, %c0_13], %14 {strides = array<i32>} : memref<144x2048xf32, #tpu.memory_space<vmem>>, vector<16x2048xf32>,
    %c0_14 = arith.constant 0 : index
    %c97 = arith.constant 97 : index
    %16 = vector.load %arg9[%c0_14, %c97] : memref<16x2304xf32, #tpu.memory_space<vmem>>, vector<16x2048xf32>
    %c2 = arith.constant 2 : index
    %c0_15 = arith.constant 0 : index
    %17 = vector.load %arg1[%c2, %c0_15] : memref<9x2048xf32, #tpu.memory_space<vmem>>, vector<1x2048xf32>
    %18 = vector.broadcast %17 : vector<1x2048xf32> to vector<16x2048xf32>
    %19 = arith.mulf %16, %18 : vector<16x2048xf32>
    %c32 = arith.constant 32 : index
    %c0_16 = arith.constant 0 : index
    %20 = vector.load %arg10[%c32, %c0_16] : memref<144x2048xf32, #tpu.memory_space<vmem>>, vector<16x2048xf32>
    tpu.vector_store %arg10[%c32, %c0_16], %19 {strides = array<i32>} : memref<144x2048xf32, #tpu.memory_space<vmem>>, vector<16x2048xf32>,
    %c0_17 = arith.constant 0 : index
    %c127 = arith.constant 127 : index
    %21 = vector.load %arg9[%c0_17, %c127] : memref<16x2304xf32, #tpu.memory_space<vmem>>, vector<16x2048xf32>
    %c3 = arith.constant 3 : index
    %c0_18 = arith.constant 0 : index
    %22 = vector.load %arg1[%c3, %c0_18] : memref<9x2048xf32, #tpu.memory_space<vmem>>, vector<1x2048xf32>
    %23 = vector.broadcast %22 : vector<1x2048xf32> to vector<16x2048xf32>
    %24 = arith.mulf %21, %23 : vector<16x2048xf32>
    %c48 = arith.constant 48 : index
    %c0_19 = arith.constant 0 : index
    %25 = vector.load %arg10[%c48, %c0_19] : memref<144x2048xf32, #tpu.memory_space<vmem>>, vector<16x2048xf32>
    tpu.vector_store %arg10[%c48, %c0_19], %24 {strides = array<i32>} : memref<144x2048xf32, #tpu.memory_space<vmem>>, vector<16x2048xf32>,
    %c0_20 = arith.constant 0 : index
    %c128_21 = arith.constant 128 : index
    %26 = vector.load %arg9[%c0_20, %c128_21] : memref<16x2304xf32, #tpu.memory_space<vmem>>, vector<16x2048xf32>
    %c4 = arith.constant 4 : index
    %c0_22 = arith.constant 0 : index
    %27 = vector.load %arg1[%c4, %c0_22] : memref<9x2048xf32, #tpu.memory_space<vmem>>, vector<1x2048xf32>
    %28 = vector.broadcast %27 : vector<1x2048xf32> to vector<16x2048xf32>
    %29 = arith.mulf %26, %28 : vector<16x2048xf32>
    %c64 = arith.constant 64 : index
    %c0_23 = arith.constant 0 : index
    %30 = vector.load %arg10[%c64, %c0_23] : memref<144x2048xf32, #tpu.memory_space<vmem>>, vector<16x2048xf32>
    tpu.vector_store %arg10[%c64, %c0_23], %29 {strides = array<i32>} : memref<144x2048xf32, #tpu.memory_space<vmem>>, vector<16x2048xf32>,
    %c0_24 = arith.constant 0 : index
    %c129 = arith.constant 129 : index
    %31 = vector.load %arg9[%c0_24, %c129] : memref<16x2304xf32, #tpu.memory_space<vmem>>, vector<16x2048xf32>
    %c5 = arith.constant 5 : index
    %c0_25 = arith.constant 0 : index
    %32 = vector.load %arg1[%c5, %c0_25] : memref<9x2048xf32, #tpu.memory_space<vmem>>, vector<1x2048xf32>
    %33 = vector.broadcast %32 : vector<1x2048xf32> to vector<16x2048xf32>
    %34 = arith.mulf %31, %33 : vector<16x2048xf32>
    %c80 = arith.constant 80 : index
    %c0_26 = arith.constant 0 : index
    %35 = vector.load %arg10[%c80, %c0_26] : memref<144x2048xf32, #tpu.memory_space<vmem>>, vector<16x2048xf32>
    tpu.vector_store %arg10[%c80, %c0_26], %34 {strides = array<i32>} : memref<144x2048xf32, #tpu.memory_space<vmem>>, vector<16x2048xf32>,
    %c0_27 = arith.constant 0 : index
    %c159 = arith.constant 159 : index
    %36 = vector.load %arg9[%c0_27, %c159] : memref<16x2304xf32, #tpu.memory_space<vmem>>, vector<16x2048xf32>
    %c6 = arith.constant 6 : index
    %c0_28 = arith.constant 0 : index
    %37 = vector.load %arg1[%c6, %c0_28] : memref<9x2048xf32, #tpu.memory_space<vmem>>, vector<1x2048xf32>
    %38 = vector.broadcast %37 : vector<1x2048xf32> to vector<16x2048xf32>
    %39 = arith.mulf %36, %38 : vector<16x2048xf32>
    %c96_29 = arith.constant 96 : index
    %c0_30 = arith.constant 0 : index
    %40 = vector.load %arg10[%c96_29, %c0_30] : memref<144x2048xf32, #tpu.memory_space<vmem>>, vector<16x2048xf32>
    tpu.vector_store %arg10[%c96_29, %c0_30], %39 {strides = array<i32>} : memref<144x2048xf32, #tpu.memory_space<vmem>>, vector<16x2048xf32>,
    %c0_31 = arith.constant 0 : index
    %c160 = arith.constant 160 : index
    %41 = vector.load %arg9[%c0_31, %c160] : memref<16x2304xf32, #tpu.memory_space<vmem>>, vector<16x2048xf32>
    %c7 = arith.constant 7 : index
    %c0_32 = arith.constant 0 : index
    %42 = vector.load %arg1[%c7, %c0_32] : memref<9x2048xf32, #tpu.memory_space<vmem>>, vector<1x2048xf32>
    %43 = vector.broadcast %42 : vector<1x2048xf32> to vector<16x2048xf32>
    %44 = arith.mulf %41, %43 : vector<16x2048xf32>
    %c112 = arith.constant 112 : index
    %c0_33 = arith.constant 0 : index
    %45 = vector.load %arg10[%c112, %c0_33] : memref<144x2048xf32, #tpu.memory_space<vmem>>, vector<16x2048xf32>
    tpu.vector_store %arg10[%c112, %c0_33], %44 {strides = array<i32>} : memref<144x2048xf32, #tpu.memory_space<vmem>>, vector<16x2048xf32>,
    %c0_34 = arith.constant 0 : index
    %c161 = arith.constant 161 : index
    %46 = vector.load %arg9[%c0_34, %c161] : memref<16x2304xf32, #tpu.memory_space<vmem>>, vector<16x2048xf32>
    %c8 = arith.constant 8 : index
    %c0_35 = arith.constant 0 : index
    %47 = vector.load %arg1[%c8, %c0_35] : memref<9x2048xf32, #tpu.memory_space<vmem>>, vector<1x2048xf32>
    %48 = vector.broadcast %47 : vector<1x2048xf32> to vector<16x2048xf32>
    %49 = arith.mulf %46, %48 : vector<16x2048xf32>
    %c128_36 = arith.constant 128 : index
    %c0_37 = arith.constant 0 : index
    %50 = vector.load %arg10[%c128_36, %c0_37] : memref<144x2048xf32, #tpu.memory_space<vmem>>, vector<16x2048xf32>
    tpu.vector_store %arg10[%c128_36, %c0_37], %49 {strides = array<i32>} : memref<144x2048xf32, #tpu.memory_space<vmem>>, vector<16x2048xf32>,
    %c0_38 = arith.constant 0 : index
    %c0_39 = arith.constant 0 : index
    %51 = vector.load %arg2[%c0_38, %c0_39] : memref<16x144xf32, #tpu.memory_space<vmem>>, vector<16x144xf32>
    %c0_40 = arith.constant 0 : index
    %c0_41 = arith.constant 0 : index
    %52 = vector.load %arg10[%c0_40, %c0_41] : memref<144x2048xf32, #tpu.memory_space<vmem>>, vector<144x2048xf32>
    %cst_42 = arith.constant dense<0.000000e+00> : vector<16x2048xf32>
    %53 = tpu.matmul %51, %52, %cst_42 {dimension_numbers = #tpu.dot_dimension_numbers<[1], [0], [0], [1], [0, 0, 1, 1], [], []>} : vector<16x144xf32>, vector<144x2048xf32>, vector<16x2048xf32> -> vector<16x2048xf32>
    %c0_43 = arith.constant 0 : index
    %c0_44 = arith.constant 0 : index
    %54 = vector.load %arg3[%c0_43, %c0_44] : memref<16x1xf32, #tpu.memory_space<vmem>>, vector<16x1xf32>
    %55 = vector.broadcast %54 : vector<16x1xf32> to vector<16x2048xf32>
    %56 = arith.addf %53, %55 : vector<16x2048xf32>
    %57 = vector.extract_strided_slice %56 {offsets = [0, 0], sizes = [8, 2048], strides = [1, 1]} : vector<16x2048xf32> to vector<8x2048xf32>
    %c0_45 = arith.constant 0 : index
    %c0_46 = arith.constant 0 : index
    %58 = vector.load %arg8[%c0_45, %c0_46] : memref<8x2048xf32, #tpu.memory_space<vmem>>, vector<8x2048xf32>
    tpu.vector_store %arg8[%c0_45, %c0_46], %57 {strides = array<i32>} : memref<8x2048xf32, #tpu.memory_space<vmem>>, vector<8x2048xf32>,
    %59 = vector.extract_strided_slice %56 {offsets = [8, 0], sizes = [8, 2048], strides = [1, 1]} : vector<16x2048xf32> to vector<8x2048xf32>
    %cst_47 = arith.constant dense<0.000000e+00> : vector<8xf32>
    %60 = vector.multi_reduction <add>, %59, %cst_47 [1] : vector<8x2048xf32> to vector<8xf32>
    %61 = vector.shape_cast %60 : vector<8xf32> to vector<8x1xf32>
    %cst_48 = arith.constant 4.8828125E-4 : f32
    %62 = vector.broadcast %cst_48 : f32 to vector<8x1xf32>
    %63 = arith.mulf %61, %62 : vector<8x1xf32>
    %64 = arith.mulf %59, %59 : vector<8x2048xf32>
    %cst_49 = arith.constant dense<0.000000e+00> : vector<8xf32>
    %65 = vector.multi_reduction <add>, %64, %cst_49 [1] : vector<8x2048xf32> to vector<8xf32>
    %66 = vector.shape_cast %65 : vector<8xf32> to vector<8x1xf32>
    %cst_50 = arith.constant 4.8828125E-4 : f32
    %67 = vector.broadcast %cst_50 : f32 to vector<8x1xf32>
    %68 = arith.mulf %66, %67 : vector<8x1xf32>
    %69 = arith.mulf %63, %63 : vector<8x1xf32>
    %70 = arith.subf %68, %69 : vector<8x1xf32>
    %c0_51 = arith.constant 0 : index
    %c0_52 = arith.constant 0 : index
    %71 = vector.load %arg6[%c0_51, %c0_52] : memref<8x1xf32, #tpu.memory_space<vmem>>, vector<8x1xf32>
    %cst_53 = arith.constant 9.99999974E-6 : f32
    %72 = vector.broadcast %cst_53 : f32 to vector<8x1xf32>
    %73 = arith.addf %70, %72 : vector<8x1xf32>
    %74 = math.rsqrt %73 : vector<8x1xf32>
    %75 = arith.mulf %71, %74 : vector<8x1xf32>
    %c0_54 = arith.constant 0 : index
    %c0_55 = arith.constant 0 : index
    %76 = vector.load %arg7[%c0_54, %c0_55] : memref<8x1xf32, #tpu.memory_space<vmem>>, vector<8x1xf32>
    %77 = arith.mulf %63, %75 : vector<8x1xf32>
    %78 = arith.subf %76, %77 : vector<8x1xf32>
    %79 = vector.broadcast %75 : vector<8x1xf32> to vector<8x2048xf32>
    %80 = arith.mulf %59, %79 : vector<8x2048xf32>
    %81 = vector.broadcast %78 : vector<8x1xf32> to vector<8x2048xf32>
    %82 = arith.addf %80, %81 : vector<8x2048xf32>
    %cst_56 = arith.constant 0.000000e+00 : f32
    %83 = vector.broadcast %cst_56 : f32 to vector<8x2048xf32>
    %84 = arith.maximumf %82, %83 : vector<8x2048xf32>
    %c0_57 = arith.constant 0 : index
    %c128_58 = arith.constant 128 : index
    %85 = vector.load %arg9[%c0_57, %c128_58] : memref<16x2304xf32, #tpu.memory_space<vmem>>, vector<8x2048xf32>
    tpu.vector_store %arg9[%c0_57, %c128_58], %84 {strides = array<i32>} : memref<16x2304xf32, #tpu.memory_space<vmem>>, vector<8x2048xf32>,
    %c0_59 = arith.constant 0 : index
    %c95_60 = arith.constant 95 : index
    %86 = vector.load %arg9[%c0_59, %c95_60] : memref<16x2304xf32, #tpu.memory_space<vmem>>, vector<8x2048xf32>
    %c0_61 = arith.constant 0 : index
    %c0_62 = arith.constant 0 : index
    %87 = vector.load %arg1[%c0_61, %c0_62] : memref<9x2048xf32, #tpu.memory_space<vmem>>, vector<1x2048xf32>
    %88 = vector.broadcast %87 : vector<1x2048xf32> to vector<8x2048xf32>
    %89 = arith.mulf %86, %88 : vector<8x2048xf32>
    %c0_63 = arith.constant 0 : index
    %c0_64 = arith.constant 0 : index
    %90 = vector.load %arg10[%c0_63, %c0_64] : memref<144x2048xf32, #tpu.memory_space<vmem>>, vector<8x2048xf32>
    tpu.vector_store %arg10[%c0_63, %c0_64], %89 {strides = array<i32>} : memref<144x2048xf32, #tpu.memory_space<vmem>>, vector<8x2048xf32>,
    %c0_65 = arith.constant 0 : index
    %c96_66 = arith.constant 96 : index
    %91 = vector.load %arg9[%c0_65, %c96_66] : memref<16x2304xf32, #tpu.memory_space<vmem>>, vector<8x2048xf32>
    %c1_67 = arith.constant 1 : index
    %c0_68 = arith.constant 0 : index
    %92 = vector.load %arg1[%c1_67, %c0_68] : memref<9x2048xf32, #tpu.memory_space<vmem>>, vector<1x2048xf32>
    %93 = vector.broadcast %92 : vector<1x2048xf32> to vector<8x2048xf32>
    %94 = arith.mulf %91, %93 : vector<8x2048xf32>
    %c8_69 = arith.constant 8 : index
    %c0_70 = arith.constant 0 : index
    %95 = vector.load %arg10[%c8_69, %c0_70] : memref<144x2048xf32, #tpu.memory_space<vmem>>, vector<8x2048xf32>
    tpu.vector_store %arg10[%c8_69, %c0_70], %94 {strides = array<i32>} : memref<144x2048xf32, #tpu.memory_space<vmem>>, vector<8x2048xf32>,
    %c0_71 = arith.constant 0 : index
    %c97_72 = arith.constant 97 : index
    %96 = vector.load %arg9[%c0_71, %c97_72] : memref<16x2304xf32, #tpu.memory_space<vmem>>, vector<8x2048xf32>
    %c2_73 = arith.constant 2 : index
    %c0_74 = arith.constant 0 : index
    %97 = vector.load %arg1[%c2_73, %c0_74] : memref<9x2048xf32, #tpu.memory_space<vmem>>, vector<1x2048xf32>
    %98 = vector.broadcast %97 : vector<1x2048xf32> to vector<8x2048xf32>
    %99 = arith.mulf %96, %98 : vector<8x2048xf32>
    %c16_75 = arith.constant 16 : index
    %c0_76 = arith.constant 0 : index
    %100 = vector.load %arg10[%c16_75, %c0_76] : memref<144x2048xf32, #tpu.memory_space<vmem>>, vector<8x2048xf32>
    tpu.vector_store %arg10[%c16_75, %c0_76], %99 {strides = array<i32>} : memref<144x2048xf32, #tpu.memory_space<vmem>>, vector<8x2048xf32>,
    %c0_77 = arith.constant 0 : index
    %c127_78 = arith.constant 127 : index
    %101 = vector.load %arg9[%c0_77, %c127_78] : memref<16x2304xf32, #tpu.memory_space<vmem>>, vector<8x2048xf32>
    %c3_79 = arith.constant 3 : index
    %c0_80 = arith.constant 0 : index
    %102 = vector.load %arg1[%c3_79, %c0_80] : memref<9x2048xf32, #tpu.memory_space<vmem>>, vector<1x2048xf32>
    %103 = vector.broadcast %102 : vector<1x2048xf32> to vector<8x2048xf32>
    %104 = arith.mulf %101, %103 : vector<8x2048xf32>
    %c24 = arith.constant 24 : index
    %c0_81 = arith.constant 0 : index
    %105 = vector.load %arg10[%c24, %c0_81] : memref<144x2048xf32, #tpu.memory_space<vmem>>, vector<8x2048xf32>
    tpu.vector_store %arg10[%c24, %c0_81], %104 {strides = array<i32>} : memref<144x2048xf32, #tpu.memory_space<vmem>>, vector<8x2048xf32>,
    %c0_82 = arith.constant 0 : index
    %c128_83 = arith.constant 128 : index
    %106 = vector.load %arg9[%c0_82, %c128_83] : memref<16x2304xf32, #tpu.memory_space<vmem>>, vector<8x2048xf32>
    %c4_84 = arith.constant 4 : index
    %c0_85 = arith.constant 0 : index
    %107 = vector.load %arg1[%c4_84, %c0_85] : memref<9x2048xf32, #tpu.memory_space<vmem>>, vector<1x2048xf32>
    %108 = vector.broadcast %107 : vector<1x2048xf32> to vector<8x2048xf32>
    %109 = arith.mulf %106, %108 : vector<8x2048xf32>
    %c32_86 = arith.constant 32 : index
    %c0_87 = arith.constant 0 : index
    %110 = vector.load %arg10[%c32_86, %c0_87] : memref<144x2048xf32, #tpu.memory_space<vmem>>, vector<8x2048xf32>
    tpu.vector_store %arg10[%c32_86, %c0_87], %109 {strides = array<i32>} : memref<144x2048xf32, #tpu.memory_space<vmem>>, vector<8x2048xf32>,
    %c0_88 = arith.constant 0 : index
    %c129_89 = arith.constant 129 : index
    %111 = vector.load %arg9[%c0_88, %c129_89] : memref<16x2304xf32, #tpu.memory_space<vmem>>, vector<8x2048xf32>
    %c5_90 = arith.constant 5 : index
    %c0_91 = arith.constant 0 : index
    %112 = vector.load %arg1[%c5_90, %c0_91] : memref<9x2048xf32, #tpu.memory_space<vmem>>, vector<1x2048xf32>
    %113 = vector.broadcast %112 : vector<1x2048xf32> to vector<8x2048xf32>
    %114 = arith.mulf %111, %113 : vector<8x2048xf32>
    %c40 = arith.constant 40 : index
    %c0_92 = arith.constant 0 : index
    %115 = vector.load %arg10[%c40, %c0_92] : memref<144x2048xf32, #tpu.memory_space<vmem>>, vector<8x2048xf32>
    tpu.vector_store %arg10[%c40, %c0_92], %114 {strides = array<i32>} : memref<144x2048xf32, #tpu.memory_space<vmem>>, vector<8x2048xf32>,
    %c0_93 = arith.constant 0 : index
    %c159_94 = arith.constant 159 : index
    %116 = vector.load %arg9[%c0_93, %c159_94] : memref<16x2304xf32, #tpu.memory_space<vmem>>, vector<8x2048xf32>
    %c6_95 = arith.constant 6 : index
    %c0_96 = arith.constant 0 : index
    %117 = vector.load %arg1[%c6_95, %c0_96] : memref<9x2048xf32, #tpu.memory_space<vmem>>, vector<1x2048xf32>
    %118 = vector.broadcast %117 : vector<1x2048xf32> to vector<8x2048xf32>
    %119 = arith.mulf %116, %118 : vector<8x2048xf32>
    %c48_97 = arith.constant 48 : index
    %c0_98 = arith.constant 0 : index
    %120 = vector.load %arg10[%c48_97, %c0_98] : memref<144x2048xf32, #tpu.memory_space<vmem>>, vector<8x2048xf32>
    tpu.vector_store %arg10[%c48_97, %c0_98], %119 {strides = array<i32>} : memref<144x2048xf32, #tpu.memory_space<vmem>>, vector<8x2048xf32>,
    %c0_99 = arith.constant 0 : index
    %c160_100 = arith.constant 160 : index
    %121 = vector.load %arg9[%c0_99, %c160_100] : memref<16x2304xf32, #tpu.memory_space<vmem>>, vector<8x2048xf32>
    %c7_101 = arith.constant 7 : index
    %c0_102 = arith.constant 0 : index
    %122 = vector.load %arg1[%c7_101, %c0_102] : memref<9x2048xf32, #tpu.memory_space<vmem>>, vector<1x2048xf32>
    %123 = vector.broadcast %122 : vector<1x2048xf32> to vector<8x2048xf32>
    %124 = arith.mulf %121, %123 : vector<8x2048xf32>
    %c56 = arith.constant 56 : index
    %c0_103 = arith.constant 0 : index
    %125 = vector.load %arg10[%c56, %c0_103] : memref<144x2048xf32, #tpu.memory_space<vmem>>, vector<8x2048xf32>
    tpu.vector_store %arg10[%c56, %c0_103], %124 {strides = array<i32>} : memref<144x2048xf32, #tpu.memory_space<vmem>>, vector<8x2048xf32>,
    %c0_104 = arith.constant 0 : index
    %c161_105 = arith.constant 161 : index
    %126 = vector.load %arg9[%c0_104, %c161_105] : memref<16x2304xf32, #tpu.memory_space<vmem>>, vector<8x2048xf32>
    %c8_106 = arith.constant 8 : index
    %c0_107 = arith.constant 0 : index
    %127 = vector.load %arg1[%c8_106, %c0_107] : memref<9x2048xf32, #tpu.memory_space<vmem>>, vector<1x2048xf32>
    %128 = vector.broadcast %127 : vector<1x2048xf32> to vector<8x2048xf32>
    %129 = arith.mulf %126, %128 : vector<8x2048xf32>
    %c64_108 = arith.constant 64 : index
    %c0_109 = arith.constant 0 : index
    %130 = vector.load %arg10[%c64_108, %c0_109] : memref<144x2048xf32, #tpu.memory_space<vmem>>, vector<8x2048xf32>
    tpu.vector_store %arg10[%c64_108, %c0_109], %129 {strides = array<i32>} : memref<144x2048xf32, #tpu.memory_space<vmem>>, vector<8x2048xf32>,
    %c0_110 = arith.constant 0 : index
    %c0_111 = arith.constant 0 : index
    %131 = vector.load %arg4[%c0_110, %c0_111] : memref<8x72xf32, #tpu.memory_space<vmem>>, vector<8x72xf32>
    %c0_112 = arith.constant 0 : index
    %c0_113 = arith.constant 0 : index
    %132 = vector.load %arg10[%c0_112, %c0_113] : memref<144x2048xf32, #tpu.memory_space<vmem>>, vector<72x2048xf32>
    %cst_114 = arith.constant dense<0.000000e+00> : vector<8x2048xf32>
    %133 = tpu.matmul %131, %132, %cst_114 {dimension_numbers = #tpu.dot_dimension_numbers<[1], [0], [0], [1], [0, 0, 1, 1], [], []>} : vector<8x72xf32>, vector<72x2048xf32>, vector<8x2048xf32> -> vector<8x2048xf32>
    %c0_115 = arith.constant 0 : index
    %c0_116 = arith.constant 0 : index
    %134 = vector.load %arg5[%c0_115, %c0_116] : memref<8x1xf32, #tpu.memory_space<vmem>>, vector<8x1xf32>
    %135 = vector.broadcast %134 : vector<8x1xf32> to vector<8x2048xf32>
    %136 = arith.addf %133, %135 : vector<8x2048xf32>
    %c0_117 = arith.constant 0 : index
    %c0_118 = arith.constant 0 : index
    %137 = vector.load %arg8[%c0_117, %c0_118] : memref<8x2048xf32, #tpu.memory_space<vmem>>, vector<8x2048xf32>
    %138 = arith.addf %137, %136 : vector<8x2048xf32>
    %c0_119 = arith.constant 0 : index
    %c0_120 = arith.constant 0 : index
    %139 = vector.load %arg8[%c0_119, %c0_120] : memref<8x2048xf32, #tpu.memory_space<vmem>>, vector<8x2048xf32>
    tpu.vector_store %arg8[%c0_119, %c0_120], %138 {strides = array<i32>} : memref<8x2048xf32, #tpu.memory_space<vmem>>, vector<8x2048xf32>,
    return
  }
}

</mosaic_0001>

<bundles_post_ra>
// kernel: residual_block_up.1
= control target key start
LH: loop header
LB: loop body
LE: loop exit
PB: predicated region body
PF: predicated region fallthrough
CT: control target
= control target key end

     0   :  { %v140_v0 = vlaneseq  ;;  %s7818_s9 = smov 95   ;;  %s7819_s18 = smov 96   ;;  %vm236_vm0 = vcmask 777216   ;;  %vm642_vm1 = vcmask 785408   ;;  %vm1048_vm2 = vcmask 793600   ;;  %s12675_s1 = inlined_call_operand.vmem [shape: f32[9,2048], index: 1, kind: input, shape index: {}]   ;;  %s12676_s0 = inlined_call_operand.vmem [shape: f32[16,2048], index: 0, kind: input, shape index: {}]   ;;  %s12677_s2 = inlined_call_operand.vmem [shape: f32[16,144], index: 2, kind: input, shape index: {}]   ;;  %s12678_s3 = inlined_call_operand.vmem [shape: f32[16,1], index: 3, kind: input, shape index: {}]   ;;  %s12679_s6 = inlined_call_operand.vmem [shape: f32[8,1], index: 6, kind: input, shape index: {}]   ;;  %s12680_s7 = inlined_call_operand.vmem [shape: f32[8,1], index: 7, kind: input, shape index: {}]   ;;  %s12681_s4 = inlined_call_operand.vmem [shape: f32[8,72], index: 4, kind: input, shape index: {}]   ;;  %s12682_s5 = inlined_call_operand.vmem [shape: f32[8,1], index: 5, kind: input, shape index: {}]   ;;  %s12683_s8 = inlined_call_operand.vmem [shape: f32[8,2048], index: 8, kind: output, shape index: {}]  }
   0x1   :  { %v131_v1 = vld [vmem:[%s12675_s1] ss:$8 sm:$0xf]  ;;  %v7665_v30 = vld [vmem:[%s12675_s1 + $0x1] ss:$8 sm:$0xf] }
   0x2   :  { %v132_v2 = vld [vmem:[%s12675_s1] ss:$8 sm:$0xf0]  ;;  %v141_v4 = vshrl.u32 %v140_v0, 7  ;;  %s7820_s23 = smov 33   ;;  %s7821_s10 = smov 32  }
   0x3   :  { %v133_v3 = vor.u32 %v132_v2, %v131_v1  ;;  %v7663_v19 = vld [vmem:[%s12675_s1 + $0x40] ss:$8 sm:$0xf]  ;;  %v7666_v31 = vld [vmem:[%s12675_s1 + $0x1] ss:$8 sm:$0xf0] }
   0x4   :  { %v7879_v5 = vsub.s32 2, %v141_v4  ;;  %v7881_v6 = vsub.s32 0, %v141_v4  ;;  %v7883_v7 = vsub.s32 3, %v141_v4  ;;  %v7885_v8 = vsub.s32 1, %v141_v4  ;;  %v7988_v63 = vld [vmem:[%s12676_s0 + $0xf8] sm:$0xff]  ;;  %s7822_s15 = smov 97  }
   0x5   :  { %v7893_v13 = vsub.s32 5, %v141_v4  ;;  %v7895_v14 = vsub.s32 4, %v141_v4  ;;  %v7901_v17 = vsub.s32 7, %v141_v4  ;;  %v7903_v18 = vsub.s32 6, %v141_v4  ;;  %v7993_v0 = vld [vmem:[%s12676_s0 + $0x78] sm:$0xff]  ;;  %s7823_s21 = smov 31  }
   0x6   :  { %12867 = vst [vmem:[#allocation4_spill] sm:$0xff] %v7879_v5  ;;  %12868 = vst [vmem:[#allocation5_spill] sm:$0xff] %v7881_v6  ;;  %v151_v9 = vrot.slane %v133_v3, %v7879_v5  ;;  %v143_v10 = vrot.slane %v133_v3, %v7881_v6  ;;  %v155_v11 = vrot.slane %v133_v3, %v7883_v7  ;;  %v7664_v20 = vld [vmem:[%s12675_s1 + $0x40] ss:$8 sm:$0xf0]  ;;  %s7824_s27 = smov 127  }
   0x7   :  { %12869 = vst [vmem:[#allocation6_spill] sm:$0xff] %v7883_v7  ;;  %12870 = vst [vmem:[#allocation7_spill] sm:$0xff] %v7885_v8  ;;  %v147_v12 = vrot.slane %v133_v3, %v7885_v8  ;;  %v163_v15 = vrot.slane %v133_v3, %v7893_v13  ;;  %v159_v16 = vrot.slane %v133_v3, %v7895_v14  ;;  %v7667_v41 = vld [vmem:[%s12675_s1 + $0x41] ss:$8 sm:$0xf]  ;;  %vm1454_vm3 = vcmask 1039360  }
   0x8   :  { %208 = vrot.lane.b32.xlu1 %v151_v9, %s7818_s9  ;;  %204 = vrot.lane.b32.xlu0 %v143_v10, %s7818_s9  ;;  %12871 = vst [vmem:[#allocation8_spill] sm:$0xff] %v7893_v13  ;;  %12872 = vst [vmem:[#allocation9_spill] sm:$0xff] %v7895_v14  ;;  %v171_v21 = vrot.slane %v133_v3, %v7901_v17  ;;  %v167_v22 = vrot.slane %v133_v3, %v7903_v18  ;;  %v7668_v42 = vld [vmem:[%s12675_s1 + $0x41] ss:$8 sm:$0xf0]  ;;  %s7825_s12 = smov 1  }
   0x9   :  { %12873 = vst [vmem:[#allocation10_spill] sm:$0xff] %v7901_v17  ;;  %12874 = vst [vmem:[#allocation11_spill] sm:$0xff] %v7903_v18  ;;  %v137_v23 = vor.u32 %v7664_v20, %v7663_v19  ;;  %v539_v34 = vor.u32 %v7666_v31, %v7665_v30  ;;  %v7959_v45 = vor.u32 %v7668_v42, %v7667_v41  ;;  %v8085_v42 = vld [vmem:[%s12676_s0 + $0x48] sm:$0xff]  ;;  %vm811_vm4 = vcmask 261120  }
   0xa   :  { %vm1217_vm5 = vcmask 252928   ;;  %vm1623_vm6 = vcmask 7168   ;;  %vm405_vm7 = vcmask 269312   ;;  %vm3826_vm8 = vcmask 130048  }
   0xb   :  { %v179_v24 = vrot.slane %v137_v23, %v7885_v8  ;;  %v175_v25 = vrot.slane %v137_v23, %v7881_v6  ;;  %v187_v26 = vrot.slane %v137_v23, %v7883_v7  ;;  %v183_v27 = vrot.slane %v137_v23, %v7879_v5 }
   0xc   :  { %210 = vrot.lane.b32.xlu1 %v155_v11, %s7818_s9  ;;  %206 = vrot.lane.b32.xlu0 %v147_v12, %s7818_s9  ;;  %v195_v28 = vrot.slane %v137_v23, %v7893_v13  ;;  %v191_v29 = vrot.slane %v137_v23, %v7895_v14  ;;  %v203_v32 = vrot.slane %v137_v23, %v7901_v17  ;;  %v8010_v11 = vld [vmem:[%s12676_s0 + $0x8] sm:$0xff]  ;;  %v8015_v12 = vld [vmem:[%s12676_s0] sm:$0xff]  ;;  %vm7039_vm9 = vcmask 588800  }
   0xd   :  { %v199_v33 = vrot.slane %v137_v23, %v7903_v18  ;;  %v553_v35 = vrot.slane %v539_v34, %v7885_v8  ;;  %v549_v36 = vrot.slane %v539_v34, %v7881_v6  ;;  %v561_v37 = vrot.slane %v539_v34, %v7883_v7  ;;  %v8035_v23 = vld [vmem:[%s12676_s0 + $0x10] sm:$0xff] }
   0xe   :  { %v557_v38 = vrot.slane %v539_v34, %v7879_v5  ;;  %v569_v39 = vrot.slane %v539_v34, %v7893_v13  ;;  %v565_v40 = vrot.slane %v539_v34, %v7895_v14  ;;  %v577_v43 = vrot.slane %v539_v34, %v7901_v17 }
   0xf   :  { %v573_v44 = vrot.slane %v539_v34, %v7903_v18  ;;  %v585_v46 = vrot.slane %v7959_v45, %v7885_v8  ;;  %v581_v47 = vrot.slane %v7959_v45, %v7881_v6  ;;  %v593_v48 = vrot.slane %v7959_v45, %v7883_v7 }
  0x10   :  { %214 = vrot.lane.b32.xlu1 %v163_v15, %s7818_s9  ;;  %212 = vrot.lane.b32.xlu0 %v159_v16, %s7818_s9  ;;  %v589_v49 = vrot.slane %v7959_v45, %v7879_v5  ;;  %v601_v50 = vrot.slane %v7959_v45, %v7893_v13  ;;  %v597_v51 = vrot.slane %v7959_v45, %v7895_v14 }
  0x14   :  { %218 = vrot.lane.b32.xlu1 %v171_v21, %s7818_s9  ;;  %216 = vrot.lane.b32.xlu0 %v167_v22, %s7818_s9  ;;  %v8030_v22 = vld [vmem:[%s12676_s0 + $0x18] sm:$0xff] }
  0x18   :  { %222 = vrot.lane.b32.xlu1 %v179_v24, %s7818_s9  ;;  %220 = vrot.lane.b32.xlu0 %v175_v25, %s7818_s9 }
  0x1c   :  { %226 = vrot.lane.b32.xlu1 %v187_v26, %s7818_s9  ;;  %224 = vrot.lane.b32.xlu0 %v183_v27, %s7818_s9 }
  0x20   :  { %230 = vrot.lane.b32.xlu1 %v195_v28, %s7818_s9  ;;  %228 = vrot.lane.b32.xlu0 %v191_v29, %s7818_s9  ;;  %v8049_v28 = vld [vmem:[%s12676_s0 + $0x28] sm:$0xff]  ;;  %v8054_v29 = vld [vmem:[%s12676_s0 + $0x20] sm:$0xff] }
  0x24   :  { %234 = vrot.lane.b32.xlu1 %v203_v32, %s7818_s9  ;;  %232 = vrot.lane.b32.xlu0 %v199_v33, %s7818_s9 }
  0x28   :  { %612 = vrot.lane.b32.xlu1 %v553_v35, %s7819_s18  ;;  %610 = vrot.lane.b32.xlu0 %v549_v36, %s7819_s18  ;;  %v8068_v35 = vld [vmem:[%s12676_s0 + $0x38] sm:$0xff]  ;;  %v8073_v36 = vld [vmem:[%s12676_s0 + $0x30] sm:$0xff] }
  0x2c   :  { %616 = vrot.lane.b32.xlu1 %v561_v37, %s7819_s18  ;;  %614 = vrot.lane.b32.xlu0 %v557_v38, %s7819_s18 }
  0x30   :  { %620 = vrot.lane.b32.xlu1 %v569_v39, %s7819_s18  ;;  %618 = vrot.lane.b32.xlu0 %v565_v40, %s7819_s18 }
  0x34   :  { %624 = vrot.lane.b32.xlu1 %v577_v43, %s7819_s18  ;;  %622 = vrot.lane.b32.xlu0 %v573_v44, %s7819_s18  ;;  %v8090_v43 = vld [vmem:[%s12676_s0 + $0x40] sm:$0xff] }
  0x38   :  { %628 = vrot.lane.b32.xlu1 %v585_v46, %s7819_s18  ;;  %626 = vrot.lane.b32.xlu0 %v581_v47, %s7819_s18 }
  0x3c   :  { %632 = vrot.lane.b32.xlu1 %v593_v48, %s7819_s18  ;;  %630 = vrot.lane.b32.xlu0 %v589_v49, %s7819_s18  ;;  %v8101_v49 = vld [vmem:[%s12676_s0 + $0x58] sm:$0xff] }
  0x3d   :  { %12875 = vst [vmem:[#allocation12_spill] sm:$0xff] %v8101_v49 }
  0x40   :  { %636 = vrot.lane.b32.xlu1 %v601_v50, %s7819_s18  ;;  %634 = vrot.lane.b32.xlu0 %v597_v51, %s7819_s18  ;;  %v8106_v50 = vld [vmem:[%s12676_s0 + $0x50] sm:$0xff] }
  0x7a   :  { %v209_v52 = vpop.permute.xlu1 %208  ;;  %v205_v53 = vpop.permute.xlu0 %204 }
  0x7b   :  { %v269_v54 = vmul.f32 0.0, %v205_v53 }
  0x7d   :  { %371 = vrot.lane.b32.xlu1 %v269_v54, %s7820_s23  ;;  %337 = vrot.lane.b32.xlu0 %v269_v54, %s7820_s23 }
  0x7e   :  { %v211_v55 = vpop.permute.xlu1 %210  ;;  %v207_v58 = vpop.permute.xlu0 %206 }
  0x7f   :  { %v8002_v9 = vsel %vm236_vm0, %v205_v53, %v207_v58  ;;  %v8005_v10 = vsel %vm236_vm0, %v207_v58, %v209_v52  ;;  %v239_v20 = vsel %vm236_vm0, %v209_v52, %v211_v55 }
  0x80   :  { %v271_v16 = vmul.f32 %v8005_v10, %v8010_v11  ;;  %v270_v19 = vmul.f32 %v8002_v9, %v8015_v12  ;;  %v272_v25 = vmul.f32 %v239_v20, %v8035_v23 }
  0x82   :  { %v215_v56 = vpop.permute.xlu1 %214  ;;  %v213_v61 = vpop.permute.xlu0 %212 }
  0x83   :  { %v8025_v21 = vsel %vm236_vm0, %v211_v55, %v213_v61  ;;  %v241_v26 = vsel %vm236_vm0, %v213_v61, %v215_v56  ;;  %v8135_v61 = vld [vmem:[%s12676_s0 + $0x80] sm:$0xff] }
  0x84   :  { %v273_v24 = vmul.f32 %v8025_v21, %v8030_v22  ;;  %v274_v32 = vmul.f32 %v241_v26, %v8054_v29 }
  0x86   :  { %v219_v57 = vpop.permute.xlu1 %218  ;;  %v217_v1 = vpop.permute.xlu0 %216 }
  0x87   :  { %v8044_v27 = vsel %vm236_vm0, %v215_v56, %v217_v1  ;;  %v243_v33 = vsel %vm236_vm0, %v217_v1, %v219_v57  ;;  %v8119_v56 = vld [vmem:[%s12676_s0 + $0x68] sm:$0xff]  ;;  %v287_v1 = vmul.f32 %v8002_v9, %v8135_v61 }
  0x88   :  { %v275_v31 = vmul.f32 %v8044_v27, %v8049_v28  ;;  %v276_v39 = vmul.f32 %v243_v33, %v8073_v36 }
  0x8a   :  { %v223_v59 = vpop.permute.xlu1 %222  ;;  %v221_v15 = vpop.permute.xlu0 %220 }
  0x8b   :  { %v8063_v34 = vsel %vm236_vm0, %v219_v57, %v221_v15  ;;  %v245_v40 = vsel %vm236_vm0, %v221_v15, %v223_v59  ;;  %v8124_v57 = vld [vmem:[%s12676_s0 + $0x60] sm:$0xff] }
  0x8c   :  { %v277_v38 = vmul.f32 %v8063_v34, %v8068_v35  ;;  %v278_v46 = vmul.f32 %v245_v40, %v8090_v43  ;;  %12876 = vst [vmem:[#allocation13_spill] sm:$0xff] %v8124_v57 }
  0x8e   :  { %v227_v60 = vpop.permute.xlu1 %226  ;;  %v225_v30 = vpop.permute.xlu0 %224 }
  0x8f   :  { %v246_v41 = vsel %vm236_vm0, %v223_v59, %v225_v30  ;;  %v247_v47 = vsel %vm236_vm0, %v225_v30, %v227_v60 }
  0x90   :  { %v279_v44 = vmul.f32 %v246_v41, %v8085_v42  ;;  %v280_v53 = vmul.f32 %v247_v47, %v8106_v50 }
  0x92   :  { %v7983_v62 = vpop.permute.xlu1 %230  ;;  %v229_v37 = vpop.permute.xlu0 %228 }
  0x93   :  { %v248_v48 = vsel %vm236_vm0, %v227_v60, %v229_v37  ;;  %v249_v54 = vsel %vm236_vm0, %v229_v37, %v7983_v62 }
  0x94   :  { %v281_v52 = vmul.f32 %v248_v48, %v8101_v49  ;;  %v282_v59 = vmul.f32 %v249_v54, %v8124_v57 }
  0x96   :  { %v7995_v2 = vpop.permute.xlu1 %234  ;;  %v233_v51 = vpop.permute.xlu0 %232 }
  0x97   :  { %v302_v3 = vmul.f32 %v7995_v2, %v7988_v63  ;;  %v285_v4 = vmul.f32 %v7995_v2, %v7993_v0  ;;  %v250_v55 = vsel %vm236_vm0, %v7983_v62, %v233_v51  ;;  %v251_v60 = vsel %vm236_vm0, %v233_v51, %v7995_v2  ;;  %v8140_v62 = vld [vmem:[%s12676_s0 + $0x70] sm:$0xff] }
  0x98   :  { %v283_v58 = vmul.f32 %v250_v55, %v8119_v56  ;;  %v8150_v2 = vld [vmem:[%s12676_s0 + $0x90] sm:$0xff] }
  0x99   :  { %403 = vrot.lane.b32.xlu1 %v302_v3, %s7820_s23  ;;  %369 = vrot.lane.b32.xlu0 %v285_v4, %s7820_s23  ;;  %v284_v3 = vmul.f32 %v251_v60, %v8140_v62  ;;  %v8155_v4 = vld [vmem:[%s12676_s0 + $0x88] sm:$0xff]  ;;  %v289_v15 = vmul.f32 %v239_v20, %v8150_v2 }
  0x9a   :  { %v288_v9 = vmul.f32 %v8005_v10, %v8155_v4  ;;  %v8180_v10 = vld [vmem:[%s12676_s0 + $0xb0] sm:$0xff]  ;;  %v611_v37 = vpop.permute.xlu0 %610 }
  0x9b   :  { %v293_v30 = vmul.f32 %v243_v33, %v8180_v10 }
  0x9d   :  { %341 = vrot.lane.b32.xlu0 %v271_v16, %s7820_s23  ;;  %339 = vrot.lane.b32.xlu1 %v270_v19, %s7820_s23  ;;  %v8165_v16 = vld [vmem:[%s12676_s0 + $0xa0] sm:$0xff]  ;;  %v8170_v19 = vld [vmem:[%s12676_s0 + $0x98] sm:$0xff] }
  0x9e   :  { %v290_v20 = vmul.f32 %v8025_v21, %v8170_v19  ;;  %v8195_v21 = vld [vmem:[%s12676_s0 + $0xc0] sm:$0xff] }
  0xa1   :  { %345 = vrot.lane.b32.xlu0 %v273_v24, %s7820_s23  ;;  %343 = vrot.lane.b32.xlu1 %v272_v25, %s7820_s23  ;;  %v291_v24 = vmul.f32 %v241_v26, %v8165_v16  ;;  %v8185_v25 = vld [vmem:[%s12676_s0 + $0xa8] sm:$0xff] }
  0xa2   :  { %v292_v26 = vmul.f32 %v8044_v27, %v8185_v25  ;;  %v613_v27 = vpop.permute.xlu1 %612 }
  0xa5   :  { %349 = vrot.lane.b32.xlu0 %v275_v31, %s7820_s23  ;;  %347 = vrot.lane.b32.xlu1 %v274_v32, %s7820_s23  ;;  %v8200_v31 = vld [vmem:[%s12676_s0 + $0xb8] sm:$0xff]  ;;  %v295_v32 = vmul.f32 %v245_v40, %v8195_v21 }
  0xa6   :  { %v294_v33 = vmul.f32 %v8063_v34, %v8200_v31  ;;  %v617_v51 = vpop.permute.xlu1 %616 }
  0xa9   :  { %353 = vrot.lane.b32.xlu0 %v277_v38, %s7820_s23  ;;  %351 = vrot.lane.b32.xlu1 %v276_v39, %s7820_s23  ;;  %v8210_v38 = vld [vmem:[%s12676_s0 + $0xd0] sm:$0xff]  ;;  %v8215_v39 = vld [vmem:[%s12676_s0 + $0xc8] sm:$0xff] }
  0xaa   :  { %v297_v40 = vmul.f32 %v247_v47, %v8210_v38  ;;  %v296_v34 = vmul.f32 %v246_v41, %v8215_v39 }
  0xad   :  { %357 = vrot.lane.b32.xlu0 %v279_v44, %s7820_s23  ;;  %355 = vrot.lane.b32.xlu1 %v278_v46, %s7820_s23  ;;  %v8224_v44 = vld [vmem:[%s12676_s0 + $0xe0] sm:$0xff]  ;;  %v8229_v46 = vld [vmem:[%s12676_s0 + $0xd8] sm:$0xff] }
  0xae   :  { %v299_v47 = vmul.f32 %v249_v54, %v8224_v44  ;;  %v298_v41 = vmul.f32 %v248_v48, %v8229_v46  ;;  %v621_v48 = vpop.permute.xlu1 %620 }
  0xb1   :  { %361 = vrot.lane.b32.xlu0 %v281_v52, %s7820_s23  ;;  %359 = vrot.lane.b32.xlu1 %v280_v53, %s7820_s23  ;;  %v615_v52 = vpop.permute.xlu0 %614  ;;  %v8238_v53 = vld [vmem:[%s12676_s0 + $0xf0] sm:$0xff] }
  0xb5   :  { %365 = vrot.lane.b32.xlu0 %v283_v58, %s7820_s23  ;;  %363 = vrot.lane.b32.xlu1 %v282_v59, %s7820_s23  ;;  %v8243_v58 = vld [vmem:[%s12676_s0 + $0xe8] sm:$0xff]  ;;  %v301_v59 = vmul.f32 %v251_v60, %v8238_v53 }
  0xb6   :  { %v300_v54 = vmul.f32 %v250_v55, %v8243_v58  ;;  %v8260_v55 = vmul.f32 0.0, %v611_v37 }
  0xb9   :  { %373 = vrot.lane.b32.xlu0 %v287_v1, %s7820_s23  ;;  %367 = vrot.lane.b32.xlu1 %v284_v3, %s7820_s23  ;;  %v619_v1 = vpop.permute.xlu0 %618  ;;  %v605_v3 = vrot.slane %v7959_v45, %v7903_v18 }
  0xbd   :  { %377 = vrot.lane.b32.xlu0 %v289_v15, %s7820_s23  ;;  %375 = vrot.lane.b32.xlu1 %v288_v9, %s7820_s23  ;;  %v609_v15 = vrot.slane %v7959_v45, %v7901_v17  ;;  %v8256_v9 = vsel %vm642_vm1, %v611_v37, %v613_v27 }
  0xbe   :  { %v676_v60 = vmul.f32 %v8256_v9, %v8015_v12 }
  0xc1   :  { %381 = vrot.lane.b32.xlu0 %v291_v24, %s7820_s23  ;;  %379 = vrot.lane.b32.xlu1 %v290_v20, %s7820_s23  ;;  %v625_v24 = vpop.permute.xlu1 %624  ;;  %v623_v20 = vpop.permute.xlu0 %622 }
  0xc5   :  { %385 = vrot.lane.b32.xlu0 %v293_v30, %s7820_s23  ;;  %383 = vrot.lane.b32.xlu1 %v292_v26, %s7820_s23  ;;  %v8265_v30 = vsel %vm642_vm1, %v613_v27, %v615_v52  ;;  %v8268_v26 = vsel %vm642_vm1, %v615_v52, %v617_v51  ;;  %v8281_v27 = vsel %vm642_vm1, %v619_v1, %v621_v48  ;;  %v629_v37 = vpop.permute.xlu1 %628 }
  0xc6   :  { %v677_v45 = vmul.f32 %v8265_v30, %v8010_v11  ;;  %v680_v52 = vmul.f32 %v8281_v27, %v8054_v29 }
  0xc9   :  { %389 = vrot.lane.b32.xlu0 %v295_v32, %s7820_s23  ;;  %387 = vrot.lane.b32.xlu1 %v294_v33, %s7820_s23  ;;  %v678_v32 = vmul.f32 %v8268_v26, %v8035_v23  ;;  %v8278_v33 = vsel %vm642_vm1, %v617_v51, %v619_v1  ;;  %v8293_v51 = vsel %vm642_vm1, %v623_v20, %v625_v24 }
  0xcd   :  { %393 = vrot.lane.b32.xlu0 %v297_v40, %s7820_s23  ;;  %391 = vrot.lane.b32.xlu1 %v296_v34, %s7820_s23  ;;  %v627_v40 = vpop.permute.xlu0 %626  ;;  %v679_v34 = vmul.f32 %v8278_v33, %v8030_v22 }
  0xd1   :  { %397 = vrot.lane.b32.xlu0 %v299_v47, %s7820_s23  ;;  %395 = vrot.lane.b32.xlu1 %v298_v41, %s7820_s23  ;;  %v8290_v47 = vsel %vm642_vm1, %v621_v48, %v623_v20  ;;  %v631_v1 = vpop.permute.xlu0 %630  ;;  %v8305_v48 = vsel %vm642_vm1, %v627_v40, %v629_v37 }
  0xd2   :  { %v681_v41 = vmul.f32 %v8290_v47, %v8049_v28  ;;  %v8314_v20 = vsel %vm642_vm1, %v629_v37, %v631_v1 }
  0xd5   :  { %401 = vrot.lane.b32.xlu0 %v301_v59, %s7820_s23  ;;  %399 = vrot.lane.b32.xlu1 %v300_v54, %s7820_s23  ;;  %v682_v59 = vmul.f32 %v8293_v51, %v8073_v36  ;;  %v633_v54 = vpop.permute.xlu1 %632 }
  0xd9   :  { %638 = vrot.lane.b32.xlu0 %v605_v3, %s7819_s18  ;;  %640 = vrot.lane.b32.xlu1 %v609_v15, %s7819_s18  ;;  %v8302_v3 = vsel %vm642_vm1, %v625_v24, %v627_v40  ;;  %v637_v24 = vpop.permute.xlu1 %636  ;;  %v685_v40 = vmul.f32 %v8314_v20, %v8085_v42 }
  0xda   :  { %v683_v15 = vmul.f32 %v8302_v3, %v8068_v35 }
  0xdd   :  { %743 = vrot.lane.b32.xlu0 %v8260_v55, %s7821_s10  ;;  %745 = vrot.lane.b32.xlu1 %v676_v60, %s7821_s10  ;;  %v684_v60 = vmul.f32 %v8305_v48, %v8090_v43 }
  0xe1   :  { %747 = vrot.lane.b32.xlu0 %v677_v45, %s7821_s10  ;;  %749 = vrot.lane.b32.xlu1 %v678_v32, %s7821_s10  ;;  %v8317_v45 = vsel %vm642_vm1, %v631_v1, %v633_v54  ;;  %v635_v32 = vpop.permute.xlu0 %634 }
  0xe2   :  { %v8329_v37 = vsel %vm642_vm1, %v635_v32, %v637_v24 }
  0xe5   :  { %751 = vrot.lane.b32.xlu0 %v679_v34, %s7821_s10  ;;  %753 = vrot.lane.b32.xlu1 %v680_v52, %s7821_s10  ;;  %v686_v34 = vmul.f32 %v8317_v45, %v8106_v50  ;;  %v8326_v52 = vsel %vm642_vm1, %v633_v54, %v635_v32 }
  0xe9   :  { %755 = vrot.lane.b32.xlu0 %v681_v41, %s7821_s10  ;;  %757 = vrot.lane.b32.xlu1 %v682_v59, %s7821_s10  ;;  %v687_v41 = vmul.f32 %v8326_v52, %v8101_v49  ;;  %v688_v59 = vmul.f32 %v8329_v37, %v8124_v57 }
  0xed   :  { %759 = vrot.lane.b32.xlu0 %v683_v15, %s7821_s10  ;;  %761 = vrot.lane.b32.xlu1 %v684_v60, %s7821_s10 }
  0xef   :  { %v8339_v1 = vpop.permute.xlu1 %371  ;;  %v8341_v54 = vpop.permute.xlu0 %337 }
  0xf0   :  { %12877 = vst [vmem:[#allocation14_spill] sm:$0xff] %v8339_v1  ;;  %12878 = vst [vmem:[#allocation15_spill] sm:$0xff] %v8341_v54 }
  0xf1   :  { %763 = vrot.lane.b32.xlu0 %v685_v40, %s7821_s10  ;;  %765 = vrot.lane.b32.xlu1 %v686_v34, %s7821_s10 }
  0xf5   :  { %767 = vrot.lane.b32.xlu0 %v687_v41, %s7821_s10  ;;  %769 = vrot.lane.b32.xlu1 %v688_v59, %s7821_s10 }
 0x10b   :  { %v8343_v15 = vpop.permute.xlu1 %403  ;;  %v8345_v60 = vpop.permute.xlu0 %369 }
 0x10c   :  { %12879 = vst [vmem:[#allocation16_spill] sm:$0xff] %v8343_v15  ;;  %12880 = vst [vmem:[#allocation17_spill] sm:$0xff] %v8345_v60 }
 0x10f   :  { %v8347_v32 = vpop.permute.xlu0 %341  ;;  %v8349_v40 = vpop.permute.xlu1 %339 }
 0x110   :  { %12881 = vst [vmem:[#allocation18_spill] sm:$0xff] %v8347_v32  ;;  %12882 = vst [vmem:[#allocation19_spill] sm:$0xff] %v8349_v40 }
 0x113   :  { %v8351_v34 = vpop.permute.xlu0 %345  ;;  %v8353_v49 = vpop.permute.xlu1 %343 }
 0x114   :  { %12883 = vst [vmem:[#allocation20_spill] sm:$0xff] %v8351_v34  ;;  %12884 = vst [vmem:[#allocation21_spill] sm:$0xff] %v8353_v49 }
 0x117   :  { %v8355_v57 = vpop.permute.xlu0 %349  ;;  %v8357_v41 = vpop.permute.xlu1 %347 }
 0x118   :  { %12885 = vst [vmem:[#allocation22_spill] sm:$0xff] %v8355_v57  ;;  %12886 = vst [vmem:[#allocation23_spill] sm:$0xff] %v8357_v41 }
 0x11b   :  { %v8359_v59 = vpop.permute.xlu0 %353  ;;  %v8361_v1 = vpop.permute.xlu1 %351 }
 0x11c   :  { %12887 = vst [vmem:[#allocation24_spill] sm:$0xff] %v8359_v59  ;;  %12888 = vst [vmem:[#allocation25_spill] sm:$0xff] %v8361_v1 }
 0x11f   :  { %v8363_v54 = vpop.permute.xlu0 %357  ;;  %v8365_v15 = vpop.permute.xlu1 %355 }
 0x120   :  { %12889 = vst [vmem:[#allocation26_spill] sm:$0xff] %v8363_v54  ;;  %12890 = vst [vmem:[#allocation27_spill] sm:$0xff] %v8365_v15 }
 0x123   :  { %v8367_v60 = vpop.permute.xlu0 %361  ;;  %v8369_v32 = vpop.permute.xlu1 %359 }
 0x124   :  { %12891 = vst [vmem:[#allocation28_spill] sm:$0xff] %v8367_v60  ;;  %12892 = vst [vmem:[#allocation29_spill] sm:$0xff] %v8369_v32 }
 0x127   :  { %v8371_v40 = vpop.permute.xlu0 %365  ;;  %v8373_v34 = vpop.permute.xlu1 %363 }
 0x128   :  { %12893 = vst [vmem:[#allocation30_spill] sm:$0xff] %v8371_v40  ;;  %12894 = vst [vmem:[#allocation31_spill] sm:$0xff] %v8373_v34 }
 0x12b   :  { %v8375_v49 = vpop.permute.xlu0 %373  ;;  %v8377_v57 = vpop.permute.xlu1 %367 }
 0x12c   :  { %12895 = vst [vmem:[#allocation32_spill] sm:$0xff] %v8375_v49  ;;  %12896 = vst [vmem:[#allocation33_spill] sm:$0xff] %v8377_v57 }
 0x12f   :  { %v8379_v41 = vpop.permute.xlu0 %377  ;;  %v8381_v59 = vpop.permute.xlu1 %375 }
 0x130   :  { %12897 = vst [vmem:[#allocation34_spill] sm:$0xff] %v8379_v41  ;;  %12898 = vst [vmem:[#allocation35_spill] sm:$0xff] %v8381_v59 }
 0x133   :  { %v8383_v1 = vpop.permute.xlu0 %381  ;;  %v8385_v54 = vpop.permute.xlu1 %379 }
 0x134   :  { %12899 = vst [vmem:[#allocation36_spill] sm:$0xff] %v8383_v1  ;;  %12900 = vst [vmem:[#allocation37_spill] sm:$0xff] %v8385_v54 }
 0x137   :  { %v8387_v15 = vpop.permute.xlu0 %385  ;;  %v8389_v60 = vpop.permute.xlu1 %383 }
 0x138   :  { %12901 = vst [vmem:[#allocation38_spill] sm:$0xff] %v8387_v15  ;;  %12902 = vst [vmem:[#allocation39_spill] sm:$0xff] %v8389_v60 }
 0x13b   :  { %v8391_v32 = vpop.permute.xlu0 %389  ;;  %v8393_v40 = vpop.permute.xlu1 %387 }
 0x13c   :  { %12903 = vst [vmem:[#allocation40_spill] sm:$0xff] %v8391_v32  ;;  %12904 = vst [vmem:[#allocation41_spill] sm:$0xff] %v8393_v40 }
 0x13f   :  { %v8395_v34 = vpop.permute.xlu0 %393  ;;  %v8397_v49 = vpop.permute.xlu1 %391 }
 0x140   :  { %12905 = vst [vmem:[#allocation42_spill] sm:$0xff] %v8395_v34  ;;  %12906 = vst [vmem:[#allocation43_spill] sm:$0xff] %v8397_v49 }
 0x143   :  { %v8399_v57 = vpop.permute.xlu0 %397  ;;  %v8401_v41 = vpop.permute.xlu1 %395 }
 0x144   :  { %12907 = vst [vmem:[#allocation44_spill] sm:$0xff] %v8399_v57  ;;  %12908 = vst [vmem:[#allocation45_spill] sm:$0xff] %v8401_v41 }
 0x147   :  { %v8403_v59 = vpop.permute.xlu0 %401  ;;  %v8405_v1 = vpop.permute.xlu1 %399 }
 0x148   :  { %12909 = vst [vmem:[#allocation46_spill] sm:$0xff] %v8403_v59  ;;  %12910 = vst [vmem:[#allocation47_spill] sm:$0xff] %v8405_v1 }
 0x14b   :  { %v639_v54 = vpop.permute.xlu0 %638  ;;  %v641_v15 = vpop.permute.xlu1 %640 }
 0x14c   :  { %v656_v60 = vsel %vm642_vm1, %v637_v24, %v639_v54  ;;  %v657_v32 = vsel %vm642_vm1, %v639_v54, %v641_v15  ;;  %v691_v57 = vmul.f32 %v641_v15, %v7993_v0  ;;  %v693_v24 = vmul.f32 %v8256_v9, %v8135_v61 }
 0x14d   :  { %v689_v40 = vmul.f32 %v656_v60, %v8119_v56  ;;  %v690_v34 = vmul.f32 %v657_v32, %v8140_v62  ;;  %v694_v54 = vmul.f32 %v8265_v30, %v8155_v4  ;;  %v698_v9 = vmul.f32 %v8290_v47, %v8185_v25 }
 0x14e   :  { %v700_v30 = vmul.f32 %v8302_v3, %v8200_v31  ;;  %v704_v47 = vmul.f32 %v8326_v52, %v8229_v46  ;;  %v7670_v3 = vld [vmem:[%s12675_s1 + $0x2] ss:$8 sm:$0xf0]  ;;  %v708_v52 = vmul.f32 %v641_v15, %v7988_v63 }
 0x14f   :  { %771 = vrot.lane.b32.xlu0 %v689_v40, %s7821_s10  ;;  %773 = vrot.lane.b32.xlu1 %v690_v34, %s7821_s10  ;;  %v695_v40 = vmul.f32 %v8268_v26, %v8150_v2  ;;  %v696_v34 = vmul.f32 %v8278_v33, %v8170_v19  ;;  %v701_v26 = vmul.f32 %v8305_v48, %v8195_v21 }
 0x150   :  { %v702_v33 = vmul.f32 %v8314_v20, %v8215_v39  ;;  %v705_v48 = vmul.f32 %v8329_v37, %v8224_v44  ;;  %v706_v20 = vmul.f32 %v656_v60, %v8243_v58 }
 0x153   :  { %775 = vrot.lane.b32.xlu0 %v691_v57, %s7821_s10  ;;  %777 = vrot.lane.b32.xlu1 %v8260_v55, %s7821_s10  ;;  %v697_v57 = vmul.f32 %v8281_v27, %v8165_v16  ;;  %v699_v55 = vmul.f32 %v8293_v51, %v8180_v10  ;;  %v703_v27 = vmul.f32 %v8317_v45, %v8210_v38  ;;  %v7669_v51 = vld [vmem:[%s12675_s1 + $0x2] ss:$8 sm:$0xf] }
 0x154   :  { %v945_v45 = vor.u32 %v7670_v3, %v7669_v51 }
 0x156   :  { %v963_v37 = vrot.slane %v945_v45, %v7879_v5  ;;  %v967_v60 = vrot.slane %v945_v45, %v7883_v7  ;;  %v971_v15 = vrot.slane %v945_v45, %v7895_v14 }
 0x157   :  { %779 = vrot.lane.b32.xlu0 %v693_v24, %s7821_s10  ;;  %781 = vrot.lane.b32.xlu1 %v694_v54, %s7821_s10  ;;  %v707_v24 = vmul.f32 %v657_v32, %v8238_v53  ;;  %v955_v54 = vrot.slane %v945_v45, %v7881_v6  ;;  %v975_v32 = vrot.slane %v945_v45, %v7893_v13 }
 0x15b   :  { %783 = vrot.lane.b32.xlu0 %v695_v40, %s7821_s10  ;;  %785 = vrot.lane.b32.xlu1 %v696_v34, %s7821_s10  ;;  %v959_v40 = vrot.slane %v945_v45, %v7885_v8  ;;  %v7671_v34 = vld [vmem:[%s12675_s1 + $0x42] ss:$8 sm:$0xf] }
 0x15f   :  { %787 = vrot.lane.b32.xlu0 %v697_v57, %s7821_s10  ;;  %789 = vrot.lane.b32.xlu1 %v698_v9, %s7821_s10  ;;  %v7672_v57 = vld [vmem:[%s12675_s1 + $0x42] ss:$8 sm:$0xf0]  ;;  %v979_v9 = vrot.slane %v945_v45, %v7903_v18 }
 0x163   :  { %791 = vrot.lane.b32.xlu0 %v699_v55, %s7821_s10  ;;  %793 = vrot.lane.b32.xlu1 %v700_v30, %s7821_s10  ;;  %v983_v55 = vrot.slane %v945_v45, %v7901_v17  ;;  %v949_v30 = vor.u32 %v7672_v57, %v7671_v34  ;;  %v8506_v45 = vpop.permute.xlu0 %743 }
 0x164   :  { %12911 = vst [vmem:[#allocation48_spill] sm:$0xff] %v8506_v45 }
 0x165   :  { %v1003_v51 = vrot.slane %v949_v30, %v7895_v14  ;;  %v1007_v3 = vrot.slane %v949_v30, %v7893_v13 }
 0x167   :  { %795 = vrot.lane.b32.xlu0 %v701_v26, %s7821_s10  ;;  %797 = vrot.lane.b32.xlu1 %v702_v33, %s7821_s10  ;;  %v987_v26 = vrot.slane %v949_v30, %v7881_v6  ;;  %v991_v33 = vrot.slane %v949_v30, %v7885_v8 }
 0x16b   :  { %799 = vrot.lane.b32.xlu0 %v703_v27, %s7821_s10  ;;  %801 = vrot.lane.b32.xlu1 %v704_v47, %s7821_s10  ;;  %v995_v27 = vrot.slane %v949_v30, %v7879_v5  ;;  %v999_v47 = vrot.slane %v949_v30, %v7883_v7 }
 0x16f   :  { %803 = vrot.lane.b32.xlu0 %v705_v48, %s7821_s10  ;;  %805 = vrot.lane.b32.xlu1 %v706_v20, %s7821_s10  ;;  %v1011_v48 = vrot.slane %v949_v30, %v7903_v18  ;;  %v1015_v20 = vrot.slane %v949_v30, %v7901_v17 }
 0x173   :  { %807 = vrot.lane.b32.xlu0 %v707_v24, %s7821_s10  ;;  %809 = vrot.lane.b32.xlu1 %v708_v52, %s7821_s10  ;;  %v8508_v52 = vpop.permute.xlu1 %745  ;;  %v8510_v24 = vpop.permute.xlu0 %747 }
 0x174   :  { %12912 = vst [vmem:[#allocation49_spill] sm:$0xff] %v8508_v52  ;;  %12913 = vst [vmem:[#allocation50_spill] sm:$0xff] %v8510_v24 }
 0x177   :  { %1016 = vrot.lane.b32.xlu0 %v955_v54, %s7822_s15  ;;  %1018 = vrot.lane.b32.xlu1 %v959_v40, %s7822_s15  ;;  %v8512_v54 = vpop.permute.xlu1 %749  ;;  %v8514_v40 = vpop.permute.xlu0 %751 }
 0x178   :  { %12914 = vst [vmem:[#allocation51_spill] sm:$0xff] %v8512_v54  ;;  %12915 = vst [vmem:[#allocation52_spill] sm:$0xff] %v8514_v40 }
 0x17b   :  { %1020 = vrot.lane.b32.xlu0 %v963_v37, %s7822_s15  ;;  %1022 = vrot.lane.b32.xlu1 %v967_v60, %s7822_s15  ;;  %v8516_v37 = vpop.permute.xlu1 %753  ;;  %v8518_v60 = vpop.permute.xlu0 %755 }
 0x17c   :  { %12916 = vst [vmem:[#allocation53_spill] sm:$0xff] %v8516_v37  ;;  %12917 = vst [vmem:[#allocation54_spill] sm:$0xff] %v8518_v60 }
 0x17f   :  { %1024 = vrot.lane.b32.xlu0 %v971_v15, %s7822_s15  ;;  %1026 = vrot.lane.b32.xlu1 %v975_v32, %s7822_s15  ;;  %v8520_v15 = vpop.permute.xlu1 %757  ;;  %v8522_v32 = vpop.permute.xlu0 %759 }
 0x180   :  { %12918 = vst [vmem:[#allocation55_spill] sm:$0xff] %v8520_v15  ;;  %12919 = vst [vmem:[#allocation56_spill] sm:$0xff] %v8522_v32 }
 0x183   :  { %1028 = vrot.lane.b32.xlu0 %v979_v9, %s7822_s15  ;;  %1030 = vrot.lane.b32.xlu1 %v983_v55, %s7822_s15  ;;  %v8524_v34 = vpop.permute.xlu1 %761  ;;  %v8526_v57 = vpop.permute.xlu0 %763 }
 0x184   :  { %12920 = vst [vmem:[#allocation57_spill] sm:$0xff] %v8524_v34  ;;  %12921 = vst [vmem:[#allocation58_spill] sm:$0xff] %v8526_v57 }
 0x187   :  { %1032 = vrot.lane.b32.xlu0 %v987_v26, %s7822_s15  ;;  %1034 = vrot.lane.b32.xlu1 %v991_v33, %s7822_s15  ;;  %v8528_v9 = vpop.permute.xlu1 %765  ;;  %v8530_v55 = vpop.permute.xlu0 %767 }
 0x188   :  { %12922 = vst [vmem:[#allocation59_spill] sm:$0xff] %v8528_v9  ;;  %12923 = vst [vmem:[#allocation60_spill] sm:$0xff] %v8530_v55 }
 0x18b   :  { %1036 = vrot.lane.b32.xlu0 %v995_v27, %s7822_s15  ;;  %1038 = vrot.lane.b32.xlu1 %v999_v47, %s7822_s15  ;;  %v8532_v30 = vpop.permute.xlu1 %769 }
 0x18c   :  { %12924 = vst [vmem:[#allocation61_spill] sm:$0xff] %v8532_v30 }
 0x18f   :  { %1040 = vrot.lane.b32.xlu0 %v1003_v51, %s7822_s15  ;;  %1042 = vrot.lane.b32.xlu1 %v1007_v3, %s7822_s15 }
 0x193   :  { %1044 = vrot.lane.b32.xlu0 %v1011_v48, %s7822_s15  ;;  %1046 = vrot.lane.b32.xlu1 %v1015_v20, %s7822_s15 }
 0x1c1   :  { %v8534_v26 = vpop.permute.xlu0 %771  ;;  %v8536_v33 = vpop.permute.xlu1 %773 }
 0x1c2   :  { %12925 = vst [vmem:[#allocation62_spill] sm:$0xff] %v8534_v26  ;;  %12926 = vst [vmem:[#allocation63_spill] sm:$0xff] %v8536_v33 }
 0x1c5   :  { %v8538_v27 = vpop.permute.xlu0 %775  ;;  %v8540_v47 = vpop.permute.xlu1 %777 }
 0x1c6   :  { %12927 = vst [vmem:[#allocation64_spill] sm:$0xff] %v8538_v27  ;;  %12928 = vst [vmem:[#allocation65_spill] sm:$0xff] %v8540_v47  ;;  %v12946_v47 = vld [vmem:[#allocation13_spill] sm:$0xff] }
 0x1c9   :  { %v8542_v51 = vpop.permute.xlu0 %779  ;;  %v8544_v3 = vpop.permute.xlu1 %781 }
 0x1ca   :  { %12929 = vst [vmem:[#allocation66_spill] sm:$0xff] %v8542_v51  ;;  %12930 = vst [vmem:[#allocation67_spill] sm:$0xff] %v8544_v3 }
 0x1cd   :  { %v8546_v48 = vpop.permute.xlu0 %783  ;;  %v8548_v20 = vpop.permute.xlu1 %785 }
 0x1ce   :  { %12931 = vst [vmem:[#allocation68_spill] sm:$0xff] %v8546_v48  ;;  %12932 = vst [vmem:[#allocation69_spill] sm:$0xff] %v8548_v20 }
 0x1d1   :  { %v8550_v59 = vpop.permute.xlu0 %787  ;;  %v8552_v1 = vpop.permute.xlu1 %789 }
 0x1d2   :  { %12933 = vst [vmem:[#allocation70_spill] sm:$0xff] %v8550_v59  ;;  %12934 = vst [vmem:[#allocation71_spill] sm:$0xff] %v8552_v1 }
 0x1d5   :  { %v8554_v30 = vpop.permute.xlu0 %791  ;;  %v8556_v26 = vpop.permute.xlu1 %793 }
 0x1d6   :  { %12935 = vst [vmem:[#allocation72_spill] sm:$0xff] %v8554_v30  ;;  %12936 = vst [vmem:[#allocation73_spill] sm:$0xff] %v8556_v26 }
 0x1d9   :  { %v8558_v33 = vpop.permute.xlu0 %795  ;;  %v8560_v27 = vpop.permute.xlu1 %797 }
 0x1da   :  { %12937 = vst [vmem:[#allocation74_spill] sm:$0xff] %v8558_v33  ;;  %12938 = vst [vmem:[#allocation75_spill] sm:$0xff] %v8560_v27 }
 0x1dd   :  { %v8562_v41 = vpop.permute.xlu0 %799  ;;  %v8564_v9 = vpop.permute.xlu1 %801 }
 0x1de   :  { %12939 = vst [vmem:[#allocation76_spill] sm:$0xff] %v8562_v41  ;;  %12940 = vst [vmem:[#allocation77_spill] sm:$0xff] %v8564_v9 }
 0x1e1   :  { %v8566_v55 = vpop.permute.xlu0 %803  ;;  %v8568_v49 = vpop.permute.xlu1 %805 }
 0x1e2   :  { %12941 = vst [vmem:[#allocation78_spill] sm:$0xff] %v8566_v55  ;;  %12942 = vst [vmem:[#allocation79_spill] sm:$0xff] %v8568_v49 }
 0x1e5   :  { %v8570_v34 = vpop.permute.xlu0 %807  ;;  %v8572_v57 = vpop.permute.xlu1 %809 }
 0x1e6   :  { %12943 = vst [vmem:[#allocation80_spill] sm:$0xff] %v8570_v34  ;;  %12944 = vst [vmem:[#allocation81_spill] sm:$0xff] %v8572_v57 }
 0x1e9   :  { %v1017_v15 = vpop.permute.xlu0 %1016  ;;  %v1019_v32 = vpop.permute.xlu1 %1018 }
 0x1ea   :  { %v8574_v30 = vmul.f32 0.0, %v1017_v15  ;;  %v8577_v33 = vsel %vm1048_vm2, %v1017_v15, %v1019_v32 }
 0x1eb   :  { %v1082_v41 = vmul.f32 %v8577_v33, %v8015_v12 }
 0x1ec   :  { %1149 = vrot.lane.b32.xlu0 %v8574_v30, %s7823_s21 }
 0x1ed   :  { %v1021_v55 = vpop.permute.xlu0 %1020  ;;  %1151 = vrot.lane.b32.xlu1 %v1082_v41, %s7823_s21  ;;  %v1023_v34 = vpop.permute.xlu1 %1022 }
 0x1ee   :  { %v1050_v57 = vsel %vm1048_vm2, %v1019_v32, %v1021_v55  ;;  %v1051_v49 = vsel %vm1048_vm2, %v1021_v55, %v1023_v34 }
 0x1ef   :  { %v1083_v9 = vmul.f32 %v1050_v57, %v8010_v11  ;;  %v1084_v15 = vmul.f32 %v1051_v49, %v8035_v23 }
 0x1f1   :  { %v1025_v27 = vpop.permute.xlu0 %1024  ;;  %1153 = vrot.lane.b32.xlu0 %v1083_v9, %s7823_s21  ;;  %1155 = vrot.lane.b32.xlu1 %v1084_v15, %s7823_s21  ;;  %v1027_v26 = vpop.permute.xlu1 %1026 }
 0x1f2   :  { %v1052_v37 = vsel %vm1048_vm2, %v1023_v34, %v1025_v27  ;;  %v1053_v60 = vsel %vm1048_vm2, %v1025_v27, %v1027_v26 }
 0x1f3   :  { %v1085_v41 = vmul.f32 %v1052_v37, %v8030_v22  ;;  %v1086_v32 = vmul.f32 %v1053_v60, %v8054_v29 }
 0x1f5   :  { %v1029_v59 = vpop.permute.xlu0 %1028  ;;  %1157 = vrot.lane.b32.xlu0 %v1085_v41, %s7823_s21  ;;  %1159 = vrot.lane.b32.xlu1 %v1086_v32, %s7823_s21  ;;  %v1031_v55 = vpop.permute.xlu1 %1030 }
 0x1f6   :  { %v1054_v1 = vsel %vm1048_vm2, %v1027_v26, %v1029_v59  ;;  %v1055_v9 = vsel %vm1048_vm2, %v1029_v59, %v1031_v55 }
 0x1f7   :  { %v1087_v15 = vmul.f32 %v1054_v1, %v8049_v28  ;;  %v1088_v34 = vmul.f32 %v1055_v9, %v8073_v36 }
 0x1f9   :  { %v1033_v54 = vpop.permute.xlu0 %1032  ;;  %1161 = vrot.lane.b32.xlu0 %v1087_v15, %s7823_s21  ;;  %1163 = vrot.lane.b32.xlu1 %v1088_v34, %s7823_s21  ;;  %v1035_v27 = vpop.permute.xlu1 %1034 }
 0x1fa   :  { %v1056_v40 = vsel %vm1048_vm2, %v1031_v55, %v1033_v54  ;;  %v1057_v41 = vsel %vm1048_vm2, %v1033_v54, %v1035_v27 }
 0x1fb   :  { %v1089_v32 = vmul.f32 %v1056_v40, %v8068_v35  ;;  %v1090_v26 = vmul.f32 %v1057_v41, %v8090_v43 }
 0x1fd   :  { %v1037_v48 = vpop.permute.xlu0 %1036  ;;  %1165 = vrot.lane.b32.xlu0 %v1089_v32, %s7823_s21  ;;  %1167 = vrot.lane.b32.xlu1 %v1090_v26, %s7823_s21  ;;  %v1039_v59 = vpop.permute.xlu1 %1038  ;;  %v12945_v26 = vld [vmem:[#allocation12_spill] sm:$0xff] }
 0x1fe   :  { %v1058_v20 = vsel %vm1048_vm2, %v1035_v27, %v1037_v48  ;;  %v1059_v15 = vsel %vm1048_vm2, %v1037_v48, %v1039_v59 }
 0x1ff   :  { %v1091_v34 = vmul.f32 %v1058_v20, %v8085_v42  ;;  %v1092_v55 = vmul.f32 %v1059_v15, %v8106_v50 }
 0x201   :  { %v1041_v45 = vpop.permute.xlu0 %1040  ;;  %1169 = vrot.lane.b32.xlu0 %v1091_v34, %s7823_s21  ;;  %1171 = vrot.lane.b32.xlu1 %v1092_v55, %s7823_s21  ;;  %v1043_v54 = vpop.permute.xlu1 %1042 }
 0x202   :  { %v1060_v52 = vsel %vm1048_vm2, %v1039_v59, %v1041_v45  ;;  %v1061_v32 = vsel %vm1048_vm2, %v1041_v45, %v1043_v54 }
 0x203   :  { %v1093_v24 = vmul.f32 %v1060_v52, %v12945_v26  ;;  %v1094_v27 = vmul.f32 %v1061_v32, %v12946_v47 }
 0x205   :  { %v1045_v51 = vpop.permute.xlu0 %1044  ;;  %1173 = vrot.lane.b32.xlu0 %v1093_v24, %s7823_s21  ;;  %1175 = vrot.lane.b32.xlu1 %v1094_v27, %s7823_s21  ;;  %v1047_v48 = vpop.permute.xlu1 %1046  ;;  %v1099_v24 = vmul.f32 %v8577_v33, %v8135_v61  ;;  %v1102_v27 = vmul.f32 %v1052_v37, %v8170_v19  ;;  %v1106_v33 = vmul.f32 %v1056_v40, %v8200_v31  ;;  %v7673_v40 = vld [vmem:[%s12675_s1 + $0x3] ss:$8 sm:$0xf] }
 0x206   :  { %v1062_v3 = vsel %vm1048_vm2, %v1043_v54, %v1045_v51  ;;  %v1063_v34 = vsel %vm1048_vm2, %v1045_v51, %v1047_v48  ;;  %v1097_v45 = vmul.f32 %v1047_v48, %v7993_v0  ;;  %v1100_v51 = vmul.f32 %v1050_v57, %v8155_v4 }
 0x207   :  { %v1095_v55 = vmul.f32 %v1062_v3, %v8119_v56  ;;  %v1096_v59 = vmul.f32 %v1063_v34, %v8140_v62  ;;  %v1101_v54 = vmul.f32 %v1051_v49, %v8150_v2  ;;  %v1103_v0 = vmul.f32 %v1053_v60, %v8165_v16 }
 0x208   :  { %v1105_v57 = vmul.f32 %v1055_v9, %v8180_v10  ;;  %v1107_v49 = vmul.f32 %v1057_v41, %v8195_v21  ;;  %v1108_v37 = vmul.f32 %v1058_v20, %v8215_v39  ;;  %v1110_v60 = vmul.f32 %v1060_v52, %v8229_v46  ;;  %v7674_v20 = vld [vmem:[%s12675_s1 + $0x3] ss:$8 sm:$0xf0] }
 0x209   :  { %1177 = vrot.lane.b32.xlu0 %v1095_v55, %s7823_s21  ;;  %1179 = vrot.lane.b32.xlu1 %v1096_v59, %s7823_s21  ;;  %v1111_v9 = vmul.f32 %v1061_v32, %v8224_v44  ;;  %v1112_v41 = vmul.f32 %v1062_v3, %v8243_v58  ;;  %v1351_v52 = vor.u32 %v7674_v20, %v7673_v40 }
 0x20a   :  { %v1114_v55 = vmul.f32 %v1047_v48, %v7988_v63 }
 0x20b   :  { %v1361_v59 = vrot.slane %v1351_v52, %v7881_v6  ;;  %v1369_v3 = vrot.slane %v1351_v52, %v7879_v5  ;;  %v1373_v32 = vrot.slane %v1351_v52, %v7883_v7  ;;  %v1377_v63 = vrot.slane %v1351_v52, %v7895_v14 }
 0x20c   :  { %v1381_v48 = vrot.slane %v1351_v52, %v7893_v13 }
 0x20d   :  { %1181 = vrot.lane.b32.xlu0 %v1097_v45, %s7823_s21  ;;  %1183 = vrot.lane.b32.xlu1 %v8574_v30, %s7823_s21  ;;  %v1104_v30 = vmul.f32 %v1054_v1, %v8185_v25  ;;  %v1109_v1 = vmul.f32 %v1059_v15, %v8210_v38  ;;  %v1113_v15 = vmul.f32 %v1063_v34, %v8238_v53  ;;  %v7675_v34 = vld [vmem:[%s12675_s1 + $0x43] ss:$8 sm:$0xf] }
 0x20e   :  { %v1365_v45 = vrot.slane %v1351_v52, %v7885_v8 }
 0x211   :  { %1185 = vrot.lane.b32.xlu0 %v1099_v24, %s7823_s21  ;;  %1187 = vrot.lane.b32.xlu1 %v1100_v51, %s7823_s21  ;;  %v7676_v24 = vld [vmem:[%s12675_s1 + $0x43] ss:$8 sm:$0xf0]  ;;  %v1385_v51 = vrot.slane %v1351_v52, %v7903_v18 }
 0x215   :  { %1189 = vrot.lane.b32.xlu0 %v1101_v54, %s7823_s21  ;;  %1191 = vrot.lane.b32.xlu1 %v1102_v27, %s7823_s21  ;;  %v1389_v54 = vrot.slane %v1351_v52, %v7901_v17  ;;  %v1355_v27 = vor.u32 %v7676_v24, %v7675_v34 }
 0x219   :  { %1193 = vrot.lane.b32.xlu0 %v1103_v0, %s7823_s21  ;;  %1195 = vrot.lane.b32.xlu1 %v1104_v30, %s7823_s21  ;;  %v1393_v0 = vrot.slane %v1355_v27, %v7881_v6  ;;  %v1397_v30 = vrot.slane %v1355_v27, %v7885_v8 }
 0x21d   :  { %1197 = vrot.lane.b32.xlu0 %v1105_v57, %s7823_s21  ;;  %1199 = vrot.lane.b32.xlu1 %v1106_v33, %s7823_s21  ;;  %v1401_v57 = vrot.slane %v1355_v27, %v7879_v5  ;;  %v1405_v33 = vrot.slane %v1355_v27, %v7883_v7 }
 0x221   :  { %1201 = vrot.lane.b32.xlu0 %v1107_v49, %s7823_s21  ;;  %1203 = vrot.lane.b32.xlu1 %v1108_v37, %s7823_s21  ;;  %v1409_v49 = vrot.slane %v1355_v27, %v7895_v14  ;;  %v1413_v37 = vrot.slane %v1355_v27, %v7893_v13 }
 0x225   :  { %1205 = vrot.lane.b32.xlu0 %v1109_v1, %s7823_s21  ;;  %1207 = vrot.lane.b32.xlu1 %v1110_v60, %s7823_s21  ;;  %v1417_v1 = vrot.slane %v1355_v27, %v7903_v18  ;;  %v1421_v60 = vrot.slane %v1355_v27, %v7901_v17 }
 0x229   :  { %1209 = vrot.lane.b32.xlu0 %v1111_v9, %s7823_s21  ;;  %1211 = vrot.lane.b32.xlu1 %v1112_v41, %s7823_s21 }
 0x22d   :  { %1213 = vrot.lane.b32.xlu0 %v1113_v15, %s7823_s21  ;;  %1215 = vrot.lane.b32.xlu1 %v1114_v55, %s7823_s21 }
 0x231   :  { %1422 = vrot.lane.b32.xlu0 %v1361_v59, %s7824_s27  ;;  %1424 = vrot.lane.b32.xlu1 %v1365_v45, %s7824_s27 }
 0x235   :  { %1426 = vrot.lane.b32.xlu0 %v1369_v3, %s7824_s27  ;;  %1428 = vrot.lane.b32.xlu1 %v1373_v32, %s7824_s27 }
 0x239   :  { %1430 = vrot.lane.b32.xlu0 %v1377_v63, %s7824_s27  ;;  %1432 = vrot.lane.b32.xlu1 %v1381_v48, %s7824_s27 }
 0x23d   :  { %1434 = vrot.lane.b32.xlu0 %v1385_v51, %s7824_s27  ;;  %1436 = vrot.lane.b32.xlu1 %v1389_v54, %s7824_s27 }
 0x241   :  { %1438 = vrot.lane.b32.xlu0 %v1393_v0, %s7824_s27  ;;  %1440 = vrot.lane.b32.xlu1 %v1397_v30, %s7824_s27 }
 0x245   :  { %1442 = vrot.lane.b32.xlu0 %v1401_v57, %s7824_s27  ;;  %1444 = vrot.lane.b32.xlu1 %v1405_v33, %s7824_s27 }
 0x249   :  { %1446 = vrot.lane.b32.xlu0 %v1409_v49, %s7824_s27  ;;  %1448 = vrot.lane.b32.xlu1 %v1413_v37, %s7824_s27 }
 0x24d   :  { %1450 = vrot.lane.b32.xlu0 %v1417_v1, %s7824_s27  ;;  %1452 = vrot.lane.b32.xlu1 %v1421_v60, %s7824_s27 }
 0x25e   :  { %v8707_v40 = vpop.permute.xlu0 %1149 }
 0x25f   :  { %v8709_v20 = vpop.permute.xlu1 %1151 }
 0x263   :  { %v8711_v9 = vpop.permute.xlu0 %1153  ;;  %v8713_v41 = vpop.permute.xlu1 %1155 }
 0x264   :  { %12947 = vst [vmem:[#allocation12_spill] sm:$0xff] %v8713_v41 }
 0x267   :  { %v8715_v52 = vpop.permute.xlu0 %1157  ;;  %v8717_v15 = vpop.permute.xlu1 %1159 }
 0x268   :  { %12948 = vst [vmem:[#allocation13_spill] sm:$0xff] %v8715_v52  ;;  %12949 = vst [vmem:[#allocation82_spill] sm:$0xff] %v8717_v15 }
 0x26b   :  { %v8719_v55 = vpop.permute.xlu0 %1161  ;;  %v8721_v59 = vpop.permute.xlu1 %1163 }
 0x26c   :  { %12950 = vst [vmem:[#allocation83_spill] sm:$0xff] %v8719_v55  ;;  %12951 = vst [vmem:[#allocation84_spill] sm:$0xff] %v8721_v59 }
 0x26f   :  { %v8723_v45 = vpop.permute.xlu0 %1165  ;;  %v8725_v3 = vpop.permute.xlu1 %1167 }
 0x270   :  { %12952 = vst [vmem:[#allocation85_spill] sm:$0xff] %v8723_v45  ;;  %12953 = vst [vmem:[#allocation86_spill] sm:$0xff] %v8725_v3 }
 0x273   :  { %v8727_v32 = vpop.permute.xlu0 %1169  ;;  %v8729_v63 = vpop.permute.xlu1 %1171 }
 0x274   :  { %12954 = vst [vmem:[#allocation87_spill] sm:$0xff] %v8727_v32  ;;  %12955 = vst [vmem:[#allocation88_spill] sm:$0xff] %v8729_v63 }
 0x277   :  { %v8731_v48 = vpop.permute.xlu0 %1173  ;;  %v8733_v34 = vpop.permute.xlu1 %1175 }
 0x278   :  { %12956 = vst [vmem:[#allocation89_spill] sm:$0xff] %v8731_v48  ;;  %12957 = vst [vmem:[#allocation90_spill] sm:$0xff] %v8733_v34 }
 0x27b   :  { %v8735_v24 = vpop.permute.xlu0 %1177  ;;  %v8737_v51 = vpop.permute.xlu1 %1179 }
 0x27c   :  { %12958 = vst [vmem:[#allocation91_spill] sm:$0xff] %v8735_v24  ;;  %12959 = vst [vmem:[#allocation92_spill] sm:$0xff] %v8737_v51 }
 0x27f   :  { %v8739_v54 = vpop.permute.xlu0 %1181  ;;  %v8741_v27 = vpop.permute.xlu1 %1183 }
 0x280   :  { %12960 = vst [vmem:[#allocation93_spill] sm:$0xff] %v8739_v54 }
 0x283   :  { %v8743_v0 = vpop.permute.xlu0 %1185  ;;  %v8745_v30 = vpop.permute.xlu1 %1187 }
 0x287   :  { %v8747_v57 = vpop.permute.xlu0 %1189  ;;  %v8749_v33 = vpop.permute.xlu1 %1191 }
 0x288   :  { %12961 = vst [vmem:[#allocation94_spill] sm:$0xff] %v8747_v57  ;;  %12962 = vst [vmem:[#allocation95_spill] sm:$0xff] %v8749_v33 }
 0x28b   :  { %v8751_v49 = vpop.permute.xlu0 %1193  ;;  %v8753_v37 = vpop.permute.xlu1 %1195 }
 0x28c   :  { %12963 = vst [vmem:[#allocation96_spill] sm:$0xff] %v8751_v49  ;;  %12964 = vst [vmem:[#allocation97_spill] sm:$0xff] %v8753_v37 }
 0x28f   :  { %v8755_v1 = vpop.permute.xlu0 %1197  ;;  %v8757_v60 = vpop.permute.xlu1 %1199 }
 0x290   :  { %12965 = vst [vmem:[#allocation98_spill] sm:$0xff] %v8755_v1  ;;  %12966 = vst [vmem:[#allocation99_spill] sm:$0xff] %v8757_v60 }
 0x293   :  { %v8759_v51 = vpop.permute.xlu0 %1201  ;;  %v8761_v54 = vpop.permute.xlu1 %1203 }
 0x294   :  { %12967 = vst [vmem:[#allocation100_spill] sm:$0xff] %v8759_v51  ;;  %12968 = vst [vmem:[#allocation101_spill] sm:$0xff] %v8761_v54 }
 0x297   :  { %v8763_v34 = vpop.permute.xlu0 %1205  ;;  %v8765_v24 = vpop.permute.xlu1 %1207 }
 0x298   :  { %12969 = vst [vmem:[#allocation102_spill] sm:$0xff] %v8763_v34  ;;  %12970 = vst [vmem:[#allocation103_spill] sm:$0xff] %v8765_v24 }
 0x29b   :  { %v8767_v63 = vpop.permute.xlu0 %1209  ;;  %v8769_v48 = vpop.permute.xlu1 %1211 }
 0x29c   :  { %12971 = vst [vmem:[#allocation104_spill] sm:$0xff] %v8767_v63  ;;  %12972 = vst [vmem:[#allocation105_spill] sm:$0xff] %v8769_v48 }
 0x29f   :  { %v8771_v3 = vpop.permute.xlu0 %1213  ;;  %v8773_v32 = vpop.permute.xlu1 %1215 }
 0x2a0   :  { %12973 = vst [vmem:[#allocation106_spill] sm:$0xff] %v8771_v3  ;;  %12974 = vst [vmem:[#allocation107_spill] sm:$0xff] %v8773_v32 }
 0x2a3   :  { %v1423_v59 = vpop.permute.xlu0 %1422  ;;  %v1425_v45 = vpop.permute.xlu1 %1424 }
 0x2a4   :  { %v8775_v1 = vmul.f32 0.0, %v1423_v59  ;;  %v8778_v51 = vsel %vm1454_vm3, %v1423_v59, %v1425_v45 }
 0x2a5   :  { %v1488_v34 = vmul.f32 %v8778_v51, %v8015_v12 }
 0x2a6   :  { %1555 = vrot.lane.b32.xlu0 %v8775_v1, %s7825_s12 }
 0x2a7   :  { %v1427_v63 = vpop.permute.xlu0 %1426  ;;  %1557 = vrot.lane.b32.xlu1 %v1488_v34, %s7825_s12  ;;  %v1429_v3 = vpop.permute.xlu1 %1428 }
 0x2a8   :  { %v1456_v32 = vsel %vm1454_vm3, %v1425_v45, %v1427_v63  ;;  %v1457_v48 = vsel %vm1454_vm3, %v1427_v63, %v1429_v3 }
 0x2a9   :  { %v1489_v24 = vmul.f32 %v1456_v32, %v8010_v11  ;;  %v1490_v59 = vmul.f32 %v1457_v48, %v8035_v23 }
 0x2ab   :  { %v1431_v54 = vpop.permute.xlu0 %1430  ;;  %1559 = vrot.lane.b32.xlu0 %v1489_v24, %s7825_s12  ;;  %1561 = vrot.lane.b32.xlu1 %v1490_v59, %s7825_s12  ;;  %v1433_v12 = vpop.permute.xlu1 %1432 }
 0x2ac   :  { %v1458_v60 = vsel %vm1454_vm3, %v1429_v3, %v1431_v54  ;;  %v1459_v15 = vsel %vm1454_vm3, %v1431_v54, %v1433_v12 }
 0x2ad   :  { %v1491_v34 = vmul.f32 %v1458_v60, %v8030_v22  ;;  %v1492_v45 = vmul.f32 %v1459_v15, %v8054_v29 }
 0x2af   :  { %v1435_v55 = vpop.permute.xlu0 %1434  ;;  %1563 = vrot.lane.b32.xlu0 %v1491_v34, %s7825_s12  ;;  %1565 = vrot.lane.b32.xlu1 %v1492_v45, %s7825_s12  ;;  %v1437_v11 = vpop.permute.xlu1 %1436 }
 0x2b0   :  { %v1460_v23 = vsel %vm1454_vm3, %v1433_v12, %v1435_v55  ;;  %v1461_v63 = vsel %vm1454_vm3, %v1435_v55, %v1437_v11 }
 0x2b1   :  { %v1493_v24 = vmul.f32 %v1460_v23, %v8049_v28  ;;  %v1494_v3 = vmul.f32 %v1461_v63, %v8073_v36 }
 0x2b3   :  { %v1439_v59 = vpop.permute.xlu0 %1438  ;;  %1567 = vrot.lane.b32.xlu0 %v1493_v24, %s7825_s12  ;;  %1569 = vrot.lane.b32.xlu1 %v1494_v3, %s7825_s12  ;;  %v1441_v22 = vpop.permute.xlu1 %1440 }
 0x2b4   :  { %v1462_v29 = vsel %vm1454_vm3, %v1437_v11, %v1439_v59  ;;  %v1463_v54 = vsel %vm1454_vm3, %v1439_v59, %v1441_v22 }
 0x2b5   :  { %v1495_v34 = vmul.f32 %v1462_v29, %v8068_v35  ;;  %v1496_v12 = vmul.f32 %v1463_v54, %v8090_v43 }
 0x2b7   :  { %v1443_v45 = vpop.permute.xlu0 %1442  ;;  %1571 = vrot.lane.b32.xlu0 %v1495_v34, %s7825_s12  ;;  %1573 = vrot.lane.b32.xlu1 %v1496_v12, %s7825_s12  ;;  %v1445_v28 = vpop.permute.xlu1 %1444 }
 0x2b8   :  { %v1464_v36 = vsel %vm1454_vm3, %v1441_v22, %v1443_v45  ;;  %v1465_v55 = vsel %vm1454_vm3, %v1443_v45, %v1445_v28 }
 0x2b9   :  { %v1497_v24 = vmul.f32 %v1464_v36, %v8085_v42  ;;  %v1498_v11 = vmul.f32 %v1465_v55, %v8106_v50 }
 0x2bb   :  { %v1447_v3 = vpop.permute.xlu0 %1446  ;;  %1575 = vrot.lane.b32.xlu0 %v1497_v24, %s7825_s12  ;;  %1577 = vrot.lane.b32.xlu1 %v1498_v11, %s7825_s12  ;;  %v1449_v35 = vpop.permute.xlu1 %1448  ;;  %v1505_v11 = vmul.f32 %v8778_v51, %v8135_v61  ;;  %v1511_v61 = vmul.f32 %v1461_v63, %v8180_v10  ;;  %v7681_v10 = vld [vmem:[%s12675_s1 + $0x5] ss:$8 sm:$0xf]  ;;  %v7690_v63 = vld [vmem:[%s12675_s1 + $0x7] ss:$8 sm:$0xf0] }
 0x2bc   :  { %v1466_v43 = vsel %vm1454_vm3, %v1445_v28, %v1447_v3  ;;  %v1467_v59 = vsel %vm1454_vm3, %v1447_v3, %v1449_v35  ;;  %v1508_v3 = vmul.f32 %v1458_v60, %v8170_v19  ;;  %v1514_v19 = vmul.f32 %v1464_v36, %v8215_v39 }
 0x2bd   :  { %v1499_v34 = vmul.f32 %v1466_v43, %v12945_v26  ;;  %v1500_v22 = vmul.f32 %v1467_v59, %v12946_v47  ;;  %v7769_v47 = vld [vmem:[%s12676_s0 + $0x78] sm:$0xff] }
 0x2bf   :  { %v1451_v12 = vpop.permute.xlu0 %1450  ;;  %1579 = vrot.lane.b32.xlu0 %v1499_v34, %s7825_s12  ;;  %1581 = vrot.lane.b32.xlu1 %v1500_v22, %s7825_s12  ;;  %v1453_v42 = vpop.permute.xlu1 %1452 }
 0x2c0   :  { %v1468_v50 = vsel %vm1454_vm3, %v1449_v35, %v1451_v12  ;;  %v1469_v45 = vsel %vm1454_vm3, %v1451_v12, %v1453_v42  ;;  %v1503_v26 = vmul.f32 %v7769_v47, %v1453_v42  ;;  %v1509_v35 = vmul.f32 %v1459_v15, %v8165_v16  ;;  %v7770_v15 = vld [vmem:[%s12676_s0 + $0xf8] sm:$0xff] }
 0x2c1   :  { %v1501_v24 = vmul.f32 %v1468_v50, %v8119_v56  ;;  %v1502_v28 = vmul.f32 %v1469_v45, %v8140_v62  ;;  %v1506_v56 = vmul.f32 %v1456_v32, %v8155_v4  ;;  %v1507_v62 = vmul.f32 %v1457_v48, %v8150_v2  ;;  %v7683_v47 = vld [vmem:[%s12675_s1 + $0x45] ss:$8 sm:$0xf] }
 0x2c2   :  { %v1512_v4 = vmul.f32 %v1462_v29, %v8200_v31  ;;  %v1513_v2 = vmul.f32 %v1463_v54, %v8195_v21  ;;  %v1515_v16 = vmul.f32 %v1465_v55, %v8210_v38  ;;  %v7682_v21 = vld [vmem:[%s12675_s1 + $0x5] ss:$8 sm:$0xf0]  ;;  %v1517_v31 = vmul.f32 %v1467_v59, %v8224_v44  ;;  %v7685_v55 = vld [vmem:[%s12675_s1 + $0x6] ss:$8 sm:$0xf] }
 0x2c3   :  { %1583 = vrot.lane.b32.xlu0 %v1501_v24, %s7825_s12  ;;  %1585 = vrot.lane.b32.xlu1 %v1502_v28, %s7825_s12  ;;  %v1518_v39 = vmul.f32 %v1468_v50, %v8243_v58  ;;  %v1943_v38 = vor.u32 %v7682_v21, %v7681_v10  ;;  %v1520_v32 = vmul.f32 %v7770_v15, %v1453_v42 }
 0x2c5   :  { %v1953_v44 = vrot.slane %v1943_v38, %v7881_v6  ;;  %v1957_v58 = vrot.slane %v1943_v38, %v7885_v8  ;;  %v1961_v48 = vrot.slane %v1943_v38, %v7879_v5  ;;  %v1969_v51 = vrot.slane %v1943_v38, %v7895_v14 }
 0x2c6   :  { %v1973_v60 = vrot.slane %v1943_v38, %v7893_v13  ;;  %v1977_v29 = vrot.slane %v1943_v38, %v7903_v18  ;;  %v1981_v54 = vrot.slane %v1943_v38, %v7901_v17 }
 0x2c7   :  { %1587 = vrot.lane.b32.xlu0 %v1503_v26, %s7825_s12  ;;  %1589 = vrot.lane.b32.xlu1 %v8775_v1, %s7825_s12  ;;  %v1510_v1 = vmul.f32 %v1460_v23, %v8185_v25  ;;  %v1516_v25 = vmul.f32 %v1466_v43, %v8229_v46  ;;  %v1519_v46 = vmul.f32 %v1469_v45, %v8238_v53  ;;  %v7689_v23 = vld [vmem:[%s12675_s1 + $0x7] ss:$8 sm:$0xf]  ;;  %v7686_v43 = vld [vmem:[%s12675_s1 + $0x6] ss:$8 sm:$0xf0] }
 0x2c8   :  { %v1965_v53 = vrot.slane %v1943_v38, %v7883_v7  ;;  %v8894_v36 = vor.u32 %v7690_v63, %v7689_v23  ;;  %v8908_v22 = vor.u32 %v7686_v43, %v7685_v55  ;;  %v7684_v26 = vld [vmem:[%s12675_s1 + $0x45] ss:$8 sm:$0xf0]  ;;  %v7691_v23 = vld [vmem:[%s12675_s1 + $0x47] ss:$8 sm:$0xf] }
 0x2c9   :  { %v7692_v63 = vld [vmem:[%s12675_s1 + $0x47] ss:$8 sm:$0xf0] }
 0x2ca   :  { %v2761_v59 = vrot.slane %v8894_v36, %v7881_v6  ;;  %v2765_v34 = vrot.slane %v8894_v36, %v7885_v8  ;;  %v2769_v12 = vrot.slane %v8894_v36, %v7879_v5  ;;  %v2357_v42 = vrot.slane %v8908_v22, %v7881_v6 }
 0x2cb   :  { %1591 = vrot.lane.b32.xlu0 %v1505_v11, %s7825_s12  ;;  %1593 = vrot.lane.b32.xlu1 %v1506_v56, %s7825_s12  ;;  %v2361_v50 = vrot.slane %v8908_v22, %v7885_v8  ;;  %v2365_v45 = vrot.slane %v8908_v22, %v7879_v5  ;;  %v2773_v24 = vrot.slane %v8894_v36, %v7883_v7 }
 0x2cc   :  { %v2777_v28 = vrot.slane %v8894_v36, %v7895_v14  ;;  %v2369_v11 = vrot.slane %v8908_v22, %v7883_v7  ;;  %v2373_v56 = vrot.slane %v8908_v22, %v7895_v14  ;;  %v2781_v38 = vrot.slane %v8894_v36, %v7893_v13 }
 0x2cd   :  { %v2789_v55 = vrot.slane %v8894_v36, %v7901_v17  ;;  %v2381_v43 = vrot.slane %v8908_v22, %v7903_v18 }
 0x2cf   :  { %1595 = vrot.lane.b32.xlu0 %v1507_v62, %s7825_s12  ;;  %1597 = vrot.lane.b32.xlu1 %v1508_v3, %s7825_s12  ;;  %v8940_v62 = vor.u32 %v7684_v26, %v7683_v47 }
 0x2d1   :  { %v1985_v3 = vrot.slane %v8940_v62, %v7881_v6  ;;  %v2009_v26 = vrot.slane %v8940_v62, %v7903_v18 }
 0x2d3   :  { %1599 = vrot.lane.b32.xlu0 %v1509_v35, %s7825_s12  ;;  %1601 = vrot.lane.b32.xlu1 %v1510_v1, %s7825_s12  ;;  %v1989_v35 = vrot.slane %v8940_v62, %v7885_v8  ;;  %v1997_v1 = vrot.slane %v8940_v62, %v7883_v7 }
 0x2d7   :  { %1603 = vrot.lane.b32.xlu0 %v1511_v61, %s7825_s12  ;;  %1605 = vrot.lane.b32.xlu1 %v1512_v4, %s7825_s12  ;;  %v1993_v61 = vrot.slane %v8940_v62, %v7879_v5  ;;  %v7693_v4 = vld [vmem:[%s12675_s1 + $0x80] ss:$8 sm:$0xf] }
 0x2db   :  { %1607 = vrot.lane.b32.xlu0 %v1513_v2, %s7825_s12  ;;  %1609 = vrot.lane.b32.xlu1 %v1514_v19, %s7825_s12  ;;  %v7694_v2 = vld [vmem:[%s12675_s1 + $0x80] ss:$8 sm:$0xf0]  ;;  %v2005_v19 = vrot.slane %v8940_v62, %v7893_v13 }
 0x2df   :  { %1611 = vrot.lane.b32.xlu0 %v1515_v16, %s7825_s12  ;;  %1613 = vrot.lane.b32.xlu1 %v1516_v25, %s7825_s12  ;;  %v8963_v16 = vor.u32 %v7694_v2, %v7693_v4  ;;  %v2001_v25 = vrot.slane %v8940_v62, %v7895_v14 }
 0x2e1   :  { %v3169_v10 = vrot.slane %v8963_v16, %v7885_v8  ;;  %v3165_v21 = vrot.slane %v8963_v16, %v7881_v6 }
 0x2e3   :  { %1615 = vrot.lane.b32.xlu0 %v1517_v31, %s7825_s12  ;;  %1617 = vrot.lane.b32.xlu1 %v1518_v39, %s7825_s12 }
 0x2e7   :  { %1619 = vrot.lane.b32.xlu0 %v1519_v46, %s7825_s12  ;;  %1621 = vrot.lane.b32.xlu1 %v1520_v32, %s7825_s12  ;;  %v3173_v46 = vrot.slane %v8963_v16, %v7879_v5 }
 0x2eb   :  { %2014 = vrot.lane.b32.xlu0 %v1953_v44, %s7825_s12  ;;  %2016 = vrot.lane.b32.xlu1 %v1957_v58, %s7825_s12  ;;  %v3177_v44 = vrot.slane %v8963_v16, %v7883_v7  ;;  %v2785_v58 = vrot.slane %v8894_v36, %v7903_v18  ;;  %v2385_v36 = vrot.slane %v8908_v22, %v7901_v17 }
 0x2ef   :  { %2018 = vrot.lane.b32.xlu0 %v1961_v48, %s7825_s12  ;;  %2020 = vrot.lane.b32.xlu1 %v1965_v53, %s7825_s12 }
 0x2f3   :  { %2022 = vrot.lane.b32.xlu0 %v1969_v51, %s7825_s12  ;;  %2024 = vrot.lane.b32.xlu1 %v1973_v60, %s7825_s12  ;;  %v2377_v51 = vrot.slane %v8908_v22, %v7893_v13  ;;  %v3181_v60 = vrot.slane %v8963_v16, %v7895_v14 }
 0x2f7   :  { %2026 = vrot.lane.b32.xlu0 %v1977_v29, %s7825_s12  ;;  %2028 = vrot.lane.b32.xlu1 %v1981_v54, %s7825_s12 }
 0x2fb   :  { %2822 = vrot.lane.b32.xlu0 %v2761_v59, %s7821_s10  ;;  %2824 = vrot.lane.b32.xlu1 %v2765_v34, %s7821_s10  ;;  %v9020_v59 = vor.u32 %v7692_v63, %v7691_v23  ;;  %v7687_v34 = vld [vmem:[%s12675_s1 + $0x46] ss:$8 sm:$0xf] }
 0x2ff   :  { %2826 = vrot.lane.b32.xlu0 %v2769_v12, %s7821_s10  ;;  %2418 = vrot.lane.b32.xlu1 %v2357_v42, %s7823_s21  ;;  %v7688_v12 = vld [vmem:[%s12675_s1 + $0x46] ss:$8 sm:$0xf0] }
 0x303   :  { %2420 = vrot.lane.b32.xlu0 %v2361_v50, %s7823_s21  ;;  %2422 = vrot.lane.b32.xlu1 %v2365_v45, %s7823_s21  ;;  %v2793_v45 = vrot.slane %v9020_v59, %v7881_v6 }
 0x307   :  { %2828 = vrot.lane.b32.xlu0 %v2773_v24, %s7821_s10  ;;  %2830 = vrot.lane.b32.xlu1 %v2777_v28, %s7821_s10  ;;  %v9038_v24 = vor.u32 %v7688_v12, %v7687_v34 }
 0x309   :  { %v2389_v22 = vrot.slane %v9038_v24, %v7881_v6 }
 0x30b   :  { %2424 = vrot.lane.b32.xlu0 %v2369_v11, %s7823_s21  ;;  %2426 = vrot.lane.b32.xlu1 %v2373_v56, %s7823_s21 }
 0x30f   :  { %2030 = vrot.lane.b32.xlu0 %v1985_v3, %s7825_s12  ;;  %2032 = vrot.lane.b32.xlu1 %v1989_v35, %s7825_s12  ;;  %v2013_v3 = vrot.slane %v8940_v62, %v7901_v17 }
 0x313   :  { %2036 = vrot.lane.b32.xlu1 %v1997_v1, %s7825_s12  ;;  %2034 = vrot.lane.b32.xlu0 %v1993_v61, %s7825_s12 }
 0x317   :  { %2040 = vrot.lane.b32.xlu1 %v2005_v19, %s7825_s12  ;;  %2038 = vrot.lane.b32.xlu0 %v2001_v25, %s7825_s12 }
 0x318   :  { %v8974_v31 = vpop.permute.xlu0 %1555 }
 0x319   :  { %v8976_v39 = vpop.permute.xlu1 %1557 }
 0x31b   :  { %3228 = vrot.lane.b32.xlu1 %v3169_v10, %s7820_s23  ;;  %3226 = vrot.lane.b32.xlu0 %v3165_v21, %s7820_s23 }
 0x31d   :  { %v8984_v15 = vpop.permute.xlu0 %1559  ;;  %v8986_v32 = vpop.permute.xlu1 %1561 }
 0x31e   :  { %12975 = vst [vmem:[#allocation108_spill] sm:$0xff] %v8986_v32 }
 0x31f   :  { %2832 = vrot.lane.b32.xlu1 %v2781_v38, %s7821_s10  ;;  %3230 = vrot.lane.b32.xlu0 %v3173_v46, %s7820_s23 }
 0x321   :  { %v8994_v48 = vpop.permute.xlu0 %1563  ;;  %v8996_v53 = vpop.permute.xlu1 %1565 }
 0x322   :  { %12976 = vst [vmem:[#allocation109_spill] sm:$0xff] %v8994_v48  ;;  %12977 = vst [vmem:[#allocation110_spill] sm:$0xff] %v8996_v53 }
 0x323   :  { %3232 = vrot.lane.b32.xlu1 %v3177_v44, %s7820_s23  ;;  %2834 = vrot.lane.b32.xlu0 %v2785_v58, %s7821_s10 }
 0x325   :  { %v9010_v29 = vpop.permute.xlu0 %1567  ;;  %v9012_v54 = vpop.permute.xlu1 %1569 }
 0x326   :  { %12978 = vst [vmem:[#allocation111_spill] sm:$0xff] %v9010_v29  ;;  %12979 = vst [vmem:[#allocation112_spill] sm:$0xff] %v9012_v54 }
 0x327   :  { %2428 = vrot.lane.b32.xlu1 %v2377_v51, %s7823_s21  ;;  %3234 = vrot.lane.b32.xlu0 %v3181_v60, %s7820_s23 }
 0x329   :  { %v9028_v42 = vpop.permute.xlu0 %1571  ;;  %v9030_v50 = vpop.permute.xlu1 %1573 }
 0x32a   :  { %12980 = vst [vmem:[#allocation113_spill] sm:$0xff] %v9028_v42  ;;  %12981 = vst [vmem:[#allocation114_spill] sm:$0xff] %v9030_v50 }
 0x32b   :  { %2836 = vrot.lane.b32.xlu1 %v2789_v55, %s7821_s10  ;;  %2430 = vrot.lane.b32.xlu0 %v2381_v43, %s7823_s21 }
 0x32d   :  { %v9040_v28 = vpop.permute.xlu0 %1575  ;;  %v9042_v47 = vpop.permute.xlu1 %1577 }
 0x32e   :  { %12982 = vst [vmem:[#allocation115_spill] sm:$0xff] %v9040_v28  ;;  %12983 = vst [vmem:[#allocation116_spill] sm:$0xff] %v9042_v47  ;;  %v9127_v47 = vld [vmem:[%s12676_s0 + $0x80] sm:$0xff] }
 0x32f   :  { %2432 = vrot.lane.b32.xlu1 %v2385_v36, %s7823_s21  ;;  %2838 = vrot.lane.b32.xlu0 %v2793_v45, %s7821_s10 }
 0x331   :  { %v9050_v11 = vpop.permute.xlu0 %1579  ;;  %v9052_v56 = vpop.permute.xlu1 %1581 }
 0x332   :  { %12984 = vst [vmem:[#allocation117_spill] sm:$0xff] %v9050_v11  ;;  %12985 = vst [vmem:[#allocation118_spill] sm:$0xff] %v9052_v56  ;;  %v9119_v56 = vld [vmem:[%s12676_s0 + $0x88] sm:$0xff] }
 0x333   :  { %2042 = vrot.lane.b32.xlu1 %v2009_v26, %s7825_s12  ;;  %2434 = vrot.lane.b32.xlu0 %v2389_v22, %s7823_s21 }
 0x335   :  { %v9058_v35 = vpop.permute.xlu0 %1583  ;;  %v9060_v1 = vpop.permute.xlu1 %1585 }
 0x336   :  { %12986 = vst [vmem:[#allocation119_spill] sm:$0xff] %v9058_v35  ;;  %12987 = vst [vmem:[#allocation120_spill] sm:$0xff] %v9060_v1 }
 0x337   :  { %2044 = vrot.lane.b32.xlu0 %v2013_v3, %s7825_s12 }
 0x339   :  { %v9063_v61 = vpop.permute.xlu0 %1587  ;;  %v9065_v4 = vpop.permute.xlu1 %1589 }
 0x33a   :  { %12988 = vst [vmem:[#allocation121_spill] sm:$0xff] %v9063_v61 }
 0x33d   :  { %v9067_v2 = vpop.permute.xlu0 %1591  ;;  %v9069_v19 = vpop.permute.xlu1 %1593 }
 0x341   :  { %v9071_v25 = vpop.permute.xlu0 %1595  ;;  %v9073_v10 = vpop.permute.xlu1 %1597 }
 0x342   :  { %12989 = vst [vmem:[#allocation122_spill] sm:$0xff] %v9071_v25  ;;  %12990 = vst [vmem:[#allocation123_spill] sm:$0xff] %v9073_v10 }
 0x345   :  { %v9075_v21 = vpop.permute.xlu0 %1599  ;;  %v9077_v62 = vpop.permute.xlu1 %1601 }
 0x346   :  { %12991 = vst [vmem:[#allocation124_spill] sm:$0xff] %v9075_v21  ;;  %12992 = vst [vmem:[#allocation125_spill] sm:$0xff] %v9077_v62 }
 0x349   :  { %v9079_v38 = vpop.permute.xlu0 %1603  ;;  %v9081_v46 = vpop.permute.xlu1 %1605 }
 0x34a   :  { %12993 = vst [vmem:[#allocation126_spill] sm:$0xff] %v9079_v38  ;;  %12994 = vst [vmem:[#allocation127_spill] sm:$0xff] %v9081_v46  ;;  %v9157_v38 = vld [vmem:[%s12676_s0] sm:$0xff] }
 0x34d   :  { %v9083_v44 = vpop.permute.xlu0 %1607  ;;  %v9085_v58 = vpop.permute.xlu1 %1609 }
 0x34e   :  { %12995 = vst [vmem:[#allocation128_spill] sm:$0xff] %v9083_v44  ;;  %12996 = vst [vmem:[#allocation129_spill] sm:$0xff] %v9085_v58  ;;  %v9148_v58 = vld [vmem:[%s12676_s0 + $0x10] sm:$0xff] }
 0x34f   :  { %13003 = vst [vmem:[#allocation136_spill] sm:$0xff] %v9148_v58 }
 0x351   :  { %v9087_v51 = vpop.permute.xlu0 %1611  ;;  %v9089_v60 = vpop.permute.xlu1 %1613 }
 0x352   :  { %12997 = vst [vmem:[#allocation130_spill] sm:$0xff] %v9087_v51  ;;  %12998 = vst [vmem:[#allocation131_spill] sm:$0xff] %v9089_v60  ;;  %v9133_v51 = vld [vmem:[%s12676_s0 + $0x90] sm:$0xff] }
 0x355   :  { %v9091_v23 = vpop.permute.xlu0 %1615  ;;  %v9093_v63 = vpop.permute.xlu1 %1617 }
 0x356   :  { %12999 = vst [vmem:[#allocation132_spill] sm:$0xff] %v9091_v23  ;;  %13000 = vst [vmem:[#allocation133_spill] sm:$0xff] %v9093_v63 }
 0x359   :  { %v9095_v55 = vpop.permute.xlu0 %1619  ;;  %v9097_v43 = vpop.permute.xlu1 %1621 }
 0x35a   :  { %13001 = vst [vmem:[#allocation134_spill] sm:$0xff] %v9095_v55  ;;  %13002 = vst [vmem:[#allocation135_spill] sm:$0xff] %v9097_v43 }
 0x35d   :  { %v9099_v34 = vpop.permute.xlu0 %2014  ;;  %v9101_v12 = vpop.permute.xlu1 %2016 }
 0x361   :  { %v9103_v36 = vpop.permute.xlu0 %2018  ;;  %v9105_v45 = vpop.permute.xlu1 %2020 }
 0x365   :  { %v9107_v26 = vpop.permute.xlu0 %2022  ;;  %v9109_v22 = vpop.permute.xlu1 %2024 }
 0x369   :  { %v9111_v3 = vpop.permute.xlu0 %2026  ;;  %v9113_v1 = vpop.permute.xlu1 %2028 }
 0x36d   :  { %v2823_v61 = vpop.permute.xlu0 %2822  ;;  %v2825_v55 = vpop.permute.xlu1 %2824 }
 0x36e   :  { %v2854_v43 = vsel %vm811_vm4, %v2823_v61, %v2825_v55  ;;  %v2903_v11 = vmul.f32 %v9127_v47, %v2823_v61 }
 0x36f   :  { %v2904_v35 = vmul.f32 %v9119_v56, %v2854_v43 }
 0x371   :  { %v2827_v23 = vpop.permute.xlu0 %2826  ;;  %2990 = vrot.lane.b32.xlu1 %v2904_v35, %s7819_s18  ;;  %v2419_v50 = vpop.permute.xlu1 %2418 }
 0x372   :  { %v2855_v63 = vsel %vm811_vm4, %v2825_v55, %v2827_v23  ;;  %v9142_v55 = vld [vmem:[%s12676_s0 + $0x8] sm:$0xff] }
 0x373   :  { %v2905_v60 = vmul.f32 %v9133_v51, %v2855_v63  ;;  %v2887_v44 = vmul.f32 %v9142_v55, %v2854_v43  ;;  %v2888_v54 = vmul.f32 %v9148_v58, %v2855_v63  ;;  %v2886_v43 = vmul.f32 %v9157_v38, %v2823_v61 }
 0x374   :  { %v2499_v61 = vmul.f32 %v9127_v47, %v2419_v50 }
 0x375   :  { %v2421_v28 = vpop.permute.xlu0 %2420  ;;  %2992 = vrot.lane.b32.xlu0 %v2905_v60, %s7819_s18  ;;  %2988 = vrot.lane.b32.xlu1 %v2903_v11, %s7819_s18  ;;  %v2423_v42 = vpop.permute.xlu1 %2422 }
 0x376   :  { %v2450_v35 = vsel %vm1217_vm5, %v2419_v50, %v2421_v28  ;;  %v2451_v46 = vsel %vm1217_vm5, %v2421_v28, %v2423_v42 }
 0x377   :  { %v2500_v60 = vmul.f32 %v9119_v56, %v2450_v35  ;;  %v2501_v63 = vmul.f32 %v9133_v51, %v2451_v46 }
 0x379   :  { %v2829_v11 = vpop.permute.xlu0 %2828  ;;  %2958 = vrot.lane.b32.xlu1 %v2888_v54, %s7819_s18  ;;  %2956 = vrot.lane.b32.xlu0 %v2887_v44, %s7819_s18  ;;  %v9168_v54 = vld [vmem:[%s12676_s0 + $0x98] sm:$0xff]  ;;  %v9171_v37 = vpop.permute.xlu1 %2830 }
 0x37a   :  { %v2856_v49 = vsel %vm811_vm4, %v2827_v23, %v2829_v11  ;;  %v2857_v28 = vsel %vm811_vm4, %v2829_v11, %v9171_v37  ;;  %v9181_v23 = vld [vmem:[%s12676_s0 + $0xa0] sm:$0xff]  ;;  %v2484_v11 = vmul.f32 %v9148_v58, %v2451_v46  ;;  %v3185_v46 = vrot.slane %v8963_v16, %v7893_v13 }
 0x37b   :  { %v2906_v44 = vmul.f32 %v9168_v54, %v2856_v49 }
 0x37d   :  { %2954 = vrot.lane.b32.xlu0 %v2886_v43, %s7819_s18  ;;  %2586 = vrot.lane.b32.xlu1 %v2500_v60, %s7822_s15  ;;  %v2907_v60 = vmul.f32 %v9181_v23, %v2857_v28  ;;  %v2483_v43 = vmul.f32 %v9142_v55, %v2450_v35 }
 0x381   :  { %2994 = vrot.lane.b32.xlu1 %v2906_v44, %s7819_s18  ;;  %2588 = vrot.lane.b32.xlu0 %v2501_v63, %s7822_s15  ;;  %v9193_v63 = vld [vmem:[%s12676_s0 + $0x18] sm:$0xff] }
 0x382   :  { %v2889_v44 = vmul.f32 %v9193_v63, %v2856_v49  ;;  %v2046_v49 = vsel %vm1623_vm6, %v9099_v34, %v9101_v12 }
 0x385   :  { %2584 = vrot.lane.b32.xlu1 %v2499_v61, %s7822_s15  ;;  %2996 = vrot.lane.b32.xlu0 %v2907_v60, %s7819_s18  ;;  %v9199_v61 = vld [vmem:[%s12676_s0 + $0x20] sm:$0xff]  ;;  %v2482_v60 = vmul.f32 %v9157_v38, %v2419_v50 }
 0x386   :  { %v2890_v35 = vmul.f32 %v9199_v61, %v2857_v28  ;;  %v3189_v28 = vrot.slane %v8963_v16, %v7903_v18 }
 0x389   :  { %2554 = vrot.lane.b32.xlu1 %v2484_v11, %s7822_s15  ;;  %2552 = vrot.lane.b32.xlu0 %v2483_v43, %s7822_s15  ;;  %v2096_v43 = vmul.f32 %v9119_v56, %v2046_v49  ;;  %v2425_v11 = vpop.permute.xlu0 %2424 }
 0x38a   :  { %v2452_v50 = vsel %vm1217_vm5, %v2423_v42, %v2425_v11  ;;  %v2095_v42 = vmul.f32 %v9127_v47, %v9099_v34 }
 0x38d   :  { %2960 = vrot.lane.b32.xlu0 %v2889_v44, %s7819_s18  ;;  %2962 = vrot.lane.b32.xlu1 %v2890_v35, %s7819_s18  ;;  %v2047_v44 = vsel %vm1623_vm6, %v9101_v12, %v9103_v36 }
 0x38e   :  { %v2097_v35 = vmul.f32 %v9133_v51, %v2047_v44 }
 0x391   :  { %2550 = vrot.lane.b32.xlu0 %v2482_v60, %s7822_s15  ;;  %3236 = vrot.lane.b32.xlu1 %v3185_v46, %s7820_s23  ;;  %v2502_v46 = vmul.f32 %v9168_v54, %v2452_v50  ;;  %v9223_v60 = vpop.permute.xlu1 %2426 }
 0x392   :  { %v2453_v53 = vsel %vm1217_vm5, %v2425_v11, %v9223_v60  ;;  %v2485_v11 = vmul.f32 %v9193_v63, %v2452_v50  ;;  %v2078_v50 = vmul.f32 %v9157_v38, %v9099_v34  ;;  %v2048_v34 = vsel %vm1623_vm6, %v9103_v36, %v9105_v45 }
 0x393   :  { %v2503_v12 = vmul.f32 %v9181_v23, %v2453_v53  ;;  %v2081_v36 = vmul.f32 %v9193_v63, %v2048_v34 }
 0x395   :  { %3238 = vrot.lane.b32.xlu0 %v3189_v28, %s7820_s23  ;;  %2182 = vrot.lane.b32.xlu1 %v2096_v43, %s7824_s27  ;;  %v2079_v28 = vmul.f32 %v9142_v55, %v2046_v49  ;;  %v2080_v43 = vmul.f32 %v9148_v58, %v2047_v44  ;;  %v7695_v49 = vld [vmem:[%s12675_s1 + $0xc0] ss:$8 sm:$0xf] }
 0x396   :  { %v7696_v44 = vld [vmem:[%s12675_s1 + $0xc0] ss:$8 sm:$0xf0] }
 0x399   :  { %2184 = vrot.lane.b32.xlu0 %v2097_v35, %s7824_s27  ;;  %2590 = vrot.lane.b32.xlu1 %v2502_v46, %s7822_s15  ;;  %v2486_v35 = vmul.f32 %v9199_v61, %v2453_v53  ;;  %v2797_v46 = vrot.slane %v9020_v59, %v7885_v8  ;;  %v2801_v53 = vrot.slane %v9020_v59, %v7879_v5 }
 0x39d   :  { %2180 = vrot.lane.b32.xlu1 %v2095_v42, %s7824_s27  ;;  %2592 = vrot.lane.b32.xlu0 %v2503_v12, %s7822_s15  ;;  %v3193_v42 = vrot.slane %v8963_v16, %v7901_v17  ;;  %v9258_v12 = vor.u32 %v7696_v44, %v7695_v49 }
 0x3a1   :  { %2150 = vrot.lane.b32.xlu1 %v2080_v43, %s7824_s27  ;;  %2148 = vrot.lane.b32.xlu0 %v2079_v28, %s7824_s27  ;;  %v9260_v28 = vpop.permute.xlu0 %2030  ;;  %v9262_v43 = vpop.permute.xlu1 %2032 }
 0x3a2   :  { %13004 = vst [vmem:[#allocation137_spill] sm:$0xff] %v9262_v43  ;;  %v9351_v43 = vld [vmem:[%s12676_s0 + $0xb0] sm:$0xff] }
 0x3a5   :  { %2556 = vrot.lane.b32.xlu0 %v2485_v11, %s7822_s15  ;;  %2558 = vrot.lane.b32.xlu1 %v2486_v35, %s7822_s15  ;;  %v3197_v11 = vrot.slane %v9258_v12, %v7881_v6  ;;  %v2098_v35 = vmul.f32 %v9168_v54, %v2048_v34  ;;  %v9272_v16 = vpop.permute.xlu0 %2034  ;;  %v9277_v49 = vpop.permute.xlu1 %2036  ;;  %v2397_v34 = vrot.slane %v9038_v24, %v7879_v5 }
 0x3a6   :  { %13005 = vst [vmem:[#allocation138_spill] sm:$0xff] %v9272_v16  ;;  %13006 = vst [vmem:[#allocation139_spill] sm:$0xff] %v9277_v49 }
 0x3a9   :  { %2146 = vrot.lane.b32.xlu0 %v2078_v50, %s7824_s27  ;;  %2840 = vrot.lane.b32.xlu1 %v2797_v46, %s7821_s10  ;;  %v2049_v46 = vsel %vm1623_vm6, %v9105_v45, %v9107_v26  ;;  %v9285_v50 = vpop.permute.xlu0 %2038 }
 0x3aa   :  { %v2099_v44 = vmul.f32 %v9181_v23, %v2049_v46  ;;  %13007 = vst [vmem:[#allocation140_spill] sm:$0xff] %v9285_v50  ;;  %v2082_v45 = vmul.f32 %v9199_v61, %v2049_v46  ;;  %v2809_v46 = vrot.slane %v9020_v59, %v7895_v14 }
 0x3ad   :  { %2842 = vrot.lane.b32.xlu0 %v2801_v53, %s7821_s10  ;;  %3240 = vrot.lane.b32.xlu1 %v3193_v42, %s7820_s23  ;;  %v2393_v53 = vrot.slane %v9038_v24, %v7885_v8  ;;  %v9290_v42 = vpop.permute.xlu1 %2040 }
 0x3ae   :  { %13008 = vst [vmem:[#allocation141_spill] sm:$0xff] %v9290_v42 }
 0x3b1   :  { %3242 = vrot.lane.b32.xlu0 %v3197_v11, %s7820_s23  ;;  %2186 = vrot.lane.b32.xlu1 %v2098_v35, %s7824_s27  ;;  %v2805_v11 = vrot.slane %v9020_v59, %v7883_v7  ;;  %v3227_v35 = vpop.permute.xlu0 %3226 }
 0x3b2   :  { %v3307_v62 = vmul.f32 %v9127_v47, %v3227_v35 }
 0x3b5   :  { %2188 = vrot.lane.b32.xlu0 %v2099_v44, %s7824_s27  ;;  %2152 = vrot.lane.b32.xlu1 %v2081_v36, %s7824_s27  ;;  %v3229_v36 = vpop.permute.xlu1 %3228  ;;  %v2401_v44 = vrot.slane %v9038_v24, %v7883_v7  ;;  %v3231_v42 = vpop.permute.xlu0 %3230 }
 0x3b9   :  { %2154 = vrot.lane.b32.xlu0 %v2082_v45, %s7824_s27  ;;  %2436 = vrot.lane.b32.xlu1 %v2393_v53, %s7823_s21  ;;  %v3258_v53 = vsel %vm405_vm7, %v3227_v35, %v3229_v36  ;;  %v2833_v29 = vpop.permute.xlu1 %2832  ;;  %v2835_v21 = vpop.permute.xlu0 %2834 }
 0x3ba   :  { %v3308_v45 = vmul.f32 %v9119_v56, %v3258_v53  ;;  %v2859_v16 = vsel %vm811_vm4, %v2833_v29, %v2835_v21 }
 0x3bd   :  { %2438 = vrot.lane.b32.xlu0 %v2397_v34, %s7823_s21  ;;  %2844 = vrot.lane.b32.xlu1 %v2805_v11, %s7821_s10  ;;  %v2405_v34 = vrot.slane %v9038_v24, %v7895_v14  ;;  %v3259_v11 = vsel %vm405_vm7, %v3229_v36, %v3231_v42  ;;  %v3233_v49 = vpop.permute.xlu1 %3232  ;;  %v9320_v36 = vld [vmem:[%s12677_s2 + $0x8] sm:$0xff] }
 0x3be   :  { %v3309_v50 = vmul.f32 %v9133_v51, %v3259_v11  ;;  %13009 = vst [vmem:[#allocation142_spill] sm:$0xff] %v9320_v36  ;;  %7697 = vmatprep.mubr.msk.f32.mxu0 %vm3826_vm8, %v9320_v36  ;;  %7699 = vmatprep.mubr.msk.f32.mxu1 %vm3826_vm8, %v9320_v36 }
 0x3c1   :  { %2846 = vrot.lane.b32.xlu0 %v2809_v46, %s7821_s10  ;;  %2440 = vrot.lane.b32.xlu1 %v2401_v44, %s7823_s21  ;;  %v3291_v46 = vmul.f32 %v9142_v55, %v3258_v53  ;;  %v3292_v44 = vmul.f32 %v9148_v58, %v3259_v11  ;;  %v2429_v36 = vpop.permute.xlu1 %2428  ;;  %v3290_v53 = vmul.f32 %v9157_v38, %v3227_v35 }
 0x3c2   :  { %v3260_v11 = vsel %vm405_vm7, %v3231_v42, %v3233_v49  ;;  %v2909_v35 = vmul.f32 %v9351_v43, %v2859_v16 }
 0x3c5   :  { %2442 = vrot.lane.b32.xlu0 %v2405_v34, %s7823_s21  ;;  %3394 = vrot.lane.b32.xlu1 %v3308_v45, %s7818_s9  ;;  %v9328_v45 = vpop.permute.xlu0 %3234 }
 0x3c6   :  { %v3261_v42 = vsel %vm405_vm7, %v3233_v49, %v9328_v45  ;;  %v3293_v49 = vmul.f32 %v9193_v63, %v3260_v11 }
 0x3c9   :  { %3396 = vrot.lane.b32.xlu0 %v3309_v50, %s7818_s9  ;;  %3392 = vrot.lane.b32.xlu1 %v3307_v62, %s7818_s9  ;;  %v2858_v62 = vsel %vm811_vm4, %v9171_v37, %v2833_v29  ;;  %v9337_v50 = vld [vmem:[%s12676_s0 + $0xa8] sm:$0xff]  ;;  %v9345_v37 = vpop.permute.xlu0 %2430 }
 0x3ca   :  { %v2908_v34 = vmul.f32 %v9337_v50, %v2858_v62  ;;  %v9361_v29 = vld [vmem:[%s12676_s0 + $0x28] sm:$0xff] }
 0x3cd   :  { %3362 = vrot.lane.b32.xlu1 %v3292_v44, %s7818_s9  ;;  %3360 = vrot.lane.b32.xlu0 %v3291_v46, %s7818_s9  ;;  %v2837_v46 = vpop.permute.xlu1 %2836  ;;  %v3310_v44 = vmul.f32 %v9168_v54, %v3260_v11  ;;  %v9365_v41 = vpop.permute.xlu0 %2838  ;;  %v3294_v11 = vmul.f32 %v9199_v61, %v3261_v42 }
 0x3ce   :  { %v2860_v57 = vsel %vm811_vm4, %v2835_v21, %v2837_v46  ;;  %v2861_v21 = vsel %vm811_vm4, %v2837_v46, %v9365_v41  ;;  %v9420_v46 = vld [vmem:[%s12676_s0 + $0x38] sm:$0xff] }
 0x3d1   :  { %3358 = vrot.lane.b32.xlu0 %v3290_v53, %s7818_s9  ;;  %2998 = vrot.lane.b32.xlu1 %v2908_v34, %s7819_s18  ;;  %v2891_v34 = vmul.f32 %v9361_v29, %v2858_v62  ;;  %v3311_v53 = vmul.f32 %v9181_v23, %v3261_v42  ;;  %v9367_v52 = vpop.permute.xlu1 %2432  ;;  %v2454_v23 = vsel %vm1217_vm5, %v9223_v60, %v2429_v36  ;;  %v9380_v62 = vpop.permute.xlu0 %2434  ;;  %v9396_v60 = vld [vmem:[%s12676_s0 + $0xb8] sm:$0xff]  ;;  %v9410_v42 = vld [vmem:[%s12676_s0 + $0xc0] sm:$0xff] }
 0x3d5   :  { %3000 = vrot.lane.b32.xlu0 %v2909_v35, %s7819_s18  ;;  %3398 = vrot.lane.b32.xlu1 %v3310_v44, %s7818_s9  ;;  %v9375_v44 = vld [vmem:[%s12676_s0 + $0x30] sm:$0xff] }
 0x3d6   :  { %v2892_v35 = vmul.f32 %v9375_v44, %v2859_v16  ;;  %v2455_v16 = vsel %vm1217_vm5, %v2429_v36, %v9345_v37  ;;  %v2487_v36 = vmul.f32 %v9361_v29, %v2454_v23 }
 0x3d9   :  { %3400 = vrot.lane.b32.xlu0 %v3311_v53, %s7818_s9  ;;  %2964 = vrot.lane.b32.xlu1 %v2891_v34, %s7819_s18  ;;  %v2504_v34 = vmul.f32 %v9337_v50, %v2454_v23  ;;  %v9385_v53 = vpop.permute.xlu1 %2042  ;;  %v2893_v23 = vmul.f32 %v9420_v46, %v2860_v57 }
 0x3da   :  { %13010 = vst [vmem:[#allocation143_spill] sm:$0xff] %v9385_v53  ;;  %v9400_v53 = vpop.permute.xlu0 %2044 }
 0x3db   :  { %13011 = vst [vmem:[#allocation144_spill] sm:$0xff] %v9400_v53 }
 0x3dd   :  { %2966 = vrot.lane.b32.xlu0 %v2892_v35, %s7819_s18  ;;  %3364 = vrot.lane.b32.xlu1 %v3293_v49, %s7818_s9  ;;  %v2910_v49 = vmul.f32 %v9396_v60, %v2860_v57  ;;  %v2505_v35 = vmul.f32 %v9351_v43, %v2455_v16 }
 0x3e1   :  { %3366 = vrot.lane.b32.xlu0 %v3294_v11, %s7818_s9  ;;  %2594 = vrot.lane.b32.xlu1 %v2504_v34, %s7822_s15  ;;  %v2911_v34 = vmul.f32 %v9410_v42, %v2861_v21 }
 0x3e3   :  { %v2991_v61 = vpop.permute.xlu1 %2990 }
 0x3e5   :  { %2596 = vrot.lane.b32.xlu0 %v2505_v35, %s7822_s15  ;;  %3002 = vrot.lane.b32.xlu1 %v2910_v49, %s7819_s18  ;;  %v2488_v49 = vmul.f32 %v9375_v44, %v2455_v16 }
 0x3e7   :  { %v2993_v11 = vpop.permute.xlu0 %2992  ;;  %v2989_v33 = vpop.permute.xlu1 %2988 }
 0x3e8   :  { %v3039_v53 = vsel %vm642_vm1, %v2991_v61, %v2993_v11  ;;  %v3038_v32 = vsel %vm642_vm1, %v2989_v33, %v2991_v61  ;;  %v3201_v33 = vrot.slane %v9258_v12, %v7885_v8  ;;  %v2050_v61 = vsel %vm1623_vm6, %v9107_v26, %v9109_v22 }
 0x3e9   :  { %3004 = vrot.lane.b32.xlu0 %v2911_v34, %s7819_s18  ;;  %2560 = vrot.lane.b32.xlu1 %v2487_v36, %s7822_s15  ;;  %v2100_v34 = vmul.f32 %v9337_v50, %v2050_v61  ;;  %v2456_v26 = vsel %vm1217_vm5, %v9345_v37, %v9367_v52 }
 0x3ea   :  { %3833 = vmatprep.subr.mxu0 %v3039_v53  ;;  %v9432_v53 = vld [vmem:[%s12676_s0 + $0x40] sm:$0xff] }
 0x3eb   :  { %3834 = vmatpush1.msra.mxu0 %v3038_v32  ;;  %v2957_v35 = vpop.permute.xlu0 %2956  ;;  %v2959_v48 = vpop.permute.xlu1 %2958  ;;  %v2894_v57 = vmul.f32 %v9432_v53, %v2861_v21 }
 0x3ec   :  { %v3023_v25 = vsel %vm642_vm1, %v2957_v35, %v2959_v48 }
 0x3ed   :  { %2562 = vrot.lane.b32.xlu0 %v2488_v49, %s7822_s15  ;;  %2968 = vrot.lane.b32.xlu1 %v2893_v23, %s7819_s18  ;;  %v2051_v49 = vsel %vm1623_vm6, %v9109_v22, %v9111_v3  ;;  %v2457_v22 = vsel %vm1217_vm5, %v9367_v52, %v9380_v62 }
 0x3ee   :  { %3835 = vmatprep.subr.mxu0 %v3023_v25  ;;  %v3205_v25 = vrot.slane %v9258_v12, %v7879_v5 }
 0x3ef   :  { %v2955_v32 = vpop.permute.xlu0 %2954  ;;  %v2587_v16 = vpop.permute.xlu1 %2586 }
 0x3f0   :  { %v3022_v36 = vsel %vm642_vm1, %v2955_v32, %v2957_v35 }
 0x3f1   :  { %2970 = vrot.lane.b32.xlu0 %v2894_v57, %s7819_s18  ;;  %3244 = vrot.lane.b32.xlu1 %v3201_v33, %s7820_s23  ;;  %v2101_v33 = vmul.f32 %v9351_v43, %v2051_v49  ;;  %v2506_v57 = vmul.f32 %v9396_v60, %v2456_v26 }
 0x3f2   :  { %3836 = vmatpush1.msra.mxu0 %v3022_v36 }
 0x3f3   :  { %v9444_v23 = vpop.permute.xlu0 %2588  ;;  %v2995_v21 = vpop.permute.xlu1 %2994 }
 0x3f4   :  { %v2635_v35 = vsel %vm1048_vm2, %v2587_v16, %v9444_v23 }
 0x3f5   :  { %3246 = vrot.lane.b32.xlu0 %v3205_v25, %s7820_s23  ;;  %2190 = vrot.lane.b32.xlu1 %v2100_v34, %s7824_s27  ;;  %v3040_v25 = vsel %vm642_vm1, %v2993_v11, %v2995_v21  ;;  %v2083_v34 = vmul.f32 %v9361_v29, %v2050_v61  ;;  %v2489_v11 = vmul.f32 %v9420_v46, %v2456_v26 }
 0x3f6   :  { %3837 = vmatprep.subr.mxu0 %v2635_v35  ;;  %v2507_v35 = vmul.f32 %v9410_v42, %v2457_v22 }
 0x3f7   :  { %v9458_v32 = vpop.permute.xlu0 %2996  ;;  %v2585_v36 = vpop.permute.xlu1 %2584 }
 0x3f8   :  { %v2634_v37 = vsel %vm1048_vm2, %v2585_v36, %v2587_v16  ;;  %v3041_v10 = vsel %vm642_vm1, %v2995_v21, %v9458_v32  ;;  %v2813_v36 = vrot.slane %v9020_v59, %v7893_v13 }
 0x3f9   :  { %2192 = vrot.lane.b32.xlu0 %v2101_v33, %s7824_s27  ;;  %2598 = vrot.lane.b32.xlu1 %v2506_v57, %s7822_s15 }
 0x3fa   :  { %3838 = vmatpush1.msra.mxu0 %v2634_v37  ;;  %3910 = vmatprep.subr.mxu1 %v3041_v10  ;;  %v2084_v10 = vmul.f32 %v9375_v44, %v2051_v49  ;;  %v2490_v49 = vmul.f32 %v9432_v53, %v2457_v22 }
 0x3fb   :  { %3911 = vmatpush1.msra.mxu1 %v3040_v25  ;;  %v2553_v58 = vpop.permute.xlu0 %2552  ;;  %v9471_v52 = vpop.permute.xlu1 %2554 }
 0x3fc   :  { %v2619_v16 = vsel %vm1048_vm2, %v2553_v58, %v9471_v52 }
 0x3fd   :  { %2600 = vrot.lane.b32.xlu0 %v2507_v35, %s7822_s15  ;;  %2156 = vrot.lane.b32.xlu1 %v2083_v34, %s7824_s27  ;;  %v3209_v34 = vrot.slane %v9258_v12, %v7883_v7 }
 0x3fe   :  { %3839 = vmatprep.subr.mxu0 %v2619_v16  ;;  %v2052_v16 = vsel %vm1623_vm6, %v9111_v3, %v9113_v1 }
 0x3ff   :  { %v2961_v21 = vpop.permute.xlu0 %2960  ;;  %v9479_v61 = vpop.permute.xlu1 %2962  ;;  %v2085_v3 = vmul.f32 %v9420_v46, %v2052_v16 }
 0x400   :  { %v3025_v33 = vsel %vm642_vm1, %v2961_v21, %v9479_v61  ;;  %v3024_v57 = vsel %vm642_vm1, %v2959_v48, %v2961_v21  ;;  %v2817_v48 = vrot.slane %v9020_v59, %v7903_v18 }
 0x401   :  { %2158 = vrot.lane.b32.xlu0 %v2084_v10, %s7824_s27  ;;  %2564 = vrot.lane.b32.xlu1 %v2489_v11, %s7822_s15  ;;  %v2102_v10 = vmul.f32 %v9396_v60, %v2052_v16  ;;  %v2409_v16 = vrot.slane %v9038_v24, %v7893_v13 }
 0x402   :  { %3912 = vmatprep.subr.mxu1 %v3025_v33  ;;  %v2053_v33 = vsel %vm1623_vm6, %v9113_v1, %v9260_v28 }
 0x403   :  { %3913 = vmatpush1.msra.mxu1 %v3024_v57  ;;  %v2551_v26 = vpop.permute.xlu0 %2550  ;;  %v9489_v37 = vpop.permute.xlu1 %3236 }
 0x404   :  { %v2618_v25 = vsel %vm1048_vm2, %v2551_v26, %v2553_v58  ;;  %v3213_v58 = vrot.slane %v9258_v12, %v7895_v14 }
 0x405   :  { %2566 = vrot.lane.b32.xlu0 %v2490_v49, %s7822_s15  ;;  %2848 = vrot.lane.b32.xlu1 %v2813_v36, %s7821_s10  ;;  %v2103_v36 = vmul.f32 %v9410_v42, %v2053_v33 }
 0x406   :  { %3840 = vmatpush1.msra.mxu0 %v2618_v25 }
 0x407   :  { %v9498_v35 = vpop.permute.xlu0 %3238  ;;  %v2183_v22 = vpop.permute.xlu1 %2182 }
 0x409   :  { %2850 = vrot.lane.b32.xlu0 %v2817_v48, %s7821_s10  ;;  %3248 = vrot.lane.b32.xlu1 %v3209_v34, %s7820_s23  ;;  %v7677_v48 = vld [vmem:[%s12675_s1 + $0x4] ss:$8 sm:$0xf] }
 0x40a   :  { %v7678_v34 = vld [vmem:[%s12675_s1 + $0x4] ss:$8 sm:$0xf0] }
 0x40b   :  { %v9508_v11 = vpop.permute.xlu0 %2184  ;;  %v2591_v21 = vpop.permute.xlu1 %2590 }
 0x40c   :  { %v2231_v57 = vsel %vm1454_vm3, %v2183_v22, %v9508_v11 }
 0x40d   :  { %3250 = vrot.lane.b32.xlu0 %v3213_v58, %s7820_s23  ;;  %2194 = vrot.lane.b32.xlu1 %v2102_v10, %s7824_s27  ;;  %v2086_v58 = vmul.f32 %v9432_v53, %v2053_v33 }
 0x40e   :  { %3841 = vmatprep.subr.mxu0 %v2231_v57 }
 0x40f   :  { %v9519_v49 = vpop.permute.xlu0 %2592  ;;  %v2181_v26 = vpop.permute.xlu1 %2180 }
 0x410   :  { %v2230_v25 = vsel %vm1454_vm3, %v2181_v26, %v2183_v22  ;;  %v2637_v1 = vsel %vm1048_vm2, %v2591_v21, %v9519_v49  ;;  %v2636_v22 = vsel %vm1048_vm2, %v9444_v23, %v2591_v21  ;;  %v9539_v26 = vor.u32 %v7678_v34, %v7677_v48 }
 0x411   :  { %2196 = vrot.lane.b32.xlu0 %v2103_v36, %s7824_s27  ;;  %2160 = vrot.lane.b32.xlu1 %v2085_v3, %s7824_s27  ;;  %v2413_v3 = vrot.slane %v9038_v24, %v7903_v18  ;;  %v2821_v23 = vrot.slane %v9020_v59, %v7901_v17 }
 0x412   :  { %3842 = vmatpush1.msra.mxu0 %v2230_v25  ;;  %3914 = vmatprep.subr.mxu1 %v2637_v1  ;;  %v1769_v25 = vrot.slane %v9539_v26, %v7885_v8  ;;  %v3262_v1 = vsel %vm405_vm7, %v9328_v45, %v9489_v37  ;;  %v1765_v59 = vrot.slane %v9539_v26, %v7881_v6 }
 0x413   :  { %3915 = vmatpush1.msra.mxu1 %v2636_v22  ;;  %v2149_v10 = vpop.permute.xlu0 %2148  ;;  %v9537_v57 = vpop.permute.xlu1 %2150  ;;  %v3312_v22 = vmul.f32 %v9337_v50, %v3262_v1 }
 0x414   :  { %v2215_v36 = vsel %vm1454_vm3, %v2149_v10, %v9537_v57 }
 0x415   :  { %2162 = vrot.lane.b32.xlu0 %v2086_v58, %s7824_s27  ;;  %2444 = vrot.lane.b32.xlu1 %v2409_v16, %s7823_s21  ;;  %v2417_v16 = vrot.slane %v9038_v24, %v7901_v17  ;;  %v1843_v24 = vmul.f32 %v9142_v55, %v1769_v25  ;;  %v1641_v55 = vsel %vm1623_vm6, %v9067_v2, %v9069_v19 }
 0x416   :  { %3843 = vmatprep.subr.mxu0 %v2215_v36  ;;  %v1859_v36 = vmul.f32 %v9119_v56, %v1769_v25  ;;  %v1842_v56 = vmul.f32 %v9157_v38, %v1765_v59 }
 0x417   :  { %v2557_v21 = vpop.permute.xlu0 %2556  ;;  %v9549_v33 = vpop.permute.xlu1 %2558 }
 0x418   :  { %v2621_v48 = vsel %vm1048_vm2, %v2557_v21, %v9549_v33  ;;  %v2620_v34 = vsel %vm1048_vm2, %v9471_v52, %v2557_v21  ;;  %v1858_v21 = vmul.f32 %v9127_v47, %v1765_v59 }
 0x419   :  { %2446 = vrot.lane.b32.xlu0 %v2413_v3, %s7823_s21  ;;  %2852 = vrot.lane.b32.xlu1 %v2821_v23, %s7821_s10  ;;  %v3263_v3 = vsel %vm405_vm7, %v9489_v37, %v9498_v35 }
 0x41a   :  { %3916 = vmatprep.subr.mxu1 %v2621_v48  ;;  %v3313_v47 = vmul.f32 %v9351_v43, %v3263_v3  ;;  %v1640_v43 = vsel %vm1623_vm6, %v9065_v4, %v9067_v2  ;;  %v1624_v4 = vsel %vm1623_vm6, %v8974_v31, %v8976_v39  ;;  %v1235_v2 = vsel %vm1217_vm5, %v8743_v0, %v8745_v30 }
 0x41b   :  { %3917 = vmatpush1.msra.mxu1 %v2620_v34  ;;  %v2147_v45 = vpop.permute.xlu0 %2146  ;;  %v2841_v58 = vpop.permute.xlu1 %2840  ;;  %v1234_v31 = vsel %vm1217_vm5, %v8741_v27, %v8743_v0  ;;  %v1218_v27 = vsel %vm1217_vm5, %v8707_v40, %v8709_v20  ;;  %v1773_v0 = vrot.slane %v9539_v26, %v7879_v5 }
 0x41c   :  { %v2214_v52 = vsel %vm1454_vm3, %v2147_v45, %v2149_v10  ;;  %v3295_v10 = vmul.f32 %v9361_v29, %v3262_v1  ;;  %v2862_v37 = vsel %vm811_vm4, %v9365_v41, %v2841_v58  ;;  %v3296_v1 = vmul.f32 %v9375_v44, %v3263_v3  ;;  %v9597_v41 = vld [vmem:[%s12676_s0 + $0xc8] sm:$0xff] }
 0x41d   :  { %2448 = vrot.lane.b32.xlu0 %v2417_v16, %s7823_s21  ;;  %3402 = vrot.lane.b32.xlu1 %v3312_v22, %s7818_s9  ;;  %v2912_v34 = vmul.f32 %v9597_v41, %v2862_v37  ;;  %v1625_v44 = vsel %vm1623_vm6, %v8976_v39, %v8984_v15  ;;  %v1219_v39 = vsel %vm1217_vm5, %v8709_v20, %v8711_v9  ;;  %v13014_v20 = vld [vmem:[#allocation65_spill] sm:$0xff] }
 0x41e   :  { %3844 = vmatpush1.msra.mxu0 %v2214_v52  ;;  %v1777_v3 = vrot.slane %v9539_v26, %v7883_v7 }
 0x41f   :  { %3845 = vmatprep.subr.mxu0 %v1859_v36  ;;  %v9576_v23 = vpop.permute.xlu0 %2842  ;;  %v3241_v48 = vpop.permute.xlu1 %3240 }
 0x420   :  { %3846 = vmatpush1.msra.mxu0 %v1858_v21  ;;  %v2863_v59 = vsel %vm811_vm4, %v2841_v58, %v9576_v23  ;;  %v3264_v16 = vsel %vm405_vm7, %v9498_v35, %v3241_v48  ;;  %v9620_v35 = vld [vmem:[%s12676_s0 + $0xd0] sm:$0xff] }
 0x421   :  { %3847 = vmatprep.subr.mxu0 %v1843_v24  ;;  %3404 = vrot.lane.b32.xlu0 %v3313_v47, %s7818_s9  ;;  %v2913_v58 = vmul.f32 %v9620_v35, %v2863_v59  ;;  %v3314_v52 = vmul.f32 %v9396_v60, %v3264_v16  ;;  %v13012_v24 = vld [vmem:[#allocation67_spill] sm:$0xff] }
 0x422   :  { %3368 = vrot.lane.b32.xlu1 %v3295_v10, %s7818_s9  ;;  %3848 = vmatpush1.msra.mxu0 %v1842_v56 }
 0x423   :  { %v9588_v25 = vpop.permute.xlu0 %3242  ;;  %v2187_v38 = vpop.permute.xlu1 %2186  ;;  %3849 = vmatprep.subr.mxu0 %v1641_v55 }
 0x424   :  { %3850 = vmatpush1.msra.mxu0 %v1640_v43  ;;  %v3265_v21 = vsel %vm405_vm7, %v3241_v48, %v9588_v25  ;;  %v13013_v48 = vld [vmem:[#allocation66_spill] sm:$0xff]  ;;  %v2232_v10 = vsel %vm1454_vm3, %v9508_v11, %v2187_v38 }
 0x425   :  { %3851 = vmatprep.subr.mxu0 %v1625_v44  ;;  %3370 = vrot.lane.b32.xlu0 %v3296_v1, %s7818_s9  ;;  %v829_v56 = vsel %vm811_vm4, %v13013_v48, %v13012_v24  ;;  %v3315_v40 = vmul.f32 %v9410_v42, %v3265_v21  ;;  %v828_v1 = vsel %vm811_vm4, %v13014_v20, %v13013_v48  ;;  %v13016_v44 = vld [vmem:[#allocation49_spill] sm:$0xff]  ;;  %v13020_v48 = vld [vmem:[#allocation14_spill] sm:$0xff] }
 0x426   :  { %3852 = vmatpush1.msra.mxu0 %v1624_v4  ;;  %3006 = vrot.lane.b32.xlu1 %v2912_v34, %s7819_s18  ;;  %v9659_v34 = vld [vmem:[%s12676_s0 + $0x48] sm:$0xff]  ;;  %v1861_v4 = vmul.f32 %v9168_v54, %v1777_v3 }
 0x427   :  { %v9615_v22 = vpop.permute.xlu0 %2188  ;;  %v2153_v45 = vpop.permute.xlu1 %2152  ;;  %3853 = vmatprep.subr.mxu0 %v1235_v2  ;;  %v2895_v11 = vmul.f32 %v9659_v34, %v2862_v37  ;;  %v13017_v2 = vld [vmem:[#allocation48_spill] sm:$0xff]  ;;  %v13018_v37 = vld [vmem:[#allocation35_spill] sm:$0xff] }
 0x428   :  { %v2233_v36 = vsel %vm1454_vm3, %v2187_v38, %v9615_v22  ;;  %3854 = vmatpush1.msra.mxu0 %v1234_v31  ;;  %v13015_v38 = vld [vmem:[#allocation50_spill] sm:$0xff]  ;;  %v1860_v31 = vmul.f32 %v9133_v51, %v1773_v0  ;;  %v1845_v51 = vmul.f32 %v9193_v63, %v1777_v3  ;;  %v13024_v63 = vld [vmem:[#allocation15_spill] sm:$0xff] }
 0x429   :  { %3918 = vmatprep.subr.mxu1 %v2233_v36  ;;  %3855 = vmatprep.subr.mxu0 %v1219_v39  ;;  %v813_v42 = vsel %vm811_vm4, %v13016_v44, %v13015_v38  ;;  %v13019_v39 = vld [vmem:[#allocation32_spill] sm:$0xff] }
 0x42a   :  { %3008 = vrot.lane.b32.xlu0 %v2913_v58, %s7819_s18  ;;  %3856 = vmatpush1.msra.mxu0 %v1218_v27  ;;  %v812_v58 = vsel %vm811_vm4, %v13017_v2, %v13016_v44  ;;  %v423_v36 = vsel %vm405_vm7, %v13019_v39, %v13018_v37 }
 0x42b   :  { %3406 = vrot.lane.b32.xlu1 %v3314_v52, %s7818_s9  ;;  %v9648_v47 = vpop.permute.xlu0 %2154  ;;  %v2437_v55 = vpop.permute.xlu1 %2436  ;;  %3857 = vmatprep.subr.mxu0 %v829_v56  ;;  %v2216_v52 = vsel %vm1454_vm3, %v9537_v57, %v2153_v45  ;;  %v422_v56 = vsel %vm405_vm7, %v13020_v48, %v13019_v39  ;;  %v13021_v57 = vld [vmem:[#allocation18_spill] sm:$0xff] }
 0x42c   :  { %3919 = vmatpush1.msra.mxu1 %v2232_v10  ;;  %v2217_v43 = vsel %vm1454_vm3, %v2153_v45, %v9648_v47  ;;  %3858 = vmatpush1.msra.mxu0 %v828_v1  ;;  %v9686_v10 = vld [vmem:[%s12676_s0 + $0x50] sm:$0xff]  ;;  %v13022_v45 = vld [vmem:[#allocation19_spill] sm:$0xff]  ;;  %v13023_v1 = vld [vmem:[#allocation136_spill] sm:$0xff]  ;;  %v2458_v44 = vsel %vm1217_vm5, %v9380_v62, %v2437_v55 }
 0x42d   :  { %3920 = vmatprep.subr.mxu1 %v2217_v43  ;;  %3859 = vmatprep.subr.mxu0 %v813_v42  ;;  %v407_v20 = vsel %vm405_vm7, %v13022_v45, %v13021_v57  ;;  %v1844_v43 = vmul.f32 %v13023_v1, %v1773_v0  ;;  %v406_v3 = vsel %vm405_vm7, %v13024_v63, %v13022_v45  ;;  %v13025_v0 = vld [vmem:[#allocation123_spill] sm:$0xff]  ;;  %v13031_v1 = vld [vmem:[#allocation13_spill] sm:$0xff] }
 0x42e   :  { %3408 = vrot.lane.b32.xlu0 %v3315_v40, %s7818_s9  ;;  %3860 = vmatpush1.msra.mxu0 %v812_v58  ;;  %v2896_v40 = vmul.f32 %v9686_v10, %v2863_v59  ;;  %v2508_v58 = vmul.f32 %v9597_v41, %v2458_v44 }
 0x42f   :  { %2972 = vrot.lane.b32.xlu1 %v2895_v11, %s7819_s18  ;;  %v9677_v54 = vpop.permute.xlu0 %2438  ;;  %v2845_v27 = vpop.permute.xlu1 %2844  ;;  %3861 = vmatprep.subr.mxu0 %v423_v36  ;;  %v3297_v11 = vmul.f32 %v9420_v46, %v3264_v16  ;;  %v3298_v16 = vmul.f32 %v9432_v53, %v3265_v21  ;;  %v13027_v53 = vld [vmem:[#allocation109_spill] sm:$0xff]  ;;  %v13028_v21 = vld [vmem:[#allocation108_spill] sm:$0xff] }
 0x430   :  { %3921 = vmatpush1.msra.mxu1 %v2216_v52  ;;  %3862 = vmatpush1.msra.mxu0 %v422_v56  ;;  %v2459_v62 = vsel %vm1217_vm5, %v2437_v55, %v9677_v54  ;;  %v2864_v39 = vsel %vm811_vm4, %v9576_v23, %v2845_v27  ;;  %v1627_v36 = vsel %vm1623_vm6, %v13028_v21, %v13027_v53  ;;  %v13029_v23 = vld [vmem:[#allocation95_spill] sm:$0xff]  ;;  %v13030_v56 = vld [vmem:[#allocation94_spill] sm:$0xff] }
 0x431   :  { %3922 = vmatprep.subr.mxu1 %v1861_v4  ;;  %3863 = vmatprep.subr.mxu0 %v407_v20  ;;  %v13026_v4 = vld [vmem:[#allocation122_spill] sm:$0xff]  ;;  %v2509_v55 = vmul.f32 %v9620_v35, %v2459_v62 }
 0x432   :  { %3923 = vmatpush1.msra.mxu1 %v1860_v31  ;;  %3864 = vmatpush1.msra.mxu0 %v406_v3  ;;  %v1643_v2 = vsel %vm1623_vm6, %v13026_v4, %v13025_v0  ;;  %v1642_v31 = vsel %vm1623_vm6, %v9069_v19, %v13026_v4  ;;  %v1626_v19 = vsel %vm1623_vm6, %v8984_v15, %v13028_v21  ;;  %v9758_v4 = vld [vmem:[%s12676_s0 + $0xe0] sm:$0xff] }
 0x433   :  { %2974 = vrot.lane.b32.xlu0 %v2896_v40, %s7819_s18  ;;  %v9700_v59 = vpop.permute.xlu0 %2846  ;;  %v9702_v42 = vpop.permute.xlu1 %2440  ;;  %3372 = vrot.lane.b32.xlu1 %v3297_v11, %s7818_s9  ;;  %v9734_v40 = vld [vmem:[%s12676_s0 + $0xd8] sm:$0xff]  ;;  %v1236_v15 = vsel %vm1217_vm5, %v8745_v30, %v13030_v56 }
 0x434   :  { %3924 = vmatprep.subr.mxu1 %v1845_v51  ;;  %v1237_v51 = vsel %vm1217_vm5, %v13030_v56, %v13029_v23  ;;  %v2914_v45 = vmul.f32 %v9734_v40, %v2864_v39  ;;  %v2865_v20 = vsel %vm811_vm4, %v2845_v27, %v9700_v59 }
 0x435   :  { %3925 = vmatpush1.msra.mxu1 %v1844_v43  ;;  %v13032_v43 = vld [vmem:[#allocation12_spill] sm:$0xff] }
 0x436   :  { %3926 = vmatprep.subr.mxu1 %v1643_v2  ;;  %v1221_v11 = vsel %vm1217_vm5, %v13032_v43, %v13031_v1  ;;  %v1220_v27 = vsel %vm1217_vm5, %v8711_v9, %v13032_v43  ;;  %v2915_v2 = vmul.f32 %v9758_v4, %v2865_v20  ;;  %v2491_v9 = vmul.f32 %v9659_v34, %v2458_v44  ;;  %v13038_v43 = vld [vmem:[#allocation34_spill] sm:$0xff] }
 0x437   :  { %3927 = vmatpush1.msra.mxu1 %v1642_v31  ;;  %3374 = vrot.lane.b32.xlu0 %v3298_v16, %s7818_s9  ;;  %v9721_v52 = vpop.permute.xlu0 %2442  ;;  %v3395_v48 = vpop.permute.xlu1 %3394  ;;  %v13034_v31 = vld [vmem:[#allocation68_spill] sm:$0xff] }
 0x438   :  { %3928 = vmatprep.subr.mxu1 %v1627_v36  ;;  %2602 = vrot.lane.b32.xlu1 %v2508_v58, %s7822_s15  ;;  %v13033_v58 = vld [vmem:[#allocation69_spill] sm:$0xff]  ;;  %v830_v36 = vsel %vm811_vm4, %v13012_v24, %v13034_v31 }
 0x439   :  { %3929 = vmatpush1.msra.mxu1 %v1626_v19  ;;  %v831_v21 = vsel %vm811_vm4, %v13034_v31, %v13033_v58  ;;  %v13036_v19 = vld [vmem:[#allocation51_spill] sm:$0xff] }
 0x43a   :  { %3930 = vmatprep.subr.mxu1 %v1237_v51  ;;  %v814_v44 = vsel %vm811_vm4, %v13015_v38, %v13036_v19  ;;  %v424_v38 = vsel %vm405_vm7, %v13018_v37, %v13038_v43 }
 0x43b   :  { %3931 = vmatpush1.msra.mxu1 %v1236_v15  ;;  %2604 = vrot.lane.b32.xlu0 %v2509_v55, %s7822_s15  ;;  %v9746_v63 = vpop.permute.xlu0 %3396  ;;  %v3393_v3 = vpop.permute.xlu1 %3392  ;;  %v13037_v15 = vld [vmem:[#allocation37_spill] sm:$0xff] }
 0x43c   :  { %3932 = vmatprep.subr.mxu1 %v1221_v11  ;;  %3010 = vrot.lane.b32.xlu1 %v2914_v45, %s7819_s18  ;;  %v3443_v30 = vsel %vm236_vm0, %v3395_v48, %v9746_v63  ;;  %v3442_v16 = vsel %vm236_vm0, %v3393_v3, %v3395_v48  ;;  %v13035_v48 = vld [vmem:[#allocation52_spill] sm:$0xff]  ;;  %v2492_v45 = vmul.f32 %v9686_v10, %v2459_v62  ;;  %v9787_v3 = vld [vmem:[%s12676_s0 + $0x58] sm:$0xff] }
 0x43d   :  { %3933 = vmatpush1.msra.mxu1 %v1220_v27  ;;  %3893 = vmatprep.subr.mxu0 %v3443_v30  ;;  %v815_v55 = vsel %vm811_vm4, %v13036_v19, %v13035_v48  ;;  %v425_v11 = vsel %vm405_vm7, %v13038_v43, %v13037_v15  ;;  %v2897_v27 = vmul.f32 %v9787_v3, %v2864_v39  ;;  %v13039_v62 = vld [vmem:[#allocation20_spill] sm:$0xff]  ;;  %v13040_v30 = vld [vmem:[#allocation21_spill] sm:$0xff] }
 0x43e   :  { %3934 = vmatprep.subr.mxu1 %v831_v21  ;;  %3894 = vmatpush2.msra.mxu0 %v3442_v16  ;;  %v409_v16 = vsel %vm405_vm7, %v13040_v30, %v13039_v62  ;;  %v9800_v21 = vld [vmem:[%s12677_s2] sm:$0xff]  ;;  %v408_v37 = vsel %vm405_vm7, %v13021_v57, %v13040_v30  ;;  %v3217_v39 = vrot.slane %v9258_v12, %v7893_v13  ;;  %v13041_v57 = vld [vmem:[#allocation137_spill] sm:$0xff] }
 0x43f   :  { %3935 = vmatpush1.msra.mxu1 %v830_v36  ;;  %3012 = vrot.lane.b32.xlu0 %v2915_v2, %s7819_s18  ;;  %v3361_v56 = vpop.permute.xlu0 %3360  ;;  %v9772_v51 = vpop.permute.xlu1 %3362  ;;  %v9812_v36 = vld [vmem:[%s12677_s2 + $0x18] sm:$0xff]  ;;  %v9817_v19 = vld [vmem:[%s12676_s0 + $0x60] sm:$0xff]  ;;  %v2460_v30 = vsel %vm1217_vm5, %v9677_v54, %v9702_v42 }
 0x440   :  { %3936 = vmatprep.subr.mxu1 %v815_v55  ;;  %2568 = vrot.lane.b32.xlu1 %v2491_v9, %s7822_s15  ;;  %v3427_v24 = vsel %vm236_vm0, %v3361_v56, %v9772_v51  ;;  %v2898_v55 = vmul.f32 %v9817_v19, %v2865_v20 }
 0x441   :  { %3937 = vmatpush1.msra.mxu1 %v814_v44  ;;  %3895 = vmatprep.subr.mxu0 %v3427_v24 }
 0x442   :  { %3938 = vmatprep.subr.mxu1 %v425_v11 }
 0x443   :  { %3939 = vmatpush1.msra.mxu1 %v424_v38  ;;  %2570 = vrot.lane.b32.xlu0 %v2492_v45, %s7822_s15  ;;  %v3359_v2 = vpop.permute.xlu0 %3358  ;;  %v2999_v31 = vpop.permute.xlu1 %2998  ;;  %v3221_v45 = vrot.slane %v9258_v12, %v7903_v18 }
 0x444   :  { %3940 = vmatprep.subr.mxu1 %v409_v16  ;;  %2976 = vrot.lane.b32.xlu1 %v2897_v27, %s7819_s18  ;;  %v3426_v9 = vsel %vm236_vm0, %v3359_v2, %v3361_v56  ;;  %v2054_v56 = vsel %vm1623_vm6, %v9260_v28, %v13041_v57  ;;  %v9837_v28 = vld [vmem:[%s12677_s2 + $0x10] sm:$0xff]  ;;  %v3042_v43 = vsel %vm642_vm1, %v9458_v32, %v2999_v31 }
 0x445   :  { %3941 = vmatpush1.msra.mxu1 %v408_v37  ;;  %3896 = vmatpush2.msra.mxu0 %v3426_v9  ;;  %v2104_v11 = vmul.f32 %v9597_v41, %v2054_v56  ;;  %v13042_v27 = vld [vmem:[#allocation138_spill] sm:$0xff]  ;;  %v2461_v9 = vsel %vm1217_vm5, %v9702_v42, %v9721_v52 }
 0x446   :  { %3898 = vmatmul.mubr.f32.vlgmr.msra.gmra.mxu0 %v9800_v21  ;;  %v2055_v38 = vsel %vm1623_vm6, %v13041_v57, %v13042_v27 }
 0x447   :  { %2978 = vrot.lane.b32.xlu0 %v2898_v55, %s7819_s18  ;;  %v9825_v44 = vpop.permute.xlu0 %3000  ;;  %v3399_v24 = vpop.permute.xlu1 %3398  ;;  %7698 = vmatprep.mubr.msk.f32.mxu0 %vm3826_vm8, %v9812_v36  ;;  %v2105_v37 = vmul.f32 %v9620_v35, %v2055_v38 }
 0x448   :  { %3252 = vrot.lane.b32.xlu1 %v3217_v39, %s7820_s23  ;;  %v3043_v20 = vsel %vm642_vm1, %v2999_v31, %v9825_v44  ;;  %v13043_v31 = vld [vmem:[#allocation142_spill] sm:$0xff]  ;;  %v3444_v54 = vsel %vm236_vm0, %v9746_v63, %v3399_v24  ;;  %v2510_v39 = vmul.f32 %v9734_v40, %v2460_v30 }
 0x449   :  { %3987 = vmatprep.subr.mxu0 %v3043_v20  ;;  %v2511_v20 = vmul.f32 %v9758_v4, %v2461_v9 }
 0x44a   :  { %3988 = vmatpush1.msra.mxu0 %v3042_v43 }
 0x44b   :  { %3254 = vrot.lane.b32.xlu0 %v3221_v45, %s7820_s23  ;;  %v9849_v16 = vpop.permute.xlu0 %3400  ;;  %v2965_v2 = vpop.permute.xlu1 %2964  ;;  %3904 = vmatmul.mubr.f32.gmra.mxu0 %v9837_v28 }
 0x44c   :  { %2198 = vrot.lane.b32.xlu1 %v2104_v11, %s7824_s27  ;;  %v3445_v32 = vsel %vm236_vm0, %v3399_v24, %v9849_v16  ;;  %7701 = vmatprep.mubr.msk.f32.mxu0 %vm3826_vm8, %v13043_v31  ;;  %v3026_v63 = vsel %vm642_vm1, %v9479_v61, %v2965_v2  ;;  %v2087_v24 = vmul.f32 %v9659_v34, %v2054_v56 }
 0x44d   :  { %3970 = vmatprep.subr.mxu1 %v3445_v32  ;;  %v2088_v32 = vmul.f32 %v9686_v10, %v2055_v38  ;;  %v2493_v61 = vmul.f32 %v9787_v3, %v2460_v30 }
 0x44e   :  { %3971 = vmatpush2.msra.mxu1 %v3444_v54  ;;  %v3225_v54 = vrot.slane %v9258_v12, %v7901_v17 }
 0x44f   :  { %2200 = vrot.lane.b32.xlu0 %v2105_v37, %s7824_s27  ;;  %v9865_v55 = vpop.permute.xlu0 %2966  ;;  %v3365_v57 = vpop.permute.xlu1 %3364 }
 0x450   :  { %2606 = vrot.lane.b32.xlu1 %v2510_v39, %s7822_s15  ;;  %v3027_v45 = vsel %vm642_vm1, %v2965_v2, %v9865_v55  ;;  %v3428_v37 = vsel %vm236_vm0, %v9772_v51, %v3365_v57  ;;  %v2494_v51 = vmul.f32 %v9817_v19, %v2461_v9  ;;  %v13044_v39 = vld [vmem:[#allocation139_spill] sm:$0xff] }
 0x451   :  { %3989 = vmatprep.subr.mxu0 %v3027_v45  ;;  %v13045_v45 = vld [vmem:[#allocation140_spill] sm:$0xff] }
 0x452   :  { %3990 = vmatpush1.msra.mxu0 %v3026_v63  ;;  %v2057_v12 = vsel %vm1623_vm6, %v13044_v39, %v13045_v45 }
 0x453   :  { %2608 = vrot.lane.b32.xlu0 %v2511_v20, %s7822_s15  ;;  %v9875_v42 = vpop.permute.xlu0 %3366  ;;  %v2595_v43 = vpop.permute.xlu1 %2594 }
 0x454   :  { %2164 = vrot.lane.b32.xlu1 %v2087_v24, %s7824_s27  ;;  %v3429_v11 = vsel %vm236_vm0, %v3365_v57, %v9875_v42  ;;  %v2638_v30 = vsel %vm1048_vm2, %v9519_v49, %v2595_v43  ;;  %v2056_v57 = vsel %vm1623_vm6, %v13042_v27, %v13044_v39  ;;  %v2107_v24 = vmul.f32 %v9758_v4, %v2057_v12 }
 0x455   :  { %3972 = vmatprep.subr.mxu1 %v3429_v11  ;;  %v2106_v27 = vmul.f32 %v9734_v40, %v2056_v57 }
 0x456   :  { %3973 = vmatpush2.msra.mxu1 %v3428_v37 }
 0x457   :  { %2166 = vrot.lane.b32.xlu0 %v2088_v32, %s7824_s27  ;;  %v9885_v56 = vpop.permute.xlu0 %2596  ;;  %v3003_v2 = vpop.permute.xlu1 %3002  ;;  %3975 = vmatmul.mubr.f32.vlgmr.msra.gmra.mxu1 %v9800_v21 }
 0x458   :  { %2572 = vrot.lane.b32.xlu1 %v2493_v61, %s7822_s15  ;;  %v2639_v38 = vsel %vm1048_vm2, %v2595_v43, %v9885_v56  ;;  %7700 = vmatprep.mubr.msk.f32.mxu1 %vm3826_vm8, %v9812_v36  ;;  %v3044_v9 = vsel %vm642_vm1, %v9825_v44, %v3003_v2  ;;  %v2090_v44 = vmul.f32 %v9817_v19, %v2057_v12 }
 0x459   :  { %3991 = vmatprep.subr.mxu0 %v2639_v38 }
 0x45a   :  { %3992 = vmatpush1.msra.mxu0 %v2638_v30 }
 0x45b   :  { %2574 = vrot.lane.b32.xlu0 %v2494_v51, %s7822_s15  ;;  %v9905_v20 = vpop.permute.xlu0 %3004  ;;  %v2561_v63 = vpop.permute.xlu1 %2560  ;;  %3981 = vmatmul.mubr.f32.gmra.mxu1 %v9837_v28 }
 0x45c   :  { %3256 = vrot.lane.b32.xlu1 %v3225_v54, %s7820_s23  ;;  %v3045_v49 = vsel %vm642_vm1, %v3003_v2, %v9905_v20  ;;  %7703 = vmatprep.mubr.msk.f32.mxu1 %vm3826_vm8, %v13043_v31  ;;  %v2089_v31 = vmul.f32 %v9787_v3, %v2056_v57  ;;  %v2622_v37 = vsel %vm1048_vm2, %v9549_v33, %v2561_v63 }
 0x45d   :  { %4064 = vmatprep.subr.mxu1 %v3045_v49 }
 0x45e   :  { %4065 = vmatpush1.msra.mxu1 %v3044_v9 }
 0x45f   :  { %2202 = vrot.lane.b32.xlu0 %v2106_v27, %s7824_s27  ;;  %v9918_v43 = vpop.permute.xlu0 %2562  ;;  %v2969_v11 = vpop.permute.xlu1 %2968 }
 0x460   :  { %2204 = vrot.lane.b32.xlu1 %v2107_v24, %s7824_s27  ;;  %v2623_v32 = vsel %vm1048_vm2, %v2561_v63, %v9918_v43  ;;  %v3028_v33 = vsel %vm642_vm1, %v9865_v55, %v2969_v11  ;;  %v1785_v24 = vrot.slane %v9539_v26, %v7893_v13 }
 0x461   :  { %3993 = vmatprep.subr.mxu0 %v2623_v32  ;;  %v1781_v32 = vrot.slane %v9539_v26, %v7895_v14 }
 0x462   :  { %3994 = vmatpush1.msra.mxu0 %v2622_v37  ;;  %v1863_v37 = vmul.f32 %v9337_v50, %v1785_v24 }
 0x463   :  { %2168 = vrot.lane.b32.xlu0 %v2089_v31, %s7824_s27  ;;  %v9928_v61 = vpop.permute.xlu0 %2970  ;;  %v3245_v2 = vpop.permute.xlu1 %3244 }
 0x464   :  { %2170 = vrot.lane.b32.xlu1 %v2090_v44, %s7824_s27  ;;  %v3266_v54 = vsel %vm405_vm7, %v9588_v25, %v3245_v2  ;;  %v3029_v38 = vsel %vm642_vm1, %v2969_v11, %v9928_v61 }
 0x465   :  { %v3316_v51 = vmul.f32 %v9597_v41, %v3266_v54  ;;  %4066 = vmatprep.subr.mxu1 %v3029_v38  ;;  %v3299_v12 = vmul.f32 %v9659_v34, %v3266_v54 }
 0x466   :  { %4067 = vmatpush1.msra.mxu1 %v3028_v33 }
 0x467   :  { %v3247_v30 = vpop.permute.xlu0 %3246  ;;  %3410 = vrot.lane.b32.xlu0 %v3316_v51, %s7818_s9  ;;  %v2191_v39 = vpop.permute.xlu1 %2190  ;;  %v7798_v51 = vld [vmem:[%s12676_s0 + $0x20] sm:$0xff] }
 0x468   :  { %v3267_v57 = vsel %vm405_vm7, %v3245_v2, %v3247_v30  ;;  %v2234_v27 = vsel %vm1454_vm3, %v9615_v22, %v2191_v39  ;;  %v7797_v2 = vld [vmem:[%s12676_s0 + $0xa0] sm:$0xff]  ;;  %v1846_v50 = vmul.f32 %v7798_v51, %v1781_v32 }
 0x469   :  { %v3317_v25 = vmul.f32 %v9620_v35, %v3267_v57  ;;  %v3300_v49 = vmul.f32 %v9686_v10, %v3267_v57  ;;  %v1862_v54 = vmul.f32 %v7797_v2, %v1781_v32  ;;  %v13049_v32 = vld [vmem:[#allocation110_spill] sm:$0xff]  ;;  %v13051_v2 = vld [vmem:[#allocation96_spill] sm:$0xff] }
 0x46a   :  { %v1238_v51 = vsel %vm1217_vm5, %v13029_v23, %v13051_v2  ;;  %v10037_v23 = vld [vmem:[%s12676_s0 + $0x68] sm:$0xff] }
 0x46b   :  { %v9942_v63 = vpop.permute.xlu0 %2192  ;;  %3412 = vrot.lane.b32.xlu1 %v3317_v25, %s7818_s9  ;;  %3376 = vrot.lane.b32.xlu0 %v3299_v12, %s7818_s9  ;;  %v2599_v41 = vpop.permute.xlu1 %2598 }
 0x46c   :  { %v2235_v55 = vsel %vm1454_vm3, %v2191_v39, %v9942_v63  ;;  %v2640_v10 = vsel %vm1048_vm2, %v9885_v56, %v2599_v41  ;;  %v1847_v56 = vmul.f32 %v9361_v29, %v1785_v24  ;;  %v9985_v29 = vld [vmem:[%s12676_s0 + $0xe8] sm:$0xff] }
 0x46d   :  { %3995 = vmatprep.subr.mxu0 %v2235_v55 }
 0x46e   :  { %3996 = vmatpush1.msra.mxu0 %v2234_v27 }
 0x46f   :  { %v9951_v9 = vpop.permute.xlu0 %2600  ;;  %3378 = vrot.lane.b32.xlu1 %v3300_v49, %s7818_s9  ;;  %v2157_v35 = vpop.permute.xlu1 %2156 }
 0x470   :  { %v2641_v11 = vsel %vm1048_vm2, %v2599_v41, %v9951_v9  ;;  %v2218_v38 = vsel %vm1454_vm3, %v9648_v47, %v2157_v35  ;;  %v13046_v41 = vld [vmem:[#allocation125_spill] sm:$0xff] }
 0x471   :  { %4068 = vmatprep.subr.mxu1 %v2641_v11  ;;  %v13048_v11 = vld [vmem:[#allocation111_spill] sm:$0xff] }
 0x472   :  { %4069 = vmatpush1.msra.mxu1 %v2640_v10  ;;  %v1629_v10 = vsel %vm1623_vm6, %v13049_v32, %v13048_v11 }
 0x473   :  { %v9962_v22 = vpop.permute.xlu0 %2158  ;;  %v2565_v31 = vpop.permute.xlu1 %2564 }
 0x474   :  { %v2219_v44 = vsel %vm1454_vm3, %v2157_v35, %v9962_v22  ;;  %v2624_v25 = vsel %vm1048_vm2, %v9918_v43, %v2565_v31 }
 0x475   :  { %3997 = vmatprep.subr.mxu0 %v2219_v44 }
 0x476   :  { %3998 = vmatpush1.msra.mxu0 %v2218_v38 }
 0x477   :  { %v9976_v33 = vpop.permute.xlu0 %2566  ;;  %3999 = vmatprep.subr.mxu0 %v1863_v37  ;;  %v2849_v39 = vpop.permute.xlu1 %2848 }
 0x478   :  { %v2866_v57 = vsel %vm811_vm4, %v9700_v59, %v2849_v39  ;;  %4000 = vmatpush1.msra.mxu0 %v1862_v54  ;;  %v2625_v12 = vsel %vm1048_vm2, %v2565_v31, %v9976_v33  ;;  %v13047_v59 = vld [vmem:[#allocation124_spill] sm:$0xff]  ;;  %v10008_v31 = vld [vmem:[%s12676_s0 + $0xf0] sm:$0xff] }
 0x479   :  { %v2916_v47 = vmul.f32 %v9985_v29, %v2866_v57  ;;  %4001 = vmatprep.subr.mxu0 %v1847_v56  ;;  %4070 = vmatprep.subr.mxu1 %v2625_v12  ;;  %v1645_v55 = vsel %vm1623_vm6, %v13047_v59, %v13046_v41  ;;  %v1644_v35 = vsel %vm1623_vm6, %v13025_v0, %v13047_v59 }
 0x47a   :  { %4002 = vmatpush1.msra.mxu0 %v1846_v50  ;;  %4071 = vmatpush1.msra.mxu1 %v2624_v25  ;;  %v1628_v0 = vsel %vm1623_vm6, %v13027_v53, %v13049_v32  ;;  %v13052_v53 = vld [vmem:[#allocation83_spill] sm:$0xff]  ;;  %v2899_v59 = vmul.f32 %v10037_v23, %v2866_v57  ;;  %v1789_v57 = vrot.slane %v9539_v26, %v7903_v18 }
 0x47b   :  { %v9993_v49 = vpop.permute.xlu0 %2850  ;;  %4003 = vmatprep.subr.mxu0 %v1645_v55  ;;  %3014 = vrot.lane.b32.xlu0 %v2916_v47, %s7819_s18  ;;  %v3249_v27 = vpop.permute.xlu1 %3248  ;;  %v13054_v55 = vld [vmem:[#allocation71_spill] sm:$0xff] }
 0x47c   :  { %v2867_v24 = vsel %vm811_vm4, %v2849_v39, %v9993_v49  ;;  %v3268_v43 = vsel %vm405_vm7, %v3247_v30, %v3249_v27  ;;  %4004 = vmatpush1.msra.mxu0 %v1644_v35  ;;  %v13050_v30 = vld [vmem:[#allocation97_spill] sm:$0xff]  ;;  %v13053_v39 = vld [vmem:[#allocation82_spill] sm:$0xff] }
 0x47d   :  { %v2917_v37 = vmul.f32 %v10008_v31, %v2867_v24  ;;  %v3318_v44 = vmul.f32 %v9734_v40, %v3268_v43  ;;  %4005 = vmatprep.subr.mxu0 %v1629_v10  ;;  %v1239_v54 = vsel %vm1217_vm5, %v13051_v2, %v13050_v30  ;;  %v1223_v12 = vsel %vm1217_vm5, %v13053_v39, %v13052_v53 }
 0x47e   :  { %4006 = vmatpush1.msra.mxu0 %v1628_v0  ;;  %v1222_v25 = vsel %vm1217_vm5, %v13031_v1, %v13053_v39  ;;  %v1793_v10 = vrot.slane %v9539_v26, %v7901_v17  ;;  %v10065_v39 = vld [vmem:[%s12676_s0 + $0x70] sm:$0xff] }
 0x47f   :  { %v10018_v38 = vpop.permute.xlu0 %3250  ;;  %4007 = vmatprep.subr.mxu0 %v1239_v54  ;;  %3016 = vrot.lane.b32.xlu1 %v2917_v37, %s7819_s18  ;;  %v2195_v56 = vpop.permute.xlu1 %2194  ;;  %v13056_v37 = vld [vmem:[#allocation54_spill] sm:$0xff]  ;;  %v2900_v26 = vmul.f32 %v10065_v39, %v2867_v24 }
 0x480   :  { %v3269_v50 = vsel %vm405_vm7, %v3249_v27, %v10018_v38  ;;  %3414 = vrot.lane.b32.xlu0 %v3318_v44, %s7818_s9  ;;  %4008 = vmatpush1.msra.mxu0 %v1238_v51  ;;  %v13055_v27 = vld [vmem:[#allocation70_spill] sm:$0xff]  ;;  %v13057_v44 = vld [vmem:[#allocation53_spill] sm:$0xff]  ;;  %v13059_v51 = vld [vmem:[#allocation23_spill] sm:$0xff] }
 0x481   :  { %v3319_v47 = vmul.f32 %v9758_v4, %v3269_v50  ;;  %4009 = vmatprep.subr.mxu0 %v1223_v12  ;;  %v833_v35 = vsel %vm811_vm4, %v13055_v27, %v13054_v55  ;;  %v832_v1 = vsel %vm811_vm4, %v13033_v58, %v13055_v27  ;;  %v817_v0 = vsel %vm811_vm4, %v13057_v44, %v13056_v37  ;;  %v13058_v54 = vld [vmem:[#allocation22_spill] sm:$0xff]  ;;  %v13061_v27 = vld [vmem:[#allocation36_spill] sm:$0xff] }
 0x482   :  { %4010 = vmatpush1.msra.mxu0 %v1222_v25  ;;  %v411_v58 = vsel %vm405_vm7, %v13059_v51, %v13058_v54  ;;  %v816_v12 = vsel %vm811_vm4, %v13035_v48, %v13057_v44  ;;  %v3301_v25 = vmul.f32 %v9787_v3, %v3268_v43  ;;  %v410_v24 = vsel %vm405_vm7, %v13039_v62, %v13059_v51 }
 0x483   :  { %v10043_v32 = vpop.permute.xlu0 %2196  ;;  %4011 = vmatprep.subr.mxu0 %v833_v35  ;;  %3416 = vrot.lane.b32.xlu1 %v3319_v47, %s7818_s9  ;;  %v2161_v4 = vpop.permute.xlu1 %2160  ;;  %v2236_v47 = vsel %vm1454_vm3, %v9942_v63, %v2195_v56  ;;  %v426_v63 = vsel %vm405_vm7, %v13037_v15, %v13061_v27  ;;  %v1865_v43 = vmul.f32 %v9396_v60, %v1793_v10 }
 0x484   :  { %2980 = vrot.lane.b32.xlu0 %v2899_v59, %s7819_s18  ;;  %4012 = vmatpush1.msra.mxu0 %v832_v1  ;;  %v2237_v2 = vsel %vm1454_vm3, %v2195_v56, %v10043_v32  ;;  %v13060_v59 = vld [vmem:[#allocation39_spill] sm:$0xff]  ;;  %v7803_v56 = vld [vmem:[%s12676_s0 + $0xb0] sm:$0xff]  ;;  %v3302_v15 = vmul.f32 %v9817_v19, %v3269_v50  ;;  %v2220_v51 = vsel %vm1454_vm3, %v9962_v22, %v2161_v4 }
 0x485   :  { %4013 = vmatprep.subr.mxu0 %v817_v0  ;;  %4072 = vmatprep.subr.mxu1 %v2237_v2  ;;  %v427_v35 = vsel %vm405_vm7, %v13061_v27, %v13060_v59  ;;  %v1864_v44 = vmul.f32 %v7803_v56, %v1789_v57  ;;  %v1849_v2 = vmul.f32 %v9420_v46, %v1793_v10 }
 0x486   :  { %4014 = vmatpush1.msra.mxu0 %v816_v12  ;;  %4073 = vmatpush1.msra.mxu1 %v2236_v47 }
 0x487   :  { %v10080_v1 = vpop.permute.xlu0 %2162  ;;  %4015 = vmatprep.subr.mxu0 %v427_v35  ;;  %2982 = vrot.lane.b32.xlu1 %v2900_v26, %s7819_s18  ;;  %v2445_v48 = vpop.permute.xlu1 %2444  ;;  %v13064_v35 = vld [vmem:[#allocation113_spill] sm:$0xff] }
 0x488   :  { %3380 = vrot.lane.b32.xlu0 %v3301_v25, %s7818_s9  ;;  %v2462_v62 = vsel %vm1217_vm5, %v9721_v52, %v2445_v48  ;;  %4016 = vmatpush1.msra.mxu0 %v426_v63  ;;  %v2221_v0 = vsel %vm1454_vm3, %v2161_v4, %v10080_v1  ;;  %v7804_v52 = vld [vmem:[%s12676_s0 + $0x30] sm:$0xff]  ;;  %v10115_v4 = vld [vmem:[%s12676_s0 + $0xf8] sm:$0xff] }
 0x489   :  { %v2512_v60 = vmul.f32 %v9985_v29, %v2462_v62  ;;  %4017 = vmatprep.subr.mxu0 %v411_v58  ;;  %4074 = vmatprep.subr.mxu1 %v2221_v0  ;;  %v1848_v26 = vmul.f32 %v7804_v52, %v1789_v57  ;;  %v13062_v57 = vld [vmem:[#allocation127_spill] sm:$0xff]  ;;  %v13063_v58 = vld [vmem:[#allocation126_spill] sm:$0xff]  ;;  %v2495_v56 = vmul.f32 %v10037_v23, %v2462_v62  ;;  %v13069_v62 = vld [vmem:[#allocation84_spill] sm:$0xff] }
 0x48a   :  { %4018 = vmatpush1.msra.mxu0 %v410_v24  ;;  %4075 = vmatpush1.msra.mxu1 %v2220_v51  ;;  %v1647_v47 = vsel %vm1623_vm6, %v13063_v58, %v13062_v57  ;;  %v1646_v27 = vsel %vm1623_vm6, %v13046_v41, %v13063_v58  ;;  %v13065_v24 = vld [vmem:[#allocation112_spill] sm:$0xff]  ;;  %v13067_v0 = vld [vmem:[#allocation98_spill] sm:$0xff]  ;;  %v10160_v58 = vld [vmem:[%s12676_s0 + $0x78] sm:$0xff] }
 0x48b   :  { %v10103_v12 = vpop.permute.xlu0 %2446  ;;  %3382 = vrot.lane.b32.xlu1 %v3302_v15, %s7818_s9  ;;  %4076 = vmatprep.subr.mxu1 %v1865_v43  ;;  %v2853_v46 = vpop.permute.xlu1 %2852  ;;  %v1630_v43 = vsel %vm1623_vm6, %v13048_v11, %v13065_v24  ;;  %v13068_v11 = vld [vmem:[#allocation85_spill] sm:$0xff] }
 0x48c   :  { %v2463_v19 = vsel %vm1217_vm5, %v2445_v48, %v10103_v12  ;;  %2610 = vrot.lane.b32.xlu0 %v2512_v60, %s7822_s15  ;;  %v2868_v22 = vsel %vm811_vm4, %v9993_v49, %v2853_v46  ;;  %4077 = vmatpush1.msra.mxu1 %v1864_v44  ;;  %v1631_v48 = vsel %vm1623_vm6, %v13065_v24, %v13064_v35  ;;  %v2902_v63 = vmul.f32 0.0, %v2853_v46  ;;  %v13066_v44 = vld [vmem:[#allocation99_spill] sm:$0xff]  ;;  %v13070_v46 = vld [vmem:[#allocation73_spill] sm:$0xff] }
 0x48d   :  { %v2513_v50 = vmul.f32 %v10008_v31, %v2463_v19  ;;  %v2918_v10 = vmul.f32 %v10115_v4, %v2868_v22  ;;  %4078 = vmatprep.subr.mxu1 %v1849_v2  ;;  %v1241_v41 = vsel %vm1217_vm5, %v13067_v0, %v13066_v44  ;;  %v1240_v2 = vsel %vm1217_vm5, %v13050_v30, %v13067_v0  ;;  %v13071_v30 = vld [vmem:[#allocation72_spill] sm:$0xff] }
 0x48e   :  { %4079 = vmatpush1.msra.mxu1 %v1848_v26  ;;  %v1225_v51 = vsel %vm1217_vm5, %v13069_v62, %v13068_v11  ;;  %v1224_v26 = vsel %vm1217_vm5, %v13052_v53, %v13069_v62  ;;  %v13072_v53 = vld [vmem:[#allocation141_spill] sm:$0xff] }
 0x48f   :  { %v10121_v25 = vpop.permute.xlu0 %2448  ;;  %4080 = vmatprep.subr.mxu1 %v1647_v47  ;;  %2612 = vrot.lane.b32.xlu1 %v2513_v50, %s7822_s15  ;;  %v3403_v49 = vpop.permute.xlu1 %3402  ;;  %v835_v50 = vsel %vm811_vm4, %v13071_v30, %v13070_v46  ;;  %v2901_v47 = vmul.f32 %v10160_v58, %v2868_v22  ;;  %v2058_v24 = vsel %vm1623_vm6, %v13045_v45, %v13072_v53  ;;  %v13076_v62 = vld [vmem:[#allocation41_spill] sm:$0xff] }
 0x490   :  { %3018 = vrot.lane.b32.xlu0 %v2918_v10, %s7819_s18  ;;  %4081 = vmatpush1.msra.mxu1 %v1646_v27  ;;  %v2496_v10 = vmul.f32 %v10065_v39, %v2463_v19  ;;  %v3446_v27 = vsel %vm236_vm0, %v9849_v16, %v3403_v49  ;;  %v834_v19 = vsel %vm811_vm4, %v13054_v55, %v13071_v30  ;;  %v13078_v30 = vld [vmem:[#allocation24_spill] sm:$0xff] }
 0x491   :  { %4082 = vmatprep.subr.mxu1 %v1631_v48  ;;  %v2108_v55 = vmul.f32 %v9985_v29, %v2058_v24 }
 0x492   :  { %4083 = vmatpush1.msra.mxu1 %v1630_v43  ;;  %v13074_v43 = vld [vmem:[#allocation55_spill] sm:$0xff] }
 0x493   :  { %4084 = vmatprep.subr.mxu1 %v1241_v41  ;;  %3020 = vrot.lane.b32.xlu1 %v2902_v63, %s7819_s18  ;;  %v10142_v15 = vpop.permute.xlu0 %3404  ;;  %v818_v0 = vsel %vm811_vm4, %v13056_v37, %v13074_v43  ;;  %v13075_v41 = vld [vmem:[#allocation143_spill] sm:$0xff] }
 0x494   :  { %2576 = vrot.lane.b32.xlu0 %v2495_v56, %s7822_s15  ;;  %v3369_v60 = vpop.permute.xlu1 %3368  ;;  %4085 = vmatpush1.msra.mxu1 %v1240_v2  ;;  %v3447_v52 = vsel %vm236_vm0, %v3403_v49, %v10142_v15  ;;  %v13073_v49 = vld [vmem:[#allocation56_spill] sm:$0xff]  ;;  %v2059_v2 = vsel %vm1623_vm6, %v13072_v53, %v13075_v41 }
 0x495   :  { %4086 = vmatprep.subr.mxu1 %v1225_v51  ;;  %4047 = vmatprep.subr.mxu0 %v3447_v52  ;;  %v819_v56 = vsel %vm811_vm4, %v13074_v43, %v13073_v49  ;;  %v3430_v45 = vsel %vm236_vm0, %v9875_v42, %v3369_v60  ;;  %v13077_v51 = vld [vmem:[#allocation38_spill] sm:$0xff]  ;;  %v2464_v42 = vsel %vm1217_vm5, %v10103_v12, %v10121_v25  ;;  %v10232_v43 = vld [vmem:[%s12677_s2 + $0x8] sm:$0xff] }
 0x496   :  { %4087 = vmatpush1.msra.mxu1 %v1224_v26  ;;  %4048 = vmatpush2.msra.mxu0 %v3446_v27  ;;  %v429_v52 = vsel %vm405_vm7, %v13077_v51, %v13076_v62  ;;  %v428_v37 = vsel %vm405_vm7, %v13060_v59, %v13077_v51  ;;  %v2514_v59 = vmul.f32 %v10115_v4, %v2464_v42 }
 0x497   :  { %4088 = vmatprep.subr.mxu1 %v835_v50  ;;  %v10168_v48 = vpop.permute.xlu0 %3370  ;;  %2578 = vrot.lane.b32.xlu1 %v2496_v10, %s7822_s15  ;;  %v13079_v50 = vld [vmem:[#allocation25_spill] sm:$0xff] }
 0x498   :  { %2984 = vrot.lane.b32.xlu0 %v2901_v47, %s7819_s18  ;;  %v3007_v22 = vpop.permute.xlu1 %3006  ;;  %4089 = vmatpush1.msra.mxu1 %v834_v19  ;;  %v3431_v16 = vsel %vm236_vm0, %v3369_v60, %v10168_v48  ;;  %v413_v10 = vsel %vm405_vm7, %v13079_v50, %v13078_v30  ;;  %v2109_v47 = vmul.f32 %v10008_v31, %v2059_v2 }
 0x499   :  { %4049 = vmatprep.subr.mxu0 %v3431_v16  ;;  %4090 = vmatprep.subr.mxu1 %v819_v56  ;;  %v3046_v27 = vsel %vm642_vm1, %v9905_v20, %v3007_v22 }
 0x49a   :  { %4050 = vmatpush2.msra.mxu0 %v3430_v45  ;;  %4091 = vmatpush1.msra.mxu1 %v818_v0  ;;  %v2497_v45 = vmul.f32 %v10160_v58, %v2464_v42 }
 0x49b   :  { %4092 = vmatprep.subr.mxu1 %v429_v52  ;;  %2986 = vrot.lane.b32.xlu1 %v2902_v63, %s7819_s18  ;;  %v412_v63 = vsel %vm405_vm7, %v13058_v54, %v13079_v50  ;;  %v2498_v54 = vmul.f32 0.0, %v10121_v25 }
 0x49c   :  { %v10195_v60 = vpop.permute.xlu0 %3008  ;;  %2206 = vrot.lane.b32.xlu0 %v2108_v55, %s7824_s27  ;;  %4093 = vmatpush1.msra.mxu1 %v428_v37  ;;  %v13080_v55 = vld [vmem:[#allocation144_spill] sm:$0xff] }
 0x49d   :  { %v3407_v26 = vpop.permute.xlu1 %3406  ;;  %v3047_v12 = vsel %vm642_vm1, %v3007_v22, %v10195_v60  ;;  %4094 = vmatprep.subr.mxu1 %v413_v10  ;;  %4052 = vmatmul.mubr.f32.vlgmr.msra.gmra.mxu0 %v9800_v21  ;;  %v2091_v22 = vmul.f32 %v10037_v23, %v2058_v24  ;;  %v2060_v51 = vsel %vm1623_vm6, %v13075_v41, %v13080_v55 }
 0x49e   :  { %4141 = vmatprep.subr.mxu0 %v3047_v12  ;;  %4095 = vmatpush1.msra.mxu1 %v412_v63  ;;  %v3448_v20 = vsel %vm236_vm0, %v10142_v15, %v3407_v26  ;;  %v2092_v15 = vmul.f32 %v10065_v39, %v2059_v2  ;;  %v2110_v42 = vmul.f32 %v10115_v4, %v2060_v51 }
 0x49f   :  { %4142 = vmatpush1.msra.mxu0 %v3046_v27  ;;  %2208 = vrot.lane.b32.xlu1 %v2109_v47, %s7824_s27 }
 0x4a0   :  { %v10215_v53 = vpop.permute.xlu0 %3408  ;;  %2614 = vrot.lane.b32.xlu0 %v2514_v59, %s7822_s15  ;;  %7702 = vmatprep.mubr.msk.f32.mxu0 %vm3826_vm8, %v9812_v36 }
 0x4a1   :  { %v2973_v19 = vpop.permute.xlu1 %2972  ;;  %v3449_v16 = vsel %vm236_vm0, %v3407_v26, %v10215_v53  ;;  %4058 = vmatmul.mubr.f32.gmra.mxu0 %v9837_v28  ;;  %v2094_v26 = vmul.f32 0.0, %v13080_v55 }
 0x4a2   :  { %4124 = vmatprep.subr.mxu1 %v3449_v16  ;;  %7705 = vmatprep.mubr.msk.f32.mxu0 %vm3826_vm8, %v10232_v43  ;;  %v3030_v0 = vsel %vm642_vm1, %v9928_v61, %v2973_v19 }
 0x4a3   :  { %4125 = vmatpush2.msra.mxu1 %v3448_v20  ;;  %2616 = vrot.lane.b32.xlu1 %v2498_v54, %s7822_s15 }
 0x4a4   :  { %2172 = vrot.lane.b32.xlu0 %v2091_v22, %s7824_s27 }
 0x4a5   :  { %v2975_v25 = vpop.permute.xlu0 %2974  ;;  %v3373_v56 = vpop.permute.xlu1 %3372 }
 0x4a6   :  { %v3031_v24 = vsel %vm642_vm1, %v2973_v19, %v2975_v25  ;;  %v3432_v61 = vsel %vm236_vm0, %v10168_v48, %v3373_v56  ;;  %v2093_v48 = vmul.f32 %v10160_v58, %v2060_v51 }
 0x4a7   :  { %4143 = vmatprep.subr.mxu0 %v3031_v24  ;;  %2174 = vrot.lane.b32.xlu1 %v2092_v15, %s7824_s27  ;;  %v7679_v24 = vld [vmem:[%s12675_s1 + $0x44] ss:$8 sm:$0xf] }
 0x4a8   :  { %4144 = vmatpush1.msra.mxu0 %v3030_v0  ;;  %2580 = vrot.lane.b32.xlu0 %v2497_v45, %s7822_s15  ;;  %v7826_v0 = vmov 0  }
 0x4a9   :  { %v10246_v52 = vpop.permute.xlu0 %3374  ;;  %7765 = vset.pattern.permute.xlu0 %v7826_v0  ;;  %7766 = vset.pattern.permute.xlu1 %v7826_v0 }
 0x4aa   :  { %v2603_v2 = vpop.permute.xlu1 %2602  ;;  %v3433_v37 = vsel %vm236_vm0, %v3373_v56, %v10246_v52 }
 0x4ab   :  { %4126 = vmatprep.subr.mxu1 %v3433_v37  ;;  %2582 = vrot.lane.b32.xlu1 %v2498_v54, %s7822_s15  ;;  %v2642_v12 = vsel %vm1048_vm2, %v9951_v9, %v2603_v2 }
 0x4ac   :  { %4127 = vmatpush2.msra.mxu1 %v3432_v61  ;;  %2210 = vrot.lane.b32.xlu0 %v2110_v42, %s7824_s27 }
 0x4ad   :  { %v10255_v41 = vpop.permute.xlu0 %2604  ;;  %4129 = vmatmul.mubr.f32.vlgmr.msra.gmra.mxu1 %v9800_v21 }
 0x4ae   :  { %v3011_v50 = vpop.permute.xlu1 %3010  ;;  %v2643_v10 = vsel %vm1048_vm2, %v2603_v2, %v10255_v41  ;;  %7704 = vmatprep.mubr.msk.f32.mxu1 %vm3826_vm8, %v9812_v36 }
 0x4af   :  { %4145 = vmatprep.subr.mxu0 %v2643_v10  ;;  %2212 = vrot.lane.b32.xlu1 %v2094_v26, %s7824_s27  ;;  %v3048_v36 = vsel %vm642_vm1, %v10195_v60, %v3011_v50 }
 0x4b0   :  { %4146 = vmatpush1.msra.mxu0 %v2642_v12  ;;  %2176 = vrot.lane.b32.xlu0 %v2093_v48, %s7824_s27 }
 0x4b1   :  { %v10268_v47 = vpop.permute.xlu0 %3012  ;;  %4135 = vmatmul.mubr.f32.gmra.mxu1 %v9837_v28 }
 0x4b2   :  { %v2569_v21 = vpop.permute.xlu1 %2568  ;;  %v3049_v63 = vsel %vm642_vm1, %v3011_v50, %v10268_v47  ;;  %7707 = vmatprep.mubr.msk.f32.mxu1 %vm3826_vm8, %v10232_v43 }
 0x4b3   :  { %4218 = vmatprep.subr.mxu1 %v3049_v63  ;;  %2178 = vrot.lane.b32.xlu1 %v2094_v26, %s7824_s27  ;;  %v2626_v27 = vsel %vm1048_vm2, %v9976_v33, %v2569_v21  ;;  %v7808_v63 = vld [vmem:[%s12676_s0 + $0xc8] sm:$0xff] }
 0x4b4   :  { %4219 = vmatpush1.msra.mxu1 %v3048_v36 }
 0x4b5   :  { %v10279_v9 = vpop.permute.xlu0 %2570 }
 0x4b6   :  { %v2977_v59 = vpop.permute.xlu1 %2976  ;;  %v2627_v28 = vsel %vm1048_vm2, %v2569_v21, %v10279_v9 }
 0x4b7   :  { %4147 = vmatprep.subr.mxu0 %v2627_v28  ;;  %v3032_v20 = vsel %vm642_vm1, %v2975_v25, %v2977_v59 }
 0x4b8   :  { %4148 = vmatpush1.msra.mxu0 %v2626_v27  ;;  %v7809_v27 = vld [vmem:[%s12676_s0 + $0xc0] sm:$0xff] }
 0x4b9   :  { %v10285_v19 = vpop.permute.xlu0 %2978 }
 0x4ba   :  { %v3253_v16 = vpop.permute.xlu1 %3252  ;;  %v3033_v60 = vsel %vm642_vm1, %v2977_v59, %v10285_v19 }
 0x4bb   :  { %v3270_v54 = vsel %vm405_vm7, %v10018_v38, %v3253_v16  ;;  %4220 = vmatprep.subr.mxu1 %v3033_v60  ;;  %v7680_v38 = vld [vmem:[%s12675_s1 + $0x44] ss:$8 sm:$0xf0] }
 0x4bc   :  { %v3320_v22 = vmul.f32 %v9985_v29, %v3270_v54  ;;  %4221 = vmatpush1.msra.mxu1 %v3032_v20  ;;  %v3303_v25 = vmul.f32 %v10037_v23, %v3270_v54  ;;  %v10304_v51 = vor.u32 %v7680_v38, %v7679_v24  ;;  %v7810_v54 = vld [vmem:[%s12676_s0 + $0x40] sm:$0xff] }
 0x4bd   :  { %v3255_v15 = vpop.permute.xlu0 %3254 }
 0x4be   :  { %v3271_v56 = vsel %vm405_vm7, %v3253_v16, %v3255_v15  ;;  %3418 = vrot.lane.b32.xlu0 %v3320_v22, %s7818_s9  ;;  %v2199_v33 = vpop.permute.xlu1 %2198  ;;  %v1801_v50 = vrot.slane %v10304_v51, %v7885_v8  ;;  %v1797_v12 = vrot.slane %v10304_v51, %v7881_v6 }
 0x4bf   :  { %v3321_v45 = vmul.f32 %v10008_v31, %v3271_v56  ;;  %v3304_v42 = vmul.f32 %v10065_v39, %v3271_v56  ;;  %v2238_v61 = vsel %vm1454_vm3, %v10043_v32, %v2199_v33 }
 0x4c0   :  { %v1867_v36 = vmul.f32 %v7808_v63, %v1801_v50  ;;  %v1866_v16 = vmul.f32 %v7809_v27, %v1797_v12  ;;  %v1850_v20 = vmul.f32 %v7810_v54, %v1797_v12  ;;  %v1805_v12 = vrot.slane %v10304_v51, %v7879_v5  ;;  %v13085_v63 = vld [vmem:[#allocation101_spill] sm:$0xff] }
 0x4c1   :  { %v2201_v55 = vpop.permute.xlu0 %2200  ;;  %3420 = vrot.lane.b32.xlu1 %v3321_v45, %s7818_s9  ;;  %v13081_v45 = vld [vmem:[#allocation129_spill] sm:$0xff] }
 0x4c2   :  { %3384 = vrot.lane.b32.xlu0 %v3303_v25, %s7818_s9  ;;  %v2607_v2 = vpop.permute.xlu1 %2606  ;;  %v2239_v37 = vsel %vm1454_vm3, %v2199_v33, %v2201_v55  ;;  %v13082_v25 = vld [vmem:[#allocation128_spill] sm:$0xff] }
 0x4c3   :  { %4149 = vmatprep.subr.mxu0 %v2239_v37  ;;  %v2644_v21 = vsel %vm1048_vm2, %v10255_v41, %v2607_v2  ;;  %v1851_v41 = vmul.f32 %v9659_v34, %v1801_v50  ;;  %v1649_v0 = vsel %vm1623_vm6, %v13082_v25, %v13081_v45 }
 0x4c4   :  { %4150 = vmatpush1.msra.mxu0 %v2238_v61 }
 0x4c5   :  { %v10311_v26 = vpop.permute.xlu0 %2608  ;;  %3386 = vrot.lane.b32.xlu1 %v3304_v42, %s7818_s9  ;;  %v13084_v42 = vld [vmem:[#allocation114_spill] sm:$0xff] }
 0x4c6   :  { %v2165_v10 = vpop.permute.xlu1 %2164  ;;  %v2645_v48 = vsel %vm1048_vm2, %v2607_v2, %v10311_v26 }
 0x4c7   :  { %4222 = vmatprep.subr.mxu1 %v2645_v48  ;;  %v2222_v60 = vsel %vm1454_vm3, %v10080_v1, %v2165_v10 }
 0x4c8   :  { %4223 = vmatpush1.msra.mxu1 %v2644_v21 }
 0x4c9   :  { %v2167_v32 = vpop.permute.xlu0 %2166 }
 0x4ca   :  { %v2573_v59 = vpop.permute.xlu1 %2572  ;;  %v2223_v28 = vsel %vm1454_vm3, %v2165_v10, %v2167_v32  ;;  %v1809_v10 = vrot.slane %v10304_v51, %v7883_v7 }
 0x4cb   :  { %4151 = vmatprep.subr.mxu0 %v2223_v28  ;;  %v2628_v34 = vsel %vm1048_vm2, %v10279_v9, %v2573_v59  ;;  %v13083_v9 = vld [vmem:[#allocation115_spill] sm:$0xff] }
 0x4cc   :  { %4152 = vmatpush1.msra.mxu0 %v2222_v60  ;;  %v1633_v61 = vsel %vm1623_vm6, %v13084_v42, %v13083_v9  ;;  %v13087_v60 = vld [vmem:[#allocation87_spill] sm:$0xff] }
 0x4cd   :  { %v10335_v22 = vpop.permute.xlu0 %2574  ;;  %4153 = vmatprep.subr.mxu0 %v1867_v36  ;;  %v13086_v36 = vld [vmem:[#allocation100_spill] sm:$0xff] }
 0x4ce   :  { %v3257_v56 = vpop.permute.xlu1 %3256  ;;  %4154 = vmatpush1.msra.mxu0 %v1866_v16  ;;  %v2629_v33 = vsel %vm1048_vm2, %v2573_v59, %v10335_v22  ;;  %v1243_v59 = vsel %vm1217_vm5, %v13086_v36, %v13085_v63  ;;  %v1869_v16 = vmul.f32 %v9734_v40, %v1809_v10  ;;  %v1853_v40 = vmul.f32 %v9787_v3, %v1809_v10  ;;  %v13096_v10 = vld [vmem:[#allocation130_spill] sm:$0xff] }
 0x4cf   :  { %v3272_v24 = vsel %vm405_vm7, %v3255_v15, %v3257_v56  ;;  %v3306_v38 = vmul.f32 0.0, %v3257_v56  ;;  %4155 = vmatprep.subr.mxu0 %v1851_v41  ;;  %4224 = vmatprep.subr.mxu1 %v2629_v33  ;;  %v1648_v15 = vsel %vm1623_vm6, %v13062_v57, %v13082_v25  ;;  %v1632_v57 = vsel %vm1623_vm6, %v13064_v35, %v13084_v42  ;;  %v13088_v41 = vld [vmem:[#allocation86_spill] sm:$0xff]  ;;  %v13093_v42 = vld [vmem:[#allocation43_spill] sm:$0xff] }
 0x4d0   :  { %v3322_v1 = vmul.f32 %v10115_v4, %v3272_v24  ;;  %4156 = vmatpush1.msra.mxu0 %v1850_v20  ;;  %4225 = vmatpush1.msra.mxu1 %v2628_v34  ;;  %v3305_v21 = vmul.f32 %v10160_v58, %v3272_v24  ;;  %v1242_v35 = vsel %vm1217_vm5, %v13066_v44, %v13086_v36  ;;  %v7811_v56 = vld [vmem:[%s12676_s0 + $0xd0] sm:$0xff] }
 0x4d1   :  { %3424 = vrot.lane.b32.xlu1 %v3306_v38, %s7818_s9  ;;  %v2203_v2 = vpop.permute.xlu0 %2202  ;;  %4157 = vmatprep.subr.mxu0 %v1649_v0  ;;  %v1227_v54 = vsel %vm1217_vm5, %v13088_v41, %v13087_v60  ;;  %v1868_v33 = vmul.f32 %v7811_v56, %v1805_v12  ;;  %v1226_v44 = vsel %vm1217_vm5, %v13068_v11, %v13088_v41  ;;  %v13090_v24 = vld [vmem:[#allocation74_spill] sm:$0xff]  ;;  %v13092_v0 = vld [vmem:[#allocation57_spill] sm:$0xff] }
 0x4d2   :  { %3422 = vrot.lane.b32.xlu0 %v3322_v1, %s7818_s9  ;;  %v10351_v37 = vpop.permute.xlu1 %2204  ;;  %4158 = vmatpush1.msra.mxu0 %v1648_v15  ;;  %v2240_v50 = vsel %vm1454_vm3, %v2201_v55, %v2203_v2  ;;  %v7812_v34 = vld [vmem:[%s12676_s0 + $0x50] sm:$0xff]  ;;  %v836_v25 = vsel %vm811_vm4, %v13070_v46, %v13090_v24  ;;  %v820_v15 = vsel %vm811_vm4, %v13073_v49, %v13092_v0  ;;  %v13095_v46 = vld [vmem:[#allocation131_spill] sm:$0xff] }
 0x4d3   :  { %4159 = vmatprep.subr.mxu0 %v1633_v61  ;;  %v2241_v48 = vsel %vm1454_vm3, %v2203_v2, %v10351_v37  ;;  %v1852_v1 = vmul.f32 %v7812_v34, %v1805_v12  ;;  %v13091_v11 = vld [vmem:[#allocation58_spill] sm:$0xff]  ;;  %v13094_v61 = vld [vmem:[#allocation40_spill] sm:$0xff]  ;;  %v1650_v49 = vsel %vm1623_vm6, %v13081_v45, %v13096_v10 }
 0x4d4   :  { %4226 = vmatprep.subr.mxu1 %v2241_v48  ;;  %4160 = vmatpush1.msra.mxu0 %v1632_v57  ;;  %v821_v2 = vsel %vm811_vm4, %v13092_v0, %v13091_v11  ;;  %v1651_v48 = vsel %vm1623_vm6, %v13096_v10, %v13095_v46  ;;  %v430_v12 = vsel %vm405_vm7, %v13076_v62, %v13094_v61  ;;  %v13110_v10 = vld [vmem:[#allocation42_spill] sm:$0xff] }
 0x4d5   :  { %3390 = vrot.lane.b32.xlu1 %v3306_v38, %s7818_s9  ;;  %4227 = vmatpush1.msra.mxu1 %v2240_v50  ;;  %v2169_v55 = vpop.permute.xlu0 %2168  ;;  %v431_v50 = vsel %vm405_vm7, %v13094_v61, %v13093_v42  ;;  %v10475_v61 = vld [vmem:[%s12677_s2 + $0x18] sm:$0xff] }
 0x4d6   :  { %4161 = vmatprep.subr.mxu0 %v1243_v59  ;;  %3388 = vrot.lane.b32.xlu0 %v3305_v21, %s7818_s9  ;;  %v10372_v28 = vpop.permute.xlu1 %2170  ;;  %v2224_v27 = vsel %vm1454_vm3, %v2167_v32, %v2169_v55  ;;  %v13089_v32 = vld [vmem:[#allocation75_spill] sm:$0xff]  ;;  %v13097_v21 = vld [vmem:[#allocation26_spill] sm:$0xff]  ;;  %v13099_v59 = vld [vmem:[#allocation117_spill] sm:$0xff] }
 0x4d7   :  { %4162 = vmatpush1.msra.mxu0 %v1242_v35  ;;  %v2225_v20 = vsel %vm1454_vm3, %v2169_v55, %v10372_v28  ;;  %v837_v38 = vsel %vm811_vm4, %v13090_v24, %v13089_v32  ;;  %v13098_v55 = vld [vmem:[#allocation27_spill] sm:$0xff]  ;;  %v13100_v35 = vld [vmem:[#allocation116_spill] sm:$0xff] }
 0x4d8   :  { %4163 = vmatprep.subr.mxu0 %v1227_v54  ;;  %4228 = vmatprep.subr.mxu1 %v2225_v20  ;;  %v415_v36 = vsel %vm405_vm7, %v13098_v55, %v13097_v21  ;;  %v414_v62 = vsel %vm405_vm7, %v13078_v30, %v13098_v55  ;;  %v1634_v45 = vsel %vm1623_vm6, %v13083_v9, %v13100_v35  ;;  %v13101_v54 = vld [vmem:[#allocation103_spill] sm:$0xff]  ;;  %v13102_v20 = vld [vmem:[#allocation102_spill] sm:$0xff]  ;;  %v13104_v24 = vld [vmem:[#allocation88_spill] sm:$0xff] }
 0x4d9   :  { %4164 = vmatpush1.msra.mxu0 %v1226_v44  ;;  %4229 = vmatpush1.msra.mxu1 %v2224_v27  ;;  %v3411_v3 = vpop.permute.xlu0 %3410  ;;  %v1635_v27 = vsel %vm1623_vm6, %v13100_v35, %v13099_v59  ;;  %v1245_v56 = vsel %vm1217_vm5, %v13102_v20, %v13101_v54  ;;  %v1244_v30 = vsel %vm1217_vm5, %v13085_v63, %v13102_v20  ;;  %v13105_v63 = vld [vmem:[#allocation77_spill] sm:$0xff] }
 0x4da   :  { %4165 = vmatprep.subr.mxu0 %v837_v38  ;;  %4230 = vmatprep.subr.mxu1 %v1869_v16  ;;  %v3450_v44 = vsel %vm236_vm0, %v10215_v53, %v3411_v3  ;;  %v1228_v34 = vsel %vm1217_vm5, %v13087_v60, %v13104_v24  ;;  %v10466_v60 = vld [vmem:[%s12677_s2] sm:$0xff]  ;;  %v13112_v55 = vld [vmem:[#allocation29_spill] sm:$0xff] }
 0x4db   :  { %4166 = vmatpush1.msra.mxu0 %v836_v25  ;;  %4231 = vmatpush1.msra.mxu1 %v1868_v33 }
 0x4dc   :  { %4167 = vmatprep.subr.mxu0 %v821_v2  ;;  %4232 = vmatprep.subr.mxu1 %v1853_v40  ;;  %v13103_v40 = vld [vmem:[#allocation89_spill] sm:$0xff]  ;;  %v13108_v2 = vld [vmem:[#allocation59_spill] sm:$0xff] }
 0x4dd   :  { %4168 = vmatpush1.msra.mxu0 %v820_v15  ;;  %4233 = vmatpush1.msra.mxu1 %v1852_v1  ;;  %v10412_v57 = vpop.permute.xlu1 %3412  ;;  %v3377_v41 = vpop.permute.xlu0 %3376  ;;  %v1229_v38 = vsel %vm1217_vm5, %v13104_v24, %v13103_v40  ;;  %v13106_v1 = vld [vmem:[#allocation76_spill] sm:$0xff] }
 0x4de   :  { %4169 = vmatprep.subr.mxu0 %v431_v50  ;;  %4234 = vmatprep.subr.mxu1 %v1651_v48  ;;  %v3451_v16 = vsel %vm236_vm0, %v3411_v3, %v10412_v57  ;;  %v3434_v53 = vsel %vm236_vm0, %v10246_v52, %v3377_v41  ;;  %v839_v25 = vsel %vm811_vm4, %v13106_v1, %v13105_v63  ;;  %v3815_v3 = vld [vmem:[%s12678_s3 + $0x8] sm:$0xff]  ;;  %v13107_v52 = vld [vmem:[#allocation60_spill] sm:$0xff] }
 0x4df   :  { %4170 = vmatpush1.msra.mxu0 %v430_v12  ;;  %4235 = vmatpush1.msra.mxu1 %v1650_v49  ;;  %v838_v0 = vsel %vm811_vm4, %v13089_v32, %v13106_v1  ;;  %v823_v15 = vsel %vm811_vm4, %v13108_v2, %v13107_v52  ;;  %v822_v32 = vsel %vm811_vm4, %v13091_v11, %v13108_v2  ;;  %v13109_v50 = vld [vmem:[#allocation45_spill] sm:$0xff]  ;;  %v10491_v49 = vld [vmem:[%s12677_s2 + $0x10] sm:$0xff]  ;;  %v13111_v11 = vld [vmem:[#allocation28_spill] sm:$0xff] }
 0x4e0   :  { %4171 = vmatprep.subr.mxu0 %v415_v36  ;;  %4236 = vmatprep.subr.mxu1 %v1635_v27  ;;  %v433_v48 = vsel %vm405_vm7, %v13110_v10, %v13109_v50  ;;  %v432_v12 = vsel %vm405_vm7, %v13093_v42, %v13110_v10  ;;  %v417_v36 = vsel %vm405_vm7, %v13112_v55, %v13111_v11 }
 0x4e1   :  { %4172 = vmatpush1.msra.mxu0 %v414_v62  ;;  %4237 = vmatpush1.msra.mxu1 %v1634_v45  ;;  %v10437_v33 = vpop.permute.xlu1 %3378  ;;  %v416_v42 = vsel %vm405_vm7, %v13097_v21, %v13112_v55 }
 0x4e2   :  { %4201 = vmatprep.subr.mxu0 %v3451_v16  ;;  %4238 = vmatprep.subr.mxu1 %v1245_v56  ;;  %v3435_v9 = vsel %vm236_vm0, %v3377_v41, %v10437_v33 }
 0x4e3   :  { %4202 = vmatpush2.msra.mxu0 %v3450_v44  ;;  %4239 = vmatpush1.msra.mxu1 %v1244_v30 }
 0x4e4   :  { %4240 = vmatprep.subr.mxu1 %v1229_v38  ;;  %4203 = vmatprep.subr.mxu0 %v3435_v9 }
 0x4e5   :  { %4241 = vmatpush1.msra.mxu1 %v1228_v34  ;;  %4204 = vmatpush2.msra.mxu0 %v3434_v53 }
 0x4e6   :  { %4242 = vmatprep.subr.mxu1 %v839_v25  ;;  %4206 = vmatmul.mubr.f32.vlgmr.msra.gmra.mxu0 %v10466_v60 }
 0x4e7   :  { %4243 = vmatpush1.msra.mxu1 %v838_v0  ;;  %7706 = vmatprep.mubr.msk.f32.mxu0 %vm3826_vm8, %v10475_v61 }
 0x4e8   :  { %4244 = vmatprep.subr.mxu1 %v823_v15  ;;  %3823 = vperm.xlu0 %7765, %v3815_v3  }
 0x4e9   :  { %4245 = vmatpush1.msra.mxu1 %v822_v32 }
 0x4ea   :  { %4246 = vmatprep.subr.mxu1 %v433_v48  ;;  %4212 = vmatmul.mubr.f32.gmra.mxu0 %v10491_v49 }
 0x4eb   :  { %4247 = vmatpush1.msra.mxu1 %v432_v12  ;;  %7709 = vmatprep.mubr.msk.f32.mxu0 %vm3826_vm8, %v10232_v43 }
 0x4ec   :  { %4248 = vmatprep.subr.mxu1 %v417_v36 }
 0x4ed   :  { %4249 = vmatpush1.msra.mxu1 %v416_v42  ;;  %v3015_v35 = vpop.permute.xlu0 %3014 }
 0x4ee   :  { %v3050_v45 = vsel %vm642_vm1, %v10268_v47, %v3015_v35 }
 0x4f1   :  { %v3017_v27 = vpop.permute.xlu1 %3016 }
 0x4f2   :  { %v3415_v16 = vpop.permute.xlu0 %3414  ;;  %v3051_v62 = vsel %vm642_vm1, %v3015_v35, %v3017_v27 }
 0x4f3   :  { %4295 = vmatprep.subr.mxu0 %v3051_v62  ;;  %v3452_v21 = vsel %vm236_vm0, %v10412_v57, %v3415_v16 }
 0x4f4   :  { %4296 = vmatpush1.msra.mxu0 %v3050_v45 }
 0x4f5   :  { %v10505_v41 = vpop.permute.xlu1 %3416 }
 0x4f6   :  { %v2981_v20 = vpop.permute.xlu0 %2980  ;;  %v3453_v56 = vsel %vm236_vm0, %v3415_v16, %v10505_v41 }
 0x4f7   :  { %4278 = vmatprep.subr.mxu1 %v3453_v56  ;;  %v3034_v47 = vsel %vm642_vm1, %v10285_v19, %v2981_v20 }
 0x4f8   :  { %4279 = vmatpush2.msra.mxu1 %v3452_v21 }
 0x4f9   :  { %v2983_v44 = vpop.permute.xlu1 %2982 }
 0x4fa   :  { %v3381_v30 = vpop.permute.xlu0 %3380  ;;  %v3035_v9 = vsel %vm642_vm1, %v2981_v20, %v2983_v44  ;;  %v1813_v20 = vrot.slane %v10304_v51, %v7895_v14 }
 0x4fb   :  { %4297 = vmatprep.subr.mxu0 %v3035_v9  ;;  %v3436_v57 = vsel %vm236_vm0, %v10437_v33, %v3381_v30  ;;  %v7816_v9 = vld [vmem:[%s12676_s0 + $0xe0] sm:$0xff] }
 0x4fc   :  { %4298 = vmatpush1.msra.mxu0 %v3034_v47  ;;  %v1870_v47 = vmul.f32 %v7816_v9, %v1813_v20 }
 0x4fd   :  { %v10514_v24 = vpop.permute.xlu1 %3382 }
 0x4fe   :  { %v2611_v38 = vpop.permute.xlu0 %2610  ;;  %v3437_v34 = vsel %vm236_vm0, %v3381_v30, %v10514_v24 }
 0x4ff   :  { %4280 = vmatprep.subr.mxu1 %v3437_v34  ;;  %v2646_v19 = vsel %vm1048_vm2, %v10311_v26, %v2611_v38 }
 0x500   :  { %4281 = vmatpush2.msra.mxu1 %v3436_v57  ;;  %v7817_v57 = vld [vmem:[%s12676_s0 + $0x60] sm:$0xff] }
 0x501   :  { %v2613_v53 = vpop.permute.xlu1 %2612  ;;  %4283 = vmatmul.mubr.f32.vlgmr.msra.gmra.mxu1 %v10466_v60 }
 0x502   :  { %v3019_v1 = vpop.permute.xlu0 %3018  ;;  %v2647_v25 = vsel %vm1048_vm2, %v2611_v38, %v2613_v53  ;;  %7708 = vmatprep.mubr.msk.f32.mxu1 %vm3826_vm8, %v10475_v61 }
 0x503   :  { %4299 = vmatprep.subr.mxu0 %v2647_v25  ;;  %v3052_v2 = vsel %vm642_vm1, %v3017_v27, %v3019_v1 }
 0x504   :  { %4300 = vmatpush1.msra.mxu0 %v2646_v19 }
 0x505   :  { %v3021_v3 = vpop.permute.xlu1 %3020  ;;  %4289 = vmatmul.mubr.f32.gmra.mxu1 %v10491_v49 }
 0x506   :  { %v2577_v0 = vpop.permute.xlu0 %2576  ;;  %v3053_v33 = vsel %vm642_vm1, %v3019_v1, %v3021_v3  ;;  %7711 = vmatprep.mubr.msk.f32.mxu1 %vm3826_vm8, %v10232_v43 }
 0x507   :  { %4372 = vmatprep.subr.mxu1 %v3053_v33  ;;  %v2630_v26 = vsel %vm1048_vm2, %v10335_v22, %v2577_v0  ;;  %v1817_v22 = vrot.slane %v10304_v51, %v7893_v13 }
 0x508   :  { %4373 = vmatpush1.msra.mxu1 %v3052_v2  ;;  %v1825_v2 = vrot.slane %v10304_v51, %v7901_v17 }
 0x509   :  { %v2579_v32 = vpop.permute.xlu1 %2578  ;;  %v1855_v34 = vmul.f32 %v10037_v23, %v1817_v22  ;;  %v13114_v23 = vld [vmem:[#allocation132_spill] sm:$0xff] }
 0x50a   :  { %v2985_v15 = vpop.permute.xlu0 %2984  ;;  %v2631_v10 = vsel %vm1048_vm2, %v2577_v0, %v2579_v32  ;;  %v1652_v33 = vsel %vm1623_vm6, %v13095_v46, %v13114_v23 }
 0x50b   :  { %4301 = vmatprep.subr.mxu0 %v2631_v10  ;;  %v3036_v43 = vsel %vm642_vm1, %v2983_v44, %v2985_v15  ;;  %v1871_v44 = vmul.f32 %v9985_v29, %v1817_v22  ;;  %v1854_v29 = vmul.f32 %v7817_v57, %v1813_v20  ;;  %v13116_v10 = vld [vmem:[#allocation118_spill] sm:$0xff]  ;;  %v13119_v22 = vld [vmem:[#allocation91_spill] sm:$0xff] }
 0x50c   :  { %4302 = vmatpush1.msra.mxu0 %v2630_v26 }
 0x50d   :  { %v2987_v48 = vpop.permute.xlu1 %2986 }
 0x50e   :  { %v2207_v12 = vpop.permute.xlu0 %2206  ;;  %v3037_v55 = vsel %vm642_vm1, %v2985_v15, %v2987_v48  ;;  %v13115_v15 = vld [vmem:[#allocation119_spill] sm:$0xff]  ;;  %v1821_v48 = vrot.slane %v10304_v51, %v7903_v18 }
 0x50f   :  { %4374 = vmatprep.subr.mxu1 %v3037_v55  ;;  %v2242_v27 = vsel %vm1454_vm3, %v10351_v37, %v2207_v12 }
 0x510   :  { %4375 = vmatpush1.msra.mxu1 %v3036_v43  ;;  %v13117_v43 = vld [vmem:[#allocation105_spill] sm:$0xff] }
 0x511   :  { %v2209_v36 = vpop.permute.xlu1 %2208 }
 0x512   :  { %v2615_v42 = vpop.permute.xlu0 %2614  ;;  %v2243_v35 = vsel %vm1454_vm3, %v2207_v12, %v2209_v36  ;;  %v1636_v12 = vsel %vm1623_vm6, %v13099_v59, %v13116_v10  ;;  %v13120_v59 = vld [vmem:[#allocation90_spill] sm:$0xff] }
 0x513   :  { %4303 = vmatprep.subr.mxu0 %v2243_v35  ;;  %v2648_v56 = vsel %vm1048_vm2, %v2613_v53, %v2615_v42  ;;  %v1230_v20 = vsel %vm1217_vm5, %v13103_v40, %v13120_v59  ;;  %v13123_v40 = vld [vmem:[#allocation62_spill] sm:$0xff] }
 0x514   :  { %4304 = vmatpush1.msra.mxu0 %v2242_v27 }
 0x515   :  { %v2617_v16 = vpop.permute.xlu1 %2616 }
 0x516   :  { %v2173_v62 = vpop.permute.xlu0 %2172  ;;  %v2649_v45 = vsel %vm1048_vm2, %v2615_v42, %v2617_v16  ;;  %v13118_v42 = vld [vmem:[#allocation104_spill] sm:$0xff]  ;;  %v1873_v16 = vmul.f32 %v10115_v4, %v1825_v2  ;;  %v13121_v4 = vld [vmem:[#allocation79_spill] sm:$0xff] }
 0x517   :  { %4376 = vmatprep.subr.mxu1 %v2649_v45  ;;  %v2226_v38 = vsel %vm1454_vm3, %v10372_v28, %v2173_v62  ;;  %v13113_v28 = vld [vmem:[#allocation133_spill] sm:$0xff]  ;;  %v1247_v35 = vsel %vm1217_vm5, %v13118_v42, %v13117_v43  ;;  %v1246_v51 = vsel %vm1217_vm5, %v13101_v54, %v13118_v42  ;;  %v1872_v45 = vmul.f32 %v10008_v31, %v1821_v48 }
 0x518   :  { %4377 = vmatpush1.msra.mxu1 %v2648_v56  ;;  %v1653_v3 = vsel %vm1623_vm6, %v13114_v23, %v13113_v28  ;;  %v1857_v54 = vmul.f32 %v10160_v58, %v1825_v2  ;;  %v13132_v23 = vld [vmem:[#allocation120_spill] sm:$0xff]  ;;  %v13134_v2 = vld [vmem:[#allocation106_spill] sm:$0xff]  ;;  %v13137_v42 = vld [vmem:[#allocation81_spill] sm:$0xff] }
 0x519   :  { %v2175_v21 = vpop.permute.xlu1 %2174 }
 0x51a   :  { %v2581_v30 = vpop.permute.xlu0 %2580  ;;  %v2227_v37 = vsel %vm1454_vm3, %v2173_v62, %v2175_v21 }
 0x51b   :  { %4305 = vmatprep.subr.mxu0 %v2227_v37  ;;  %v2632_v19 = vsel %vm1048_vm2, %v2579_v32, %v2581_v30  ;;  %v1637_v32 = vsel %vm1623_vm6, %v13116_v10, %v13115_v15  ;;  %v1856_v37 = vmul.f32 %v10065_v39, %v1821_v48  ;;  %v13125_v39 = vld [vmem:[#allocation47_spill] sm:$0xff]  ;;  %v13135_v48 = vld [vmem:[#allocation93_spill] sm:$0xff] }
 0x51c   :  { %4306 = vmatpush1.msra.mxu0 %v2226_v38 }
 0x51d   :  { %4307 = vmatprep.subr.mxu0 %v1871_v44  ;;  %v2583_v53 = vpop.permute.xlu1 %2582  ;;  %v13122_v44 = vld [vmem:[#allocation78_spill] sm:$0xff] }
 0x51e   :  { %v2211_v1 = vpop.permute.xlu0 %2210  ;;  %4308 = vmatpush1.msra.mxu0 %v1870_v47  ;;  %v2633_v25 = vsel %vm1048_vm2, %v2581_v30, %v2583_v53  ;;  %v841_v30 = vsel %vm811_vm4, %v13122_v44, %v13121_v4  ;;  %v840_v31 = vsel %vm811_vm4, %v13105_v63, %v13122_v44  ;;  %v13126_v47 = vld [vmem:[#allocation44_spill] sm:$0xff]  ;;  %v13128_v63 = vld [vmem:[#allocation134_spill] sm:$0xff]  ;;  %v13143_v44 = vld [vmem:[#allocation17_spill] sm:$0xff] }
 0x51f   :  { %4309 = vmatprep.subr.mxu0 %v1855_v34  ;;  %4378 = vmatprep.subr.mxu1 %v2633_v25  ;;  %v2244_v46 = vsel %vm1454_vm3, %v2209_v36, %v2211_v1  ;;  %v1231_v36 = vsel %vm1217_vm5, %v13120_v59, %v13119_v22  ;;  %v435_v38 = vsel %vm405_vm7, %v13126_v47, %v13125_v39  ;;  %v13127_v34 = vld [vmem:[#allocation135_spill] sm:$0xff]  ;;  %v13129_v53 = vld [vmem:[#allocation30_spill] sm:$0xff]  ;;  %v13139_v59 = vld [vmem:[#allocation64_spill] sm:$0xff] }
 0x520   :  { %4310 = vmatpush1.msra.mxu0 %v1854_v29  ;;  %4379 = vmatpush1.msra.mxu1 %v2632_v19  ;;  %v1655_v57 = vsel %vm1623_vm6, %v13128_v63, %v13127_v34  ;;  %v434_v29 = vsel %vm405_vm7, %v13109_v50, %v13126_v47  ;;  %v13131_v19 = vld [vmem:[#allocation121_spill] sm:$0xff]  ;;  %v10684_v34 = vpop.f32.mrf.mxu0 }
 0x521   :  { %4311 = vmatprep.subr.mxu0 %v1653_v3  ;;  %v2213_v0 = vpop.permute.xlu1 %2212  ;;  %v1639_v3 = vsel %vm1623_vm6, %v13132_v23, %v13131_v19  ;;  %13145 = vst [vmem:[#allocation67_spill] sm:$0xff] %v10684_v34 }
 0x522   :  { %4312 = vmatpush1.msra.mxu0 %v1652_v33  ;;  %v2245_v26 = vsel %vm1454_vm3, %v2211_v1, %v2213_v0  ;;  %v2177_v55 = vpop.permute.xlu0 %2176  ;;  %v13130_v1 = vld [vmem:[#allocation31_spill] sm:$0xff] }
 0x523   :  { %4313 = vmatprep.subr.mxu0 %v1637_v32  ;;  %4380 = vmatprep.subr.mxu1 %v2245_v26  ;;  %v2228_v56 = vsel %vm1454_vm3, %v2175_v21, %v2177_v55  ;;  %v13124_v21 = vld [vmem:[#allocation61_spill] sm:$0xff]  ;;  %v419_v25 = vsel %vm405_vm7, %v13130_v1, %v13129_v53  ;;  %v418_v50 = vsel %vm405_vm7, %v13111_v11, %v13130_v1  ;;  %v13133_v33 = vld [vmem:[#allocation107_spill] sm:$0xff] }
 0x524   :  { %4314 = vmatpush1.msra.mxu0 %v1636_v12  ;;  %4381 = vmatpush1.msra.mxu1 %v2244_v46  ;;  %v825_v58 = vsel %vm811_vm4, %v13124_v21, %v13123_v40  ;;  %v824_v9 = vsel %vm811_vm4, %v13107_v52, %v13124_v21  ;;  %v1654_v52 = vsel %vm1623_vm6, %v13113_v28, %v13128_v63  ;;  %v13136_v12 = vld [vmem:[#allocation92_spill] sm:$0xff]  ;;  %v10686_v63 = vpop.f32.mrf.mxu0 }
 0x525   :  { %4315 = vmatprep.subr.mxu0 %v1247_v35  ;;  %v2179_v27 = vpop.permute.xlu1 %2178  ;;  %v1638_v28 = vsel %vm1623_vm6, %v13115_v15, %v13132_v23  ;;  %v1249_v10 = vsel %vm1217_vm5, %v13134_v2, %v13133_v33  ;;  %v1248_v32 = vsel %vm1217_vm5, %v13117_v43, %v13134_v2  ;;  %v1233_v11 = vsel %vm1217_vm5, %v13136_v12, %v13135_v48  ;;  %v13138_v43 = vld [vmem:[#allocation80_spill] sm:$0xff] }
 0x526   :  { %4316 = vmatpush1.msra.mxu0 %v1246_v51  ;;  %v2229_v62 = vsel %vm1454_vm3, %v2177_v55, %v2179_v27  ;;  %v1232_v15 = vsel %vm1217_vm5, %v13119_v22, %v13136_v12  ;;  %v843_v35 = vsel %vm811_vm4, %v13138_v43, %v13137_v42  ;;  %v842_v51 = vsel %vm811_vm4, %v13121_v4, %v13138_v43  ;;  %v13140_v22 = vld [vmem:[#allocation63_spill] sm:$0xff] }
 0x527   :  { %4317 = vmatprep.subr.mxu0 %v1231_v36  ;;  %4382 = vmatprep.subr.mxu1 %v2229_v62  ;;  %v827_v36 = vsel %vm811_vm4, %v13140_v22, %v13139_v59  ;;  %v826_v62 = vsel %vm811_vm4, %v13123_v40, %v13140_v22  ;;  %13146 = vst [vmem:[#allocation66_spill] sm:$0xff] %v10686_v63 }
 0x528   :  { %4318 = vmatpush1.msra.mxu0 %v1230_v20  ;;  %4383 = vmatpush1.msra.mxu1 %v2228_v56  ;;  %v13141_v20 = vld [vmem:[#allocation16_spill] sm:$0xff]  ;;  %v13142_v56 = vld [vmem:[#allocation46_spill] sm:$0xff] }
 0x529   :  { %4319 = vmatprep.subr.mxu0 %v841_v30  ;;  %4384 = vmatprep.subr.mxu1 %v1873_v16  ;;  %v436_v4 = vsel %vm405_vm7, %v13125_v39, %v13142_v56  ;;  %v13144_v30 = vld [vmem:[#allocation33_spill] sm:$0xff] }
 0x52a   :  { %4320 = vmatpush1.msra.mxu0 %v840_v31  ;;  %4385 = vmatpush1.msra.mxu1 %v1872_v45 }
 0x52b   :  { %4321 = vmatprep.subr.mxu0 %v825_v58  ;;  %4386 = vmatprep.subr.mxu1 %v1857_v54  ;;  %v437_v54 = vsel %vm405_vm7, %v13142_v56, %v13141_v20 }
 0x52c   :  { %4322 = vmatpush1.msra.mxu0 %v824_v9  ;;  %4387 = vmatpush1.msra.mxu1 %v1856_v37  ;;  %v421_v37 = vsel %vm405_vm7, %v13144_v30, %v13143_v44 }
 0x52d   :  { %4323 = vmatprep.subr.mxu0 %v435_v38  ;;  %4388 = vmatprep.subr.mxu1 %v1655_v57  ;;  %v3905_v57 = vpop.f32.mrf.mxu0 }
 0x52e   :  { %4324 = vmatpush1.msra.mxu0 %v434_v29  ;;  %4389 = vmatpush1.msra.mxu1 %v1654_v52  ;;  %v10688_v29 = vpop.f32.mrf.mxu1 }
 0x52f   :  { %4325 = vmatprep.subr.mxu0 %v419_v25  ;;  %4390 = vmatprep.subr.mxu1 %v1639_v3  ;;  %13147 = vst [vmem:[#allocation65_spill] sm:$0xff] %v10688_v29  ;;  %v3907_v52 = vpop.f32.mrf.mxu0  ;;  %v7721_v29 = vld [vmem:[%s12675_s1 + $0x42] ss:$8 sm:$0xf] }
 0x530   :  { %v3419_v0 = vpop.permute.xlu0 %3418  ;;  %4326 = vmatpush1.msra.mxu0 %v418_v50  ;;  %4391 = vmatpush1.msra.mxu1 %v1638_v28  ;;  %v10692_v1 = vpop.f32.mrf.mxu1 }
 0x531   :  { %4392 = vmatprep.subr.mxu1 %v1249_v10  ;;  %v3454_v55 = vsel %vm236_vm0, %v10505_v41, %v3419_v0  ;;  %13148 = vst [vmem:[#allocation50_spill] sm:$0xff] %v10692_v1 }
 0x532   :  { %4393 = vmatpush1.msra.mxu1 %v1248_v32 }
 0x533   :  { %v3421_v26 = vpop.permute.xlu1 %3420  ;;  %4394 = vmatprep.subr.mxu1 %v1233_v11 }
 0x534   :  { %v3455_v46 = vsel %vm236_vm0, %v3419_v0, %v3421_v26  ;;  %4395 = vmatpush1.msra.mxu1 %v1232_v15  ;;  %v3385_v27 = vpop.permute.xlu0 %3384 }
 0x535   :  { %4355 = vmatprep.subr.mxu0 %v3455_v46  ;;  %4396 = vmatprep.subr.mxu1 %v843_v35  ;;  %v3438_v45 = vsel %vm236_vm0, %v10514_v24, %v3385_v27  ;;  %v420_v24 = vsel %vm405_vm7, %v13129_v53, %v13144_v30 }
 0x536   :  { %4356 = vmatpush2.msra.mxu0 %v3454_v55  ;;  %4397 = vmatpush1.msra.mxu1 %v842_v51 }
 0x537   :  { %v3387_v16 = vpop.permute.xlu1 %3386  ;;  %4398 = vmatprep.subr.mxu1 %v827_v36 }
 0x538   :  { %v3439_v41 = vsel %vm236_vm0, %v3385_v27, %v3387_v16  ;;  %4399 = vmatpush1.msra.mxu1 %v826_v62 }
 0x539   :  { %4357 = vmatprep.subr.mxu0 %v3439_v41  ;;  %4400 = vmatprep.subr.mxu1 %v437_v54 }
 0x53a   :  { %4358 = vmatpush2.msra.mxu0 %v3438_v45  ;;  %4401 = vmatpush1.msra.mxu1 %v436_v4 }
 0x53b   :  { %4360 = vmatmul.mubr.f32.vlgmr.msra.gmra.mxu0 %v10466_v60  ;;  %4402 = vmatprep.subr.mxu1 %v421_v37 }
 0x53c   :  { %7710 = vmatprep.mubr.msk.f32.mxu0 %vm3826_vm8, %v10475_v61  ;;  %4403 = vmatpush1.msra.mxu1 %v420_v24 }
 0x53f   :  { %4366 = vmatmul.mubr.f32.gmra.mxu0 %v10491_v49 }
 0x543   :  { %v3425_v31 = vpop.permute.xlu1 %3424 }
 0x544   :  { %v3423_v40 = vpop.permute.xlu0 %3422 }
 0x545   :  { %v3457_v21 = vsel %vm236_vm0, %v3423_v40, %v3425_v31  ;;  %v3456_v58 = vsel %vm236_vm0, %v3421_v26, %v3423_v40 }
 0x546   :  { %4432 = vmatprep.subr.mxu1 %v3457_v21 }
 0x547   :  { %4433 = vmatpush2.msra.mxu1 %v3456_v58  ;;  %v3391_v9 = vpop.permute.xlu1 %3390 }
 0x548   :  { %v3389_v39 = vpop.permute.xlu0 %3388 }
 0x549   :  { %v3441_v47 = vsel %vm236_vm0, %v3389_v39, %v3391_v9  ;;  %v3440_v38 = vsel %vm236_vm0, %v3387_v16, %v3389_v39 }
 0x54a   :  { %4434 = vmatprep.subr.mxu1 %v3441_v47 }
 0x54b   :  { %4435 = vmatpush2.msra.mxu1 %v3440_v38 }
 0x54c   :  { %4437 = vmatmul.mubr.f32.vlgmr.msra.gmra.mxu1 %v10466_v60 }
 0x54d   :  { %7712 = vmatprep.mubr.msk.f32.mxu1 %vm3826_vm8, %v10475_v61  ;;  %v3982_v61 = vpop.f32.mrf.mxu1 }
 0x54f   :  { %v3984_v0 = vpop.f32.mrf.mxu1 }
 0x550   :  { %4443 = vmatmul.mubr.f32.gmra.mxu1 %v10491_v49 }
 0x55d   :  { %v10700_v49 = vpop.f32.mrf.mxu0 }
 0x55e   :  { %13149 = vst [vmem:[#allocation49_spill] sm:$0xff] %v10700_v49 }
 0x55f   :  { %v10709_v50 = vpop.f32.mrf.mxu0 }
 0x560   :  { %13150 = vst [vmem:[#allocation48_spill] sm:$0xff] %v10709_v50  ;;  %v7725_v50 = vld [vmem:[%s12675_s1 + $0x43] ss:$8 sm:$0xf] }
 0x561   :  { %v4059_v32 = vpop.f32.mrf.mxu0 }
 0x563   :  { %v10690_v53 = vpop.permute.xlu0 %3823  ;;  %v4061_v15 = vpop.f32.mrf.mxu0 }
 0x564   :  { %v10695_v25 = vadd.f32 %v3905_v57, %v10690_v53  ;;  %v10698_v60 = vadd.f32 %v3907_v52, %v10690_v53  ;;  %v10703_v19 = vadd.f32 %v3982_v61, %v10690_v53  ;;  %v10716_v10 = vadd.f32 %v3984_v0, %v10690_v53 }
 0x565   :  { %v10724_v46 = vadd.f32 %v4059_v32, %v10690_v53  ;;  %v10732_v27 = vadd.f32 %v4061_v15, %v10690_v53 }
 0x566   :  { %v4483_v23 = vmul.f32 %v10695_v25, %v10695_v25  ;;  %v4484_v3 = vmul.f32 %v10698_v60, %v10698_v60  ;;  %v4465_v28 = vadd.f32 %v10698_v60, %v10695_v25  ;;  %v4485_v33 = vmul.f32 %v10703_v19, %v10703_v19 }
 0x567   :  { %v4486_v11 = vmul.f32 %v10716_v10, %v10716_v10  ;;  %v4487_v35 = vmul.f32 %v10724_v46, %v10724_v46  ;;  %v4488_v36 = vmul.f32 %v10732_v27, %v10732_v27 }
 0x568   :  { %v4499_v2 = vadd.f32 %v4484_v3, %v4483_v23  ;;  %v4466_v48 = vadd.f32 %v4465_v28, %v10703_v19 }
 0x56a   :  { %v4500_v12 = vadd.f32 %v4499_v2, %v4485_v33  ;;  %v4467_v42 = vadd.f32 %v4466_v48, %v10716_v10 }
 0x56c   :  { %v4501_v43 = vadd.f32 %v4500_v12, %v4486_v11  ;;  %v4468_v59 = vadd.f32 %v4467_v42, %v10724_v46 }
 0x56d   :  { %v10718_v26 = vpop.f32.mrf.mxu1 }
 0x56e   :  { %13151 = vst [vmem:[#allocation35_spill] sm:$0xff] %v10718_v26  ;;  %v4502_v22 = vadd.f32 %v4501_v43, %v4487_v35  ;;  %v4469_v20 = vadd.f32 %v4468_v59, %v10732_v27 }
 0x56f   :  { %v10726_v55 = vpop.f32.mrf.mxu1 }
 0x570   :  { %13152 = vst [vmem:[#allocation32_spill] sm:$0xff] %v10726_v55  ;;  %v4503_v56 = vadd.f32 %v4502_v22, %v4488_v36  ;;  %v7742_v55 = vld [vmem:[%s12675_s1 + $0x47] ss:$8 sm:$0xf0] }
 0x571   :  { %v4136_v51 = vpop.f32.mrf.mxu1 }
 0x572   :  { %v10740_v41 = vadd.f32 %v4136_v51, %v10690_v53 }
 0x573   :  { %v4138_v62 = vpop.f32.mrf.mxu1 }
 0x574   :  { %v4489_v54 = vmul.f32 %v10740_v41, %v10740_v41  ;;  %v10748_v4 = vadd.f32 %v4138_v62, %v10690_v53  ;;  %v4470_v37 = vadd.f32 %v4469_v20, %v10740_v41 }
 0x576   :  { %v4504_v24 = vadd.f32 %v4503_v56, %v4489_v54  ;;  %v4490_v31 = vmul.f32 %v10748_v4, %v10748_v4  ;;  %v4471_v9 = vadd.f32 %v4470_v37, %v10748_v4 }
 0x578   :  { %v4505_v47 = vadd.f32 %v4504_v24, %v4490_v31 }
 0x5a6   :  { %v10734_v16 = vpop.f32.mrf.mxu0 }
 0x5a7   :  { %13153 = vst [vmem:[#allocation14_spill] sm:$0xff] %v10734_v16 }
 0x5a8   :  { %v10742_v45 = vpop.f32.mrf.mxu0 }
 0x5a9   :  { %13154 = vst [vmem:[#allocation18_spill] sm:$0xff] %v10742_v45 }
 0x5aa   :  { %v4213_v44 = vpop.f32.mrf.mxu0 }
 0x5ab   :  { %v10756_v40 = vadd.f32 %v4213_v44, %v10690_v53 }
 0x5ac   :  { %v4215_v21 = vpop.f32.mrf.mxu0 }
 0x5ad   :  { %v4491_v38 = vmul.f32 %v10756_v40, %v10756_v40  ;;  %v10766_v57 = vadd.f32 %v4215_v21, %v10690_v53  ;;  %v4472_v61 = vadd.f32 %v4471_v9, %v10756_v40 }
 0x5af   :  { %v4506_v3 = vadd.f32 %v4505_v47, %v4491_v38  ;;  %v4492_v0 = vmul.f32 %v10766_v57, %v10766_v57  ;;  %v4473_v2 = vadd.f32 %v4472_v61, %v10766_v57 }
 0x5b1   :  { %v4507_v48 = vadd.f32 %v4506_v3, %v4492_v0 }
 0x5c1   :  { %v10750_v30 = vpop.f32.mrf.mxu1 }
 0x5c2   :  { %13155 = vst [vmem:[#allocation19_spill] sm:$0xff] %v10750_v30 }
 0x5c3   :  { %v10758_v58 = vpop.f32.mrf.mxu1 }
 0x5c4   :  { %13156 = vst [vmem:[#allocation136_spill] sm:$0xff] %v10758_v58 }
 0x5c5   :  { %v4290_v52 = vpop.f32.mrf.mxu1 }
 0x5c6   :  { %v10774_v28 = vadd.f32 %v4290_v52, %v10690_v53 }
 0x5c7   :  { %v4292_v33 = vpop.f32.mrf.mxu1 }
 0x5c8   :  { %v4493_v12 = vmul.f32 %v10774_v28, %v10774_v28  ;;  %v10780_v11 = vadd.f32 %v4292_v33, %v10690_v53  ;;  %v4474_v15 = vadd.f32 %v4473_v2, %v10774_v28 }
 0x5ca   :  { %v4508_v35 = vadd.f32 %v4507_v48, %v4493_v12  ;;  %v4494_v51 = vmul.f32 %v10780_v11, %v10780_v11  ;;  %v4475_v59 = vadd.f32 %v4474_v15, %v10780_v11 }
 0x5cc   :  { %v4509_v20 = vadd.f32 %v4508_v35, %v4494_v51 }
 0x5fb   :  { %v10761_v39 = vpop.f32.mrf.mxu0 }
 0x5fc   :  { %13157 = vst [vmem:[#allocation15_spill] sm:$0xff] %v10761_v39 }
 0x5fd   :  { %v10769_v23 = vpop.f32.mrf.mxu0 }
 0x5fe   :  { %13158 = vst [vmem:[#allocation123_spill] sm:$0xff] %v10769_v23 }
 0x5ff   :  { %v4367_v32 = vpop.f32.mrf.mxu0 }
 0x600   :  { %v10784_v42 = vadd.f32 %v4367_v32, %v10690_v53  ;;  %v3814_v32 = vld [vmem:[%s12678_s3] sm:$0xff] }
 0x601   :  { %v4369_v43 = vpop.f32.mrf.mxu0 }
 0x602   :  { %v4495_v22 = vmul.f32 %v10784_v42, %v10784_v42  ;;  %v10792_v36 = vadd.f32 %v4369_v43, %v10690_v53  ;;  %v4476_v56 = vadd.f32 %v4475_v59, %v10784_v42  ;;  %v4617_v59 = vld [vmem:[%s12675_s1] ss:$8 sm:$0xf] }
 0x604   :  { %v4510_v44 = vadd.f32 %v4509_v20, %v4495_v22  ;;  %v4496_v37 = vmul.f32 %v10792_v36, %v10792_v36  ;;  %v4477_v31 = vadd.f32 %v4476_v56, %v10792_v36  ;;  %v4618_v22 = vld [vmem:[%s12675_s1] ss:$8 sm:$0xf0] }
 0x605   :  { %v4519_v20 = vld [vmem:[%s12679_s6] sm:$0xff]  ;;  %v4619_v56 = vor.u32 %v4618_v22, %v4617_v59 }
 0x606   :  { %v4511_v47 = vadd.f32 %v4510_v44, %v4496_v37 }
 0x60c   :  { %v10794_v62 = vpop.f32.mrf.mxu1 }
 0x60d   :  { %13159 = vst [vmem:[#allocation122_spill] sm:$0xff] %v10794_v62 }
 0x60e   :  { %v10797_v54 = vpop.f32.mrf.mxu1 }
 0x60f   :  { %13160 = vst [vmem:[#allocation109_spill] sm:$0xff] %v10797_v54 }
 0x610   :  { %v4444_v24 = vpop.f32.mrf.mxu1 }
 0x611   :  { %v10803_v21 = vadd.f32 %v4444_v24, %v10690_v53  ;;  %v4523_v24 = vld [vmem:[%s12680_s7] sm:$0xff] }
 0x612   :  { %v4446_v9 = vpop.f32.mrf.mxu1 }
 0x613   :  { %v4478_v38 = vadd.f32 %v4477_v31, %v10803_v21  ;;  %v4497_v52 = vmul.f32 %v10803_v21, %v10803_v21  ;;  %v10809_v61 = vadd.f32 %v4446_v9, %v10690_v53  ;;  %v4632_v9 = vrot.slane %v4619_v56, %v7885_v8 }
 0x615   :  { %v4498_v3 = vmul.f32 %v10809_v61, %v10809_v61  ;;  %v4479_v0 = vadd.f32 %v4478_v38, %v10809_v61  ;;  %v4512_v33 = vadd.f32 %v4511_v47, %v4497_v52  ;;  %v4640_v38 = vrot.slane %v4619_v56, %v7883_v7 }
 0x616   :  { %v4628_v52 = vrot.slane %v4619_v56, %v7881_v6 }
 0x617   :  { %4480 = vadd.xlane.f32.xlu1 %v4479_v0  ;;  %v4513_v2 = vadd.f32 %v4512_v33, %v4498_v3  ;;  %v4648_v3 = vrot.slane %v4619_v56, %v7893_v13  ;;  %v4636_v0 = vrot.slane %v4619_v56, %v7879_v5  ;;  %v7713_v33 = vld [vmem:[%s12675_s1 + $0x40] ss:$8 sm:$0xf] }
 0x619   :  { %4514 = vadd.xlane.f32.xlu0 %v4513_v2  ;;  %v7714_v2 = vld [vmem:[%s12675_s1 + $0x40] ss:$8 sm:$0xf0] }
 0x628   :  { %3818 = vperm.xlu1 %7766, %v3814_v32   ;;  %v4656_v32 = vrot.slane %v4619_v56, %v7901_v17 }
 0x6a0   :  { %v4481_v48 = vpop.xlane.xlu1 %4480 }
 0x6a1   :  { %v4482_v12 = vmul.f32 0.00048828125, %v4481_v48  ;;  %v4644_v48 = vrot.slane %v4619_v56, %v7895_v14 }
 0x6a2   :  { %v4515_v15 = vpop.xlane.xlu0 %4514 }
 0x6a3   :  { %v4517_v43 = vmul.f32 %v4482_v12, %v4482_v12  ;;  %v4516_v53 = vmul.f32 0.00048828125, %v4515_v15 }
 0x6a5   :  { %v4518_v35 = vsub.f32 %v4516_v53, %v4517_v43  ;;  %v4652_v43 = vrot.slane %v4619_v56, %v7903_v18 }
 0x6a7   :  { %v4520_v51 = vadd.f32 1e-05, %v4518_v35 }
 0x6a9   :  { %7767 = vrsqrt.f32 %v4520_v51 }
 0x6b6   :  { %v7768_v44 = vpop.eup %7767 }
 0x6b7   :  { %v4522_v37 = vmul.f32 %v7768_v44, %v4519_v20  ;;  %v10867_v44 = vpop.permute.xlu1 %3818 }
 0x6b8   :  { %13161 = vst [vmem:[#allocation108_spill] sm:$0xff] %v10867_v44 }
 0x6b9   :  { %4528 = vperm.xlu0 %7765, %v4522_v37   ;;  %v4524_v31 = vmul.f32 %v4522_v37, %v4482_v12  ;;  %v4622_v12 = vor.u32 %v7714_v2, %v7713_v33 }
 0x6bb   :  { %v4525_v47 = vsub.f32 %v4523_v24, %v4524_v31  ;;  %v4664_v15 = vrot.slane %v4622_v12, %v7885_v8  ;;  %v4672_v53 = vrot.slane %v4622_v12, %v7883_v7  ;;  %v4660_v35 = vrot.slane %v4622_v12, %v7881_v6 }
 0x6bc   :  { %v4680_v51 = vrot.slane %v4622_v12, %v7893_v13  ;;  %v4668_v59 = vrot.slane %v4622_v12, %v7879_v5  ;;  %v4688_v22 = vrot.slane %v4622_v12, %v7901_v17  ;;  %v4676_v20 = vrot.slane %v4622_v12, %v7895_v14 }
 0x6bd   :  { %4549 = vperm.xlu1 %7766, %v4525_v47   ;;  %4691 = vrot.lane.b32.xlu0 %v4632_v9, %s7818_s9  ;;  %v4684_v56 = vrot.slane %v4622_v12, %v7903_v18 }
 0x6c1   :  { %4695 = vrot.lane.b32.xlu0 %v4640_v38, %s7818_s9  ;;  %4689 = vrot.lane.b32.xlu1 %v4628_v52, %s7818_s9 }
 0x6c5   :  { %4699 = vrot.lane.b32.xlu0 %v4648_v3, %s7818_s9  ;;  %4693 = vrot.lane.b32.xlu1 %v4636_v0, %s7818_s9 }
 0x6c9   :  { %4703 = vrot.lane.b32.xlu0 %v4656_v32, %s7818_s9  ;;  %4697 = vrot.lane.b32.xlu1 %v4644_v48, %s7818_s9 }
 0x6cd   :  { %4707 = vrot.lane.b32.xlu0 %v4664_v15, %s7818_s9  ;;  %4701 = vrot.lane.b32.xlu1 %v4652_v43, %s7818_s9 }
 0x6d1   :  { %4711 = vrot.lane.b32.xlu0 %v4672_v53, %s7818_s9  ;;  %4705 = vrot.lane.b32.xlu1 %v4660_v35, %s7818_s9 }
 0x6d5   :  { %4715 = vrot.lane.b32.xlu0 %v4680_v51, %s7818_s9  ;;  %4709 = vrot.lane.b32.xlu1 %v4668_v59, %s7818_s9 }
 0x6d9   :  { %4719 = vrot.lane.b32.xlu0 %v4688_v22, %s7818_s9  ;;  %4713 = vrot.lane.b32.xlu1 %v4676_v20, %s7818_s9 }
 0x6dd   :  { %4717 = vrot.lane.b32.xlu1 %v4684_v56, %s7818_s9 }
 0x734   :  { %v10869_v37 = vpop.permute.xlu0 %4528 }
 0x735   :  { %v4531_v24 = vmul.f32 %v10869_v37, %v10695_v25  ;;  %v4532_v38 = vmul.f32 %v10869_v37, %v10698_v60  ;;  %v4533_v52 = vmul.f32 %v10869_v37, %v10703_v19  ;;  %v4534_v15 = vmul.f32 %v10869_v37, %v10716_v10 }
 0x736   :  { %v4535_v60 = vmul.f32 %v10869_v37, %v10724_v46  ;;  %v4536_v56 = vmul.f32 %v10869_v37, %v10732_v27 }
 0x738   :  { %v4692_v31 = vpop.permute.xlu0 %4691  ;;  %v10873_v9 = vpop.permute.xlu1 %4549 }
 0x739   :  { %v4552_v47 = vadd.f32 %v10873_v9, %v4531_v24  ;;  %v4553_v2 = vadd.f32 %v10873_v9, %v4532_v38  ;;  %v4554_v32 = vadd.f32 %v10873_v9, %v4533_v52  ;;  %v4555_v51 = vadd.f32 %v10873_v9, %v4534_v15 }
 0x73a   :  { %v4556_v59 = vadd.f32 %v10873_v9, %v4535_v60  ;;  %v4537_v24 = vmul.f32 %v10869_v37, %v10740_v41 }
 0x73b   :  { %v10880_v3 = vmax.f32 %v4552_v47, 0.0  ;;  %v10892_v43 = vmax.f32 %v4553_v2, 0.0  ;;  %v10894_v53 = vmax.f32 %v4554_v32, 0.0  ;;  %v10908_v38 = vmax.f32 %v4555_v51, 0.0 }
 0x73c   :  { %v4696_v0 = vpop.permute.xlu0 %4695  ;;  %v4690_v33 = vpop.permute.xlu1 %4689  ;;  %v4558_v2 = vadd.f32 %v10873_v9, %v4537_v24 }
 0x73d   :  { %v4721_v25 = vsel %vm236_vm0, %v4690_v33, %v4692_v31  ;;  %v4753_v48 = vmul.f32 0.0, %v4690_v33  ;;  %v4557_v33 = vadd.f32 %v10873_v9, %v4536_v56 }
 0x73e   :  { %v4754_v12 = vmul.f32 %v4721_v25, %v10880_v3 }
 0x73f   :  { %4787 = vrot.lane.b32.xlu1 %v4753_v48, %s7820_s23  ;;  %v4538_v48 = vmul.f32 %v10869_v37, %v10748_v4  ;;  %v10924_v60 = vmax.f32 %v4557_v33, 0.0 }
 0x740   :  { %v4700_v19 = vpop.permute.xlu0 %4699  ;;  %4789 = vrot.lane.b32.xlu0 %v4754_v12, %s7820_s23  ;;  %v4694_v35 = vpop.permute.xlu1 %4693  ;;  %v4539_v12 = vmul.f32 %v10869_v37, %v10756_v40 }
 0x741   :  { %v4722_v22 = vsel %vm236_vm0, %v4692_v31, %v4694_v35  ;;  %v4723_v10 = vsel %vm236_vm0, %v4694_v35, %v4696_v0  ;;  %v10910_v31 = vmax.f32 %v4556_v59, 0.0  ;;  %v4559_v51 = vadd.f32 %v10873_v9, %v4538_v48 }
 0x742   :  { %v4755_v46 = vmul.f32 %v4722_v22, %v10892_v43  ;;  %v4756_v20 = vmul.f32 %v4723_v10, %v10894_v53  ;;  %v4560_v59 = vadd.f32 %v10873_v9, %v4539_v12 }
 0x743   :  { %13162 = vst [vmem:[#allocation95_spill] sm:$0xff] %v10910_v31  ;;  %v10940_v24 = vmax.f32 %v4559_v51, 0.0 }
 0x744   :  { %v4704_v47 = vpop.permute.xlu0 %4703  ;;  %4793 = vrot.lane.b32.xlu0 %v4756_v20, %s7820_s23  ;;  %4791 = vrot.lane.b32.xlu1 %v4755_v46, %s7820_s23  ;;  %v4698_v52 = vpop.permute.xlu1 %4697  ;;  %v4540_v46 = vmul.f32 %v10869_v37, %v10766_v57  ;;  %v4541_v20 = vmul.f32 %v10869_v37, %v10774_v28 }
 0x745   :  { %v4724_v32 = vsel %vm236_vm0, %v4696_v0, %v4698_v52  ;;  %v4725_v27 = vsel %vm236_vm0, %v4698_v52, %v4700_v19  ;;  %v10926_v0 = vmax.f32 %v4558_v2, 0.0 }
 0x746   :  { %v4757_v41 = vmul.f32 %v4724_v32, %v10908_v38  ;;  %v4758_v25 = vmul.f32 %v4725_v27, %v10910_v31  ;;  %v4561_v33 = vadd.f32 %v10873_v9, %v4540_v46  ;;  %v4562_v2 = vadd.f32 %v10873_v9, %v4541_v20 }
 0x748   :  { %v4708_v15 = vpop.permute.xlu0 %4707  ;;  %4797 = vrot.lane.b32.xlu0 %v4758_v25, %s7820_s23  ;;  %4795 = vrot.lane.b32.xlu1 %v4757_v41, %s7820_s23  ;;  %v4702_v35 = vpop.permute.xlu1 %4701  ;;  %v4542_v41 = vmul.f32 %v10869_v37, %v10780_v11  ;;  %v4543_v25 = vmul.f32 %v10869_v37, %v10784_v42  ;;  %v10956_v48 = vmax.f32 %v4561_v33, 0.0  ;;  %v10958_v12 = vmax.f32 %v4562_v2, 0.0 }
 0x749   :  { %v4726_v22 = vsel %vm236_vm0, %v4700_v19, %v4702_v35  ;;  %v4727_v4 = vsel %vm236_vm0, %v4702_v35, %v4704_v47  ;;  %v10942_v19 = vmax.f32 %v4560_v59, 0.0 }
 0x74a   :  { %v4759_v40 = vmul.f32 %v4726_v22, %v10924_v60  ;;  %v4760_v10 = vmul.f32 %v4727_v4, %v10926_v0  ;;  %v4563_v35 = vadd.f32 %v10873_v9, %v4542_v41  ;;  %v4564_v51 = vadd.f32 %v10873_v9, %v4543_v25 }
 0x74c   :  { %v4712_v56 = vpop.permute.xlu0 %4711  ;;  %4801 = vrot.lane.b32.xlu0 %v4760_v10, %s7820_s23  ;;  %4799 = vrot.lane.b32.xlu1 %v4759_v40, %s7820_s23  ;;  %v4706_v52 = vpop.permute.xlu1 %4705  ;;  %v4544_v40 = vmul.f32 %v10869_v37, %v10792_v36  ;;  %v4545_v10 = vmul.f32 %v10869_v37, %v10803_v21  ;;  %v10972_v46 = vmax.f32 %v4563_v35, 0.0  ;;  %v7715_v21 = vld [vmem:[%s12675_s1 + $0x1] ss:$8 sm:$0xf] }
 0x74d   :  { %v4728_v32 = vsel %vm236_vm0, %v4704_v47, %v4706_v52  ;;  %v4729_v57 = vsel %vm236_vm0, %v4706_v52, %v4708_v15 }
 0x74e   :  { %v4761_v28 = vmul.f32 %v4728_v32, %v10940_v24  ;;  %v4762_v27 = vmul.f32 %v4729_v57, %v10942_v19  ;;  %v4565_v52 = vadd.f32 %v10873_v9, %v4544_v40  ;;  %v4566_v33 = vadd.f32 %v10873_v9, %v4545_v10  ;;  %v7716_v32 = vld [vmem:[%s12675_s1 + $0x1] ss:$8 sm:$0xf0] }
 0x74f   :  { %v4546_v57 = vmul.f32 %v10869_v37, %v10809_v61 }
 0x750   :  { %4805 = vrot.lane.b32.xlu0 %v4762_v27, %s7820_s23  ;;  %4803 = vrot.lane.b32.xlu1 %v4761_v28, %s7820_s23  ;;  %v4710_v47 = vpop.permute.xlu1 %4709  ;;  %v4716_v22 = vpop.permute.xlu0 %4715  ;;  %v10993_v25 = vmax.f32 %v4565_v52, 0.0  ;;  %v7717_v52 = vld [vmem:[%s12675_s1 + $0x41] ss:$8 sm:$0xf] }
 0x751   :  { %v4730_v59 = vsel %vm236_vm0, %v4708_v15, %v4710_v47  ;;  %v4731_v11 = vsel %vm236_vm0, %v4710_v47, %v4712_v56  ;;  %v10974_v15 = vmax.f32 %v4564_v51, 0.0  ;;  %v10995_v47 = vmax.f32 %v4566_v33, 0.0  ;;  %v7718_v33 = vld [vmem:[%s12675_s1 + $0x41] ss:$8 sm:$0xf0] }
 0x752   :  { %v4763_v42 = vmul.f32 %v4730_v59, %v10956_v48  ;;  %v4764_v4 = vmul.f32 %v4731_v11, %v10958_v12  ;;  %13163 = vst [vmem:[#allocation94_spill] sm:$0xff] %v10993_v25  ;;  %v4888_v51 = vor.u32 %v7716_v32, %v7715_v21  ;;  %v4891_v21 = vor.u32 %v7718_v33, %v7717_v52 }
 0x753   :  { %13164 = vst [vmem:[#allocation13_spill] sm:$0xff] %v10995_v47 }
 0x754   :  { %4809 = vrot.lane.b32.xlu0 %v4764_v4, %s7820_s23  ;;  %4807 = vrot.lane.b32.xlu1 %v4763_v42, %s7820_s23  ;;  %v4714_v20 = vpop.permute.xlu1 %4713  ;;  %v4720_v41 = vpop.permute.xlu0 %4719  ;;  %v4901_v40 = vrot.slane %v4888_v51, %v7885_v8  ;;  %v4913_v10 = vrot.slane %v4888_v51, %v7895_v14  ;;  %v4929_v32 = vrot.slane %v4891_v21, %v7881_v6 }
 0x755   :  { %v4732_v2 = vsel %vm236_vm0, %v4712_v56, %v4714_v20  ;;  %v4733_v36 = vsel %vm236_vm0, %v4714_v20, %v4716_v22  ;;  %v4567_v56 = vadd.f32 %v10873_v9, %v4546_v57  ;;  %v4897_v9 = vrot.slane %v4888_v51, %v7881_v6 }
 0x756   :  { %v4765_v28 = vmul.f32 %v4732_v2, %v10972_v46  ;;  %v4766_v27 = vmul.f32 %v4733_v36, %v10974_v15  ;;  %v4909_v20 = vrot.slane %v4888_v51, %v7883_v7  ;;  %v4921_v2 = vrot.slane %v4888_v51, %v7903_v18 }
 0x757   :  { %v11001_v42 = vmax.f32 %v4567_v56, 0.0  ;;  %v4917_v36 = vrot.slane %v4888_v51, %v7893_v13  ;;  %v4925_v57 = vrot.slane %v4888_v51, %v7901_v17  ;;  %v4941_v56 = vrot.slane %v4891_v21, %v7883_v7 }
 0x758   :  { %4813 = vrot.lane.b32.xlu0 %v4766_v27, %s7820_s23  ;;  %4811 = vrot.lane.b32.xlu1 %v4765_v28, %s7820_s23  ;;  %v4718_v35 = vpop.permute.xlu1 %4717  ;;  %v4937_v28 = vrot.slane %v4891_v21, %v7879_v5  ;;  %v4933_v27 = vrot.slane %v4891_v21, %v7885_v8 }
 0x759   :  { %v4734_v59 = vsel %vm236_vm0, %v4716_v22, %v4718_v35  ;;  %v4735_v61 = vsel %vm236_vm0, %v4718_v35, %v4720_v41  ;;  %13165 = vst [vmem:[#allocation12_spill] sm:$0xff] %v11001_v42  ;;  %v4769_v4 = vmul.f32 %v4720_v41, %v11001_v42  ;;  %v4905_v22 = vrot.slane %v4888_v51, %v7879_v5 }
 0x75a   :  { %v4767_v37 = vmul.f32 %v4734_v59, %v10993_v25  ;;  %v4768_v11 = vmul.f32 %v4735_v61, %v10995_v47  ;;  %v4945_v41 = vrot.slane %v4891_v21, %v7895_v14  ;;  %v4953_v35 = vrot.slane %v4891_v21, %v7903_v18 }
 0x75b   :  { %v4949_v51 = vrot.slane %v4891_v21, %v7893_v13  ;;  %v4957_v59 = vrot.slane %v4891_v21, %v7901_v17 }
 0x75c   :  { %4817 = vrot.lane.b32.xlu0 %v4768_v11, %s7820_s23  ;;  %4815 = vrot.lane.b32.xlu1 %v4767_v37, %s7820_s23 }
 0x760   :  { %4958 = vrot.lane.b32.xlu0 %v4897_v9, %s7819_s18  ;;  %4819 = vrot.lane.b32.xlu1 %v4769_v4, %s7820_s23 }
 0x764   :  { %4962 = vrot.lane.b32.xlu0 %v4905_v22, %s7819_s18  ;;  %4960 = vrot.lane.b32.xlu1 %v4901_v40, %s7819_s18 }
 0x768   :  { %4966 = vrot.lane.b32.xlu0 %v4913_v10, %s7819_s18  ;;  %4964 = vrot.lane.b32.xlu1 %v4909_v20, %s7819_s18 }
 0x76c   :  { %4970 = vrot.lane.b32.xlu0 %v4921_v2, %s7819_s18  ;;  %4968 = vrot.lane.b32.xlu1 %v4917_v36, %s7819_s18 }
 0x770   :  { %4974 = vrot.lane.b32.xlu0 %v4929_v32, %s7819_s18  ;;  %4972 = vrot.lane.b32.xlu1 %v4925_v57, %s7819_s18 }
 0x774   :  { %4978 = vrot.lane.b32.xlu0 %v4937_v28, %s7819_s18  ;;  %4976 = vrot.lane.b32.xlu1 %v4933_v27, %s7819_s18 }
 0x778   :  { %4982 = vrot.lane.b32.xlu0 %v4945_v41, %s7819_s18  ;;  %4980 = vrot.lane.b32.xlu1 %v4941_v56, %s7819_s18 }
 0x77c   :  { %4986 = vrot.lane.b32.xlu0 %v4953_v35, %s7819_s18  ;;  %4984 = vrot.lane.b32.xlu1 %v4949_v51, %s7819_s18 }
 0x780   :  { %4988 = vrot.lane.b32.xlu1 %v4957_v59, %s7819_s18 }
 0x7b1   :  { %v11045_v61 = vpop.permute.xlu1 %4787 }
 0x7b2   :  { %13166 = vst [vmem:[#allocation69_spill] sm:$0xff] %v11045_v61  ;;  %v11047_v37 = vpop.permute.xlu0 %4789 }
 0x7b3   :  { %13167 = vst [vmem:[#allocation68_spill] sm:$0xff] %v11047_v37 }
 0x7b6   :  { %v11049_v11 = vpop.permute.xlu0 %4793  ;;  %v11051_v9 = vpop.permute.xlu1 %4791 }
 0x7b7   :  { %13168 = vst [vmem:[#allocation52_spill] sm:$0xff] %v11049_v11  ;;  %13169 = vst [vmem:[#allocation51_spill] sm:$0xff] %v11051_v9 }
 0x7ba   :  { %v11053_v4 = vpop.permute.xlu0 %4797  ;;  %v11055_v22 = vpop.permute.xlu1 %4795 }
 0x7bb   :  { %13170 = vst [vmem:[#allocation37_spill] sm:$0xff] %v11053_v4  ;;  %13171 = vst [vmem:[#allocation34_spill] sm:$0xff] %v11055_v22 }
 0x7be   :  { %v11057_v40 = vpop.permute.xlu0 %4801  ;;  %v11059_v10 = vpop.permute.xlu1 %4799 }
 0x7bf   :  { %13172 = vst [vmem:[#allocation20_spill] sm:$0xff] %v11057_v40  ;;  %13173 = vst [vmem:[#allocation21_spill] sm:$0xff] %v11059_v10 }
 0x7c2   :  { %v11061_v20 = vpop.permute.xlu0 %4805  ;;  %v11063_v52 = vpop.permute.xlu1 %4803 }
 0x7c3   :  { %13174 = vst [vmem:[#allocation137_spill] sm:$0xff] %v11061_v20  ;;  %13175 = vst [vmem:[#allocation138_spill] sm:$0xff] %v11063_v52 }
 0x7c6   :  { %v11065_v33 = vpop.permute.xlu0 %4809  ;;  %v11067_v2 = vpop.permute.xlu1 %4807 }
 0x7c7   :  { %13176 = vst [vmem:[#allocation142_spill] sm:$0xff] %v11065_v33  ;;  %13177 = vst [vmem:[#allocation139_spill] sm:$0xff] %v11067_v2 }
 0x7ca   :  { %v11069_v36 = vpop.permute.xlu0 %4813  ;;  %v11071_v21 = vpop.permute.xlu1 %4811 }
 0x7cb   :  { %13178 = vst [vmem:[#allocation140_spill] sm:$0xff] %v11069_v36  ;;  %13179 = vst [vmem:[#allocation125_spill] sm:$0xff] %v11071_v21 }
 0x7ce   :  { %v11073_v32 = vpop.permute.xlu0 %4817  ;;  %v11075_v57 = vpop.permute.xlu1 %4815 }
 0x7cf   :  { %13180 = vst [vmem:[#allocation124_spill] sm:$0xff] %v11073_v32  ;;  %13181 = vst [vmem:[#allocation111_spill] sm:$0xff] %v11075_v57 }
 0x7d2   :  { %v4959_v28 = vpop.permute.xlu0 %4958  ;;  %v11077_v27 = vpop.permute.xlu1 %4819 }
 0x7d3   :  { %13182 = vst [vmem:[#allocation110_spill] sm:$0xff] %v11077_v27  ;;  %v5022_v41 = vmul.f32 0.0, %v4959_v28 }
 0x7d5   :  { %5056 = vrot.lane.b32.xlu0 %v5022_v41, %s7821_s10 }
 0x7d6   :  { %v4963_v56 = vpop.permute.xlu0 %4962  ;;  %v4961_v35 = vpop.permute.xlu1 %4960 }
 0x7d7   :  { %v4990_v51 = vsel %vm642_vm1, %v4959_v28, %v4961_v35  ;;  %v4991_v59 = vsel %vm642_vm1, %v4961_v35, %v4963_v56 }
 0x7d8   :  { %v5023_v54 = vmul.f32 %v4990_v51, %v10880_v3  ;;  %v5024_v62 = vmul.f32 %v4991_v59, %v10892_v43 }
 0x7da   :  { %v4967_v23 = vpop.permute.xlu0 %4966  ;;  %5060 = vrot.lane.b32.xlu0 %v5024_v62, %s7821_s10  ;;  %5058 = vrot.lane.b32.xlu1 %v5023_v54, %s7821_s10  ;;  %v4965_v39 = vpop.permute.xlu1 %4964 }
 0x7db   :  { %v4992_v58 = vsel %vm642_vm1, %v4963_v56, %v4965_v39  ;;  %v4993_v41 = vsel %vm642_vm1, %v4965_v39, %v4967_v23 }
 0x7dc   :  { %v5025_v30 = vmul.f32 %v4992_v58, %v10894_v53  ;;  %v5026_v28 = vmul.f32 %v4993_v41, %v10908_v38 }
 0x7de   :  { %v4971_v45 = vpop.permute.xlu0 %4970  ;;  %5064 = vrot.lane.b32.xlu0 %v5026_v28, %s7821_s10  ;;  %5062 = vrot.lane.b32.xlu1 %v5025_v30, %s7821_s10  ;;  %v4969_v35 = vpop.permute.xlu1 %4968 }
 0x7df   :  { %v4994_v51 = vsel %vm642_vm1, %v4967_v23, %v4969_v35  ;;  %v4995_v62 = vsel %vm642_vm1, %v4969_v35, %v4971_v45 }
 0x7e0   :  { %v5027_v54 = vmul.f32 %v4994_v51, %v10910_v31  ;;  %v5028_v56 = vmul.f32 %v4995_v62, %v10924_v60 }
 0x7e2   :  { %v4975_v59 = vpop.permute.xlu0 %4974  ;;  %5068 = vrot.lane.b32.xlu0 %v5028_v56, %s7821_s10  ;;  %5066 = vrot.lane.b32.xlu1 %v5027_v54, %s7821_s10  ;;  %v4973_v58 = vpop.permute.xlu1 %4972 }
 0x7e3   :  { %v4996_v39 = vsel %vm642_vm1, %v4971_v45, %v4973_v58  ;;  %v4997_v41 = vsel %vm642_vm1, %v4973_v58, %v4975_v59 }
 0x7e4   :  { %v5029_v30 = vmul.f32 %v4996_v39, %v10926_v0  ;;  %v5030_v23 = vmul.f32 %v4997_v41, %v10940_v24 }
 0x7e6   :  { %v4979_v28 = vpop.permute.xlu0 %4978  ;;  %5072 = vrot.lane.b32.xlu0 %v5030_v23, %s7821_s10  ;;  %5070 = vrot.lane.b32.xlu1 %v5029_v30, %s7821_s10  ;;  %v4977_v35 = vpop.permute.xlu1 %4976 }
 0x7e7   :  { %v4998_v51 = vsel %vm642_vm1, %v4975_v59, %v4977_v35  ;;  %v4999_v62 = vsel %vm642_vm1, %v4977_v35, %v4979_v28 }
 0x7e8   :  { %v5031_v54 = vmul.f32 %v4998_v51, %v10942_v19  ;;  %v5032_v45 = vmul.f32 %v4999_v62, %v10956_v48 }
 0x7ea   :  { %v4983_v56 = vpop.permute.xlu0 %4982  ;;  %5076 = vrot.lane.b32.xlu0 %v5032_v45, %s7821_s10  ;;  %5074 = vrot.lane.b32.xlu1 %v5031_v54, %s7821_s10  ;;  %v4981_v58 = vpop.permute.xlu1 %4980  ;;  %v7720_v54 = vld [vmem:[%s12675_s1 + $0x2] ss:$8 sm:$0xf0] }
 0x7eb   :  { %v5000_v39 = vsel %vm642_vm1, %v4979_v28, %v4981_v58  ;;  %v5001_v41 = vsel %vm642_vm1, %v4981_v58, %v4983_v56  ;;  %v7719_v28 = vld [vmem:[%s12675_s1 + $0x2] ss:$8 sm:$0xf] }
 0x7ec   :  { %v5033_v30 = vmul.f32 %v5000_v39, %v10958_v12  ;;  %v5034_v59 = vmul.f32 %v5001_v41, %v10972_v46 }
 0x7ee   :  { %v4987_v23 = vpop.permute.xlu0 %4986  ;;  %5080 = vrot.lane.b32.xlu0 %v5034_v59, %s7821_s10  ;;  %5078 = vrot.lane.b32.xlu1 %v5033_v30, %s7821_s10  ;;  %v4985_v35 = vpop.permute.xlu1 %4984 }
 0x7ef   :  { %v5002_v51 = vsel %vm642_vm1, %v4983_v56, %v4985_v35  ;;  %v5003_v62 = vsel %vm642_vm1, %v4985_v35, %v4987_v23  ;;  %v11128_v56 = vor.u32 %v7720_v54, %v7719_v28 }
 0x7f0   :  { %v5035_v45 = vmul.f32 %v5002_v51, %v10974_v15  ;;  %v5036_v58 = vmul.f32 %v5003_v62, %v10993_v25  ;;  %v7743_v62 = vld [vmem:[%s12675_s1 + $0x80] ss:$8 sm:$0xf] }
 0x7f1   :  { %v5170_v35 = vrot.slane %v11128_v56, %v7885_v8  ;;  %v5166_v51 = vrot.slane %v11128_v56, %v7881_v6  ;;  %v5178_v28 = vrot.slane %v11128_v56, %v7883_v7  ;;  %v5174_v54 = vrot.slane %v11128_v56, %v7879_v5 }
 0x7f2   :  { %5084 = vrot.lane.b32.xlu0 %v5036_v58, %s7821_s10  ;;  %5082 = vrot.lane.b32.xlu1 %v5035_v45, %s7821_s10  ;;  %v4989_v39 = vpop.permute.xlu1 %4988 }
 0x7f3   :  { %v5004_v41 = vsel %vm642_vm1, %v4987_v23, %v4989_v39  ;;  %v5038_v30 = vmul.f32 %v4989_v39, %v11001_v42  ;;  %v7744_v23 = vld [vmem:[%s12675_s1 + $0x80] ss:$8 sm:$0xf0]  ;;  %v5182_v39 = vrot.slane %v11128_v56, %v7895_v14 }
 0x7f4   :  { %v5037_v59 = vmul.f32 %v5004_v41, %v10995_v47  ;;  %v11151_v45 = vor.u32 %v7744_v23, %v7743_v62 }
 0x7f6   :  { %5088 = vrot.lane.b32.xlu0 %v5038_v30, %s7821_s10  ;;  %5086 = vrot.lane.b32.xlu1 %v5037_v59, %s7821_s10  ;;  %v6647_v58 = vrot.slane %v11151_v45, %v7881_v6  ;;  %v6655_v41 = vrot.slane %v11151_v45, %v7879_v5  ;;  %v6651_v30 = vrot.slane %v11151_v45, %v7885_v8  ;;  %v7739_v59 = vld [vmem:[%s12675_s1 + $0x7] ss:$8 sm:$0xf] }
 0x7f7   :  { %v6659_v62 = vrot.slane %v11151_v45, %v7883_v7 }
 0x7fa   :  { %5229 = vrot.lane.b32.xlu0 %v5170_v35, %s7822_s15  ;;  %5227 = vrot.lane.b32.xlu1 %v5166_v51, %s7822_s15  ;;  %v7740_v35 = vld [vmem:[%s12675_s1 + $0x7] ss:$8 sm:$0xf0]  ;;  %v6663_v51 = vrot.slane %v11151_v45, %v7895_v14 }
 0x7fb   :  { %v11177_v23 = vor.u32 %v7740_v35, %v7739_v59 }
 0x7fe   :  { %5233 = vrot.lane.b32.xlu0 %v5178_v28, %s7822_s15  ;;  %5231 = vrot.lane.b32.xlu1 %v5174_v54, %s7822_s15  ;;  %v6382_v28 = vrot.slane %v11177_v23, %v7885_v8  ;;  %v6378_v54 = vrot.slane %v11177_v23, %v7881_v6 }
 0x802   :  { %6708 = vrot.lane.b32.xlu0 %v6647_v58, %s7820_s23  ;;  %5235 = vrot.lane.b32.xlu1 %v5182_v39, %s7822_s15  ;;  %v7735_v58 = vld [vmem:[%s12675_s1 + $0x6] ss:$8 sm:$0xf] }
 0x803   :  { %v7736_v39 = vld [vmem:[%s12675_s1 + $0x6] ss:$8 sm:$0xf0] }
 0x804   :  { %v11197_v59 = vor.u32 %v7736_v39, %v7735_v58  ;;  %v7732_v58 = vld [vmem:[%s12675_s1 + $0x5] ss:$8 sm:$0xf0] }
 0x806   :  { %6712 = vrot.lane.b32.xlu0 %v6655_v41, %s7820_s23  ;;  %6710 = vrot.lane.b32.xlu1 %v6651_v30, %s7820_s23  ;;  %v6390_v41 = vrot.slane %v11177_v23, %v7883_v7  ;;  %v6386_v30 = vrot.slane %v11177_v23, %v7879_v5  ;;  %v6109_v35 = vrot.slane %v11197_v59, %v7881_v6 }
 0x807   :  { %v6125_v39 = vrot.slane %v11197_v59, %v7895_v14 }
 0x80a   :  { %6716 = vrot.lane.b32.xlu0 %v6663_v51, %s7820_s23  ;;  %6714 = vrot.lane.b32.xlu1 %v6659_v62, %s7820_s23  ;;  %v6394_v51 = vrot.slane %v11177_v23, %v7895_v14  ;;  %v6117_v62 = vrot.slane %v11197_v59, %v7879_v5 }
 0x80e   :  { %6441 = vrot.lane.b32.xlu0 %v6382_v28, %s7821_s10  ;;  %6439 = vrot.lane.b32.xlu1 %v6378_v54, %s7821_s10  ;;  %v6113_v28 = vrot.slane %v11197_v59, %v7885_v8  ;;  %v7731_v54 = vld [vmem:[%s12675_s1 + $0x5] ss:$8 sm:$0xf] }
 0x812   :  { %6445 = vrot.lane.b32.xlu0 %v6390_v41, %s7821_s10  ;;  %6443 = vrot.lane.b32.xlu1 %v6386_v30, %s7821_s10  ;;  %v6121_v41 = vrot.slane %v11197_v59, %v7883_v7  ;;  %v11223_v30 = vor.u32 %v7732_v58, %v7731_v54 }
 0x814   :  { %v5852_v54 = vrot.slane %v11223_v30, %v7883_v7  ;;  %v5848_v58 = vrot.slane %v11223_v30, %v7879_v5 }
 0x816   :  { %6170 = vrot.lane.b32.xlu0 %v6109_v35, %s7823_s21  ;;  %6447 = vrot.lane.b32.xlu1 %v6394_v51, %s7821_s10  ;;  %v5844_v35 = vrot.slane %v11223_v30, %v7885_v8  ;;  %v5840_v51 = vrot.slane %v11223_v30, %v7881_v6 }
 0x81a   :  { %6174 = vrot.lane.b32.xlu0 %v6117_v62, %s7823_s21  ;;  %6172 = vrot.lane.b32.xlu1 %v6113_v28, %s7823_s21  ;;  %v7723_v62 = vld [vmem:[%s12675_s1 + $0x3] ss:$8 sm:$0xf] }
 0x81b   :  { %v7724_v28 = vld [vmem:[%s12675_s1 + $0x3] ss:$8 sm:$0xf0] }
 0x81e   :  { %6178 = vrot.lane.b32.xlu0 %v6125_v39, %s7823_s21  ;;  %6176 = vrot.lane.b32.xlu1 %v6121_v41, %s7823_s21  ;;  %v11243_v39 = vor.u32 %v7724_v28, %v7723_v62 }
 0x820   :  { %v5435_v41 = vrot.slane %v11243_v39, %v7881_v6  ;;  %v5439_v62 = vrot.slane %v11243_v39, %v7885_v8  ;;  %v5451_v28 = vrot.slane %v11243_v39, %v7895_v14 }
 0x822   :  { %5903 = vrot.lane.b32.xlu0 %v5844_v35, %s7825_s12  ;;  %5901 = vrot.lane.b32.xlu1 %v5840_v51, %s7825_s12  ;;  %v5856_v35 = vrot.slane %v11223_v30, %v7895_v14  ;;  %v5443_v51 = vrot.slane %v11243_v39, %v7879_v5 }
 0x826   :  { %5907 = vrot.lane.b32.xlu0 %v5852_v54, %s7825_s12  ;;  %5905 = vrot.lane.b32.xlu1 %v5848_v58, %s7825_s12  ;;  %v5447_v54 = vrot.slane %v11243_v39, %v7883_v7  ;;  %v7745_v58 = vld [vmem:[%s12675_s1 + $0xc0] ss:$8 sm:$0xf] }
 0x82a   :  { %5496 = vrot.lane.b32.xlu0 %v5435_v41, %s7824_s27  ;;  %5909 = vrot.lane.b32.xlu1 %v5856_v35, %s7825_s12  ;;  %v7746_v41 = vld [vmem:[%s12675_s1 + $0xc0] ss:$8 sm:$0xf0]  ;;  %v6671_v35 = vrot.slane %v11151_v45, %v7903_v18 }
 0x82e   :  { %5500 = vrot.lane.b32.xlu0 %v5443_v51, %s7824_s27  ;;  %5498 = vrot.lane.b32.xlu1 %v5439_v62, %s7824_s27  ;;  %v6667_v51 = vrot.slane %v11151_v45, %v7893_v13  ;;  %v11275_v62 = vor.u32 %v7746_v41, %v7745_v58  ;;  %v6402_v58 = vrot.slane %v11177_v23, %v7903_v18 }
 0x82f   :  { %v6398_v41 = vrot.slane %v11177_v23, %v7893_v13 }
 0x830   :  { %v6679_v16 = vrot.slane %v11275_v62, %v7881_v6  ;;  %v6703_v11 = vrot.slane %v11275_v62, %v7903_v18 }
 0x832   :  { %5504 = vrot.lane.b32.xlu0 %v5451_v28, %s7824_s27  ;;  %5502 = vrot.lane.b32.xlu1 %v5447_v54, %s7824_s27  ;;  %v6675_v28 = vrot.slane %v11151_v45, %v7901_v17  ;;  %v7741_v54 = vld [vmem:[%s12675_s1 + $0x47] ss:$8 sm:$0xf] }
 0x836   :  { %6720 = vrot.lane.b32.xlu0 %v6671_v35, %s7820_s23  ;;  %6718 = vrot.lane.b32.xlu1 %v6667_v51, %s7820_s23  ;;  %v11295_v35 = vor.u32 %v7742_v55, %v7741_v54  ;;  %v7737_v51 = vld [vmem:[%s12675_s1 + $0x46] ss:$8 sm:$0xf]  ;;  %v6133_v55 = vrot.slane %v11197_v59, %v7903_v18  ;;  %v6129_v54 = vrot.slane %v11197_v59, %v7893_v13 }
 0x838   :  { %v6410_v45 = vrot.slane %v11295_v35, %v7881_v6  ;;  %v6430_v22 = vrot.slane %v11295_v35, %v7893_v13  ;;  %v6438_v37 = vrot.slane %v11295_v35, %v7901_v17 }
 0x83a   :  { %6724 = vrot.lane.b32.xlu0 %v6679_v16, %s7820_s23  ;;  %6722 = vrot.lane.b32.xlu1 %v6675_v28, %s7820_s23  ;;  %v6406_v16 = vrot.slane %v11177_v23, %v7901_v17  ;;  %v7738_v28 = vld [vmem:[%s12675_s1 + $0x46] ss:$8 sm:$0xf0] }
 0x83e   :  { %6451 = vrot.lane.b32.xlu0 %v6402_v58, %s7821_s10  ;;  %6449 = vrot.lane.b32.xlu1 %v6398_v41, %s7821_s10  ;;  %v11315_v58 = vor.u32 %v7738_v28, %v7737_v51  ;;  %v6137_v41 = vrot.slane %v11197_v59, %v7901_v17  ;;  %v7734_v51 = vld [vmem:[%s12675_s1 + $0x45] ss:$8 sm:$0xf0]  ;;  %v5864_v28 = vrot.slane %v11223_v30, %v7903_v18 }
 0x83f   :  { %v5860_v59 = vrot.slane %v11223_v30, %v7893_v13 }
 0x840   :  { %v6141_v23 = vrot.slane %v11315_v58, %v7881_v6  ;;  %v6149_v33 = vrot.slane %v11315_v58, %v7879_v5 }
 0x842   :  { %6455 = vrot.lane.b32.xlu0 %v6410_v45, %s7821_s10  ;;  %6453 = vrot.lane.b32.xlu1 %v6406_v16, %s7821_s10  ;;  %v7733_v16 = vld [vmem:[%s12675_s1 + $0x45] ss:$8 sm:$0xf] }
 0x846   :  { %6182 = vrot.lane.b32.xlu0 %v6133_v55, %s7823_s21  ;;  %6180 = vrot.lane.b32.xlu1 %v6129_v54, %s7823_s21  ;;  %v11337_v55 = vor.u32 %v7734_v51, %v7733_v16  ;;  %v7726_v16 = vld [vmem:[%s12675_s1 + $0x43] ss:$8 sm:$0xf0] }
 0x847   :  { %v11323_v45 = vpop.permute.xlu0 %5056 }
 0x848   :  { %13183 = vst [vmem:[#allocation97_spill] sm:$0xff] %v11323_v45  ;;  %v5880_v20 = vrot.slane %v11337_v55, %v7879_v5  ;;  %v5900_v45 = vrot.slane %v11337_v55, %v7901_v17 }
 0x84a   :  { %6186 = vrot.lane.b32.xlu0 %v6141_v23, %s7823_s21  ;;  %6184 = vrot.lane.b32.xlu1 %v6137_v41, %s7823_s21  ;;  %v5872_v23 = vrot.slane %v11337_v55, %v7881_v6  ;;  %v5868_v41 = vrot.slane %v11223_v30, %v7901_v17  ;;  %v5455_v30 = vrot.slane %v11243_v39, %v7893_v13 }
 0x84c   :  { %v11339_v54 = vpop.permute.xlu0 %5060  ;;  %v11341_v26 = vpop.permute.xlu1 %5058 }
 0x84d   :  { %13184 = vst [vmem:[#allocation96_spill] sm:$0xff] %v11339_v54  ;;  %13185 = vst [vmem:[#allocation83_spill] sm:$0xff] %v11341_v26 }
 0x84e   :  { %5913 = vrot.lane.b32.xlu0 %v5864_v28, %s7825_s12  ;;  %5911 = vrot.lane.b32.xlu1 %v5860_v59, %s7825_s12  ;;  %v5459_v28 = vrot.slane %v11243_v39, %v7903_v18  ;;  %v11365_v59 = vor.u32 %v7726_v16, %v7725_v50  ;;  %v7722_v50 = vld [vmem:[%s12675_s1 + $0x42] ss:$8 sm:$0xf0] }
 0x850   :  { %v11355_v51 = vpop.permute.xlu0 %5064  ;;  %v11357_v49 = vpop.permute.xlu1 %5062  ;;  %v5475_v40 = vrot.slane %v11365_v59, %v7879_v5 }
 0x851   :  { %13186 = vst [vmem:[#allocation82_spill] sm:$0xff] %v11355_v51  ;;  %13187 = vst [vmem:[#allocation71_spill] sm:$0xff] %v11357_v49 }
 0x852   :  { %5917 = vrot.lane.b32.xlu0 %v5872_v23, %s7825_s12  ;;  %5915 = vrot.lane.b32.xlu1 %v5868_v41, %s7825_s12  ;;  %v5467_v23 = vrot.slane %v11365_v59, %v7881_v6  ;;  %v5463_v41 = vrot.slane %v11243_v39, %v7901_v17  ;;  %v5186_v39 = vrot.slane %v11128_v56, %v7893_v13 }
 0x854   :  { %v11367_v1 = vpop.permute.xlu0 %5068  ;;  %v11369_v63 = vpop.permute.xlu1 %5066 }
 0x855   :  { %13188 = vst [vmem:[#allocation70_spill] sm:$0xff] %v11367_v1  ;;  %13189 = vst [vmem:[#allocation54_spill] sm:$0xff] %v11369_v63 }
 0x856   :  { %5508 = vrot.lane.b32.xlu0 %v5459_v28, %s7824_s27  ;;  %5506 = vrot.lane.b32.xlu1 %v5455_v30, %s7824_s27  ;;  %v5190_v28 = vrot.slane %v11128_v56, %v7903_v18  ;;  %v11393_v30 = vor.u32 %v7722_v50, %v7721_v29  ;;  %v6687_v29 = vrot.slane %v11275_v62, %v7879_v5 }
 0x857   :  { %v6683_v50 = vrot.slane %v11275_v62, %v7885_v8 }
 0x858   :  { %v11383_v16 = vpop.permute.xlu0 %5072  ;;  %v11385_v34 = vpop.permute.xlu1 %5070  ;;  %v5206_v4 = vrot.slane %v11393_v30, %v7879_v5  ;;  %v5214_v63 = vrot.slane %v11393_v30, %v7895_v14 }
 0x859   :  { %13190 = vst [vmem:[#allocation53_spill] sm:$0xff] %v11383_v16  ;;  %13191 = vst [vmem:[#allocation22_spill] sm:$0xff] %v11385_v34  ;;  %v5483_v34 = vrot.slane %v11365_v59, %v7895_v14 }
 0x85a   :  { %5512 = vrot.lane.b32.xlu0 %v5467_v23, %s7824_s27  ;;  %5510 = vrot.lane.b32.xlu1 %v5463_v41, %s7824_s27  ;;  %v5198_v23 = vrot.slane %v11393_v30, %v7881_v6  ;;  %v5194_v41 = vrot.slane %v11128_v56, %v7901_v17  ;;  %v6695_v56 = vrot.slane %v11275_v62, %v7895_v14 }
 0x85c   :  { %v11395_v44 = vpop.permute.xlu0 %5076  ;;  %v11397_v32 = vpop.permute.xlu1 %5074 }
 0x85d   :  { %13192 = vst [vmem:[#allocation23_spill] sm:$0xff] %v11395_v44  ;;  %13193 = vst [vmem:[#allocation39_spill] sm:$0xff] %v11397_v32  ;;  %v5888_v32 = vrot.slane %v11337_v55, %v7895_v14 }
 0x85e   :  { %5239 = vrot.lane.b32.xlu0 %v5190_v28, %s7822_s15  ;;  %5237 = vrot.lane.b32.xlu1 %v5186_v39, %s7822_s15 }
 0x860   :  { %v11405_v27 = vpop.permute.xlu0 %5080  ;;  %v11407_v36 = vpop.permute.xlu1 %5078 }
 0x861   :  { %13194 = vst [vmem:[#allocation36_spill] sm:$0xff] %v11405_v27  ;;  %13195 = vst [vmem:[#allocation127_spill] sm:$0xff] %v11407_v36  ;;  %v6157_v36 = vrot.slane %v11315_v58, %v7895_v14 }
 0x862   :  { %5243 = vrot.lane.b32.xlu0 %v5198_v23, %s7822_s15  ;;  %5241 = vrot.lane.b32.xlu1 %v5194_v41, %s7822_s15  ;;  %v6691_v23 = vrot.slane %v11275_v62, %v7883_v7 }
 0x864   :  { %v11415_v28 = vpop.permute.xlu0 %5084  ;;  %v11417_v39 = vpop.permute.xlu1 %5082 }
 0x865   :  { %13196 = vst [vmem:[#allocation126_spill] sm:$0xff] %v11415_v28  ;;  %13197 = vst [vmem:[#allocation113_spill] sm:$0xff] %v11417_v39  ;;  %v6418_v39 = vrot.slane %v11295_v35, %v7879_v5 }
 0x866   :  { %6728 = vrot.lane.b32.xlu0 %v6687_v29, %s7820_s23  ;;  %6726 = vrot.lane.b32.xlu1 %v6683_v50, %s7820_s23  ;;  %v6414_v29 = vrot.slane %v11295_v35, %v7885_v8 }
 0x868   :  { %v11425_v41 = vpop.permute.xlu0 %5088  ;;  %v11427_v57 = vpop.permute.xlu1 %5086 }
 0x869   :  { %13198 = vst [vmem:[#allocation112_spill] sm:$0xff] %v11425_v41  ;;  %13199 = vst [vmem:[#allocation99_spill] sm:$0xff] %v11427_v57  ;;  %v6426_v57 = vrot.slane %v11295_v35, %v7895_v14 }
 0x86a   :  { %6732 = vrot.lane.b32.xlu0 %v6695_v56, %s7820_s23  ;;  %6730 = vrot.lane.b32.xlu1 %v6691_v23, %s7820_s23  ;;  %v6422_v56 = vrot.slane %v11295_v35, %v7883_v7 }
 0x86c   :  { %v11435_v50 = vpop.permute.xlu0 %5229  ;;  %v11437_v28 = vpop.permute.xlu1 %5227 }
 0x86e   :  { %6459 = vrot.lane.b32.xlu0 %v6418_v39, %s7821_s10  ;;  %6457 = vrot.lane.b32.xlu1 %v6414_v29, %s7821_s10  ;;  %v6145_v39 = vrot.slane %v11315_v58, %v7885_v8 }
 0x870   :  { %v11445_v23 = vpop.permute.xlu0 %5233  ;;  %v11447_v41 = vpop.permute.xlu1 %5231 }
 0x872   :  { %6463 = vrot.lane.b32.xlu0 %v6426_v57, %s7821_s10  ;;  %6461 = vrot.lane.b32.xlu1 %v6422_v56, %s7821_s10  ;;  %v6153_v57 = vrot.slane %v11315_v58, %v7883_v7 }
 0x874   :  { %v11455_v29 = vpop.permute.xlu0 %6708  ;;  %v11457_v21 = vpop.permute.xlu1 %5235 }
 0x876   :  { %6190 = vrot.lane.b32.xlu0 %v6149_v33, %s7823_s21  ;;  %6188 = vrot.lane.b32.xlu1 %v6145_v39, %s7823_s21  ;;  %v5876_v33 = vrot.slane %v11337_v55, %v7885_v8 }
 0x878   :  { %v11465_v56 = vpop.permute.xlu0 %6712  ;;  %v11467_v27 = vpop.permute.xlu1 %6710 }
 0x87a   :  { %6194 = vrot.lane.b32.xlu0 %v6157_v36, %s7823_s21  ;;  %6192 = vrot.lane.b32.xlu1 %v6153_v57, %s7823_s21  ;;  %v5884_v36 = vrot.slane %v11337_v55, %v7883_v7 }
 0x87c   :  { %v11475_v39 = vpop.permute.xlu0 %6716  ;;  %v11477_v2 = vpop.permute.xlu1 %6714 }
 0x87d   :  { %v6742_v25 = vsel %vm405_vm7, %v11465_v56, %v11477_v2 }
 0x87e   :  { %5921 = vrot.lane.b32.xlu0 %v5880_v20, %s7825_s12  ;;  %5919 = vrot.lane.b32.xlu1 %v5876_v33, %s7825_s12  ;;  %v5471_v20 = vrot.slane %v11365_v59, %v7885_v8 }
 0x880   :  { %v11485_v57 = vpop.permute.xlu0 %6441  ;;  %v11487_v44 = vpop.permute.xlu1 %6439 }
 0x882   :  { %5925 = vrot.lane.b32.xlu0 %v5888_v32, %s7825_s12  ;;  %5923 = vrot.lane.b32.xlu1 %v5884_v36, %s7825_s12  ;;  %v5479_v32 = vrot.slane %v11365_v59, %v7883_v7 }
 0x884   :  { %v11495_v33 = vpop.permute.xlu0 %6445  ;;  %v11497_v52 = vpop.permute.xlu1 %6443 }
 0x885   :  { %v6473_v47 = vsel %vm811_vm4, %v11497_v52, %v11495_v33 }
 0x886   :  { %5516 = vrot.lane.b32.xlu0 %v5475_v40, %s7824_s27  ;;  %5514 = vrot.lane.b32.xlu1 %v5471_v20, %s7824_s27  ;;  %v5202_v40 = vrot.slane %v11393_v30, %v7885_v8 }
 0x888   :  { %v11505_v36 = vpop.permute.xlu0 %6170  ;;  %v11507_v16 = vpop.permute.xlu1 %6447 }
 0x88a   :  { %5520 = vrot.lane.b32.xlu0 %v5483_v34, %s7824_s27  ;;  %5518 = vrot.lane.b32.xlu1 %v5479_v32, %s7824_s27  ;;  %v5210_v34 = vrot.slane %v11393_v30, %v7883_v7 }
 0x88c   :  { %v11515_v20 = vpop.permute.xlu0 %6174  ;;  %v11517_v10 = vpop.permute.xlu1 %6172 }
 0x88d   :  { %v6203_v7 = vsel %vm1217_vm5, %v11517_v10, %v11515_v20 }
 0x88e   :  { %5247 = vrot.lane.b32.xlu0 %v5206_v4, %s7822_s15  ;;  %5245 = vrot.lane.b32.xlu1 %v5202_v40, %s7822_s15  ;;  %v6699_v4 = vrot.slane %v11275_v62, %v7893_v13 }
 0x890   :  { %v11525_v32 = vpop.permute.xlu0 %6178  ;;  %v11527_v1 = vpop.permute.xlu1 %6176 }
 0x891   :  { %v6204_v6 = vsel %vm1217_vm5, %v11515_v20, %v11527_v1  ;;  %v5218_v20 = vrot.slane %v11393_v30, %v7893_v13 }
 0x892   :  { %5251 = vrot.lane.b32.xlu0 %v5214_v63, %s7822_s15  ;;  %5249 = vrot.lane.b32.xlu1 %v5210_v34, %s7822_s15  ;;  %v6707_v63 = vrot.slane %v11275_v62, %v7901_v17  ;;  %v6165_v62 = vrot.slane %v11315_v58, %v7903_v18 }
 0x894   :  { %v11535_v40 = vpop.permute.xlu0 %5903  ;;  %v11537_v14 = vpop.permute.xlu1 %5901 }
 0x896   :  { %6736 = vrot.lane.b32.xlu0 %v6703_v11, %s7820_s23  ;;  %6734 = vrot.lane.b32.xlu1 %v6699_v4, %s7820_s23  ;;  %v6434_v11 = vrot.slane %v11295_v35, %v7903_v18  ;;  %v5892_v35 = vrot.slane %v11337_v55, %v7893_v13 }
 0x898   :  { %v11545_v34 = vpop.permute.xlu0 %5907  ;;  %v11547_v61 = vpop.permute.xlu1 %5905 }
 0x89a   :  { %6465 = vrot.lane.b32.xlu0 %v6430_v22, %s7821_s10  ;;  %6738 = vrot.lane.b32.xlu1 %v6707_v63, %s7820_s23  ;;  %v6161_v22 = vrot.slane %v11315_v58, %v7893_v13 }
 0x89c   :  { %v11555_v4 = vpop.permute.xlu0 %5496  ;;  %v11557_v9 = vpop.permute.xlu1 %5909 }
 0x89e   :  { %6469 = vrot.lane.b32.xlu0 %v6438_v37, %s7821_s10  ;;  %6467 = vrot.lane.b32.xlu1 %v6434_v11, %s7821_s10  ;;  %v6169_v37 = vrot.slane %v11315_v58, %v7901_v17  ;;  %v6740_v58 = vsel %vm405_vm7, %v11455_v29, %v11467_v27 }
 0x8a0   :  { %v11565_v63 = vpop.permute.xlu0 %5500  ;;  %v11567_v49 = vpop.permute.xlu1 %5498 }
 0x8a2   :  { %6198 = vrot.lane.b32.xlu0 %v6165_v62, %s7823_s21  ;;  %6196 = vrot.lane.b32.xlu1 %v6161_v22, %s7823_s21  ;;  %v5896_v62 = vrot.slane %v11337_v55, %v7903_v18 }
 0x8a4   :  { %v11575_v11 = vpop.permute.xlu0 %5504  ;;  %v11577_v51 = vpop.permute.xlu1 %5502 }
 0x8a5   :  { %v5530_v8 = vsel %vm1454_vm3, %v11565_v63, %v11577_v51 }
 0x8a6   :  { %5927 = vrot.lane.b32.xlu0 %v5892_v35, %s7825_s12  ;;  %6200 = vrot.lane.b32.xlu1 %v6169_v37, %s7823_s21  ;;  %v6741_v35 = vsel %vm405_vm7, %v11467_v27, %v11465_v56  ;;  %v6773_v37 = vmul.f32 %v6740_v58, %v10892_v43  ;;  %v6743_v27 = vsel %vm405_vm7, %v11477_v2, %v11475_v39 }
 0x8a7   :  { %v6774_v55 = vmul.f32 %v6741_v35, %v10894_v53  ;;  %v6471_v56 = vsel %vm811_vm4, %v11487_v44, %v11485_v57  ;;  %v6772_v2 = vmul.f32 %v11455_v29, %v10880_v3 }
 0x8a8   :  { %v11585_v22 = vpop.permute.xlu0 %6720  ;;  %v11587_v26 = vpop.permute.xlu1 %6718 }
 0x8aa   :  { %5931 = vrot.lane.b32.xlu0 %v5900_v45, %s7825_s12  ;;  %5929 = vrot.lane.b32.xlu1 %v5896_v62, %s7825_s12  ;;  %v6775_v45 = vmul.f32 %v6742_v25, %v10908_v38  ;;  %v6776_v62 = vmul.f32 %v6743_v27, %v10910_v31  ;;  %v6472_v27 = vsel %vm811_vm4, %v11485_v57, %v11497_v52 }
 0x8ab   :  { %v6505_v29 = vmul.f32 %v6472_v27, %v10894_v53  ;;  %v6474_v57 = vsel %vm811_vm4, %v11495_v33, %v11507_v16  ;;  %v5487_v52 = vrot.slane %v11365_v59, %v7893_v13  ;;  %v5495_v33 = vrot.slane %v11365_v59, %v7901_v17 }
 0x8ac   :  { %v11599_v54 = vpop.permute.xlu0 %6724  ;;  %v11601_v42 = vpop.permute.xlu1 %6722  ;;  %v5491_v27 = vrot.slane %v11365_v59, %v7903_v18  ;;  %v5935_v13 = vsel %vm1623_vm6, %v11547_v61, %v11545_v34 }
 0x8ae   :  { %6810 = vrot.lane.b32.xlu0 %v6774_v55, %s7818_s9  ;;  %6808 = vrot.lane.b32.xlu1 %v6773_v37, %s7818_s9  ;;  %v6504_v37 = vmul.f32 %v6471_v56, %v10892_v43 }
 0x8b0   :  { %v11613_v58 = vpop.permute.xlu0 %6451  ;;  %v11615_v35 = vpop.permute.xlu1 %6449 }
 0x8b2   :  { %6814 = vrot.lane.b32.xlu0 %v6776_v62, %s7818_s9  ;;  %6812 = vrot.lane.b32.xlu1 %v6775_v45, %s7818_s9  ;;  %v6506_v45 = vmul.f32 %v6473_v47, %v10908_v38 }
 0x8b4   :  { %v11625_v25 = vpop.permute.xlu0 %6455  ;;  %v11627_v55 = vpop.permute.xlu1 %6453 }
 0x8b6   :  { %6806 = vrot.lane.b32.xlu1 %v6772_v2, %s7818_s9  ;;  %6539 = vrot.lane.b32.xlu0 %v6504_v37, %s7819_s18  ;;  %v6507_v2 = vmul.f32 %v6474_v57, %v10910_v31  ;;  %v6202_v57 = vsel %vm1217_vm5, %v11505_v36, %v11517_v10  ;;  %v6205_v10 = vsel %vm1217_vm5, %v11527_v1, %v11525_v32 }
 0x8b7   :  { %v5222_v1 = vrot.slane %v11393_v30, %v7903_v18 }
 0x8b8   :  { %v11639_v62 = vpop.permute.xlu0 %6182  ;;  %v11641_v56 = vpop.permute.xlu1 %6180 }
 0x8ba   :  { %6543 = vrot.lane.b32.xlu0 %v6506_v45, %s7819_s18  ;;  %6541 = vrot.lane.b32.xlu1 %v6505_v29, %s7819_s18 }
 0x8bc   :  { %v11651_v37 = vpop.permute.xlu0 %6186  ;;  %v11653_v47 = vpop.permute.xlu1 %6184 }
 0x8be   :  { %5522 = vrot.lane.b32.xlu0 %v5487_v52, %s7824_s27  ;;  %6545 = vrot.lane.b32.xlu1 %v6507_v2, %s7819_s18  ;;  %v6503_v52 = vmul.f32 %v11487_v44, %v10880_v3  ;;  %v6235_v2 = vmul.f32 %v6202_v57, %v10892_v43  ;;  %v6236_v44 = vmul.f32 %v6203_v7, %v10894_v53 }
 0x8c0   :  { %v11661_v29 = vpop.permute.xlu0 %5913  ;;  %v11663_v45 = vpop.permute.xlu1 %5911 }
 0x8c2   :  { %5526 = vrot.lane.b32.xlu0 %v5495_v33, %s7824_s27  ;;  %5524 = vrot.lane.b32.xlu1 %v5491_v27, %s7824_s27  ;;  %v6237_v33 = vmul.f32 %v6204_v6, %v10908_v38 }
 0x8c4   :  { %v11673_v5 = vpop.permute.xlu0 %5917  ;;  %v11675_v59 = vpop.permute.xlu1 %5915 }
 0x8c6   :  { %6537 = vrot.lane.b32.xlu1 %v6503_v52, %s7819_s18  ;;  %6270 = vrot.lane.b32.xlu0 %v6235_v2, %s7822_s15  ;;  %v6238_v52 = vmul.f32 %v6205_v10, %v10910_v31  ;;  %v5226_v2 = vrot.slane %v11393_v30, %v7901_v17  ;;  %v5933_v10 = vsel %vm1623_vm6, %v11537_v14, %v11535_v40 }
 0x8c7   :  { %v5934_v17 = vsel %vm1623_vm6, %v11535_v40, %v11547_v61  ;;  %v5936_v40 = vsel %vm1623_vm6, %v11545_v34, %v11557_v9  ;;  %v5965_v61 = vmul.f32 %v11537_v14, %v10880_v3  ;;  %v5529_v34 = vsel %vm1454_vm3, %v11567_v49, %v11565_v63 }
 0x8c8   :  { %v11687_v27 = vpop.permute.xlu0 %5508  ;;  %v11689_v57 = vpop.permute.xlu1 %5506  ;;  %v5259_v63 = vsel %vm1048_vm2, %v11437_v28, %v11435_v50 }
 0x8ca   :  { %6272 = vrot.lane.b32.xlu1 %v6236_v44, %s7822_s15  ;;  %6274 = vrot.lane.b32.xlu0 %v6237_v33, %s7822_s15 }
 0x8cc   :  { %v11699_v7 = vpop.permute.xlu0 %5512  ;;  %v11701_v6 = vpop.permute.xlu1 %5510 }
 0x8ce   :  { %6276 = vrot.lane.b32.xlu1 %v6238_v52, %s7822_s15  ;;  %5253 = vrot.lane.b32.xlu0 %v5218_v20, %s7822_s15  ;;  %v6234_v20 = vmul.f32 %v11505_v36, %v10880_v3  ;;  %v5966_v52 = vmul.f32 %v5933_v10, %v10892_v43  ;;  %v5967_v36 = vmul.f32 %v5934_v17, %v10894_v53 }
 0x8d0   :  { %v11709_v44 = vpop.permute.xlu0 %5239  ;;  %v11711_v33 = vpop.permute.xlu1 %5237 }
 0x8d2   :  { %5255 = vrot.lane.b32.xlu1 %v5222_v1, %s7822_s15  ;;  %5257 = vrot.lane.b32.xlu0 %v5226_v2, %s7822_s15  ;;  %v5968_v1 = vmul.f32 %v5935_v13, %v10908_v38 }
 0x8d4   :  { %v11721_v18 = vpop.permute.xlu0 %5243  ;;  %v11723_v30 = vpop.permute.xlu1 %5241 }
 0x8d6   :  { %6268 = vrot.lane.b32.xlu1 %v6234_v20, %s7822_s15  ;;  %6001 = vrot.lane.b32.xlu0 %v5966_v52, %s7824_s27  ;;  %v5969_v20 = vmul.f32 %v5936_v40, %v10910_v31  ;;  %v5528_v52 = vsel %vm1454_vm3, %v11555_v4, %v11567_v49  ;;  %v5531_v49 = vsel %vm1454_vm3, %v11577_v51, %v11575_v11 }
 0x8d7   :  { %v5561_v14 = vmul.f32 %v5528_v52, %v10880_v3  ;;  %v5292_v51 = vmul.f32 %v5259_v63, %v10880_v3 }
 0x8d8   :  { %v11735_v2 = vpop.permute.xlu0 %6728  ;;  %v11737_v10 = vpop.permute.xlu1 %6726 }
 0x8da   :  { %6005 = vrot.lane.b32.xlu0 %v5968_v1, %s7824_s27  ;;  %6003 = vrot.lane.b32.xlu1 %v5967_v36, %s7824_s27  ;;  %v5562_v36 = vmul.f32 %v5529_v34, %v10892_v43 }
 0x8dc   :  { %v11747_v17 = vpop.permute.xlu0 %6732  ;;  %v11749_v13 = vpop.permute.xlu1 %6730 }
 0x8de   :  { %5999 = vrot.lane.b32.xlu0 %v5965_v61, %s7824_s27  ;;  %6007 = vrot.lane.b32.xlu1 %v5969_v20, %s7824_s27  ;;  %v5563_v61 = vmul.f32 %v5530_v8, %v10894_v53  ;;  %v5564_v20 = vmul.f32 %v5531_v49, %v10908_v38  ;;  %v5260_v49 = vsel %vm1048_vm2, %v11435_v50, %v11447_v41 }
 0x8e0   :  { %v11761_v1 = vpop.permute.xlu0 %6459  ;;  %v11763_v40 = vpop.permute.xlu1 %6457 }
 0x8e2   :  { %5598 = vrot.lane.b32.xlu0 %v5562_v36, %s7825_s12  ;;  %5596 = vrot.lane.b32.xlu1 %v5561_v14, %s7825_s12  ;;  %v5560_v14 = vmul.f32 0.0, %v11555_v4  ;;  %v5293_v4 = vmul.f32 %v5260_v49, %v10892_v43 }
 0x8e4   :  { %v11775_v52 = vpop.permute.xlu0 %6463  ;;  %v11777_v34 = vpop.permute.xlu1 %6461 }
 0x8e5   :  { %13200 = vst [vmem:[#allocation98_spill] sm:$0xff] %v11775_v52  ;;  %v5261_v52 = vsel %vm1048_vm2, %v11447_v41, %v11445_v23  ;;  %v5262_v41 = vsel %vm1048_vm2, %v11445_v23, %v11457_v21  ;;  %v6745_v23 = vsel %vm405_vm7, %v11587_v26, %v11585_v22 }
 0x8e6   :  { %5602 = vrot.lane.b32.xlu0 %v5564_v20, %s7825_s12  ;;  %5600 = vrot.lane.b32.xlu1 %v5563_v61, %s7825_s12  ;;  %v12864_v61 = vmov 0.0   ;;  %v5294_v20 = vmul.f32 %v5261_v52, %v10894_v53  ;;  %v6744_v52 = vsel %vm405_vm7, %v11475_v39, %v11587_v26  ;;  %v6746_v39 = vsel %vm405_vm7, %v11585_v22, %v11601_v42 }
 0x8e7   :  { %7107 = vmatprep.mubr.f32.mxu0 %v12864_v61  ;;  %7178 = vmatprep.mubr.f32.mxu1 %v12864_v61  ;;  %v6747_v26 = vsel %vm405_vm7, %v11601_v42, %v11599_v54  ;;  %v6475_v22 = vsel %vm811_vm4, %v11507_v16, %v11615_v35  ;;  %v6476_v42 = vsel %vm811_vm4, %v11615_v35, %v11613_v58 }
 0x8e8   :  { %v11786_v36 = vpop.permute.xlu0 %6190  ;;  %v11788_v8 = vpop.permute.xlu1 %6188  ;;  %v6477_v16 = vsel %vm811_vm4, %v11613_v58, %v11627_v55  ;;  %v6478_v35 = vsel %vm811_vm4, %v11627_v55, %v11625_v25  ;;  %v6206_v58 = vsel %vm1217_vm5, %v11525_v32, %v11641_v56  ;;  %v6207_v55 = vsel %vm1217_vm5, %v11641_v56, %v11639_v62 }
 0x8e9   :  { %v6208_v32 = vsel %vm1217_vm5, %v11639_v62, %v11653_v47  ;;  %v6209_v56 = vsel %vm1217_vm5, %v11653_v47, %v11651_v37  ;;  %v5937_v62 = vsel %vm1623_vm6, %v11557_v9, %v11663_v45  ;;  %v5938_v47 = vsel %vm1623_vm6, %v11663_v45, %v11661_v29 }
 0x8ea   :  { %5327 = vrot.lane.b32.xlu0 %v5292_v51, %s7823_s21  ;;  %5594 = vrot.lane.b32.xlu1 %v5560_v14, %s7825_s12  ;;  %v5291_v51 = vmul.f32 0.0, %v11437_v28  ;;  %v5295_v14 = vmul.f32 %v5262_v41, %v10908_v38  ;;  %v6777_v28 = vmul.f32 %v6744_v52, %v10924_v60  ;;  %v5939_v9 = vsel %vm1623_vm6, %v11661_v29, %v11675_v59 }
 0x8eb   :  { %v5940_v45 = vsel %vm1623_vm6, %v11675_v59, %v11673_v5  ;;  %v5532_v29 = vsel %vm1454_vm3, %v11575_v11, %v11689_v57  ;;  %v5533_v59 = vsel %vm1454_vm3, %v11689_v57, %v11687_v27  ;;  %v5534_v11 = vsel %vm1454_vm3, %v11687_v27, %v11701_v6 }
 0x8ec   :  { %v11802_v63 = vpop.permute.xlu0 %6194  ;;  %v11804_v50 = vpop.permute.xlu1 %6192  ;;  %v5535_v57 = vsel %vm1454_vm3, %v11701_v6, %v11699_v7  ;;  %v5263_v27 = vsel %vm1048_vm2, %v11457_v21, %v11711_v33  ;;  %v5264_v6 = vsel %vm1048_vm2, %v11711_v33, %v11709_v44  ;;  %v5265_v21 = vsel %vm1048_vm2, %v11709_v44, %v11723_v30 }
 0x8ed   :  { %v5266_v33 = vsel %vm1048_vm2, %v11723_v30, %v11721_v18  ;;  %v6749_v44 = vsel %vm405_vm7, %v11737_v10, %v11735_v2 }
 0x8ee   :  { %5331 = vrot.lane.b32.xlu0 %v5294_v20, %s7823_s21  ;;  %5329 = vrot.lane.b32.xlu1 %v5293_v4, %s7823_s21  ;;  %v6778_v4 = vmul.f32 %v6745_v23, %v10926_v0 }
 0x8f0   :  { %v11813_v61 = vpop.permute.xlu0 %5921  ;;  %v11815_v49 = vpop.permute.xlu1 %5919 }
 0x8f2   :  { %5325 = vrot.lane.b32.xlu0 %v5291_v51, %s7823_s21  ;;  %5333 = vrot.lane.b32.xlu1 %v5295_v14, %s7823_s21  ;;  %v6779_v51 = vmul.f32 %v6746_v39, %v10940_v24  ;;  %v6780_v14 = vmul.f32 %v6747_v26, %v10942_v19 }
 0x8f4   :  { %v11827_v20 = vpop.permute.xlu0 %5925  ;;  %v11829_v41 = vpop.permute.xlu1 %5923 }
 0x8f6   :  { %6818 = vrot.lane.b32.xlu0 %v6778_v4, %s7818_s9  ;;  %6816 = vrot.lane.b32.xlu1 %v6777_v28, %s7818_s9  ;;  %v6508_v28 = vmul.f32 %v6475_v22, %v10924_v60  ;;  %v6509_v4 = vmul.f32 %v6476_v42, %v10926_v0 }
 0x8f8   :  { %v11841_v52 = vpop.permute.xlu0 %5516  ;;  %v11843_v23 = vpop.permute.xlu1 %5514 }
 0x8fa   :  { %6822 = vrot.lane.b32.xlu0 %v6780_v14, %s7818_s9  ;;  %6820 = vrot.lane.b32.xlu1 %v6779_v51, %s7818_s9  ;;  %v6510_v51 = vmul.f32 %v6477_v16, %v10940_v24  ;;  %v6511_v14 = vmul.f32 %v6478_v35, %v10942_v19 }
 0x8fc   :  { %v11855_v39 = vpop.permute.xlu0 %5520  ;;  %v11857_v26 = vpop.permute.xlu1 %5518 }
 0x8fe   :  { %6549 = vrot.lane.b32.xlu0 %v6509_v4, %s7819_s18  ;;  %6547 = vrot.lane.b32.xlu1 %v6508_v28, %s7819_s18  ;;  %v6239_v28 = vmul.f32 %v6206_v58, %v10924_v60  ;;  %v6240_v4 = vmul.f32 %v6207_v55, %v10926_v0 }
 0x900   :  { %v11869_v22 = vpop.permute.xlu0 %5247  ;;  %v11871_v42 = vpop.permute.xlu1 %5245 }
 0x902   :  { %6553 = vrot.lane.b32.xlu0 %v6511_v14, %s7819_s18  ;;  %6551 = vrot.lane.b32.xlu1 %v6510_v51, %s7819_s18  ;;  %v6241_v51 = vmul.f32 %v6208_v32, %v10940_v24  ;;  %v6242_v14 = vmul.f32 %v6209_v56, %v10942_v19 }
 0x904   :  { %v11883_v16 = vpop.permute.xlu0 %5251  ;;  %v11885_v35 = vpop.permute.xlu1 %5249 }
 0x906   :  { %6280 = vrot.lane.b32.xlu0 %v6240_v4, %s7822_s15  ;;  %6278 = vrot.lane.b32.xlu1 %v6239_v28, %s7822_s15  ;;  %v5970_v28 = vmul.f32 %v5937_v62, %v10924_v60  ;;  %v5971_v4 = vmul.f32 %v5938_v47, %v10926_v0 }
 0x908   :  { %v11897_v58 = vpop.permute.xlu0 %6736  ;;  %v11899_v55 = vpop.permute.xlu1 %6734 }
 0x90a   :  { %6284 = vrot.lane.b32.xlu0 %v6242_v14, %s7822_s15  ;;  %6282 = vrot.lane.b32.xlu1 %v6241_v51, %s7822_s15  ;;  %v5972_v51 = vmul.f32 %v5939_v9, %v10940_v24  ;;  %v5973_v14 = vmul.f32 %v5940_v45, %v10942_v19 }
 0x90c   :  { %v11911_v32 = vpop.permute.xlu0 %6465  ;;  %v11913_v56 = vpop.permute.xlu1 %6738 }
 0x90e   :  { %6011 = vrot.lane.b32.xlu0 %v5971_v4, %s7824_s27  ;;  %6009 = vrot.lane.b32.xlu1 %v5970_v28, %s7824_s27  ;;  %v5565_v28 = vmul.f32 %v5532_v29, %v10910_v31  ;;  %v5566_v4 = vmul.f32 %v5533_v59, %v10924_v60 }
 0x910   :  { %v11925_v62 = vpop.permute.xlu0 %6469  ;;  %v11927_v47 = vpop.permute.xlu1 %6467 }
 0x912   :  { %6015 = vrot.lane.b32.xlu0 %v5973_v14, %s7824_s27  ;;  %6013 = vrot.lane.b32.xlu1 %v5972_v51, %s7824_s27  ;;  %v5567_v51 = vmul.f32 %v5534_v11, %v10926_v0  ;;  %v5568_v14 = vmul.f32 %v5535_v57, %v10940_v24 }
 0x914   :  { %v11939_v9 = vpop.permute.xlu0 %6198  ;;  %v11941_v45 = vpop.permute.xlu1 %6196 }
 0x916   :  { %5606 = vrot.lane.b32.xlu0 %v5566_v4, %s7825_s12  ;;  %5604 = vrot.lane.b32.xlu1 %v5565_v28, %s7825_s12  ;;  %v5296_v28 = vmul.f32 %v5263_v27, %v10910_v31  ;;  %v5297_v4 = vmul.f32 %v5264_v6, %v10924_v60  ;;  %v6748_v31 = vsel %vm405_vm7, %v11599_v54, %v11737_v10 }
 0x917   :  { %v6750_v54 = vsel %vm405_vm7, %v11735_v2, %v11749_v13  ;;  %v6751_v10 = vsel %vm405_vm7, %v11749_v13, %v11747_v17  ;;  %v6479_v13 = vsel %vm811_vm4, %v11625_v25, %v11763_v40  ;;  %v6481_v25 = vsel %vm811_vm4, %v11761_v1, %v11777_v34 }
 0x918   :  { %v11953_v29 = vpop.permute.xlu0 %5927  ;;  %v11955_v59 = vpop.permute.xlu1 %6200 }
 0x91a   :  { %5610 = vrot.lane.b32.xlu0 %v5568_v14, %s7825_s12  ;;  %5608 = vrot.lane.b32.xlu1 %v5567_v51, %s7825_s12  ;;  %v5298_v51 = vmul.f32 %v5265_v21, %v10926_v0  ;;  %v5299_v14 = vmul.f32 %v5266_v33, %v10940_v24 }
 0x91c   :  { %v11967_v11 = vpop.permute.xlu0 %5931  ;;  %v11969_v57 = vpop.permute.xlu1 %5929 }
 0x91e   :  { %5337 = vrot.lane.b32.xlu0 %v5297_v4, %s7823_s21  ;;  %5335 = vrot.lane.b32.xlu1 %v5296_v28, %s7823_s21  ;;  %v6781_v28 = vmul.f32 %v6748_v31, %v10956_v48  ;;  %v6782_v4 = vmul.f32 %v6749_v44, %v10958_v12  ;;  %v6783_v31 = vmul.f32 %v6750_v54, %v10972_v46 }
 0x91f   :  { %v6784_v44 = vmul.f32 %v6751_v10, %v10974_v15 }
 0x920   :  { %v6811_v27 = vpop.permute.xlu0 %6810  ;;  %v6809_v6 = vpop.permute.xlu1 %6808 }
 0x921   :  { %v6841_v30 = vsel %vm236_vm0, %v6809_v6, %v6811_v27 }
 0x922   :  { %5341 = vrot.lane.b32.xlu0 %v5299_v14, %s7823_s21  ;;  %5339 = vrot.lane.b32.xlu1 %v5298_v51, %s7823_s21 }
 0x923   :  { %7057 = vmatprep.subr.mxu0 %v6841_v30 }
 0x924   :  { %v11992_v21 = vpop.permute.xlu0 %6814  ;;  %v6813_v33 = vpop.permute.xlu1 %6812 }
 0x925   :  { %v6843_v14 = vsel %vm236_vm0, %v6813_v33, %v11992_v21  ;;  %v6842_v51 = vsel %vm236_vm0, %v6811_v27, %v6813_v33  ;;  %v6480_v27 = vsel %vm811_vm4, %v11763_v40, %v11761_v1  ;;  %v6210_v1 = vsel %vm1217_vm5, %v11651_v37, %v11788_v8 }
 0x926   :  { %6826 = vrot.lane.b32.xlu0 %v6782_v4, %s7818_s9  ;;  %6824 = vrot.lane.b32.xlu1 %v6781_v28, %s7818_s9  ;;  %v6512_v28 = vmul.f32 %v6479_v13, %v10956_v48  ;;  %v6513_v33 = vmul.f32 %v6480_v27, %v10958_v12 }
 0x927   :  { %7128 = vmatprep.subr.mxu1 %v6843_v14  ;;  %v13201_v14 = vld [vmem:[#allocation98_spill] sm:$0xff] }
 0x928   :  { %7129 = vmatpush1.msra.mxu1 %v6842_v51  ;;  %v6540_v2 = vpop.permute.xlu0 %6539  ;;  %v6807_v30 = vpop.permute.xlu1 %6806  ;;  %v6482_v40 = vsel %vm811_vm4, %v11777_v34, %v13201_v14  ;;  %v6514_v51 = vmul.f32 %v6481_v25, %v10972_v46  ;;  %v6211_v34 = vsel %vm1217_vm5, %v11788_v8, %v11786_v36  ;;  %v6212_v8 = vsel %vm1217_vm5, %v11786_v36, %v11804_v50 }
 0x929   :  { %v6840_v4 = vsel %vm236_vm0, %v6807_v30, %v6809_v6  ;;  %v6213_v25 = vsel %vm1217_vm5, %v11804_v50, %v11802_v63  ;;  %v5942_v36 = vsel %vm1623_vm6, %v11815_v49, %v11813_v61 }
 0x92a   :  { %6830 = vrot.lane.b32.xlu0 %v6784_v44, %s7818_s9  ;;  %6828 = vrot.lane.b32.xlu1 %v6783_v31, %s7818_s9  ;;  %v6515_v31 = vmul.f32 %v6482_v40, %v10974_v15 }
 0x92b   :  { %7058 = vmatpush1.msra.mxu0 %v6840_v4  ;;  %v6243_v4 = vmul.f32 %v6210_v1, %v10956_v48  ;;  %v5975_v1 = vmul.f32 %v5942_v36, %v10958_v12  ;;  %v5539_v36 = vsel %vm1454_vm3, %v11857_v26, %v11855_v39 }
 0x92c   :  { %v6544_v54 = vpop.permute.xlu0 %6543  ;;  %v6542_v10 = vpop.permute.xlu1 %6541 }
 0x92d   :  { %v6572_v6 = vsel %vm642_vm1, %v6540_v2, %v6542_v10  ;;  %v6573_v27 = vsel %vm642_vm1, %v6542_v10, %v6544_v54  ;;  %v6246_v10 = vmul.f32 %v6213_v25, %v10974_v15 }
 0x92e   :  { %6557 = vrot.lane.b32.xlu0 %v6513_v33, %s7819_s18  ;;  %6555 = vrot.lane.b32.xlu1 %v6512_v28, %s7819_s18  ;;  %v6244_v28 = vmul.f32 %v6211_v34, %v10958_v12 }
 0x92f   :  { %7059 = vmatprep.subr.mxu0 %v6572_v6 }
 0x930   :  { %v12029_v44 = vpop.permute.xlu0 %5522  ;;  %v12031_v30 = vpop.permute.xlu1 %6545 }
 0x931   :  { %v6574_v13 = vsel %vm642_vm1, %v6544_v54, %v12031_v30  ;;  %v6245_v54 = vmul.f32 %v6212_v8, %v10972_v46 }
 0x932   :  { %6561 = vrot.lane.b32.xlu0 %v6515_v31, %s7819_s18  ;;  %6559 = vrot.lane.b32.xlu1 %v6514_v51, %s7819_s18  ;;  %v5941_v51 = vsel %vm1623_vm6, %v11673_v5, %v11815_v49  ;;  %v5943_v5 = vsel %vm1623_vm6, %v11813_v61, %v11829_v41  ;;  %v5944_v49 = vsel %vm1623_vm6, %v11829_v41, %v11827_v20 }
 0x933   :  { %7130 = vmatprep.subr.mxu1 %v6574_v13  ;;  %v5974_v31 = vmul.f32 %v5941_v51, %v10956_v48  ;;  %v5536_v61 = vsel %vm1454_vm3, %v11699_v7, %v11843_v23  ;;  %v5537_v41 = vsel %vm1454_vm3, %v11843_v23, %v11841_v52  ;;  %v5538_v23 = vsel %vm1454_vm3, %v11841_v52, %v11857_v26 }
 0x934   :  { %7131 = vmatpush1.msra.mxu1 %v6573_v27  ;;  %v12046_v37 = vpop.permute.xlu0 %5526  ;;  %v12048_v33 = vpop.permute.xlu1 %5524  ;;  %v5976_v27 = vmul.f32 %v5943_v5, %v10972_v46  ;;  %v5572_v52 = vmul.f32 %v5539_v36, %v10972_v46  ;;  %v5267_v26 = vsel %vm1048_vm2, %v11721_v18, %v11871_v42  ;;  %v5268_v5 = vsel %vm1048_vm2, %v11871_v42, %v11869_v22 }
 0x935   :  { %v5269_v18 = vsel %vm1048_vm2, %v11869_v22, %v11885_v35  ;;  %v5270_v42 = vsel %vm1048_vm2, %v11885_v35, %v11883_v16 }
 0x936   :  { %6288 = vrot.lane.b32.xlu0 %v6244_v28, %s7822_s15  ;;  %6286 = vrot.lane.b32.xlu1 %v6243_v4, %s7822_s15  ;;  %v5977_v4 = vmul.f32 %v5944_v49, %v10974_v15  ;;  %v5302_v36 = vmul.f32 %v5269_v18, %v10958_v12  ;;  %v5303_v35 = vmul.f32 %v5270_v42, %v10972_v46  ;;  %v13206_v42 = vld [vmem:[#allocation13_spill] sm:$0xff] }
 0x938   :  { %v6271_v40 = vpop.permute.xlu0 %6270  ;;  %v6538_v6 = vpop.permute.xlu1 %6537 }
 0x939   :  { %v6571_v50 = vsel %vm642_vm1, %v6538_v6, %v6540_v2  ;;  %v5570_v6 = vmul.f32 %v5537_v41, %v10956_v48 }
 0x93a   :  { %6292 = vrot.lane.b32.xlu0 %v6246_v10, %s7822_s15  ;;  %6290 = vrot.lane.b32.xlu1 %v6245_v54, %s7822_s15  ;;  %v5569_v10 = vmul.f32 %v5536_v61, %v10942_v19 }
 0x93b   :  { %7060 = vmatpush1.msra.mxu0 %v6571_v50  ;;  %v7727_v50 = vld [vmem:[%s12675_s1 + $0x4] ss:$8 sm:$0xf] }
 0x93c   :  { %v6275_v34 = vpop.permute.xlu0 %6274  ;;  %v6273_v13 = vpop.permute.xlu1 %6272 }
 0x93d   :  { %v6303_v2 = vsel %vm1048_vm2, %v6271_v40, %v6273_v13  ;;  %v6304_v54 = vsel %vm1048_vm2, %v6273_v13, %v6275_v34 }
 0x93e   :  { %6019 = vrot.lane.b32.xlu0 %v5975_v1, %s7824_s27  ;;  %6017 = vrot.lane.b32.xlu1 %v5974_v31, %s7824_s27  ;;  %v7728_v31 = vld [vmem:[%s12675_s1 + $0x4] ss:$8 sm:$0xf0]  ;;  %v5571_v1 = vmul.f32 %v5538_v23, %v10958_v12 }
 0x93f   :  { %7061 = vmatprep.subr.mxu0 %v6303_v2  ;;  %v12128_v2 = vor.u32 %v7728_v31, %v7727_v50  ;;  %v13204_v23 = vld [vmem:[#allocation6_spill] sm:$0xff] }
 0x940   :  { %v12082_v28 = vpop.permute.xlu0 %5253  ;;  %v12084_v8 = vpop.permute.xlu1 %6276 }
 0x941   :  { %v6305_v25 = vsel %vm1048_vm2, %v6275_v34, %v12084_v8  ;;  %v5715_v22 = vrot.slane %v12128_v2, %v13204_v23 }
 0x942   :  { %6023 = vrot.lane.b32.xlu0 %v5977_v4, %s7824_s27  ;;  %6021 = vrot.lane.b32.xlu1 %v5976_v27, %s7824_s27  ;;  %v5300_v27 = vmul.f32 %v5267_v26, %v10942_v19  ;;  %v5301_v4 = vmul.f32 %v5268_v5, %v10956_v48 }
 0x943   :  { %7132 = vmatprep.subr.mxu1 %v6305_v25  ;;  %v13202_v25 = vld [vmem:[#allocation7_spill] sm:$0xff] }
 0x944   :  { %7133 = vmatpush1.msra.mxu1 %v6304_v54  ;;  %v12099_v7 = vpop.permute.xlu0 %5257  ;;  %v12101_v51 = vpop.permute.xlu1 %5255  ;;  %v5707_v54 = vrot.slane %v12128_v2, %v13202_v25 }
 0x946   :  { %5614 = vrot.lane.b32.xlu0 %v5570_v6, %s7825_s12  ;;  %5612 = vrot.lane.b32.xlu1 %v5569_v10, %s7825_s12  ;;  %v13203_v10 = vld [vmem:[#allocation5_spill] sm:$0xff] }
 0x947   :  { %v5703_v6 = vrot.slane %v12128_v2, %v13203_v10 }
 0x948   :  { %v6002_v34 = vpop.permute.xlu0 %6001  ;;  %v6269_v13 = vpop.permute.xlu1 %6268 }
 0x949   :  { %v6302_v49 = vsel %vm1048_vm2, %v6269_v13, %v6271_v40  ;;  %v6753_v13 = vsel %vm405_vm7, %v11899_v55, %v11897_v58  ;;  %v5780_v18 = vmul.f32 %v5703_v6, %v10880_v3  ;;  %v6754_v3 = vsel %vm405_vm7, %v11897_v58, %v11913_v56 }
 0x94a   :  { %5618 = vrot.lane.b32.xlu0 %v5572_v52, %s7825_s12  ;;  %5616 = vrot.lane.b32.xlu1 %v5571_v1, %s7825_s12  ;;  %v13205_v1 = vld [vmem:[#allocation4_spill] sm:$0xff]  ;;  %v6484_v6 = vsel %vm811_vm4, %v11911_v32, %v11927_v47 }
 0x94b   :  { %7062 = vmatpush1.msra.mxu0 %v6302_v49  ;;  %v5711_v52 = vrot.slane %v12128_v2, %v13205_v1  ;;  %v6752_v49 = vsel %vm405_vm7, %v11747_v17, %v11899_v55 }
 0x94c   :  { %v6006_v61 = vpop.permute.xlu0 %6005  ;;  %v6004_v41 = vpop.permute.xlu1 %6003 }
 0x94d   :  { %v6034_v40 = vsel %vm1454_vm3, %v6002_v34, %v6004_v41  ;;  %v5782_v55 = vmul.f32 %v5711_v52, %v10894_v53  ;;  %v6483_v52 = vsel %vm811_vm4, %v13201_v14, %v11911_v32  ;;  %v6519_v32 = vmul.f32 0.0, %v11925_v62 }
 0x94e   :  { %5345 = vrot.lane.b32.xlu0 %v5301_v4, %s7823_s21  ;;  %5343 = vrot.lane.b32.xlu1 %v5300_v27, %s7823_s21  ;;  %v5781_v27 = vmul.f32 %v5707_v54, %v10892_v43  ;;  %v6035_v4 = vsel %vm1454_vm3, %v6004_v41, %v6006_v61  ;;  %v13208_v41 = vld [vmem:[#allocation12_spill] sm:$0xff] }
 0x94f   :  { %7063 = vmatprep.subr.mxu0 %v6034_v40  ;;  %v6786_v40 = vmul.f32 %v6753_v13, %v13206_v42  ;;  %v6787_v54 = vmul.f32 %v6754_v3, %v13208_v41  ;;  %v13209_v3 = vld [vmem:[#allocation96_spill] sm:$0xff] }
 0x950   :  { %v6000_v50 = vpop.permute.xlu0 %5999  ;;  %v12149_v31 = vpop.permute.xlu1 %6007 }
 0x951   :  { %v6033_v26 = vsel %vm1454_vm3, %v6000_v50, %v6002_v34  ;;  %v6036_v5 = vsel %vm1454_vm3, %v6006_v61, %v12149_v31  ;;  %v5783_v34 = vmul.f32 %v5715_v22, %v10908_v38  ;;  %v6788_v38 = vmul.f32 0.0, %v11913_v56 }
 0x952   :  { %5349 = vrot.lane.b32.xlu0 %v5303_v35, %s7823_s21  ;;  %5347 = vrot.lane.b32.xlu1 %v5302_v36, %s7823_s21  ;;  %v13207_v35 = vld [vmem:[#allocation94_spill] sm:$0xff]  ;;  %v6517_v56 = vmul.f32 %v6484_v6, %v13206_v42  ;;  %v13211_v6 = vld [vmem:[#allocation97_spill] sm:$0xff] }
 0x953   :  { %7064 = vmatpush1.msra.mxu0 %v6033_v26  ;;  %7134 = vmatprep.subr.mxu1 %v6036_v5  ;;  %v6785_v36 = vmul.f32 %v6752_v49, %v13207_v35  ;;  %v6516_v5 = vmul.f32 %v6483_v52, %v13207_v35 }
 0x954   :  { %7065 = vmatprep.subr.mxu0 %v5781_v27  ;;  %7135 = vmatpush1.msra.mxu1 %v6035_v4  ;;  %v5599_v50 = vpop.permute.xlu0 %5598  ;;  %v5597_v17 = vpop.permute.xlu1 %5596  ;;  %v6485_v27 = vsel %vm811_vm4, %v11927_v47, %v11925_v62  ;;  %v6214_v47 = vsel %vm1217_vm5, %v11802_v63, %v11941_v45  ;;  %v6216_v63 = vsel %vm1217_vm5, %v11939_v9, %v11955_v59 }
 0x955   :  { %7066 = vmatpush1.msra.mxu0 %v5780_v18  ;;  %7136 = vmatprep.subr.mxu1 %v5783_v34  ;;  %v5629_v43 = vsel %vm1623_vm6, %v5597_v17, %v5599_v50  ;;  %v6518_v18 = vmul.f32 %v6485_v27, %v13208_v41  ;;  %v6215_v34 = vsel %vm1217_vm5, %v11941_v45, %v11939_v9  ;;  %v13212_v9 = vld [vmem:[#allocation82_spill] sm:$0xff] }
 0x956   :  { %7137 = vmatpush1.msra.mxu1 %v5782_v55  ;;  %6834 = vrot.lane.b32.xlu0 %v6786_v40, %s7818_s9  ;;  %v6248_v62 = vmul.f32 %v6215_v34, %v13206_v42  ;;  %v6247_v55 = vmul.f32 %v6214_v47, %v13207_v35  ;;  %v5945_v34 = vsel %vm1623_vm6, %v11827_v20, %v11953_v29  ;;  %v13218_v47 = vld [vmem:[#allocation52_spill] sm:$0xff] }
 0x957   :  { %6832 = vrot.lane.b32.xlu1 %v6785_v36, %s7818_s9  ;;  %7067 = vmatprep.subr.mxu0 %v5629_v43 }
 0x958   :  { %v12178_v61 = vpop.permute.xlu0 %5602  ;;  %v5601_v53 = vpop.permute.xlu1 %5600 }
 0x959   :  { %v5630_v22 = vsel %vm1623_vm6, %v5599_v50, %v5601_v53  ;;  %v5631_v58 = vsel %vm1623_vm6, %v5601_v53, %v12178_v61 }
 0x95a   :  { %6838 = vrot.lane.b32.xlu0 %v6788_v38, %s7818_s9  ;;  %7138 = vmatprep.subr.mxu1 %v5631_v58  ;;  %v13210_v38 = vld [vmem:[#allocation83_spill] sm:$0xff] }
 0x95b   :  { %6836 = vrot.lane.b32.xlu1 %v6787_v54, %s7818_s9  ;;  %7139 = vmatpush1.msra.mxu1 %v5630_v22  ;;  %v5091_v53 = vsel %vm811_vm4, %v13210_v38, %v13209_v3  ;;  %v5090_v22 = vsel %vm811_vm4, %v13211_v6, %v13210_v38  ;;  %v13213_v58 = vld [vmem:[#allocation71_spill] sm:$0xff]  ;;  %v5947_v38 = vsel %vm1623_vm6, %v11969_v57, %v11967_v11 }
 0x95c   :  { %v5328_v13 = vpop.permute.xlu0 %5327  ;;  %v5595_v26 = vpop.permute.xlu1 %5594  ;;  %v5093_v52 = vsel %vm811_vm4, %v13213_v58, %v13212_v9 }
 0x95d   :  { %v5628_v49 = vsel %vm1623_vm6, %v5595_v26, %v5597_v17  ;;  %v6250_v26 = vmul.f32 0.0, %v11955_v59 }
 0x95e   :  { %6565 = vrot.lane.b32.xlu0 %v6517_v56, %s7819_s18  ;;  %7068 = vmatpush1.msra.mxu0 %v5628_v49  ;;  %v13215_v49 = vld [vmem:[#allocation68_spill] sm:$0xff] }
 0x95f   :  { %6563 = vrot.lane.b32.xlu1 %v6516_v5, %s7819_s18  ;;  %v13214_v5 = vld [vmem:[#allocation51_spill] sm:$0xff] }
 0x960   :  { %v5332_v14 = vpop.permute.xlu0 %5331  ;;  %v5330_v4 = vpop.permute.xlu1 %5329  ;;  %v4822_v27 = vsel %vm405_vm7, %v13215_v49, %v13214_v5 }
 0x961   :  { %v5360_v40 = vsel %vm1217_vm5, %v5328_v13, %v5330_v4  ;;  %v5361_v45 = vsel %vm1217_vm5, %v5330_v4, %v5332_v14  ;;  %v13216_v4 = vld [vmem:[#allocation69_spill] sm:$0xff] }
 0x962   :  { %6569 = vrot.lane.b32.xlu0 %v6519_v32, %s7819_s18  ;;  %7069 = vmatprep.subr.mxu0 %v5360_v40  ;;  %v5092_v32 = vsel %vm811_vm4, %v13209_v3, %v13213_v58  ;;  %v4821_v59 = vsel %vm405_vm7, %v13216_v4, %v13215_v49  ;;  %v13217_v40 = vld [vmem:[#allocation34_spill] sm:$0xff]  ;;  %v13219_v58 = vmov 0.0  }
 0x963   :  { %6567 = vrot.lane.b32.xlu1 %v6518_v18, %s7819_s18  ;;  %v12250_v18 = vld [vmem:[%s12681_s4] sm:$0xff] }
 0x964   :  { %v5326_v50 = vpop.permute.xlu0 %5325  ;;  %v12212_v17 = vpop.permute.xlu1 %5333 }
 0x965   :  { %v5359_v36 = vsel %vm1217_vm5, %v5326_v50, %v5328_v13  ;;  %v5362_v43 = vsel %vm1217_vm5, %v5332_v14, %v12212_v17  ;;  %v6249_v13 = vmul.f32 %v6216_v63, %v13208_v41  ;;  %v5946_v14 = vsel %vm1623_vm6, %v11953_v29, %v11969_v57 }
 0x966   :  { %6296 = vrot.lane.b32.xlu0 %v6248_v62, %s7822_s15  ;;  %7070 = vmatpush1.msra.mxu0 %v5359_v36  ;;  %v4824_v62 = vsel %vm405_vm7, %v13218_v47, %v13217_v40  ;;  %v5979_v20 = vmul.f32 %v5946_v14, %v13206_v42  ;;  %v5978_v63 = vmul.f32 %v5945_v34, %v13207_v35 }
 0x967   :  { %6294 = vrot.lane.b32.xlu1 %v6247_v55, %s7822_s15  ;;  %7140 = vmatprep.subr.mxu1 %v5362_v43  ;;  %v4823_v55 = vsel %vm405_vm7, %v13214_v5, %v13218_v47  ;;  %v5980_v57 = vmul.f32 %v5947_v38, %v13208_v41  ;;  %v5271_v34 = vsel %vm1048_vm2, %v11883_v16, %v12082_v28 }
 0x968   :  { %7071 = vmatprep.subr.mxu0 %v5091_v53  ;;  %7141 = vmatpush1.msra.mxu1 %v5361_v45  ;;  %v6819_v54 = vpop.permute.xlu0 %6818  ;;  %v6817_v56 = vpop.permute.xlu1 %6816 }
 0x969   :  { %7072 = vmatpush1.msra.mxu0 %v5090_v22  ;;  %7142 = vmatprep.subr.mxu1 %v5093_v52  ;;  %v6845_v50 = vsel %vm236_vm0, %v6817_v56, %v6819_v54  ;;  %v6844_v45 = vsel %vm236_vm0, %v11992_v21, %v6817_v56  ;;  %v5981_v21 = vmul.f32 0.0, %v11967_v11  ;;  %v5541_v52 = vsel %vm1454_vm3, %v12029_v44, %v12048_v33 }
 0x96a   :  { %7073 = vmatprep.subr.mxu0 %v4822_v27  ;;  %7143 = vmatpush1.msra.mxu1 %v5092_v32  ;;  %v5540_v11 = vsel %vm1454_vm3, %v11855_v39, %v12029_v44  ;;  %v5542_v39 = vsel %vm1454_vm3, %v12048_v33, %v12046_v37  ;;  %v5576_v32 = vmul.f32 %v12046_v37, %v13208_v41 }
 0x96b   :  { %6300 = vrot.lane.b32.xlu0 %v6250_v26, %s7822_s15  ;;  %6298 = vrot.lane.b32.xlu1 %v6249_v13, %s7822_s15  ;;  %v5574_v13 = vmul.f32 %v5541_v52, %v13207_v35  ;;  %v5573_v49 = vmul.f32 %v5540_v11, %v10974_v15  ;;  %v5272_v33 = vsel %vm1048_vm2, %v12082_v28, %v12101_v51  ;;  %v13224_v52 = vld [vmem:[#allocation11_spill] sm:$0xff] }
 0x96c   :  { %7074 = vmatpush1.msra.mxu0 %v4821_v59  ;;  %7144 = vmatprep.subr.mxu1 %v4824_v62  ;;  %v12264_v36 = vpop.permute.xlu0 %6822  ;;  %v6821_v43 = vpop.permute.xlu1 %6820  ;;  %v5575_v59 = vmul.f32 %v5542_v39, %v13206_v42  ;;  %v5305_v47 = vmul.f32 %v5272_v33, %v13207_v35  ;;  %v5273_v28 = vsel %vm1048_vm2, %v12101_v51, %v12099_v7  ;;  %v13225_v33 = vld [vmem:[#allocation70_spill] sm:$0xff] }
 0x96d   :  { %7747 = vmatmul.mubr.msk.f32.vlgmr.msra.gmra.mxu0 %vm7039_vm9, %v12250_v18  ;;  %7145 = vmatpush1.msra.mxu1 %v4823_v55  ;;  %v6847_v29 = vsel %vm236_vm0, %v6821_v43, %v12264_v36  ;;  %v6846_v3 = vsel %vm236_vm0, %v6819_v54, %v6821_v43  ;;  %v5304_v55 = vmul.f32 %v5271_v34, %v10974_v15  ;;  %v13220_v43 = vld [vmem:[#allocation8_spill] sm:$0xff]  ;;  %v13226_v34 = vld [vmem:[#allocation54_spill] sm:$0xff] }
 0x96e   :  { %7199 = vmatprep.subr.mxu0 %v6845_v50  ;;  %7748 = vmatmul.mubr.msk.f32.vlgmr.msra.gmra.mxu1 %vm7039_vm9, %v12250_v18  ;;  %v5723_v16 = vrot.slane %v12128_v2, %v13220_v43  ;;  %v5306_v51 = vmul.f32 %v5273_v28, %v13206_v42 }
 0x96f   :  { %7200 = vmatpush1.msra.mxu0 %v6844_v45  ;;  %6027 = vrot.lane.b32.xlu0 %v5979_v20, %s7824_s27  ;;  %v13221_v20 = vld [vmem:[#allocation9_spill] sm:$0xff] }
 0x970   :  { %6025 = vrot.lane.b32.xlu1 %v5978_v63, %s7824_s27  ;;  %7270 = vmatprep.subr.mxu1 %v6847_v29  ;;  %v6550_v53 = vpop.permute.xlu0 %6549  ;;  %v6548_v6 = vpop.permute.xlu1 %6547  ;;  %v5719_v29 = vrot.slane %v12128_v2, %v13221_v20 }
 0x971   :  { %7271 = vmatpush1.msra.mxu1 %v6846_v3  ;;  %v6575_v22 = vsel %vm642_vm1, %v12031_v30, %v6548_v6  ;;  %v6576_v54 = vsel %vm642_vm1, %v6548_v6, %v6550_v53  ;;  %7249 = vmatprep.mubr.f32.mxu0 %v13219_v58  ;;  %v5307_v3 = vmul.f32 %v12099_v7, %v13208_v41 }
 0x972   :  { %7201 = vmatprep.subr.mxu0 %v6576_v54  ;;  %7320 = vmatprep.mubr.f32.mxu1 %v13219_v58  ;;  %v5785_v6 = vmul.f32 %v5723_v16, %v10924_v60  ;;  %v13223_v54 = vld [vmem:[#allocation95_spill] sm:$0xff]  ;;  %v5727_v7 = vrot.slane %v12128_v2, %v13224_v52  ;;  %v7033_v60 = vld [vmem:[%s12682_s5] sm:$0xff]  ;;  %v13228_v16 = vld [vmem:[#allocation37_spill] sm:$0xff] }
 0x973   :  { %6031 = vrot.lane.b32.xlu0 %v5981_v21, %s7824_s27  ;;  %7202 = vmatpush1.msra.mxu0 %v6575_v22  ;;  %v13222_v21 = vld [vmem:[#allocation10_spill] sm:$0xff] }
 0x974   :  { %6029 = vrot.lane.b32.xlu1 %v5980_v57, %s7824_s27  ;;  %v12297_v30 = vpop.permute.xlu0 %6553  ;;  %v6552_v56 = vpop.permute.xlu1 %6551  ;;  %v5731_v22 = vrot.slane %v12128_v2, %v13222_v21  ;;  %v5784_v57 = vmul.f32 %v5719_v29, %v13223_v54  ;;  %v5786_v2 = vmul.f32 %v5727_v7, %v10926_v0 }
 0x975   :  { %v6577_v26 = vsel %vm642_vm1, %v6550_v53, %v6552_v56  ;;  %v6578_v5 = vsel %vm642_vm1, %v6552_v56, %v12297_v30 }
 0x976   :  { %7272 = vmatprep.subr.mxu1 %v6578_v5 }
 0x977   :  { %5622 = vrot.lane.b32.xlu0 %v5574_v13, %s7825_s12  ;;  %7273 = vmatpush1.msra.mxu1 %v6577_v26  ;;  %v5787_v26 = vmul.f32 %v5731_v22, %v10940_v24  ;;  %v13232_v22 = vld [vmem:[#allocation20_spill] sm:$0xff] }
 0x978   :  { %5620 = vrot.lane.b32.xlu1 %v5573_v49, %s7825_s12  ;;  %v6281_v44 = vpop.permute.xlu0 %6280  ;;  %v6279_v27 = vpop.permute.xlu1 %6278 }
 0x979   :  { %v6306_v14 = vsel %vm1048_vm2, %v12084_v8, %v6279_v27  ;;  %v6307_v4 = vsel %vm1048_vm2, %v6279_v27, %v6281_v44 }
 0x97a   :  { %7203 = vmatprep.subr.mxu0 %v6307_v4 }
 0x97b   :  { %5626 = vrot.lane.b32.xlu0 %v5576_v32, %s7825_s12  ;;  %7204 = vmatpush1.msra.mxu0 %v6306_v14 }
 0x97c   :  { %5624 = vrot.lane.b32.xlu1 %v5575_v59, %s7825_s12  ;;  %v12323_v37 = vpop.permute.xlu0 %6284  ;;  %v6283_v8 = vpop.permute.xlu1 %6282 }
 0x97d   :  { %v6308_v62 = vsel %vm1048_vm2, %v6281_v44, %v6283_v8  ;;  %v6309_v50 = vsel %vm1048_vm2, %v6283_v8, %v12323_v37  ;;  %v5095_v8 = vsel %vm811_vm4, %v13226_v34, %v13225_v33 }
 0x97e   :  { %7274 = vmatprep.subr.mxu1 %v6309_v50  ;;  %v5094_v50 = vsel %vm811_vm4, %v13212_v9, %v13226_v34  ;;  %v13230_v9 = vld [vmem:[#allocation22_spill] sm:$0xff] }
 0x97f   :  { %5353 = vrot.lane.b32.xlu0 %v5305_v47, %s7823_s21  ;;  %7275 = vmatpush1.msra.mxu1 %v6308_v62 }
 0x980   :  { %5351 = vrot.lane.b32.xlu1 %v5304_v55, %s7823_s21  ;;  %v6012_v63 = vpop.permute.xlu0 %6011  ;;  %v6010_v45 = vpop.permute.xlu1 %6009 }
 0x981   :  { %v6037_v38 = vsel %vm1454_vm3, %v12149_v31, %v6010_v45  ;;  %v6038_v53 = vsel %vm1454_vm3, %v6010_v45, %v6012_v63  ;;  %v13229_v45 = vld [vmem:[#allocation53_spill] sm:$0xff] }
 0x982   :  { %7205 = vmatprep.subr.mxu0 %v6038_v53 }
 0x983   :  { %5357 = vrot.lane.b32.xlu0 %v5307_v3, %s7823_s21  ;;  %7206 = vmatpush1.msra.mxu0 %v6037_v38  ;;  %v5097_v3 = vsel %vm811_vm4, %v13230_v9, %v13229_v45 }
 0x984   :  { %5355 = vrot.lane.b32.xlu1 %v5306_v51, %s7823_s21  ;;  %v12353_v31 = vpop.permute.xlu0 %6015  ;;  %7207 = vmatprep.subr.mxu0 %v5785_v6  ;;  %v6014_v11 = vpop.permute.xlu1 %6013  ;;  %v5096_v51 = vsel %vm811_vm4, %v13225_v33, %v13230_v9 }
 0x985   :  { %v6039_v56 = vsel %vm1454_vm3, %v6012_v63, %v6014_v11  ;;  %7208 = vmatpush1.msra.mxu0 %v5784_v57  ;;  %v6040_v13 = vsel %vm1454_vm3, %v6014_v11, %v12353_v31  ;;  %v4825_v63 = vsel %vm405_vm7, %v13217_v40, %v13228_v16  ;;  %v13231_v40 = vld [vmem:[#allocation138_spill] sm:$0xff] }
 0x986   :  { %7276 = vmatprep.subr.mxu1 %v6040_v13  ;;  %v4828_v54 = vsel %vm405_vm7, %v13232_v22, %v13231_v40 }
 0x987   :  { %7277 = vmatpush1.msra.mxu1 %v6039_v56 }
 0x988   :  { %7036 = vperm.xlu1 %7766, %v7033_v60   ;;  %v5607_v5 = vpop.permute.xlu0 %5606  ;;  %7278 = vmatprep.subr.mxu1 %v5787_v26  ;;  %v5605_v49 = vpop.permute.xlu1 %5604 }
 0x989   :  { %v5632_v39 = vsel %vm1623_vm6, %v12178_v61, %v5605_v49  ;;  %7279 = vmatpush1.msra.mxu1 %v5786_v2  ;;  %v5633_v44 = vsel %vm1623_vm6, %v5605_v49, %v5607_v5 }
 0x98a   :  { %7209 = vmatprep.subr.mxu0 %v5633_v44 }
 0x98b   :  { %7210 = vmatpush1.msra.mxu0 %v5632_v39 }
 0x98c   :  { %v12366_v27 = vpop.permute.xlu0 %5610  ;;  %v5609_v32 = vpop.permute.xlu1 %5608 }
 0x98d   :  { %v5634_v24 = vsel %vm1623_vm6, %v5607_v5, %v5609_v32  ;;  %v5635_v0 = vsel %vm1623_vm6, %v5609_v32, %v12366_v27 }
 0x98e   :  { %7280 = vmatprep.subr.mxu1 %v5635_v0 }
 0x98f   :  { %7281 = vmatpush1.msra.mxu1 %v5634_v24  ;;  %v7729_v24 = vld [vmem:[%s12675_s1 + $0x44] ss:$8 sm:$0xf] }
 0x990   :  { %v5338_v14 = vpop.permute.xlu0 %5337  ;;  %v5336_v4 = vpop.permute.xlu1 %5335 }
 0x991   :  { %v5363_v61 = vsel %vm1217_vm5, %v12212_v17, %v5336_v4  ;;  %v5364_v59 = vsel %vm1217_vm5, %v5336_v4, %v5338_v14  ;;  %v13227_v17 = vld [vmem:[#allocation21_spill] sm:$0xff] }
 0x992   :  { %7211 = vmatprep.subr.mxu0 %v5364_v59  ;;  %v4826_v28 = vsel %vm405_vm7, %v13228_v16, %v13227_v17  ;;  %v4827_v7 = vsel %vm405_vm7, %v13227_v17, %v13232_v22 }
 0x993   :  { %7212 = vmatpush1.msra.mxu0 %v5363_v61 }
 0x994   :  { %v12377_v47 = vpop.permute.xlu0 %5341  ;;  %7213 = vmatprep.subr.mxu0 %v5095_v8  ;;  %v5340_v62 = vpop.permute.xlu1 %5339 }
 0x995   :  { %v5365_v55 = vsel %vm1217_vm5, %v5338_v14, %v5340_v62  ;;  %7214 = vmatpush1.msra.mxu0 %v5094_v50  ;;  %v5366_v29 = vsel %vm1217_vm5, %v5340_v62, %v12377_v47 }
 0x996   :  { %7215 = vmatprep.subr.mxu0 %v4826_v28  ;;  %7282 = vmatprep.subr.mxu1 %v5366_v29 }
 0x997   :  { %7216 = vmatpush1.msra.mxu0 %v4825_v63  ;;  %7283 = vmatpush1.msra.mxu1 %v5365_v55 }
 0x998   :  { %v6827_v38 = vpop.permute.xlu0 %6826  ;;  %7749 = vmatmul.mubr.msk.f32.vlgmr.msra.gmra.mxu0 %vm7039_vm9, %v12250_v18  ;;  %7284 = vmatprep.subr.mxu1 %v5097_v3  ;;  %v6825_v53 = vpop.permute.xlu1 %6824 }
 0x999   :  { %v6848_v6 = vsel %vm236_vm0, %v12264_v36, %v6825_v53  ;;  %7285 = vmatpush1.msra.mxu1 %v5096_v51  ;;  %v6849_v57 = vsel %vm236_vm0, %v6825_v53, %v6827_v38  ;;  %7391 = vmatprep.mubr.f32.mxu0 %v13219_v58 }
 0x99a   :  { %7286 = vmatprep.subr.mxu1 %v4828_v54  ;;  %7341 = vmatprep.subr.mxu0 %v6849_v57 }
 0x99b   :  { %7287 = vmatpush1.msra.mxu1 %v4827_v7  ;;  %7342 = vmatpush1.msra.mxu0 %v6848_v6 }
 0x99c   :  { %v12409_v11 = vpop.permute.xlu0 %6830  ;;  %7750 = vmatmul.mubr.msk.f32.vlgmr.msra.gmra.mxu1 %vm7039_vm9, %v12250_v18  ;;  %v6829_v36 = vpop.permute.xlu1 %6828 }
 0x99d   :  { %v6850_v56 = vsel %vm236_vm0, %v6827_v38, %v6829_v36  ;;  %v6851_v60 = vsel %vm236_vm0, %v6829_v36, %v12409_v11  ;;  %7462 = vmatprep.mubr.f32.mxu1 %v13219_v58  ;;  %v13233_v36 = vld [vmem:[#allocation23_spill] sm:$0xff] }
 0x99e   :  { %7412 = vmatprep.subr.mxu1 %v6851_v60 }
 0x99f   :  { %7413 = vmatpush1.msra.mxu1 %v6850_v56  ;;  %v13234_v56 = vld [vmem:[#allocation39_spill] sm:$0xff] }
 0x9a0   :  { %v6558_v13 = vpop.permute.xlu0 %6557  ;;  %v6556_v26 = vpop.permute.xlu1 %6555  ;;  %v5099_v60 = vsel %vm811_vm4, %v13234_v56, %v13233_v36 }
 0x9a1   :  { %v6579_v2 = vsel %vm642_vm1, %v12297_v30, %v6556_v26  ;;  %v6580_v5 = vsel %vm642_vm1, %v6556_v26, %v6558_v13  ;;  %v7730_v30 = vld [vmem:[%s12675_s1 + $0x44] ss:$8 sm:$0xf0] }
 0x9a2   :  { %7343 = vmatprep.subr.mxu0 %v6580_v5  ;;  %v12434_v59 = vor.u32 %v7730_v30, %v7729_v24  ;;  %v13237_v30 = vld [vmem:[#allocation36_spill] sm:$0xff] }
 0x9a3   :  { %7344 = vmatpush1.msra.mxu0 %v6579_v2  ;;  %v5098_v2 = vsel %vm811_vm4, %v13229_v45, %v13234_v56  ;;  %v13238_v45 = vld [vmem:[#allocation127_spill] sm:$0xff] }
 0x9a4   :  { %v12420_v49 = vpop.permute.xlu0 %6561  ;;  %v6560_v39 = vpop.permute.xlu1 %6559  ;;  %v5739_v50 = vrot.slane %v12434_v59, %v13202_v25  ;;  %v5747_v63 = vrot.slane %v12434_v59, %v13204_v23  ;;  %v5743_v9 = vrot.slane %v12434_v59, %v13205_v1  ;;  %v5759_v56 = vrot.slane %v12434_v59, %v13224_v52 }
 0x9a5   :  { %v6581_v44 = vsel %vm642_vm1, %v6558_v13, %v6560_v39  ;;  %v6582_v32 = vsel %vm642_vm1, %v6560_v39, %v12420_v49  ;;  %v13236_v39 = vld [vmem:[#allocation137_spill] sm:$0xff] }
 0x9a6   :  { %7414 = vmatprep.subr.mxu1 %v6582_v32  ;;  %v5789_v29 = vmul.f32 %v5739_v50, %v10956_v48  ;;  %v5791_v48 = vmul.f32 %v5747_v63, %v10972_v46  ;;  %v5790_v23 = vmul.f32 %v5743_v9, %v10958_v12  ;;  %v4829_v24 = vsel %vm405_vm7, %v13231_v40, %v13236_v39 }
 0x9a7   :  { %7415 = vmatpush1.msra.mxu1 %v6581_v44 }
 0x9a8   :  { %v6289_v0 = vpop.permute.xlu0 %6288  ;;  %v6287_v14 = vpop.permute.xlu1 %6286 }
 0x9a9   :  { %v6310_v4 = vsel %vm1048_vm2, %v12323_v37, %v6287_v14  ;;  %v6311_v61 = vsel %vm1048_vm2, %v6287_v14, %v6289_v0  ;;  %v5735_v37 = vrot.slane %v12434_v59, %v13203_v10 }
 0x9aa   :  { %7345 = vmatprep.subr.mxu0 %v6311_v61 }
 0x9ab   :  { %7346 = vmatpush1.msra.mxu0 %v6310_v4  ;;  %v5788_v25 = vmul.f32 %v5735_v37, %v10942_v19  ;;  %v5100_v4 = vsel %vm811_vm4, %v13233_v36, %v13238_v45 }
 0x9ac   :  { %v12436_v33 = vpop.permute.xlu0 %6292  ;;  %v6291_v34 = vpop.permute.xlu1 %6290 }
 0x9ad   :  { %v6312_v8 = vsel %vm1048_vm2, %v6289_v0, %v6291_v34  ;;  %v6313_v62 = vsel %vm1048_vm2, %v6291_v34, %v12436_v33  ;;  %v5101_v0 = vsel %vm811_vm4, %v13238_v45, %v13237_v30  ;;  %v13239_v34 = vld [vmem:[#allocation125_spill] sm:$0xff] }
 0x9ae   :  { %7416 = vmatprep.subr.mxu1 %v6313_v62  ;;  %v13242_v45 = vld [vmem:[#allocation113_spill] sm:$0xff] }
 0x9af   :  { %7417 = vmatpush1.msra.mxu1 %v6312_v8  ;;  %v13240_v8 = vld [vmem:[#allocation142_spill] sm:$0xff] }
 0x9b0   :  { %v6020_v55 = vpop.permute.xlu0 %6019  ;;  %v6018_v17 = vpop.permute.xlu1 %6017  ;;  %v4832_v40 = vsel %vm405_vm7, %v13240_v8, %v13239_v34 }
 0x9b1   :  { %v6041_v16 = vsel %vm1454_vm3, %v12353_v31, %v6018_v17  ;;  %v6042_v28 = vsel %vm1454_vm3, %v6018_v17, %v6020_v55 }
 0x9b2   :  { %7347 = vmatprep.subr.mxu0 %v6042_v28 }
 0x9b3   :  { %7348 = vmatpush1.msra.mxu0 %v6041_v16 }
 0x9b4   :  { %v12454_v10 = vpop.permute.xlu0 %6023  ;;  %7349 = vmatprep.subr.mxu0 %v5789_v29  ;;  %v6022_v3 = vpop.permute.xlu1 %6021 }
 0x9b5   :  { %v6043_v31 = vsel %vm1454_vm3, %v6020_v55, %v6022_v3  ;;  %7350 = vmatpush1.msra.mxu0 %v5788_v25  ;;  %v6044_v38 = vsel %vm1454_vm3, %v6022_v3, %v12454_v10 }
 0x9b6   :  { %7418 = vmatprep.subr.mxu1 %v6044_v38 }
 0x9b7   :  { %7419 = vmatpush1.msra.mxu1 %v6043_v31 }
 0x9b8   :  { %v5615_v19 = vpop.permute.xlu0 %5614  ;;  %7420 = vmatprep.subr.mxu1 %v5791_v48  ;;  %v5613_v53 = vpop.permute.xlu1 %5612 }
 0x9b9   :  { %v5636_v1 = vsel %vm1623_vm6, %v12366_v27, %v5613_v53  ;;  %7421 = vmatpush1.msra.mxu1 %v5790_v23  ;;  %v5637_v51 = vsel %vm1623_vm6, %v5613_v53, %v5615_v19 }
 0x9ba   :  { %7351 = vmatprep.subr.mxu0 %v5637_v51 }
 0x9bb   :  { %7352 = vmatpush1.msra.mxu0 %v5636_v1 }
 0x9bc   :  { %v12464_v6 = vpop.permute.xlu0 %5618  ;;  %v5617_v22 = vpop.permute.xlu1 %5616 }
 0x9bd   :  { %v5638_v54 = vsel %vm1623_vm6, %v5615_v19, %v5617_v22  ;;  %v5639_v46 = vsel %vm1623_vm6, %v5617_v22, %v12464_v6  ;;  %v5755_v22 = vrot.slane %v12434_v59, %v13220_v43 }
 0x9be   :  { %7422 = vmatprep.subr.mxu1 %v5639_v46  ;;  %v5751_v46 = vrot.slane %v12434_v59, %v13221_v20 }
 0x9bf   :  { %7423 = vmatpush1.msra.mxu1 %v5638_v54 }
 0x9c0   :  { %v5346_v12 = vpop.permute.xlu0 %5345  ;;  %v5344_v57 = vpop.permute.xlu1 %5343  ;;  %v5792_v43 = vmul.f32 %v5751_v46, %v10974_v15 }
 0x9c1   :  { %v5367_v27 = vsel %vm1217_vm5, %v12377_v47, %v5344_v57  ;;  %v5368_v7 = vsel %vm1217_vm5, %v5344_v57, %v5346_v12  ;;  %v13235_v47 = vld [vmem:[#allocation139_spill] sm:$0xff] }
 0x9c2   :  { %7353 = vmatprep.subr.mxu0 %v5368_v7  ;;  %v4830_v44 = vsel %vm405_vm7, %v13236_v39, %v13235_v47  ;;  %v4831_v37 = vsel %vm405_vm7, %v13235_v47, %v13240_v8  ;;  %v5763_v7 = vrot.slane %v12434_v59, %v13222_v21  ;;  %v5794_v21 = vmul.f32 %v5759_v56, %v13206_v42  ;;  %v13243_v8 = vld [vmem:[#allocation111_spill] sm:$0xff] }
 0x9c3   :  { %7354 = vmatpush1.msra.mxu0 %v5367_v27  ;;  %v5793_v27 = vmul.f32 %v5755_v22, %v13207_v35 }
 0x9c4   :  { %v12475_v13 = vpop.permute.xlu0 %5349  ;;  %7355 = vmatprep.subr.mxu0 %v5099_v60  ;;  %v5348_v26 = vpop.permute.xlu1 %5347  ;;  %v5795_v35 = vmul.f32 %v5763_v7, %v13208_v41  ;;  %v13254_v7 = vld [vmem:[#allocation49_spill] sm:$0xff] }
 0x9c5   :  { %v5369_v5 = vsel %vm1217_vm5, %v5346_v12, %v5348_v26  ;;  %7356 = vmatpush1.msra.mxu0 %v5098_v2  ;;  %v5370_v32 = vsel %vm1217_vm5, %v5348_v26, %v12475_v13 }
 0x9c6   :  { %7357 = vmatprep.subr.mxu0 %v4830_v44  ;;  %7424 = vmatprep.subr.mxu1 %v5370_v32 }
 0x9c7   :  { %7358 = vmatpush1.msra.mxu0 %v4829_v24  ;;  %7425 = vmatpush1.msra.mxu1 %v5369_v5  ;;  %v13241_v24 = vld [vmem:[#allocation126_spill] sm:$0xff] }
 0x9c8   :  { %v6835_v14 = vpop.permute.xlu0 %6834  ;;  %7751 = vmatmul.mubr.msk.f32.vlgmr.msra.gmra.mxu0 %vm7039_vm9, %v12250_v18  ;;  %7426 = vmatprep.subr.mxu1 %v5101_v0  ;;  %v5103_v0 = vsel %vm811_vm4, %v13242_v45, %v13241_v24 }
 0x9c9   :  { %v6833_v61 = vpop.permute.xlu1 %6832  ;;  %7427 = vmatpush1.msra.mxu1 %v5100_v4  ;;  %7533 = vmatprep.mubr.f32.mxu0 %v13219_v58  ;;  %v5102_v4 = vsel %vm811_vm4, %v13237_v30, %v13242_v45 }
 0x9ca   :  { %v6852_v62 = vsel %vm236_vm0, %v12409_v11, %v6833_v61  ;;  %7428 = vmatprep.subr.mxu1 %v4832_v40  ;;  %v6853_v50 = vsel %vm236_vm0, %v6833_v61, %v6835_v14 }
 0x9cb   :  { %7483 = vmatprep.subr.mxu0 %v6853_v50  ;;  %7429 = vmatpush1.msra.mxu1 %v4831_v37  ;;  %v13245_v37 = vld [vmem:[#allocation112_spill] sm:$0xff] }
 0x9cc   :  { %7484 = vmatpush1.msra.mxu0 %v6852_v62  ;;  %v6839_v55 = vpop.permute.xlu0 %6838  ;;  %7752 = vmatmul.mubr.msk.f32.vlgmr.msra.gmra.mxu1 %vm7039_vm9, %v12250_v18 }
 0x9cd   :  { %v6837_v17 = vpop.permute.xlu1 %6836  ;;  %7604 = vmatprep.mubr.f32.mxu1 %v13219_v58 }
 0x9ce   :  { %v6854_v16 = vsel %vm236_vm0, %v6835_v14, %v6837_v17  ;;  %v6855_v11 = vsel %vm236_vm0, %v6837_v17, %v6839_v55  ;;  %v13246_v55 = vld [vmem:[#allocation99_spill] sm:$0xff] }
 0x9cf   :  { %7554 = vmatprep.subr.mxu1 %v6855_v11  ;;  %v5105_v30 = vsel %vm811_vm4, %v13246_v55, %v13245_v37  ;;  %v5104_v17 = vsel %vm811_vm4, %v13241_v24, %v13246_v55  ;;  %v13248_v11 = vld [vmem:[#allocation124_spill] sm:$0xff] }
 0x9d0   :  { %7555 = vmatpush1.msra.mxu1 %v6854_v16  ;;  %v6566_v28 = vpop.permute.xlu0 %6565  ;;  %v13247_v16 = vld [vmem:[#allocation110_spill] sm:$0xff] }
 0x9d1   :  { %v6564_v29 = vpop.permute.xlu1 %6563 }
 0x9d2   :  { %v6583_v63 = vsel %vm642_vm1, %v12420_v49, %v6564_v29  ;;  %v6584_v25 = vsel %vm642_vm1, %v6564_v29, %v6566_v28 }
 0x9d3   :  { %7485 = vmatprep.subr.mxu0 %v6584_v25  ;;  %v13249_v25 = vld [vmem:[#allocation108_spill] sm:$0xff] }
 0x9d4   :  { %7486 = vmatpush1.msra.mxu0 %v6583_v63  ;;  %v6570_v9 = vpop.permute.xlu0 %6569 }
 0x9d5   :  { %v6568_v3 = vpop.permute.xlu1 %6567 }
 0x9d6   :  { %v6585_v31 = vsel %vm642_vm1, %v6566_v28, %v6568_v3  ;;  %v6586_v58 = vsel %vm642_vm1, %v6568_v3, %v6570_v9  ;;  %v4836_v28 = vsel %vm405_vm7, %v13248_v11, %v13247_v16  ;;  %v13250_v9 = vld [vmem:[#allocation67_spill] sm:$0xff] }
 0x9d7   :  { %7556 = vmatprep.subr.mxu1 %v6586_v58  ;;  %v3900_v3 = vadd.f32 %v13250_v9, %v13249_v25 }
 0x9d8   :  { %7557 = vmatpush1.msra.mxu1 %v6585_v31  ;;  %v6297_v38 = vpop.permute.xlu0 %6296 }
 0x9d9   :  { %v6295_v48 = vpop.permute.xlu1 %6294 }
 0x9da   :  { %v6314_v23 = vsel %vm1048_vm2, %v12436_v33, %v6295_v48  ;;  %v6315_v19 = vsel %vm1048_vm2, %v6295_v48, %v6297_v38 }
 0x9db   :  { %7487 = vmatprep.subr.mxu0 %v6315_v19 }
 0x9dc   :  { %7488 = vmatpush1.msra.mxu0 %v6314_v23 }
 0x9dd   :  { %v6301_v49 = vpop.permute.xlu0 %6300  ;;  %v6299_v53 = vpop.permute.xlu1 %6298 }
 0x9de   :  { %v6316_v1 = vsel %vm1048_vm2, %v6297_v38, %v6299_v53  ;;  %v6317_v51 = vsel %vm1048_vm2, %v6299_v53, %v6301_v49  ;;  %v13251_v38 = vld [vmem:[#allocation65_spill] sm:$0xff]  ;;  %v13252_v53 = vld [vmem:[#allocation66_spill] sm:$0xff] }
 0x9df   :  { %7558 = vmatprep.subr.mxu1 %v6317_v51  ;;  %v3977_v48 = vadd.f32 %v13251_v38, %v13249_v25 }
 0x9e0   :  { %7559 = vmatpush1.msra.mxu1 %v6316_v1  ;;  %v3902_v1 = vadd.f32 %v13252_v53, %v13249_v25 }
 0x9e1   :  { %v6028_v54 = vpop.permute.xlu0 %6027 }
 0x9e2   :  { %v6026_v33 = vpop.permute.xlu1 %6025 }
 0x9e3   :  { %v6045_v12 = vsel %vm1454_vm3, %v12454_v10, %v6026_v33  ;;  %v6046_v57 = vsel %vm1454_vm3, %v6026_v33, %v6028_v54 }
 0x9e4   :  { %7489 = vmatprep.subr.mxu0 %v6046_v57 }
 0x9e5   :  { %7490 = vmatpush1.msra.mxu0 %v6045_v12  ;;  %v6032_v36 = vpop.permute.xlu0 %6031 }
 0x9e6   :  { %7491 = vmatprep.subr.mxu0 %v5793_v27  ;;  %v6030_v20 = vpop.permute.xlu1 %6029 }
 0x9e7   :  { %v6047_v60 = vsel %vm1454_vm3, %v6028_v54, %v6030_v20  ;;  %7492 = vmatpush1.msra.mxu0 %v5792_v43  ;;  %v6048_v10 = vsel %vm1454_vm3, %v6030_v20, %v6032_v36  ;;  %v13253_v54 = vld [vmem:[#allocation50_spill] sm:$0xff]  ;;  %v4054_v36 = vadd.f32 %v13254_v7, %v13249_v25 }
 0x9e8   :  { %7560 = vmatprep.subr.mxu1 %v6048_v10  ;;  %v3979_v46 = vadd.f32 %v13253_v54, %v13249_v25 }
 0x9e9   :  { %7561 = vmatpush1.msra.mxu1 %v6047_v60  ;;  %v5623_v26 = vpop.permute.xlu0 %5622  ;;  %v13255_v60 = vld [vmem:[#allocation48_spill] sm:$0xff] }
 0x9ea   :  { %7562 = vmatprep.subr.mxu1 %v5795_v35  ;;  %v5621_v2 = vpop.permute.xlu1 %5620  ;;  %v4056_v10 = vadd.f32 %v13255_v60, %v13249_v25 }
 0x9eb   :  { %v5640_v15 = vsel %vm1623_vm6, %v12464_v6, %v5621_v2  ;;  %7563 = vmatpush1.msra.mxu1 %v5794_v21  ;;  %v5641_v52 = vsel %vm1623_vm6, %v5621_v2, %v5623_v26  ;;  %v13256_v2 = vld [vmem:[#allocation35_spill] sm:$0xff] }
 0x9ec   :  { %7493 = vmatprep.subr.mxu0 %v5641_v52 }
 0x9ed   :  { %7494 = vmatpush1.msra.mxu0 %v5640_v15  ;;  %v5627_v59 = vpop.permute.xlu0 %5626  ;;  %v4131_v15 = vadd.f32 %v13256_v2, %v13249_v25 }
 0x9ee   :  { %v5625_v5 = vpop.permute.xlu1 %5624 }
 0x9ef   :  { %v5642_v47 = vsel %vm1623_vm6, %v5623_v26, %v5625_v5  ;;  %v5643_v41 = vsel %vm1623_vm6, %v5625_v5, %v5627_v59 }
 0x9f0   :  { %7564 = vmatprep.subr.mxu1 %v5643_v41 }
 0x9f1   :  { %7565 = vmatpush1.msra.mxu1 %v5642_v47  ;;  %v5354_v39 = vpop.permute.xlu0 %5353  ;;  %v13257_v47 = vld [vmem:[#allocation32_spill] sm:$0xff] }
 0x9f2   :  { %v5352_v42 = vpop.permute.xlu1 %5351  ;;  %v4133_v41 = vadd.f32 %v13257_v47, %v13249_v25 }
 0x9f3   :  { %v5371_v44 = vsel %vm1217_vm5, %v12475_v13, %v5352_v42  ;;  %v5372_v6 = vsel %vm1217_vm5, %v5352_v42, %v5354_v39  ;;  %v13244_v13 = vld [vmem:[#allocation140_spill] sm:$0xff] }
 0x9f4   :  { %7495 = vmatprep.subr.mxu0 %v5372_v6  ;;  %v4834_v40 = vsel %vm405_vm7, %v13244_v13, %v13243_v8  ;;  %v4833_v50 = vsel %vm405_vm7, %v13239_v34, %v13244_v13  ;;  %v4835_v34 = vsel %vm405_vm7, %v13243_v8, %v13248_v11  ;;  %v13258_v6 = vld [vmem:[#allocation14_spill] sm:$0xff] }
 0x9f5   :  { %7496 = vmatpush1.msra.mxu0 %v5371_v44  ;;  %v5358_v32 = vpop.permute.xlu0 %5357 }
 0x9f6   :  { %7497 = vmatprep.subr.mxu0 %v5103_v0  ;;  %v5356_v14 = vpop.permute.xlu1 %5355 }
 0x9f7   :  { %v5373_v61 = vsel %vm1217_vm5, %v5354_v39, %v5356_v14  ;;  %7498 = vmatpush1.msra.mxu0 %v5102_v4  ;;  %v5374_v62 = vsel %vm1217_vm5, %v5356_v14, %v5358_v32  ;;  %v4208_v32 = vadd.f32 %v13258_v6, %v13249_v25  ;;  %v13259_v14 = vld [vmem:[#allocation18_spill] sm:$0xff] }
 0x9f8   :  { %7499 = vmatprep.subr.mxu0 %v4834_v40  ;;  %7566 = vmatprep.subr.mxu1 %v5374_v62  ;;  %v4210_v4 = vadd.f32 %v13259_v14, %v13249_v25  ;;  %v13260_v40 = vld [vmem:[#allocation19_spill] sm:$0xff] }
 0x9f9   :  { %7500 = vmatpush1.msra.mxu0 %v4833_v50  ;;  %7567 = vmatpush1.msra.mxu1 %v5373_v61  ;;  %v4285_v62 = vadd.f32 %v13260_v40, %v13249_v25 }
 0x9fa   :  { %7753 = vmatmul.mubr.msk.f32.vlgmr.msra.gmra.mxu0 %vm7039_vm9, %v12250_v18  ;;  %7568 = vmatprep.subr.mxu1 %v5105_v30  ;;  %v13261_v30 = vld [vmem:[#allocation136_spill] sm:$0xff] }
 0x9fb   :  { %7569 = vmatpush1.msra.mxu1 %v5104_v17  ;;  %v4287_v17 = vadd.f32 %v13261_v30, %v13249_v25 }
 0x9fc   :  { %7570 = vmatprep.subr.mxu1 %v4836_v28 }
 0x9fd   :  { %7571 = vmatpush1.msra.mxu1 %v4835_v34  ;;  %v13262_v34 = vld [vmem:[#allocation15_spill] sm:$0xff] }
 0x9fe   :  { %7754 = vmatmul.mubr.msk.f32.vlgmr.msra.gmra.mxu1 %vm7039_vm9, %v12250_v18 }
 0xa03   :  { %v12577_v29 = vpop.permute.xlu1 %7036 }
 0xa2d   :  { %v7109_v63 = vpop.f32.mrf.mxu0 }
 0xa2e   :  { %v7110_v31 = vadd.f32 %v7109_v63, %v12577_v29  ;;  %v7180_v58 = vpop.f32.mrf.mxu1  ;;  %v4362_v63 = vadd.f32 %v13262_v34, %v13249_v25 }
 0xa2f   :  { %v7181_v23 = vadd.f32 %v7180_v58, %v12577_v29  ;;  %v7111_v19 = vpop.f32.mrf.mxu0  ;;  %v13263_v58 = vld [vmem:[#allocation123_spill] sm:$0xff] }
 0xa30   :  { %v7627_v49 = vadd.f32 %v7110_v31, %v3900_v3  ;;  %v7112_v18 = vadd.f32 %v7111_v19, %v12577_v29  ;;  %v7182_v51 = vpop.f32.mrf.mxu1  ;;  %v4364_v38 = vadd.f32 %v13263_v58, %v13249_v25 }
 0xa31   :  { %v7629_v22 = vadd.f32 %v7181_v23, %v3977_v48  ;;  %v7183_v33 = vadd.f32 %v7182_v51, %v12577_v29 }
 0xa32   :  { %7643 = vst [vmem:[%s12683_s8] sm:$0xff] %v7627_v49  ;;  %v7628_v12 = vadd.f32 %v7112_v18, %v3902_v1  ;;  %v13264_v49 = vld [vmem:[#allocation122_spill] sm:$0xff] }
 0xa33   :  { %7645 = vst [vmem:[%s12683_s8 + $0x10] sm:$0xff] %v7629_v22  ;;  %v7630_v57 = vadd.f32 %v7183_v33, %v3979_v46  ;;  %v4439_v53 = vadd.f32 %v13264_v49, %v13249_v25  ;;  %v13265_v22 = vld [vmem:[#allocation109_spill] sm:$0xff] }
 0xa34   :  { %7644 = vst [vmem:[%s12683_s8 + $0x8] sm:$0xff] %v7628_v12  ;;  %v4441_v54 = vadd.f32 %v13265_v22, %v13249_v25 }
 0xa35   :  { %7646 = vst [vmem:[%s12683_s8 + $0x18] sm:$0xff] %v7630_v57 }
 0xa58   :  { %v7251_v27 = vpop.f32.mrf.mxu0 }
 0xa59   :  { %v7252_v43 = vadd.f32 %v7251_v27, %v12577_v29 }
 0xa5a   :  { %v7253_v56 = vpop.f32.mrf.mxu0 }
 0xa5b   :  { %v7631_v20 = vadd.f32 %v7252_v43, %v4054_v36  ;;  %v7254_v35 = vadd.f32 %v7253_v56, %v12577_v29 }
 0xa5c   :  { %v7322_v26 = vpop.f32.mrf.mxu1 }
 0xa5d   :  { %7647 = vst [vmem:[%s12683_s8 + $0x20] sm:$0xff] %v7631_v20  ;;  %v7632_v21 = vadd.f32 %v7254_v35, %v4056_v10  ;;  %v7323_v52 = vadd.f32 %v7322_v26, %v12577_v29 }
 0xa5e   :  { %v7324_v59 = vpop.f32.mrf.mxu1 }
 0xa5f   :  { %7648 = vst [vmem:[%s12683_s8 + $0x28] sm:$0xff] %v7632_v21  ;;  %v7633_v5 = vadd.f32 %v7323_v52, %v4131_v15  ;;  %v7325_v39 = vadd.f32 %v7324_v59, %v12577_v29 }
 0xa61   :  { %7649 = vst [vmem:[%s12683_s8 + $0x30] sm:$0xff] %v7633_v5  ;;  %v7634_v42 = vadd.f32 %v7325_v39, %v4133_v41 }
 0xa63   :  { %7650 = vst [vmem:[%s12683_s8 + $0x38] sm:$0xff] %v7634_v42 }
 0xa88   :  { %v7393_v44 = vpop.f32.mrf.mxu0 }
 0xa89   :  { %v7394_v24 = vadd.f32 %v7393_v44, %v12577_v29 }
 0xa8a   :  { %v7395_v45 = vpop.f32.mrf.mxu0 }
 0xa8b   :  { %v7635_v0 = vadd.f32 %v7394_v24, %v4208_v32  ;;  %v7396_v61 = vadd.f32 %v7395_v45, %v12577_v29 }
 0xa8c   :  { %v7464_v8 = vpop.f32.mrf.mxu1 }
 0xa8d   :  { %7651 = vst [vmem:[%s12683_s8 + $0x40] sm:$0xff] %v7635_v0  ;;  %v7636_v13 = vadd.f32 %v7396_v61, %v4210_v4  ;;  %v7465_v50 = vadd.f32 %v7464_v8, %v12577_v29 }
 0xa8e   :  { %v7466_v37 = vpop.f32.mrf.mxu1 }
 0xa8f   :  { %7652 = vst [vmem:[%s12683_s8 + $0x48] sm:$0xff] %v7636_v13  ;;  %v7637_v55 = vadd.f32 %v7465_v50, %v4285_v62  ;;  %v7467_v16 = vadd.f32 %v7466_v37, %v12577_v29 }
 0xa91   :  { %7653 = vst [vmem:[%s12683_s8 + $0x50] sm:$0xff] %v7637_v55  ;;  %v7638_v11 = vadd.f32 %v7467_v16, %v4287_v17 }
 0xa93   :  { %7654 = vst [vmem:[%s12683_s8 + $0x58] sm:$0xff] %v7638_v11 }
 0xaba   :  { %v7535_v28 = vpop.f32.mrf.mxu0 }
 0xabb   :  { %v7536_v9 = vadd.f32 %v7535_v28, %v12577_v29 }
 0xabc   :  { %v7537_v3 = vpop.f32.mrf.mxu0 }
 0xabd   :  { %v7639_v31 = vadd.f32 %v7536_v9, %v4362_v63  ;;  %v7538_v48 = vadd.f32 %v7537_v3, %v12577_v29 }
 0xabe   :  { %v7606_v23 = vpop.f32.mrf.mxu1 }
 0xabf   :  { %7655 = vst [vmem:[%s12683_s8 + $0x60] sm:$0xff] %v7639_v31  ;;  %v7640_v19 = vadd.f32 %v7538_v48, %v4364_v38  ;;  %v7607_v1 = vadd.f32 %v7606_v23, %v12577_v29 }
 0xac0   :  { %v7608_v18 = vpop.f32.mrf.mxu1 }
 0xac1   :  { %7656 = vst [vmem:[%s12683_s8 + $0x68] sm:$0xff] %v7640_v19  ;;  %v7641_v51 = vadd.f32 %v7607_v1, %v4439_v53  ;;  %v7609_v46 = vadd.f32 %v7608_v18, %v12577_v29 }
 0xac3   :  { %7657 = vst [vmem:[%s12683_s8 + $0x70] sm:$0xff] %v7641_v51  ;;  %v7642_v33 = vadd.f32 %v7609_v46, %v4441_v54 }
 0xac5   :  { %7658 = vst [vmem:[%s12683_s8 + $0x78] sm:$0xff] %v7642_v33 }

</bundles_post_ra>
